<compile_context>
chip_gen: v7x
topology: tpu7x:2x2x1
jax: 0.10.0
libtpu: 0.0.40
codegen_flags: <defaults>
</compile_context>

<pallas_src>
import functools
import math

import jax
import jax.numpy as jnp
from jax.experimental import pallas as pl
from jax.experimental.pallas import tpu as pltpu

BN_EPS = 1e-5
BN_SCALE = 1.0 / math.sqrt(1.0 + BN_EPS)


# ----------------------------------------------------------------------------
# per-generation tiling / VMEM constants
# ----------------------------------------------------------------------------
def _detect_vmem_capacity():
    try:
        return int(pltpu.get_tpu_info().vmem_capacity_bytes)
    except Exception:
        return 64 * 1024 * 1024          # conservative (v7x-sized) fallback


_VMEM_CAPACITY = _detect_vmem_capacity()
if _VMEM_CAPACITY >= 100 * 1024 * 1024:   # v5e / v6e: 128 MiB VMEM per core
    VMEM_LIMIT_BYTES = 96 * 1024 * 1024
    TARGET_BLOCK_BYTES = 8 * 1024 * 1024
else:                                      # v7x (64 MiB / TC) or unknown
    VMEM_LIMIT_BYTES = 32 * 1024 * 1024
    TARGET_BLOCK_BYTES = 4 * 1024 * 1024


def _compiler_params():
    return pltpu.CompilerParams(
        dimension_semantics=("parallel",),
        vmem_limit_bytes=VMEM_LIMIT_BYTES,
    )


def _tree_reduce(vals, op):
    """Pairwise (log-depth) reduction to break the serial dependency chain."""
    vals = list(vals)
    while len(vals) > 1:
        nxt = [op(vals[i], vals[i + 1]) for i in range(0, len(vals) - 1, 2)]
        if len(vals) % 2:
            nxt.append(vals[-1])
        vals = nxt
    return vals[0]


def _choose_tile_m(M, bytes_per_row):
    """Largest tile that (a) divides M exactly (no pad/slice copies), (b) stays
    under the per-block byte budget, (c) is a multiple of 8 when < M, and
    (d) prefers >=2 grid steps so both v7x TensorCores get work."""
    cap = max(1, TARGET_BLOCK_BYTES // max(bytes_per_row, 1))
    tm = M
    if M % 2 == 0 and (M // 2) % 8 == 0:
        tm = M // 2
    while tm > cap and tm % 2 == 0 and (tm // 2) % 8 == 0:
        tm //= 2
    return tm


# ----------------------------------------------------------------------------
# Pallas kernels
# ----------------------------------------------------------------------------
def _matmul_bias_act_kernel(x_ref, w_ref, b_ref, o_ref, *, relu):
    """o = act(x @ w + b); x:(TM,Cin) f32, w:(Cin,Cout) bf16, b:(1,Cout) f32."""
    x = x_ref[...].astype(jnp.bfloat16)
    acc = jnp.dot(x, w_ref[...], preferred_element_type=jnp.float32) + b_ref[...]
    if relu:
        acc = jnp.maximum(acc, 0.0)
    o_ref[...] = acc.astype(o_ref.dtype)


def _s2_col_taps(g_ref, di, wo):
    """For row-tap di return the 3 column taps (dj=0,1,2) of a 3x3/stride-2
    window from the even/odd column groups; unit-stride slices only."""
    ge = g_ref[2 * di]           # (TM, Wo+1, C) even padded columns
    go = g_ref[2 * di + 1]       # (TM, Wo+1, C) odd  padded columns
    return ge[:, 0:wo, :], go[:, 0:wo, :], ge[:, 1:wo + 1, :]


def _dws2_pw_kernel(g_ref, wd_ref, bd_ref, wp_ref, bp_ref, o_ref):
    """Fused depthwise 3x3 / stride-2 (+BN bias) -> 1x1 conv (+BN bias +ReLU).
    g:(6,TM,Wo+1,C)  wd:(3,3,C)  bd:(1,1,C)  wp:(C,Cout) bf16  bp:(1,Cout)
    o:(TM,Wo,Cout)."""
    tm, wo, cout = o_ref.shape
    c = g_ref.shape[-1]
    wd = wd_ref[...]
    taps = []
    for di in range(3):
        t0, t1, t2 = _s2_col_taps(g_ref, di, wo)
        taps.append(t0 * wd[di, 0])
        taps.append(t1 * wd[di, 1])
        taps.append(t2 * wd[di, 2])
    h = _tree_reduce(taps, lambda a, b: a + b) + bd_ref[...]
    h2 = h.reshape(tm * wo, c).astype(jnp.bfloat16)
    y = jnp.dot(h2, wp_ref[...], preferred_element_type=jnp.float32)
    y = jnp.maximum(y + bp_ref[...], 0.0)
    o_ref[...] = y.reshape(tm, wo, cout).astype(o_ref.dtype)


def _maxpool_s2_kernel(g_ref, o_ref):
    """3x3 / stride-2 max-pool from even/odd row-tap groups. o:(TM,Wo,C)."""
    wo = o_ref.shape[1]
    vals = []
    for di in range(3):
        t0, t1, t2 = _s2_col_taps(g_ref, di, wo)
        vals += [t0, t1, t2]
    o_ref[...] = _tree_reduce(vals, jnp.maximum).astype(o_ref.dtype)


def _stem_conv3x3_s2_kernel(g_ref, w_ref, b_ref, o_ref):
    """Dense 3x3 / stride-2 conv (+BN bias +ReLU) as 9 accumulated MXU dots.
    g:(6,TM,Wo+1,Cin)  w:(9,Cin,Cout) bf16  b:(1,Cout)  o:(TM,Wo,Cout)."""
    tm, wo, cout = o_ref.shape
    cin = g_ref.shape[-1]
    dots = []
    for di in range(3):
        cols = _s2_col_taps(g_ref, di, wo)
        for dj in range(3):
            t = cols[dj].reshape(tm * wo, cin).astype(jnp.bfloat16)
            dots.append(jnp.dot(t, w_ref[3 * di + dj],
                                preferred_element_type=jnp.float32))
    acc = _tree_reduce(dots, lambda a, b: a + b) + b_ref[...]
    o_ref[...] = jnp.maximum(acc, 0.0).reshape(tm, wo, cout).astype(o_ref.dtype)


def _shuffle_unit_s1_kernel(x_ref, w1_ref, b1_ref, wd_ref, bd_ref, w2_ref,
                            b2_ref, o_ref, pad_ref):
    """One whole stride-1 ShuffleUnit per image, fully fused in VMEM:
         x2 -> 1x1(+ReLU) -> dw3x3(+bias) -> 1x1(+ReLU) -> concat(x1, .)
    x:(1,H,W,2S)  w1,w2:(S,S) bf16  b1,b2:(1,S)  wd:(3,3,S)  bd:(1,1,S)
    o:(1,H,W,2S)  pad scratch:(H+2,W+2,S) f32 (dw halo stays on-chip)."""
    _, H, W, C = x_ref.shape
    S = C // 2
    x = x_ref[0]                                   # (H, W, C)
    x1 = x[:, :, :S]
    x2 = x[:, :, S:]
    # 1x1 conv + ReLU (bf16 MXU operands, f32 accumulate)
    h1 = jnp.dot(x2.reshape(H * W, S).astype(jnp.bfloat16), w1_ref[...],
                 preferred_element_type=jnp.float32)
    h1 = jnp.maximum(h1 + b1_ref[...], 0.0).reshape(H, W, S)
    # depthwise 3x3, stride 1: zero-padded halo kept entirely in VMEM scratch
    pad_ref[...] = jnp.zeros(pad_ref.shape, pad_ref.dtype)
    pad_ref[1:H + 1, 1:W + 1, :] = h1
    hp = pad_ref[...]
    wd = wd_ref[...]
    taps = []
    for di in range(3):
        for dj in range(3):
            taps.append(hp[di:di + H, dj:dj + W, :] * wd[di, dj])
    h2 = _tree_reduce(taps, lambda a, b: a + b) + bd_ref[...]
    # 1x1 conv + ReLU
    h3 = jnp.dot(h2.reshape(H * W, S).astype(jnp.bfloat16), w2_ref[...],
                 preferred_element_type=jnp.float32)
    h3 = jnp.maximum(h3 + b2_ref[...], 0.0).reshape(H, W, S)
    # concat with the passthrough half absorbed into the store
    o_ref[0] = jnp.concatenate([x1, h3], axis=-1).astype(o_ref.dtype)


# ----------------------------------------------------------------------------
# Pallas-backed ops (wrappers with exact-division grids / BlockSpecs)
# ----------------------------------------------------------------------------
def _build_s2_groups(xp, Ho, Wo):
    """Padded NHWC -> (6, N*Ho, Wo+1, C) even/odd-column row-tap groups for a
    3x3/stride-2 window (~1.5x read amplification instead of the old 9x)."""
    N, Hp, Wp, C = xp.shape
    assert Wp % 2 == 0, "even input width required for the even/odd split"
    groups = []
    for di in range(3):
        rows = xp[:, di:di + 2 * Ho - 1:2, :, :]       # (N, Ho, Wp, C)
        groups.append(rows[:, :, 0::2, :])             # even padded columns
        groups.append(rows[:, :, 1::2, :])             # odd  padded columns
    g = jnp.stack(groups, axis=0)                      # (6, N, Ho, Wo+1, C)
    return g.reshape(6, N * Ho, Wo + 1, C)


def conv1x1_bn(x, p, relu=True):
    N, H, W, C = x.shape
    Cout = p["w"].shape[1]
    M = N * H * W
    tm = _choose_tile_m(M, 4 * (C + Cout))
    kern = functools.partial(_matmul_bias_act_kernel, relu=relu)
    y = pl.pallas_call(
        kern,
        grid=(M // tm,),
        out_shape=jax.ShapeDtypeStruct((M, Cout), jnp.float32),
        in_specs=[
            pl.BlockSpec((tm, C), lambda i: (i, 0)),
            pl.BlockSpec((C, Cout), lambda i: (0, 0)),
            pl.BlockSpec((1, Cout), lambda i: (0, 0)),
        ],
        out_specs=pl.BlockSpec((tm, Cout), lambda i: (i, 0)),
        compiler_params=_compiler_params(),
    )(x.reshape(M, C), p["w"], p["bias"])
    return y.reshape(N, H, W, Cout)


def dwconv3x3_s2_pw_bn(x, p_dw, p_pw):
    """Fused [depthwise 3x3 / stride 2 (+BN)] -> [1x1 conv (+BN +ReLU)]."""
    N, H, W, C = x.shape
    Ho = (H - 1) // 2 + 1
    Wo = (W - 1) // 2 + 1
    Cout = p_pw["w"].shape[1]
    xp = jnp.pad(x, ((0, 0), (1, 1), (1, 1), (0, 0)))
    g = _build_s2_groups(xp, Ho, Wo)
    M = N * Ho
    tm = _choose_tile_m(M, 4 * ((6 * (Wo + 1) + Wo) * C + Wo * Cout))
    y = pl.pallas_call(
        _dws2_pw_kernel,
        grid=(M // tm,),
        out_shape=jax.ShapeDtypeStruct((M, Wo, Cout), jnp.float32),
        in_specs=[
            pl.BlockSpec((6, tm, Wo + 1, C), lambda i: (0, i, 0, 0)),
            pl.BlockSpec((3, 3, C), lambda i: (0, 0, 0)),
            pl.BlockSpec((1, 1, C), lambda i: (0, 0, 0)),
            pl.BlockSpec((C, Cout), lambda i: (0, 0)),
            pl.BlockSpec((1, Cout), lambda i: (0, 0)),
        ],
        out_specs=pl.BlockSpec((tm, Wo, Cout), lambda i: (i, 0, 0)),
        compiler_params=_compiler_params(),
    )(g, p_dw["w"], p_dw["bias"], p_pw["w"], p_pw["bias"])
    return y.reshape(N, Ho, Wo, Cout)


def conv3x3_dense_bn_relu_s2(x, p):
    N, H, W, Cin = x.shape
    Ho = (H - 1) // 2 + 1
    Wo = (W - 1) // 2 + 1
    Cout = p["w"].shape[-1]
    xp = jnp.pad(x, ((0, 0), (1, 1), (1, 1), (0, 0)))
    g = _build_s2_groups(xp, Ho, Wo)
    M = N * Ho
    tm = _choose_tile_m(M, 4 * (6 * (Wo + 1) * Cin + Wo * Cout))
    y = pl.pallas_call(
        _stem_conv3x3_s2_kernel,
        grid=(M // tm,),
        out_shape=jax.ShapeDtypeStruct((M, Wo, Cout), jnp.float32),
        in_specs=[
            pl.BlockSpec((6, tm, Wo + 1, Cin), lambda i: (0, i, 0, 0)),
            pl.BlockSpec((9, Cin, Cout), lambda i: (0, 0, 0)),
            pl.BlockSpec((1, Cout), lambda i: (0, 0)),
        ],
        out_specs=pl.BlockSpec((tm, Wo, Cout), lambda i: (i, 0, 0)),
        compiler_params=_compiler_params(),
    )(g, p["w"], p["bias"])
    return y.reshape(N, Ho, Wo, Cout)


def maxpool3x3_s2(x):
    N, H, W, C = x.shape
    Ho = (H - 1) // 2 + 1
    Wo = (W - 1) // 2 + 1
    xp = jnp.pad(x, ((0, 0), (1, 1), (1, 1), (0, 0)),
                 constant_values=-jnp.inf)
    g = _build_s2_groups(xp, Ho, Wo)
    M = N * Ho
    tm = _choose_tile_m(M, 4 * (6 * (Wo + 1) + Wo) * C)
    y = pl.pallas_call(
        _maxpool_s2_kernel,
        grid=(M // tm,),
        out_shape=jax.ShapeDtypeStruct((M, Wo, C), jnp.float32),
        in_specs=[pl.BlockSpec((6, tm, Wo + 1, C), lambda i: (0, i, 0, 0))],
        out_specs=pl.BlockSpec((tm, Wo, C), lambda i: (i, 0, 0)),
        compiler_params=_compiler_params(),
    )(g)
    return y.reshape(N, Ho, Wo, C)


def shuffle_unit_s1_fused(x, p):
    """Whole stride-1 ShuffleUnit (minus channel shuffle) as one pallas_call."""
    N, H, W, C = x.shape
    S = C // 2
    return pl.pallas_call(
        _shuffle_unit_s1_kernel,
        grid=(N,),
        out_shape=jax.ShapeDtypeStruct((N, H, W, C), jnp.float32),
        in_specs=[
            pl.BlockSpec((1, H, W, C), lambda n: (n, 0, 0, 0)),
            pl.BlockSpec((S, S), lambda n: (0, 0)),
            pl.BlockSpec((1, S), lambda n: (0, 0)),
            pl.BlockSpec((3, 3, S), lambda n: (0, 0, 0)),
            pl.BlockSpec((1, 1, S), lambda n: (0, 0, 0)),
            pl.BlockSpec((S, S), lambda n: (0, 0)),
            pl.BlockSpec((1, S), lambda n: (0, 0)),
        ],
        out_specs=pl.BlockSpec((1, H, W, C), lambda n: (n, 0, 0, 0)),
        scratch_shapes=[pltpu.VMEM((H + 2, W + 2, S), jnp.float32)],
        compiler_params=_compiler_params(),
    )(x, p["res1"]["w"], p["res1"]["bias"], p["res_dw"]["w"],
      p["res_dw"]["bias"], p["res2"]["w"], p["res2"]["bias"])


# ----------------------------------------------------------------------------
# ShuffleNetV2 structure (glue in JAX)
# ----------------------------------------------------------------------------
def channel_shuffle_nhwc(x, groups=2):
    # TODO(synk): absorb this fixed lane permutation into the producing
    # kernel's output stores instead of an XLA relayout.
    N, H, W, C = x.shape
    gc = C // groups
    x = x.reshape(N, H, W, groups, gc)
    x = jnp.swapaxes(x, 3, 4)
    return x.reshape(N, H, W, C)


def shuffle_unit(x, p, stride, in_c, out_c):
    if stride == 1 and in_c == out_c:
        out = shuffle_unit_s1_fused(x, p)
    else:
        # Downsample unit: both branches end in dw3x3(s2) -> 1x1(+ReLU),
        # each fused into a single kernel.
        s = dwconv3x3_s2_pw_bn(x, p["sc_dw"], p["sc_pw"])
        r = conv1x1_bn(x, p["res1"], relu=True)
        r = dwconv3x3_s2_pw_bn(r, p["res_dw"], p["res2"])
        out = jnp.concatenate([s, r], axis=-1)
    return channel_shuffle_nhwc(out, groups=2)


# ---- deterministic parameter init (kaiming-normal-like, fan_out, relu) ----
# Inference-mode BN with freshly-initialized running stats is folded into the
# conv weights: w *= 1/sqrt(1+eps), bias = 0.  MXU weights stored in bf16.
def make_pw_params(key, cin, cout):
    std = math.sqrt(2.0 / cout)
    w = jax.random.normal(key, (cin, cout), jnp.float32) * (std * BN_SCALE)
    return {"w": w.astype(jnp.bfloat16),
            "bias": jnp.zeros((1, cout), jnp.float32)}


def make_dw_params(key, c):
    std = math.sqrt(2.0 / 9.0)
    w = jax.random.normal(key, (3, 3, c), jnp.float32) * (std * BN_SCALE)
    return {"w": w, "bias": jnp.zeros((1, 1, c), jnp.float32)}


def make_dense3x3_params(key, cin, cout):
    std = math.sqrt(2.0 / (cout * 9))
    w = jax.random.normal(key, (3, 3, cin, cout), jnp.float32) * (std * BN_SCALE)
    return {"w": w.reshape(9, cin, cout).astype(jnp.bfloat16),
            "bias": jnp.zeros((1, cout), jnp.float32)}


def make_unit_params(key, in_c, out_c, stride):
    split = out_c // 2
    keys = jax.random.split(key, 5)
    p = {}
    if stride != 1 or in_c != out_c:
        p["sc_dw"] = make_dw_params(keys[0], in_c)
        p["sc_pw"] = make_pw_params(keys[1], in_c, split)
        p["res1"] = make_pw_params(keys[2], in_c, split)
    else:
        p["res1"] = make_pw_params(keys[2], split, split)
    p["res_dw"] = make_dw_params(keys[3], split)
    p["res2"] = make_pw_params(keys[4], split, split)
    return p


def make_model_params(key, out_channels):
    k_conv1, k2, k3, k4 = jax.random.split(key, 4)
    params = {"conv1": make_dense3x3_params(k_conv1, 3, 24)}

    def make_stage(k, in_c, out_c, repeat):
        ks = jax.random.split(k, repeat + 1)
        units = [(make_unit_params(ks[0], in_c, out_c, 2), 2, in_c, out_c)]
        for i in range(repeat):
            units.append((make_unit_params(ks[i + 1], out_c, out_c, 1),
                          1, out_c, out_c))
        return units

    params["stage2"] = make_stage(k2, 24, out_channels[0], 3)
    params["stage3"] = make_stage(k3, out_channels[0], out_channels[1], 7)
    params["stage4"] = make_stage(k4, out_channels[1], out_channels[2], 3)
    return params


def shufflenet_v2_forward(x_nchw, params):
    # PyTorch NCHW in -> NHWC internally -> NCHW out.
    x = jnp.transpose(x_nchw, (0, 2, 3, 1)).astype(jnp.float32)
    c1 = conv3x3_dense_bn_relu_s2(x, params["conv1"])
    c2 = maxpool3x3_s2(c1)

    def run_stage(h, stage):
        for p, stride, in_c, out_c in stage:
            h = shuffle_unit(h, p, stride, in_c, out_c)
        return h

    c3 = run_stage(c2, params["stage2"])
    c4 = run_stage(c3, params["stage3"])
    c5 = run_stage(c4, params["stage4"])
    to_nchw = lambda t: jnp.transpose(t, (0, 3, 1, 2))
    return to_nchw(c2), to_nchw(c3), to_nchw(c4), to_nchw(c5)


# ----------------------------------------------------------------------------
if __name__ == "__main__":
    key = jax.random.PRNGKey(0)
    k_params, k_x = jax.random.split(key)

    out_channels = (32, 64, 128)          # small ShuffleNetV2 width
    params = make_model_params(k_params, out_channels)

    x = jax.random.normal(k_x, (2, 3, 32, 32), jnp.float32)   # NCHW, like PyTorch

    fwd = jax.jit(lambda inp: shufflenet_v2_forward(inp, params))
    c2, c3, c4, c5 = fwd(x)
    jax.block_until_ready((c2, c3, c4, c5))

    assert c2.shape == (2, 24, 8, 8)
    assert c3.shape == (2, out_channels[0], 4, 4)
    assert c4.shape == (2, out_channels[1], 2, 2)
    assert c5.shape == (2, out_channels[2], 1, 1)
    assert all(bool(jnp.all(jnp.isfinite(t))) for t in (c2, c3, c4, c5))
    print("KERNEL_OK")
</pallas_src>

<mosaic_0001>
module attributes {stable_mosaic.version = 11 : i64} {
  func.func @_stem_conv3x3_s2_kernel(%arg0: i32, %arg1: memref<6x16x17x3xf32, #tpu.memory_space<vmem>>, %arg2: memref<9x3x24xbf16, #tpu.memory_space<vmem>>, %arg3: memref<1x24xf32, #tpu.memory_space<vmem>>, %arg4: memref<16x16x24xf32, #tpu.memory_space<vmem>>) attributes {dimension_semantics = [#tpu.dimension_semantics<parallel>], iteration_bounds = array<i64: 2>, scalar_prefetch = 0 : i64, scratch_operands = 0 : i64, tpu.core_type = #tpu.core_type<tc>, window_params = [{transform_indices = @transform_0, window_bounds = array<i64: 6, 16, 17, 3>}, {pipeline_mode = #tpu.pipeline_mode<synchronous>, transform_indices = @transform_1, window_bounds = array<i64: 9, 3, 24>}, {pipeline_mode = #tpu.pipeline_mode<synchronous>, transform_indices = @transform_2, window_bounds = array<i64: 1, 24>}, {transform_indices = @transform_3, window_bounds = array<i64: 16, 16, 24>}]} {
    %c0 = arith.constant 0 : index
    %c0_0 = arith.constant 0 : index
    %c0_1 = arith.constant 0 : index
    %c0_2 = arith.constant 0 : index
    %0 = vector.load %arg1[%c0, %c0_0, %c0_1, %c0_2] : memref<6x16x17x3xf32, #tpu.memory_space<vmem>>, vector<1x16x17x3xf32>
    %1 = vector.shape_cast %0 : vector<1x16x17x3xf32> to vector<16x17x3xf32>
    %c1 = arith.constant 1 : index
    %c0_3 = arith.constant 0 : index
    %c0_4 = arith.constant 0 : index
    %c0_5 = arith.constant 0 : index
    %2 = vector.load %arg1[%c1, %c0_3, %c0_4, %c0_5] : memref<6x16x17x3xf32, #tpu.memory_space<vmem>>, vector<1x16x17x3xf32>
    %3 = vector.shape_cast %2 : vector<1x16x17x3xf32> to vector<16x17x3xf32>
    %4 = vector.extract_strided_slice %1 {offsets = [0, 0, 0], sizes = [16, 16, 3], strides = [1, 1, 1]} : vector<16x17x3xf32> to vector<16x16x3xf32>
    %5 = vector.extract_strided_slice %3 {offsets = [0, 0, 0], sizes = [16, 16, 3], strides = [1, 1, 1]} : vector<16x17x3xf32> to vector<16x16x3xf32>
    %6 = vector.extract_strided_slice %1 {offsets = [0, 1, 0], sizes = [16, 16, 3], strides = [1, 1, 1]} : vector<16x17x3xf32> to vector<16x16x3xf32>
    %7 = vector.shape_cast %4 : vector<16x16x3xf32> to vector<256x3xf32>
    %8 = arith.truncf %7 : vector<256x3xf32> to vector<256x3xbf16>
    %c0_6 = arith.constant 0 : index
    %c0_7 = arith.constant 0 : index
    %c0_8 = arith.constant 0 : index
    %9 = vector.load %arg2[%c0_6, %c0_7, %c0_8] : memref<9x3x24xbf16, #tpu.memory_space<vmem>>, vector<1x3x24xbf16>
    %10 = vector.shape_cast %9 : vector<1x3x24xbf16> to vector<3x24xbf16>
    %cst = arith.constant dense<0.000000e+00> : vector<256x24xf32>
    %11 = tpu.matmul %8, %10, %cst {dimension_numbers = #tpu.dot_dimension_numbers<[1], [0], [0], [1], [0, 0, 1, 1], [], []>} : vector<256x3xbf16>, vector<3x24xbf16>, vector<256x24xf32> -> vector<256x24xf32>
    %12 = vector.shape_cast %5 : vector<16x16x3xf32> to vector<256x3xf32>
    %13 = arith.truncf %12 : vector<256x3xf32> to vector<256x3xbf16>
    %c1_9 = arith.constant 1 : index
    %c0_10 = arith.constant 0 : index
    %c0_11 = arith.constant 0 : index
    %14 = vector.load %arg2[%c1_9, %c0_10, %c0_11] : memref<9x3x24xbf16, #tpu.memory_space<vmem>>, vector<1x3x24xbf16>
    %15 = vector.shape_cast %14 : vector<1x3x24xbf16> to vector<3x24xbf16>
    %cst_12 = arith.constant dense<0.000000e+00> : vector<256x24xf32>
    %16 = tpu.matmul %13, %15, %cst_12 {dimension_numbers = #tpu.dot_dimension_numbers<[1], [0], [0], [1], [0, 0, 1, 1], [], []>} : vector<256x3xbf16>, vector<3x24xbf16>, vector<256x24xf32> -> vector<256x24xf32>
    %17 = vector.shape_cast %6 : vector<16x16x3xf32> to vector<256x3xf32>
    %18 = arith.truncf %17 : vector<256x3xf32> to vector<256x3xbf16>
    %c2 = arith.constant 2 : index
    %c0_13 = arith.constant 0 : index
    %c0_14 = arith.constant 0 : index
    %19 = vector.load %arg2[%c2, %c0_13, %c0_14] : memref<9x3x24xbf16, #tpu.memory_space<vmem>>, vector<1x3x24xbf16>
    %20 = vector.shape_cast %19 : vector<1x3x24xbf16> to vector<3x24xbf16>
    %cst_15 = arith.constant dense<0.000000e+00> : vector<256x24xf32>
    %21 = tpu.matmul %18, %20, %cst_15 {dimension_numbers = #tpu.dot_dimension_numbers<[1], [0], [0], [1], [0, 0, 1, 1], [], []>} : vector<256x3xbf16>, vector<3x24xbf16>, vector<256x24xf32> -> vector<256x24xf32>
    %c2_16 = arith.constant 2 : index
    %c0_17 = arith.constant 0 : index
    %c0_18 = arith.constant 0 : index
    %c0_19 = arith.constant 0 : index
    %22 = vector.load %arg1[%c2_16, %c0_17, %c0_18, %c0_19] : memref<6x16x17x3xf32, #tpu.memory_space<vmem>>, vector<1x16x17x3xf32>
    %23 = vector.shape_cast %22 : vector<1x16x17x3xf32> to vector<16x17x3xf32>
    %c3 = arith.constant 3 : index
    %c0_20 = arith.constant 0 : index
    %c0_21 = arith.constant 0 : index
    %c0_22 = arith.constant 0 : index
    %24 = vector.load %arg1[%c3, %c0_20, %c0_21, %c0_22] : memref<6x16x17x3xf32, #tpu.memory_space<vmem>>, vector<1x16x17x3xf32>
    %25 = vector.shape_cast %24 : vector<1x16x17x3xf32> to vector<16x17x3xf32>
    %26 = vector.extract_strided_slice %23 {offsets = [0, 0, 0], sizes = [16, 16, 3], strides = [1, 1, 1]} : vector<16x17x3xf32> to vector<16x16x3xf32>
    %27 = vector.extract_strided_slice %25 {offsets = [0, 0, 0], sizes = [16, 16, 3], strides = [1, 1, 1]} : vector<16x17x3xf32> to vector<16x16x3xf32>
    %28 = vector.extract_strided_slice %23 {offsets = [0, 1, 0], sizes = [16, 16, 3], strides = [1, 1, 1]} : vector<16x17x3xf32> to vector<16x16x3xf32>
    %29 = vector.shape_cast %26 : vector<16x16x3xf32> to vector<256x3xf32>
    %30 = arith.truncf %29 : vector<256x3xf32> to vector<256x3xbf16>
    %c3_23 = arith.constant 3 : index
    %c0_24 = arith.constant 0 : index
    %c0_25 = arith.constant 0 : index
    %31 = vector.load %arg2[%c3_23, %c0_24, %c0_25] : memref<9x3x24xbf16, #tpu.memory_space<vmem>>, vector<1x3x24xbf16>
    %32 = vector.shape_cast %31 : vector<1x3x24xbf16> to vector<3x24xbf16>
    %cst_26 = arith.constant dense<0.000000e+00> : vector<256x24xf32>
    %33 = tpu.matmul %30, %32, %cst_26 {dimension_numbers = #tpu.dot_dimension_numbers<[1], [0], [0], [1], [0, 0, 1, 1], [], []>} : vector<256x3xbf16>, vector<3x24xbf16>, vector<256x24xf32> -> vector<256x24xf32>
    %34 = vector.shape_cast %27 : vector<16x16x3xf32> to vector<256x3xf32>
    %35 = arith.truncf %34 : vector<256x3xf32> to vector<256x3xbf16>
    %c4 = arith.constant 4 : index
    %c0_27 = arith.constant 0 : index
    %c0_28 = arith.constant 0 : index
    %36 = vector.load %arg2[%c4, %c0_27, %c0_28] : memref<9x3x24xbf16, #tpu.memory_space<vmem>>, vector<1x3x24xbf16>
    %37 = vector.shape_cast %36 : vector<1x3x24xbf16> to vector<3x24xbf16>
    %cst_29 = arith.constant dense<0.000000e+00> : vector<256x24xf32>
    %38 = tpu.matmul %35, %37, %cst_29 {dimension_numbers = #tpu.dot_dimension_numbers<[1], [0], [0], [1], [0, 0, 1, 1], [], []>} : vector<256x3xbf16>, vector<3x24xbf16>, vector<256x24xf32> -> vector<256x24xf32>
    %39 = vector.shape_cast %28 : vector<16x16x3xf32> to vector<256x3xf32>
    %40 = arith.truncf %39 : vector<256x3xf32> to vector<256x3xbf16>
    %c5 = arith.constant 5 : index
    %c0_30 = arith.constant 0 : index
    %c0_31 = arith.constant 0 : index
    %41 = vector.load %arg2[%c5, %c0_30, %c0_31] : memref<9x3x24xbf16, #tpu.memory_space<vmem>>, vector<1x3x24xbf16>
    %42 = vector.shape_cast %41 : vector<1x3x24xbf16> to vector<3x24xbf16>
    %cst_32 = arith.constant dense<0.000000e+00> : vector<256x24xf32>
    %43 = tpu.matmul %40, %42, %cst_32 {dimension_numbers = #tpu.dot_dimension_numbers<[1], [0], [0], [1], [0, 0, 1, 1], [], []>} : vector<256x3xbf16>, vector<3x24xbf16>, vector<256x24xf32> -> vector<256x24xf32>
    %c4_33 = arith.constant 4 : index
    %c0_34 = arith.constant 0 : index
    %c0_35 = arith.constant 0 : index
    %c0_36 = arith.constant 0 : index
    %44 = vector.load %arg1[%c4_33, %c0_34, %c0_35, %c0_36] : memref<6x16x17x3xf32, #tpu.memory_space<vmem>>, vector<1x16x17x3xf32>
    %45 = vector.shape_cast %44 : vector<1x16x17x3xf32> to vector<16x17x3xf32>
    %c5_37 = arith.constant 5 : index
    %c0_38 = arith.constant 0 : index
    %c0_39 = arith.constant 0 : index
    %c0_40 = arith.constant 0 : index
    %46 = vector.load %arg1[%c5_37, %c0_38, %c0_39, %c0_40] : memref<6x16x17x3xf32, #tpu.memory_space<vmem>>, vector<1x16x17x3xf32>
    %47 = vector.shape_cast %46 : vector<1x16x17x3xf32> to vector<16x17x3xf32>
    %48 = vector.extract_strided_slice %45 {offsets = [0, 0, 0], sizes = [16, 16, 3], strides = [1, 1, 1]} : vector<16x17x3xf32> to vector<16x16x3xf32>
    %49 = vector.extract_strided_slice %47 {offsets = [0, 0, 0], sizes = [16, 16, 3], strides = [1, 1, 1]} : vector<16x17x3xf32> to vector<16x16x3xf32>
    %50 = vector.extract_strided_slice %45 {offsets = [0, 1, 0], sizes = [16, 16, 3], strides = [1, 1, 1]} : vector<16x17x3xf32> to vector<16x16x3xf32>
    %51 = vector.shape_cast %48 : vector<16x16x3xf32> to vector<256x3xf32>
    %52 = arith.truncf %51 : vector<256x3xf32> to vector<256x3xbf16>
    %c6 = arith.constant 6 : index
    %c0_41 = arith.constant 0 : index
    %c0_42 = arith.constant 0 : index
    %53 = vector.load %arg2[%c6, %c0_41, %c0_42] : memref<9x3x24xbf16, #tpu.memory_space<vmem>>, vector<1x3x24xbf16>
    %54 = vector.shape_cast %53 : vector<1x3x24xbf16> to vector<3x24xbf16>
    %cst_43 = arith.constant dense<0.000000e+00> : vector<256x24xf32>
    %55 = tpu.matmul %52, %54, %cst_43 {dimension_numbers = #tpu.dot_dimension_numbers<[1], [0], [0], [1], [0, 0, 1, 1], [], []>} : vector<256x3xbf16>, vector<3x24xbf16>, vector<256x24xf32> -> vector<256x24xf32>
    %56 = vector.shape_cast %49 : vector<16x16x3xf32> to vector<256x3xf32>
    %57 = arith.truncf %56 : vector<256x3xf32> to vector<256x3xbf16>
    %c7 = arith.constant 7 : index
    %c0_44 = arith.constant 0 : index
    %c0_45 = arith.constant 0 : index
    %58 = vector.load %arg2[%c7, %c0_44, %c0_45] : memref<9x3x24xbf16, #tpu.memory_space<vmem>>, vector<1x3x24xbf16>
    %59 = vector.shape_cast %58 : vector<1x3x24xbf16> to vector<3x24xbf16>
    %cst_46 = arith.constant dense<0.000000e+00> : vector<256x24xf32>
    %60 = tpu.matmul %57, %59, %cst_46 {dimension_numbers = #tpu.dot_dimension_numbers<[1], [0], [0], [1], [0, 0, 1, 1], [], []>} : vector<256x3xbf16>, vector<3x24xbf16>, vector<256x24xf32> -> vector<256x24xf32>
    %61 = vector.shape_cast %50 : vector<16x16x3xf32> to vector<256x3xf32>
    %62 = arith.truncf %61 : vector<256x3xf32> to vector<256x3xbf16>
    %c8 = arith.constant 8 : index
    %c0_47 = arith.constant 0 : index
    %c0_48 = arith.constant 0 : index
    %63 = vector.load %arg2[%c8, %c0_47, %c0_48] : memref<9x3x24xbf16, #tpu.memory_space<vmem>>, vector<1x3x24xbf16>
    %64 = vector.shape_cast %63 : vector<1x3x24xbf16> to vector<3x24xbf16>
    %cst_49 = arith.constant dense<0.000000e+00> : vector<256x24xf32>
    %65 = tpu.matmul %62, %64, %cst_49 {dimension_numbers = #tpu.dot_dimension_numbers<[1], [0], [0], [1], [0, 0, 1, 1], [], []>} : vector<256x3xbf16>, vector<3x24xbf16>, vector<256x24xf32> -> vector<256x24xf32>
    %66 = arith.addf %11, %16 : vector<256x24xf32>
    %67 = arith.addf %21, %33 : vector<256x24xf32>
    %68 = arith.addf %38, %43 : vector<256x24xf32>
    %69 = arith.addf %55, %60 : vector<256x24xf32>
    %70 = arith.addf %66, %67 : vector<256x24xf32>
    %71 = arith.addf %68, %69 : vector<256x24xf32>
    %72 = arith.addf %70, %71 : vector<256x24xf32>
    %73 = arith.addf %72, %65 : vector<256x24xf32>
    %c0_50 = arith.constant 0 : index
    %c0_51 = arith.constant 0 : index
    %74 = vector.load %arg3[%c0_50, %c0_51] : memref<1x24xf32, #tpu.memory_space<vmem>>, vector<1x24xf32>
    %75 = vector.broadcast %74 : vector<1x24xf32> to vector<256x24xf32>
    %76 = arith.addf %73, %75 : vector<256x24xf32>
    %cst_52 = arith.constant 0.000000e+00 : f32
    %77 = vector.broadcast %cst_52 : f32 to vector<256x24xf32>
    %78 = arith.maximumf %76, %77 : vector<256x24xf32>
    %79 = vector.shape_cast %78 : vector<256x24xf32> to vector<16x16x24xf32>
    %c0_53 = arith.constant 0 : index
    %c0_54 = arith.constant 0 : index
    %c0_55 = arith.constant 0 : index
    %80 = vector.load %arg4[%c0_53, %c0_54, %c0_55] : memref<16x16x24xf32, #tpu.memory_space<vmem>>, vector<16x16x24xf32>
    tpu.vector_store %arg4[%c0_53, %c0_54, %c0_55], %79 {strides = array<i32>} : memref<16x16x24xf32, #tpu.memory_space<vmem>>, vector<16x16x24xf32>,
    return
  }
  func.func @transform_0(%arg0: i32) -> (i32, i32, i32, i32) {
    %c0_i32 = arith.constant 0 : i32
    %c0_i32_0 = arith.constant 0 : i32
    %c0_i32_1 = arith.constant 0 : i32
    %c0_i32_2 = arith.constant 0 : i32
    return %c0_i32, %arg0, %c0_i32_0, %c0_i32_1 : i32, i32, i32, i32
  }
  func.func @transform_1(%arg0: i32) -> (i32, i32, i32) {
    %c0_i32 = arith.constant 0 : i32
    %c0_i32_0 = arith.constant 0 : i32
    %c0_i32_1 = arith.constant 0 : i32
    %c0_i32_2 = arith.constant 0 : i32
    return %c0_i32, %c0_i32_0, %c0_i32_1 : i32, i32, i32
  }
  func.func @transform_2(%arg0: i32) -> (i32, i32) {
    %c0_i32 = arith.constant 0 : i32
    %c0_i32_0 = arith.constant 0 : i32
    %c0_i32_1 = arith.constant 0 : i32
    return %c0_i32, %c0_i32_0 : i32, i32
  }
  func.func @transform_3(%arg0: i32) -> (i32, i32, i32) {
    %c0_i32 = arith.constant 0 : i32
    %c0_i32_0 = arith.constant 0 : i32
    %c0_i32_1 = arith.constant 0 : i32
    return %arg0, %c0_i32, %c0_i32_0 : i32, i32, i32
  }
}

module attributes {stable_mosaic.version = 11 : i64} {
  func.func @_maxpool_s2_kernel(%arg0: i32, %arg1: memref<6x8x9x24xf32, #tpu.memory_space<vmem>>, %arg2: memref<8x8x24xf32, #tpu.memory_space<vmem>>) attributes {dimension_semantics = [#tpu.dimension_semantics<parallel>], iteration_bounds = array<i64: 2>, scalar_prefetch = 0 : i64, scratch_operands = 0 : i64, tpu.core_type = #tpu.core_type<tc>, window_params = [{transform_indices = @transform_0, window_bounds = array<i64: 6, 8, 9, 24>}, {transform_indices = @transform_1, window_bounds = array<i64: 8, 8, 24>}]} {
    %c0 = arith.constant 0 : index
    %c0_0 = arith.constant 0 : index
    %c0_1 = arith.constant 0 : index
    %c0_2 = arith.constant 0 : index
    %0 = vector.load %arg1[%c0, %c0_0, %c0_1, %c0_2] : memref<6x8x9x24xf32, #tpu.memory_space<vmem>>, vector<1x8x9x24xf32>
    %1 = vector.shape_cast %0 : vector<1x8x9x24xf32> to vector<8x9x24xf32>
    %c1 = arith.constant 1 : index
    %c0_3 = arith.constant 0 : index
    %c0_4 = arith.constant 0 : index
    %c0_5 = arith.constant 0 : index
    %2 = vector.load %arg1[%c1, %c0_3, %c0_4, %c0_5] : memref<6x8x9x24xf32, #tpu.memory_space<vmem>>, vector<1x8x9x24xf32>
    %3 = vector.shape_cast %2 : vector<1x8x9x24xf32> to vector<8x9x24xf32>
    %4 = vector.extract_strided_slice %1 {offsets = [0, 0, 0], sizes = [8, 8, 24], strides = [1, 1, 1]} : vector<8x9x24xf32> to vector<8x8x24xf32>
    %5 = vector.extract_strided_slice %3 {offsets = [0, 0, 0], sizes = [8, 8, 24], strides = [1, 1, 1]} : vector<8x9x24xf32> to vector<8x8x24xf32>
    %6 = vector.extract_strided_slice %1 {offsets = [0, 1, 0], sizes = [8, 8, 24], strides = [1, 1, 1]} : vector<8x9x24xf32> to vector<8x8x24xf32>
    %c2 = arith.constant 2 : index
    %c0_6 = arith.constant 0 : index
    %c0_7 = arith.constant 0 : index
    %c0_8 = arith.constant 0 : index
    %7 = vector.load %arg1[%c2, %c0_6, %c0_7, %c0_8] : memref<6x8x9x24xf32, #tpu.memory_space<vmem>>, vector<1x8x9x24xf32>
    %8 = vector.shape_cast %7 : vector<1x8x9x24xf32> to vector<8x9x24xf32>
    %c3 = arith.constant 3 : index
    %c0_9 = arith.constant 0 : index
    %c0_10 = arith.constant 0 : index
    %c0_11 = arith.constant 0 : index
    %9 = vector.load %arg1[%c3, %c0_9, %c0_10, %c0_11] : memref<6x8x9x24xf32, #tpu.memory_space<vmem>>, vector<1x8x9x24xf32>
    %10 = vector.shape_cast %9 : vector<1x8x9x24xf32> to vector<8x9x24xf32>
    %11 = vector.extract_strided_slice %8 {offsets = [0, 0, 0], sizes = [8, 8, 24], strides = [1, 1, 1]} : vector<8x9x24xf32> to vector<8x8x24xf32>
    %12 = vector.extract_strided_slice %10 {offsets = [0, 0, 0], sizes = [8, 8, 24], strides = [1, 1, 1]} : vector<8x9x24xf32> to vector<8x8x24xf32>
    %13 = vector.extract_strided_slice %8 {offsets = [0, 1, 0], sizes = [8, 8, 24], strides = [1, 1, 1]} : vector<8x9x24xf32> to vector<8x8x24xf32>
    %c4 = arith.constant 4 : index
    %c0_12 = arith.constant 0 : index
    %c0_13 = arith.constant 0 : index
    %c0_14 = arith.constant 0 : index
    %14 = vector.load %arg1[%c4, %c0_12, %c0_13, %c0_14] : memref<6x8x9x24xf32, #tpu.memory_space<vmem>>, vector<1x8x9x24xf32>
    %15 = vector.shape_cast %14 : vector<1x8x9x24xf32> to vector<8x9x24xf32>
    %c5 = arith.constant 5 : index
    %c0_15 = arith.constant 0 : index
    %c0_16 = arith.constant 0 : index
    %c0_17 = arith.constant 0 : index
    %16 = vector.load %arg1[%c5, %c0_15, %c0_16, %c0_17] : memref<6x8x9x24xf32, #tpu.memory_space<vmem>>, vector<1x8x9x24xf32>
    %17 = vector.shape_cast %16 : vector<1x8x9x24xf32> to vector<8x9x24xf32>
    %18 = vector.extract_strided_slice %15 {offsets = [0, 0, 0], sizes = [8, 8, 24], strides = [1, 1, 1]} : vector<8x9x24xf32> to vector<8x8x24xf32>
    %19 = vector.extract_strided_slice %17 {offsets = [0, 0, 0], sizes = [8, 8, 24], strides = [1, 1, 1]} : vector<8x9x24xf32> to vector<8x8x24xf32>
    %20 = vector.extract_strided_slice %15 {offsets = [0, 1, 0], sizes = [8, 8, 24], strides = [1, 1, 1]} : vector<8x9x24xf32> to vector<8x8x24xf32>
    %21 = arith.maximumf %4, %5 : vector<8x8x24xf32>
    %22 = arith.maximumf %6, %11 : vector<8x8x24xf32>
    %23 = arith.maximumf %12, %13 : vector<8x8x24xf32>
    %24 = arith.maximumf %18, %19 : vector<8x8x24xf32>
    %25 = arith.maximumf %21, %22 : vector<8x8x24xf32>
    %26 = arith.maximumf %23, %24 : vector<8x8x24xf32>
    %27 = arith.maximumf %25, %26 : vector<8x8x24xf32>
    %28 = arith.maximumf %27, %20 : vector<8x8x24xf32>
    %c0_18 = arith.constant 0 : index
    %c0_19 = arith.constant 0 : index
    %c0_20 = arith.constant 0 : index
    %29 = vector.load %arg2[%c0_18, %c0_19, %c0_20] : memref<8x8x24xf32, #tpu.memory_space<vmem>>, vector<8x8x24xf32>
    tpu.vector_store %arg2[%c0_18, %c0_19, %c0_20], %28 {strides = array<i32>} : memref<8x8x24xf32, #tpu.memory_space<vmem>>, vector<8x8x24xf32>,
    return
  }
  func.func @transform_0(%arg0: i32) -> (i32, i32, i32, i32) {
    %c0_i32 = arith.constant 0 : i32
    %c0_i32_0 = arith.constant 0 : i32
    %c0_i32_1 = arith.constant 0 : i32
    %c0_i32_2 = arith.constant 0 : i32
    return %c0_i32, %arg0, %c0_i32_0, %c0_i32_1 : i32, i32, i32, i32
  }
  func.func @transform_1(%arg0: i32) -> (i32, i32, i32) {
    %c0_i32 = arith.constant 0 : i32
    %c0_i32_0 = arith.constant 0 : i32
    %c0_i32_1 = arith.constant 0 : i32
    return %arg0, %c0_i32, %c0_i32_0 : i32, i32, i32
  }
}

module attributes {stable_mosaic.version = 11 : i64} {
  func.func @_dws2_pw_kernel(%arg0: i32, %arg1: memref<6x8x5x24xf32, #tpu.memory_space<vmem>>, %arg2: memref<3x3x24xf32, #tpu.memory_space<vmem>>, %arg3: memref<1x1x24xf32, #tpu.memory_space<vmem>>, %arg4: memref<24x16xbf16, #tpu.memory_space<vmem>>, %arg5: memref<1x16xf32, #tpu.memory_space<vmem>>, %arg6: memref<8x4x16xf32, #tpu.memory_space<vmem>>) attributes {dimension_semantics = [#tpu.dimension_semantics<parallel>], iteration_bounds = array<i64: 1>, scalar_prefetch = 0 : i64, scratch_operands = 0 : i64, tpu.core_type = #tpu.core_type<tc>, window_params = [{transform_indices = @transform_0, window_bounds = array<i64: 6, 8, 5, 24>}, {pipeline_mode = #tpu.pipeline_mode<synchronous>, transform_indices = @transform_1, window_bounds = array<i64: 3, 3, 24>}, {pipeline_mode = #tpu.pipeline_mode<synchronous>, transform_indices = @transform_2, window_bounds = array<i64: 1, 1, 24>}, {pipeline_mode = #tpu.pipeline_mode<synchronous>, transform_indices = @transform_3, window_bounds = array<i64: 24, 16>}, {pipeline_mode = #tpu.pipeline_mode<synchronous>, transform_indices = @transform_4, window_bounds = array<i64: 1, 16>}, {transform_indices = @transform_5, window_bounds = array<i64: 8, 4, 16>}]} {
    %c0 = arith.constant 0 : index
    %c0_0 = arith.constant 0 : index
    %c0_1 = arith.constant 0 : index
    %0 = vector.load %arg2[%c0, %c0_0, %c0_1] : memref<3x3x24xf32, #tpu.memory_space<vmem>>, vector<3x3x24xf32>
    %c0_2 = arith.constant 0 : index
    %c0_3 = arith.constant 0 : index
    %c0_4 = arith.constant 0 : index
    %c0_5 = arith.constant 0 : index
    %1 = vector.load %arg1[%c0_2, %c0_3, %c0_4, %c0_5] : memref<6x8x5x24xf32, #tpu.memory_space<vmem>>, vector<1x8x5x24xf32>
    %2 = vector.shape_cast %1 : vector<1x8x5x24xf32> to vector<8x5x24xf32>
    %c1 = arith.constant 1 : index
    %c0_6 = arith.constant 0 : index
    %c0_7 = arith.constant 0 : index
    %c0_8 = arith.constant 0 : index
    %3 = vector.load %arg1[%c1, %c0_6, %c0_7, %c0_8] : memref<6x8x5x24xf32, #tpu.memory_space<vmem>>, vector<1x8x5x24xf32>
    %4 = vector.shape_cast %3 : vector<1x8x5x24xf32> to vector<8x5x24xf32>
    %5 = vector.extract_strided_slice %2 {offsets = [0, 0, 0], sizes = [8, 4, 24], strides = [1, 1, 1]} : vector<8x5x24xf32> to vector<8x4x24xf32>
    %6 = vector.extract_strided_slice %4 {offsets = [0, 0, 0], sizes = [8, 4, 24], strides = [1, 1, 1]} : vector<8x5x24xf32> to vector<8x4x24xf32>
    %7 = vector.extract_strided_slice %2 {offsets = [0, 1, 0], sizes = [8, 4, 24], strides = [1, 1, 1]} : vector<8x5x24xf32> to vector<8x4x24xf32>
    %8 = vector.extract_strided_slice %0 {offsets = [0, 0, 0], sizes = [1, 1, 24], strides = [1, 1, 1]} : vector<3x3x24xf32> to vector<1x1x24xf32>
    %9 = vector.shape_cast %8 : vector<1x1x24xf32> to vector<24xf32>
    %10 = vector.shape_cast %9 : vector<24xf32> to vector<1x1x24xf32>
    %11 = vector.broadcast %10 : vector<1x1x24xf32> to vector<8x4x24xf32>
    %12 = arith.mulf %5, %11 : vector<8x4x24xf32>
    %13 = vector.extract_strided_slice %0 {offsets = [0, 1, 0], sizes = [1, 1, 24], strides = [1, 1, 1]} : vector<3x3x24xf32> to vector<1x1x24xf32>
    %14 = vector.shape_cast %13 : vector<1x1x24xf32> to vector<24xf32>
    %15 = vector.shape_cast %14 : vector<24xf32> to vector<1x1x24xf32>
    %16 = vector.broadcast %15 : vector<1x1x24xf32> to vector<8x4x24xf32>
    %17 = arith.mulf %6, %16 : vector<8x4x24xf32>
    %18 = vector.extract_strided_slice %0 {offsets = [0, 2, 0], sizes = [1, 1, 24], strides = [1, 1, 1]} : vector<3x3x24xf32> to vector<1x1x24xf32>
    %19 = vector.shape_cast %18 : vector<1x1x24xf32> to vector<24xf32>
    %20 = vector.shape_cast %19 : vector<24xf32> to vector<1x1x24xf32>
    %21 = vector.broadcast %20 : vector<1x1x24xf32> to vector<8x4x24xf32>
    %22 = arith.mulf %7, %21 : vector<8x4x24xf32>
    %c2 = arith.constant 2 : index
    %c0_9 = arith.constant 0 : index
    %c0_10 = arith.constant 0 : index
    %c0_11 = arith.constant 0 : index
    %23 = vector.load %arg1[%c2, %c0_9, %c0_10, %c0_11] : memref<6x8x5x24xf32, #tpu.memory_space<vmem>>, vector<1x8x5x24xf32>
    %24 = vector.shape_cast %23 : vector<1x8x5x24xf32> to vector<8x5x24xf32>
    %c3 = arith.constant 3 : index
    %c0_12 = arith.constant 0 : index
    %c0_13 = arith.constant 0 : index
    %c0_14 = arith.constant 0 : index
    %25 = vector.load %arg1[%c3, %c0_12, %c0_13, %c0_14] : memref<6x8x5x24xf32, #tpu.memory_space<vmem>>, vector<1x8x5x24xf32>
    %26 = vector.shape_cast %25 : vector<1x8x5x24xf32> to vector<8x5x24xf32>
    %27 = vector.extract_strided_slice %24 {offsets = [0, 0, 0], sizes = [8, 4, 24], strides = [1, 1, 1]} : vector<8x5x24xf32> to vector<8x4x24xf32>
    %28 = vector.extract_strided_slice %26 {offsets = [0, 0, 0], sizes = [8, 4, 24], strides = [1, 1, 1]} : vector<8x5x24xf32> to vector<8x4x24xf32>
    %29 = vector.extract_strided_slice %24 {offsets = [0, 1, 0], sizes = [8, 4, 24], strides = [1, 1, 1]} : vector<8x5x24xf32> to vector<8x4x24xf32>
    %30 = vector.extract_strided_slice %0 {offsets = [1, 0, 0], sizes = [1, 1, 24], strides = [1, 1, 1]} : vector<3x3x24xf32> to vector<1x1x24xf32>
    %31 = vector.shape_cast %30 : vector<1x1x24xf32> to vector<24xf32>
    %32 = vector.shape_cast %31 : vector<24xf32> to vector<1x1x24xf32>
    %33 = vector.broadcast %32 : vector<1x1x24xf32> to vector<8x4x24xf32>
    %34 = arith.mulf %27, %33 : vector<8x4x24xf32>
    %35 = vector.extract_strided_slice %0 {offsets = [1, 1, 0], sizes = [1, 1, 24], strides = [1, 1, 1]} : vector<3x3x24xf32> to vector<1x1x24xf32>
    %36 = vector.shape_cast %35 : vector<1x1x24xf32> to vector<24xf32>
    %37 = vector.shape_cast %36 : vector<24xf32> to vector<1x1x24xf32>
    %38 = vector.broadcast %37 : vector<1x1x24xf32> to vector<8x4x24xf32>
    %39 = arith.mulf %28, %38 : vector<8x4x24xf32>
    %40 = vector.extract_strided_slice %0 {offsets = [1, 2, 0], sizes = [1, 1, 24], strides = [1, 1, 1]} : vector<3x3x24xf32> to vector<1x1x24xf32>
    %41 = vector.shape_cast %40 : vector<1x1x24xf32> to vector<24xf32>
    %42 = vector.shape_cast %41 : vector<24xf32> to vector<1x1x24xf32>
    %43 = vector.broadcast %42 : vector<1x1x24xf32> to vector<8x4x24xf32>
    %44 = arith.mulf %29, %43 : vector<8x4x24xf32>
    %c4 = arith.constant 4 : index
    %c0_15 = arith.constant 0 : index
    %c0_16 = arith.constant 0 : index
    %c0_17 = arith.constant 0 : index
    %45 = vector.load %arg1[%c4, %c0_15, %c0_16, %c0_17] : memref<6x8x5x24xf32, #tpu.memory_space<vmem>>, vector<1x8x5x24xf32>
    %46 = vector.shape_cast %45 : vector<1x8x5x24xf32> to vector<8x5x24xf32>
    %c5 = arith.constant 5 : index
    %c0_18 = arith.constant 0 : index
    %c0_19 = arith.constant 0 : index
    %c0_20 = arith.constant 0 : index
    %47 = vector.load %arg1[%c5, %c0_18, %c0_19, %c0_20] : memref<6x8x5x24xf32, #tpu.memory_space<vmem>>, vector<1x8x5x24xf32>
    %48 = vector.shape_cast %47 : vector<1x8x5x24xf32> to vector<8x5x24xf32>
    %49 = vector.extract_strided_slice %46 {offsets = [0, 0, 0], sizes = [8, 4, 24], strides = [1, 1, 1]} : vector<8x5x24xf32> to vector<8x4x24xf32>
    %50 = vector.extract_strided_slice %48 {offsets = [0, 0, 0], sizes = [8, 4, 24], strides = [1, 1, 1]} : vector<8x5x24xf32> to vector<8x4x24xf32>
    %51 = vector.extract_strided_slice %46 {offsets = [0, 1, 0], sizes = [8, 4, 24], strides = [1, 1, 1]} : vector<8x5x24xf32> to vector<8x4x24xf32>
    %52 = vector.extract_strided_slice %0 {offsets = [2, 0, 0], sizes = [1, 1, 24], strides = [1, 1, 1]} : vector<3x3x24xf32> to vector<1x1x24xf32>
    %53 = vector.shape_cast %52 : vector<1x1x24xf32> to vector<24xf32>
    %54 = vector.shape_cast %53 : vector<24xf32> to vector<1x1x24xf32>
    %55 = vector.broadcast %54 : vector<1x1x24xf32> to vector<8x4x24xf32>
    %56 = arith.mulf %49, %55 : vector<8x4x24xf32>
    %57 = vector.extract_strided_slice %0 {offsets = [2, 1, 0], sizes = [1, 1, 24], strides = [1, 1, 1]} : vector<3x3x24xf32> to vector<1x1x24xf32>
    %58 = vector.shape_cast %57 : vector<1x1x24xf32> to vector<24xf32>
    %59 = vector.shape_cast %58 : vector<24xf32> to vector<1x1x24xf32>
    %60 = vector.broadcast %59 : vector<1x1x24xf32> to vector<8x4x24xf32>
    %61 = arith.mulf %50, %60 : vector<8x4x24xf32>
    %62 = vector.extract_strided_slice %0 {offsets = [2, 2, 0], sizes = [1, 1, 24], strides = [1, 1, 1]} : vector<3x3x24xf32> to vector<1x1x24xf32>
    %63 = vector.shape_cast %62 : vector<1x1x24xf32> to vector<24xf32>
    %64 = vector.shape_cast %63 : vector<24xf32> to vector<1x1x24xf32>
    %65 = vector.broadcast %64 : vector<1x1x24xf32> to vector<8x4x24xf32>
    %66 = arith.mulf %51, %65 : vector<8x4x24xf32>
    %67 = arith.addf %12, %17 : vector<8x4x24xf32>
    %68 = arith.addf %22, %34 : vector<8x4x24xf32>
    %69 = arith.addf %39, %44 : vector<8x4x24xf32>
    %70 = arith.addf %56, %61 : vector<8x4x24xf32>
    %71 = arith.addf %67, %68 : vector<8x4x24xf32>
    %72 = arith.addf %69, %70 : vector<8x4x24xf32>
    %73 = arith.addf %71, %72 : vector<8x4x24xf32>
    %74 = arith.addf %73, %66 : vector<8x4x24xf32>
    %c0_21 = arith.constant 0 : index
    %c0_22 = arith.constant 0 : index
    %c0_23 = arith.constant 0 : index
    %75 = vector.load %arg3[%c0_21, %c0_22, %c0_23] : memref<1x1x24xf32, #tpu.memory_space<vmem>>, vector<1x1x24xf32>
    %76 = vector.broadcast %75 : vector<1x1x24xf32> to vector<8x4x24xf32>
    %77 = arith.addf %74, %76 : vector<8x4x24xf32>
    %78 = vector.shape_cast %77 : vector<8x4x24xf32> to vector<32x24xf32>
    %79 = arith.truncf %78 : vector<32x24xf32> to vector<32x24xbf16>
    %c0_24 = arith.constant 0 : index
    %c0_25 = arith.constant 0 : index
    %80 = vector.load %arg4[%c0_24, %c0_25] : memref<24x16xbf16, #tpu.memory_space<vmem>>, vector<24x16xbf16>
    %cst = arith.constant dense<0.000000e+00> : vector<32x16xf32>
    %81 = tpu.matmul %79, %80, %cst {dimension_numbers = #tpu.dot_dimension_numbers<[1], [0], [0], [1], [0, 0, 1, 1], [], []>} : vector<32x24xbf16>, vector<24x16xbf16>, vector<32x16xf32> -> vector<32x16xf32>
    %c0_26 = arith.constant 0 : index
    %c0_27 = arith.constant 0 : index
    %82 = vector.load %arg5[%c0_26, %c0_27] : memref<1x16xf32, #tpu.memory_space<vmem>>, vector<1x16xf32>
    %83 = vector.broadcast %82 : vector<1x16xf32> to vector<32x16xf32>
    %84 = arith.addf %81, %83 : vector<32x16xf32>
    %cst_28 = arith.constant 0.000000e+00 : f32
    %85 = vector.broadcast %cst_28 : f32 to vector<32x16xf32>
    %86 = arith.maximumf %84, %85 : vector<32x16xf32>
    %87 = vector.shape_cast %86 : vector<32x16xf32> to vector<8x4x16xf32>
    %c0_29 = arith.constant 0 : index
    %c0_30 = arith.constant 0 : index
    %c0_31 = arith.constant 0 : index
    %88 = vector.load %arg6[%c0_29, %c0_30, %c0_31] : memref<8x4x16xf32, #tpu.memory_space<vmem>>, vector<8x4x16xf32>
    tpu.vector_store %arg6[%c0_29, %c0_30, %c0_31], %87 {strides = array<i32>} : memref<8x4x16xf32, #tpu.memory_space<vmem>>, vector<8x4x16xf32>,
    return
  }
  func.func @transform_0(%arg0: i32) -> (i32, i32, i32, i32) {
    %c0_i32 = arith.constant 0 : i32
    %c0_i32_0 = arith.constant 0 : i32
    %c0_i32_1 = arith.constant 0 : i32
    %c0_i32_2 = arith.constant 0 : i32
    return %c0_i32, %arg0, %c0_i32_0, %c0_i32_1 : i32, i32, i32, i32
  }
  func.func @transform_1(%arg0: i32) -> (i32, i32, i32) {
    %c0_i32 = arith.constant 0 : i32
    %c0_i32_0 = arith.constant 0 : i32
    %c0_i32_1 = arith.constant 0 : i32
    %c0_i32_2 = arith.constant 0 : i32
    return %c0_i32, %c0_i32_0, %c0_i32_1 : i32, i32, i32
  }
  func.func @transform_2(%arg0: i32) -> (i32, i32, i32) {
    %c0_i32 = arith.constant 0 : i32
    %c0_i32_0 = arith.constant 0 : i32
    %c0_i32_1 = arith.constant 0 : i32
    %c0_i32_2 = arith.constant 0 : i32
    return %c0_i32, %c0_i32_0, %c0_i32_1 : i32, i32, i32
  }
  func.func @transform_3(%arg0: i32) -> (i32, i32) {
    %c0_i32 = arith.constant 0 : i32
    %c0_i32_0 = arith.constant 0 : i32
    %c0_i32_1 = arith.constant 0 : i32
    return %c0_i32, %c0_i32_0 : i32, i32
  }
  func.func @transform_4(%arg0: i32) -> (i32, i32) {
    %c0_i32 = arith.constant 0 : i32
    %c0_i32_0 = arith.constant 0 : i32
    %c0_i32_1 = arith.constant 0 : i32
    return %c0_i32, %c0_i32_0 : i32, i32
  }
  func.func @transform_5(%arg0: i32) -> (i32, i32, i32) {
    %c0_i32 = arith.constant 0 : i32
    %c0_i32_0 = arith.constant 0 : i32
    %c0_i32_1 = arith.constant 0 : i32
    return %arg0, %c0_i32, %c0_i32_0 : i32, i32, i32
  }
}

module attributes {stable_mosaic.version = 11 : i64} {
  func.func @_matmul_bias_act_kernel(%arg0: i32, %arg1: memref<64x24xf32, #tpu.memory_space<vmem>>, %arg2: memref<24x16xbf16, #tpu.memory_space<vmem>>, %arg3: memref<1x16xf32, #tpu.memory_space<vmem>>, %arg4: memref<64x16xf32, #tpu.memory_space<vmem>>) attributes {dimension_semantics = [#tpu.dimension_semantics<parallel>], iteration_bounds = array<i64: 2>, scalar_prefetch = 0 : i64, scratch_operands = 0 : i64, tpu.core_type = #tpu.core_type<tc>, window_params = [{transform_indices = @transform_0, window_bounds = array<i64: 64, 24>}, {pipeline_mode = #tpu.pipeline_mode<synchronous>, transform_indices = @transform_1, window_bounds = array<i64: 24, 16>}, {pipeline_mode = #tpu.pipeline_mode<synchronous>, transform_indices = @transform_2, window_bounds = array<i64: 1, 16>}, {transform_indices = @transform_3, window_bounds = array<i64: 64, 16>}]} {
    %c0 = arith.constant 0 : index
    %c0_0 = arith.constant 0 : index
    %0 = vector.load %arg1[%c0, %c0_0] : memref<64x24xf32, #tpu.memory_space<vmem>>, vector<64x24xf32>
    %1 = arith.truncf %0 : vector<64x24xf32> to vector<64x24xbf16>
    %c0_1 = arith.constant 0 : index
    %c0_2 = arith.constant 0 : index
    %2 = vector.load %arg2[%c0_1, %c0_2] : memref<24x16xbf16, #tpu.memory_space<vmem>>, vector<24x16xbf16>
    %cst = arith.constant dense<0.000000e+00> : vector<64x16xf32>
    %3 = tpu.matmul %1, %2, %cst {dimension_numbers = #tpu.dot_dimension_numbers<[1], [0], [0], [1], [0, 0, 1, 1], [], []>} : vector<64x24xbf16>, vector<24x16xbf16>, vector<64x16xf32> -> vector<64x16xf32>
    %c0_3 = arith.constant 0 : index
    %c0_4 = arith.constant 0 : index
    %4 = vector.load %arg3[%c0_3, %c0_4] : memref<1x16xf32, #tpu.memory_space<vmem>>, vector<1x16xf32>
    %5 = vector.broadcast %4 : vector<1x16xf32> to vector<64x16xf32>
    %6 = arith.addf %3, %5 : vector<64x16xf32>
    %cst_5 = arith.constant 0.000000e+00 : f32
    %7 = vector.broadcast %cst_5 : f32 to vector<64x16xf32>
    %8 = arith.maximumf %6, %7 : vector<64x16xf32>
    %c0_6 = arith.constant 0 : index
    %c0_7 = arith.constant 0 : index
    %9 = vector.load %arg4[%c0_6, %c0_7] : memref<64x16xf32, #tpu.memory_space<vmem>>, vector<64x16xf32>
    tpu.vector_store %arg4[%c0_6, %c0_7], %8 {strides = array<i32>} : memref<64x16xf32, #tpu.memory_space<vmem>>, vector<64x16xf32>,
    return
  }
  func.func @transform_0(%arg0: i32) -> (i32, i32) {
    %c0_i32 = arith.constant 0 : i32
    %c0_i32_0 = arith.constant 0 : i32
    return %arg0, %c0_i32 : i32, i32
  }
  func.func @transform_1(%arg0: i32) -> (i32, i32) {
    %c0_i32 = arith.constant 0 : i32
    %c0_i32_0 = arith.constant 0 : i32
    %c0_i32_1 = arith.constant 0 : i32
    return %c0_i32, %c0_i32_0 : i32, i32
  }
  func.func @transform_2(%arg0: i32) -> (i32, i32) {
    %c0_i32 = arith.constant 0 : i32
    %c0_i32_0 = arith.constant 0 : i32
    %c0_i32_1 = arith.constant 0 : i32
    return %c0_i32, %c0_i32_0 : i32, i32
  }
  func.func @transform_3(%arg0: i32) -> (i32, i32) {
    %c0_i32 = arith.constant 0 : i32
    %c0_i32_0 = arith.constant 0 : i32
    return %arg0, %c0_i32 : i32, i32
  }
}

module attributes {stable_mosaic.version = 11 : i64} {
  func.func @_dws2_pw_kernel(%arg0: i32, %arg1: memref<6x8x5x16xf32, #tpu.memory_space<vmem>>, %arg2: memref<3x3x16xf32, #tpu.memory_space<vmem>>, %arg3: memref<1x1x16xf32, #tpu.memory_space<vmem>>, %arg4: memref<16x16xbf16, #tpu.memory_space<vmem>>, %arg5: memref<1x16xf32, #tpu.memory_space<vmem>>, %arg6: memref<8x4x16xf32, #tpu.memory_space<vmem>>) attributes {dimension_semantics = [#tpu.dimension_semantics<parallel>], iteration_bounds = array<i64: 1>, scalar_prefetch = 0 : i64, scratch_operands = 0 : i64, tpu.core_type = #tpu.core_type<tc>, window_params = [{transform_indices = @transform_0, window_bounds = array<i64: 6, 8, 5, 16>}, {pipeline_mode = #tpu.pipeline_mode<synchronous>, transform_indices = @transform_1, window_bounds = array<i64: 3, 3, 16>}, {pipeline_mode = #tpu.pipeline_mode<synchronous>, transform_indices = @transform_2, window_bounds = array<i64: 1, 1, 16>}, {pipeline_mode = #tpu.pipeline_mode<synchronous>, transform_indices = @transform_3, window_bounds = array<i64: 16, 16>}, {pipeline_mode = #tpu.pipeline_mode<synchronous>, transform_indices = @transform_4, window_bounds = array<i64: 1, 16>}, {transform_indices = @transform_5, window_bounds = array<i64: 8, 4, 16>}]} {
    %c0 = arith.constant 0 : index
    %c0_0 = arith.constant 0 : index
    %c0_1 = arith.constant 0 : index
    %0 = vector.load %arg2[%c0, %c0_0, %c0_1] : memref<3x3x16xf32, #tpu.memory_space<vmem>>, vector<3x3x16xf32>
    %c0_2 = arith.constant 0 : index
    %c0_3 = arith.constant 0 : index
    %c0_4 = arith.constant 0 : index
    %c0_5 = arith.constant 0 : index
    %1 = vector.load %arg1[%c0_2, %c0_3, %c0_4, %c0_5] : memref<6x8x5x16xf32, #tpu.memory_space<vmem>>, vector<1x8x5x16xf32>
    %2 = vector.shape_cast %1 : vector<1x8x5x16xf32> to vector<8x5x16xf32>
    %c1 = arith.constant 1 : index
    %c0_6 = arith.constant 0 : index
    %c0_7 = arith.constant 0 : index
    %c0_8 = arith.constant 0 : index
    %3 = vector.load %arg1[%c1, %c0_6, %c0_7, %c0_8] : memref<6x8x5x16xf32, #tpu.memory_space<vmem>>, vector<1x8x5x16xf32>
    %4 = vector.shape_cast %3 : vector<1x8x5x16xf32> to vector<8x5x16xf32>
    %5 = vector.extract_strided_slice %2 {offsets = [0, 0, 0], sizes = [8, 4, 16], strides = [1, 1, 1]} : vector<8x5x16xf32> to vector<8x4x16xf32>
    %6 = vector.extract_strided_slice %4 {offsets = [0, 0, 0], sizes = [8, 4, 16], strides = [1, 1, 1]} : vector<8x5x16xf32> to vector<8x4x16xf32>
    %7 = vector.extract_strided_slice %2 {offsets = [0, 1, 0], sizes = [8, 4, 16], strides = [1, 1, 1]} : vector<8x5x16xf32> to vector<8x4x16xf32>
    %8 = vector.extract_strided_slice %0 {offsets = [0, 0, 0], sizes = [1, 1, 16], strides = [1, 1, 1]} : vector<3x3x16xf32> to vector<1x1x16xf32>
    %9 = vector.shape_cast %8 : vector<1x1x16xf32> to vector<16xf32>
    %10 = vector.shape_cast %9 : vector<16xf32> to vector<1x1x16xf32>
    %11 = vector.broadcast %10 : vector<1x1x16xf32> to vector<8x4x16xf32>
    %12 = arith.mulf %5, %11 : vector<8x4x16xf32>
    %13 = vector.extract_strided_slice %0 {offsets = [0, 1, 0], sizes = [1, 1, 16], strides = [1, 1, 1]} : vector<3x3x16xf32> to vector<1x1x16xf32>
    %14 = vector.shape_cast %13 : vector<1x1x16xf32> to vector<16xf32>
    %15 = vector.shape_cast %14 : vector<16xf32> to vector<1x1x16xf32>
    %16 = vector.broadcast %15 : vector<1x1x16xf32> to vector<8x4x16xf32>
    %17 = arith.mulf %6, %16 : vector<8x4x16xf32>
    %18 = vector.extract_strided_slice %0 {offsets = [0, 2, 0], sizes = [1, 1, 16], strides = [1, 1, 1]} : vector<3x3x16xf32> to vector<1x1x16xf32>
    %19 = vector.shape_cast %18 : vector<1x1x16xf32> to vector<16xf32>
    %20 = vector.shape_cast %19 : vector<16xf32> to vector<1x1x16xf32>
    %21 = vector.broadcast %20 : vector<1x1x16xf32> to vector<8x4x16xf32>
    %22 = arith.mulf %7, %21 : vector<8x4x16xf32>
    %c2 = arith.constant 2 : index
    %c0_9 = arith.constant 0 : index
    %c0_10 = arith.constant 0 : index
    %c0_11 = arith.constant 0 : index
    %23 = vector.load %arg1[%c2, %c0_9, %c0_10, %c0_11] : memref<6x8x5x16xf32, #tpu.memory_space<vmem>>, vector<1x8x5x16xf32>
    %24 = vector.shape_cast %23 : vector<1x8x5x16xf32> to vector<8x5x16xf32>
    %c3 = arith.constant 3 : index
    %c0_12 = arith.constant 0 : index
    %c0_13 = arith.constant 0 : index
    %c0_14 = arith.constant 0 : index
    %25 = vector.load %arg1[%c3, %c0_12, %c0_13, %c0_14] : memref<6x8x5x16xf32, #tpu.memory_space<vmem>>, vector<1x8x5x16xf32>
    %26 = vector.shape_cast %25 : vector<1x8x5x16xf32> to vector<8x5x16xf32>
    %27 = vector.extract_strided_slice %24 {offsets = [0, 0, 0], sizes = [8, 4, 16], strides = [1, 1, 1]} : vector<8x5x16xf32> to vector<8x4x16xf32>
    %28 = vector.extract_strided_slice %26 {offsets = [0, 0, 0], sizes = [8, 4, 16], strides = [1, 1, 1]} : vector<8x5x16xf32> to vector<8x4x16xf32>
    %29 = vector.extract_strided_slice %24 {offsets = [0, 1, 0], sizes = [8, 4, 16], strides = [1, 1, 1]} : vector<8x5x16xf32> to vector<8x4x16xf32>
    %30 = vector.extract_strided_slice %0 {offsets = [1, 0, 0], sizes = [1, 1, 16], strides = [1, 1, 1]} : vector<3x3x16xf32> to vector<1x1x16xf32>
    %31 = vector.shape_cast %30 : vector<1x1x16xf32> to vector<16xf32>
    %32 = vector.shape_cast %31 : vector<16xf32> to vector<1x1x16xf32>
    %33 = vector.broadcast %32 : vector<1x1x16xf32> to vector<8x4x16xf32>
    %34 = arith.mulf %27, %33 : vector<8x4x16xf32>
    %35 = vector.extract_strided_slice %0 {offsets = [1, 1, 0], sizes = [1, 1, 16], strides = [1, 1, 1]} : vector<3x3x16xf32> to vector<1x1x16xf32>
    %36 = vector.shape_cast %35 : vector<1x1x16xf32> to vector<16xf32>
    %37 = vector.shape_cast %36 : vector<16xf32> to vector<1x1x16xf32>
    %38 = vector.broadcast %37 : vector<1x1x16xf32> to vector<8x4x16xf32>
    %39 = arith.mulf %28, %38 : vector<8x4x16xf32>
    %40 = vector.extract_strided_slice %0 {offsets = [1, 2, 0], sizes = [1, 1, 16], strides = [1, 1, 1]} : vector<3x3x16xf32> to vector<1x1x16xf32>
    %41 = vector.shape_cast %40 : vector<1x1x16xf32> to vector<16xf32>
    %42 = vector.shape_cast %41 : vector<16xf32> to vector<1x1x16xf32>
    %43 = vector.broadcast %42 : vector<1x1x16xf32> to vector<8x4x16xf32>
    %44 = arith.mulf %29, %43 : vector<8x4x16xf32>
    %c4 = arith.constant 4 : index
    %c0_15 = arith.constant 0 : index
    %c0_16 = arith.constant 0 : index
    %c0_17 = arith.constant 0 : index
    %45 = vector.load %arg1[%c4, %c0_15, %c0_16, %c0_17] : memref<6x8x5x16xf32, #tpu.memory_space<vmem>>, vector<1x8x5x16xf32>
    %46 = vector.shape_cast %45 : vector<1x8x5x16xf32> to vector<8x5x16xf32>
    %c5 = arith.constant 5 : index
    %c0_18 = arith.constant 0 : index
    %c0_19 = arith.constant 0 : index
    %c0_20 = arith.constant 0 : index
    %47 = vector.load %arg1[%c5, %c0_18, %c0_19, %c0_20] : memref<6x8x5x16xf32, #tpu.memory_space<vmem>>, vector<1x8x5x16xf32>
    %48 = vector.shape_cast %47 : vector<1x8x5x16xf32> to vector<8x5x16xf32>
    %49 = vector.extract_strided_slice %46 {offsets = [0, 0, 0], sizes = [8, 4, 16], strides = [1, 1, 1]} : vector<8x5x16xf32> to vector<8x4x16xf32>
    %50 = vector.extract_strided_slice %48 {offsets = [0, 0, 0], sizes = [8, 4, 16], strides = [1, 1, 1]} : vector<8x5x16xf32> to vector<8x4x16xf32>
    %51 = vector.extract_strided_slice %46 {offsets = [0, 1, 0], sizes = [8, 4, 16], strides = [1, 1, 1]} : vector<8x5x16xf32> to vector<8x4x16xf32>
    %52 = vector.extract_strided_slice %0 {offsets = [2, 0, 0], sizes = [1, 1, 16], strides = [1, 1, 1]} : vector<3x3x16xf32> to vector<1x1x16xf32>
    %53 = vector.shape_cast %52 : vector<1x1x16xf32> to vector<16xf32>
    %54 = vector.shape_cast %53 : vector<16xf32> to vector<1x1x16xf32>
    %55 = vector.broadcast %54 : vector<1x1x16xf32> to vector<8x4x16xf32>
    %56 = arith.mulf %49, %55 : vector<8x4x16xf32>
    %57 = vector.extract_strided_slice %0 {offsets = [2, 1, 0], sizes = [1, 1, 16], strides = [1, 1, 1]} : vector<3x3x16xf32> to vector<1x1x16xf32>
    %58 = vector.shape_cast %57 : vector<1x1x16xf32> to vector<16xf32>
    %59 = vector.shape_cast %58 : vector<16xf32> to vector<1x1x16xf32>
    %60 = vector.broadcast %59 : vector<1x1x16xf32> to vector<8x4x16xf32>
    %61 = arith.mulf %50, %60 : vector<8x4x16xf32>
    %62 = vector.extract_strided_slice %0 {offsets = [2, 2, 0], sizes = [1, 1, 16], strides = [1, 1, 1]} : vector<3x3x16xf32> to vector<1x1x16xf32>
    %63 = vector.shape_cast %62 : vector<1x1x16xf32> to vector<16xf32>
    %64 = vector.shape_cast %63 : vector<16xf32> to vector<1x1x16xf32>
    %65 = vector.broadcast %64 : vector<1x1x16xf32> to vector<8x4x16xf32>
    %66 = arith.mulf %51, %65 : vector<8x4x16xf32>
    %67 = arith.addf %12, %17 : vector<8x4x16xf32>
    %68 = arith.addf %22, %34 : vector<8x4x16xf32>
    %69 = arith.addf %39, %44 : vector<8x4x16xf32>
    %70 = arith.addf %56, %61 : vector<8x4x16xf32>
    %71 = arith.addf %67, %68 : vector<8x4x16xf32>
    %72 = arith.addf %69, %70 : vector<8x4x16xf32>
    %73 = arith.addf %71, %72 : vector<8x4x16xf32>
    %74 = arith.addf %73, %66 : vector<8x4x16xf32>
    %c0_21 = arith.constant 0 : index
    %c0_22 = arith.constant 0 : index
    %c0_23 = arith.constant 0 : index
    %75 = vector.load %arg3[%c0_21, %c0_22, %c0_23] : memref<1x1x16xf32, #tpu.memory_space<vmem>>, vector<1x1x16xf32>
    %76 = vector.broadcast %75 : vector<1x1x16xf32> to vector<8x4x16xf32>
    %77 = arith.addf %74, %76 : vector<8x4x16xf32>
    %78 = vector.shape_cast %77 : vector<8x4x16xf32> to vector<32x16xf32>
    %79 = arith.truncf %78 : vector<32x16xf32> to vector<32x16xbf16>
    %c0_24 = arith.constant 0 : index
    %c0_25 = arith.constant 0 : index
    %80 = vector.load %arg4[%c0_24, %c0_25] : memref<16x16xbf16, #tpu.memory_space<vmem>>, vector<16x16xbf16>
    %cst = arith.constant dense<0.000000e+00> : vector<32x16xf32>
    %81 = tpu.matmul %79, %80, %cst {dimension_numbers = #tpu.dot_dimension_numbers<[1], [0], [0], [1], [0, 0, 1, 1], [], []>} : vector<32x16xbf16>, vector<16x16xbf16>, vector<32x16xf32> -> vector<32x16xf32>
    %c0_26 = arith.constant 0 : index
    %c0_27 = arith.constant 0 : index
    %82 = vector.load %arg5[%c0_26, %c0_27] : memref<1x16xf32, #tpu.memory_space<vmem>>, vector<1x16xf32>
    %83 = vector.broadcast %82 : vector<1x16xf32> to vector<32x16xf32>
    %84 = arith.addf %81, %83 : vector<32x16xf32>
    %cst_28 = arith.constant 0.000000e+00 : f32
    %85 = vector.broadcast %cst_28 : f32 to vector<32x16xf32>
    %86 = arith.maximumf %84, %85 : vector<32x16xf32>
    %87 = vector.shape_cast %86 : vector<32x16xf32> to vector<8x4x16xf32>
    %c0_29 = arith.constant 0 : index
    %c0_30 = arith.constant 0 : index
    %c0_31 = arith.constant 0 : index
    %88 = vector.load %arg6[%c0_29, %c0_30, %c0_31] : memref<8x4x16xf32, #tpu.memory_space<vmem>>, vector<8x4x16xf32>
    tpu.vector_store %arg6[%c0_29, %c0_30, %c0_31], %87 {strides = array<i32>} : memref<8x4x16xf32, #tpu.memory_space<vmem>>, vector<8x4x16xf32>,
    return
  }
  func.func @transform_0(%arg0: i32) -> (i32, i32, i32, i32) {
    %c0_i32 = arith.constant 0 : i32
    %c0_i32_0 = arith.constant 0 : i32
    %c0_i32_1 = arith.constant 0 : i32
    %c0_i32_2 = arith.constant 0 : i32
    return %c0_i32, %arg0, %c0_i32_0, %c0_i32_1 : i32, i32, i32, i32
  }
  func.func @transform_1(%arg0: i32) -> (i32, i32, i32) {
    %c0_i32 = arith.constant 0 : i32
    %c0_i32_0 = arith.constant 0 : i32
    %c0_i32_1 = arith.constant 0 : i32
    %c0_i32_2 = arith.constant 0 : i32
    return %c0_i32, %c0_i32_0, %c0_i32_1 : i32, i32, i32
  }
  func.func @transform_2(%arg0: i32) -> (i32, i32, i32) {
    %c0_i32 = arith.constant 0 : i32
    %c0_i32_0 = arith.constant 0 : i32
    %c0_i32_1 = arith.constant 0 : i32
    %c0_i32_2 = arith.constant 0 : i32
    return %c0_i32, %c0_i32_0, %c0_i32_1 : i32, i32, i32
  }
  func.func @transform_3(%arg0: i32) -> (i32, i32) {
    %c0_i32 = arith.constant 0 : i32
    %c0_i32_0 = arith.constant 0 : i32
    %c0_i32_1 = arith.constant 0 : i32
    return %c0_i32, %c0_i32_0 : i32, i32
  }
  func.func @transform_4(%arg0: i32) -> (i32, i32) {
    %c0_i32 = arith.constant 0 : i32
    %c0_i32_0 = arith.constant 0 : i32
    %c0_i32_1 = arith.constant 0 : i32
    return %c0_i32, %c0_i32_0 : i32, i32
  }
  func.func @transform_5(%arg0: i32) -> (i32, i32, i32) {
    %c0_i32 = arith.constant 0 : i32
    %c0_i32_0 = arith.constant 0 : i32
    %c0_i32_1 = arith.constant 0 : i32
    return %arg0, %c0_i32, %c0_i32_0 : i32, i32, i32
  }
}

module attributes {stable_mosaic.version = 11 : i64} {
  func.func @_shuffle_unit_s1_kernel(%arg0: i32, %arg1: memref<1x4x4x32xf32, #tpu.memory_space<vmem>>, %arg2: memref<16x16xbf16, #tpu.memory_space<vmem>>, %arg3: memref<1x16xf32, #tpu.memory_space<vmem>>, %arg4: memref<3x3x16xf32, #tpu.memory_space<vmem>>, %arg5: memref<1x1x16xf32, #tpu.memory_space<vmem>>, %arg6: memref<16x16xbf16, #tpu.memory_space<vmem>>, %arg7: memref<1x16xf32, #tpu.memory_space<vmem>>, %arg8: memref<1x4x4x32xf32, #tpu.memory_space<vmem>>, %arg9: memref<6x6x16xf32, #tpu.memory_space<vmem>>) attributes {dimension_semantics = [#tpu.dimension_semantics<parallel>], iteration_bounds = array<i64: 2>, scalar_prefetch = 0 : i64, scratch_operands = 1 : i64, tpu.core_type = #tpu.core_type<tc>, window_params = [{transform_indices = @transform_0, window_bounds = array<i64: 1, 4, 4, 32>}, {pipeline_mode = #tpu.pipeline_mode<synchronous>, transform_indices = @transform_1, window_bounds = array<i64: 16, 16>}, {pipeline_mode = #tpu.pipeline_mode<synchronous>, transform_indices = @transform_2, window_bounds = array<i64: 1, 16>}, {pipeline_mode = #tpu.pipeline_mode<synchronous>, transform_indices = @transform_3, window_bounds = array<i64: 3, 3, 16>}, {pipeline_mode = #tpu.pipeline_mode<synchronous>, transform_indices = @transform_4, window_bounds = array<i64: 1, 1, 16>}, {pipeline_mode = #tpu.pipeline_mode<synchronous>, transform_indices = @transform_5, window_bounds = array<i64: 16, 16>}, {pipeline_mode = #tpu.pipeline_mode<synchronous>, transform_indices = @transform_6, window_bounds = array<i64: 1, 16>}, {transform_indices = @transform_7, window_bounds = array<i64: 1, 4, 4, 32>}]} {
    %c0 = arith.constant 0 : index
    %c0_0 = arith.constant 0 : index
    %c0_1 = arith.constant 0 : index
    %c0_2 = arith.constant 0 : index
    %0 = vector.load %arg1[%c0, %c0_0, %c0_1, %c0_2] : memref<1x4x4x32xf32, #tpu.memory_space<vmem>>, vector<1x4x4x32xf32>
    %1 = vector.shape_cast %0 : vector<1x4x4x32xf32> to vector<4x4x32xf32>
    %2 = vector.extract_strided_slice %1 {offsets = [0, 0, 0], sizes = [4, 4, 16], strides = [1, 1, 1]} : vector<4x4x32xf32> to vector<4x4x16xf32>
    %3 = vector.extract_strided_slice %1 {offsets = [0, 0, 16], sizes = [4, 4, 16], strides = [1, 1, 1]} : vector<4x4x32xf32> to vector<4x4x16xf32>
    %4 = vector.shape_cast %3 : vector<4x4x16xf32> to vector<16x16xf32>
    %5 = arith.truncf %4 : vector<16x16xf32> to vector<16x16xbf16>
    %c0_3 = arith.constant 0 : index
    %c0_4 = arith.constant 0 : index
    %6 = vector.load %arg2[%c0_3, %c0_4] : memref<16x16xbf16, #tpu.memory_space<vmem>>, vector<16x16xbf16>
    %cst = arith.constant dense<0.000000e+00> : vector<16x16xf32>
    %7 = tpu.matmul %5, %6, %cst {dimension_numbers = #tpu.dot_dimension_numbers<[1], [0], [0], [1], [0, 0, 1, 1], [], []>} : vector<16x16xbf16>, vector<16x16xbf16>, vector<16x16xf32> -> vector<16x16xf32>
    %c0_5 = arith.constant 0 : index
    %c0_6 = arith.constant 0 : index
    %8 = vector.load %arg3[%c0_5, %c0_6] : memref<1x16xf32, #tpu.memory_space<vmem>>, vector<1x16xf32>
    %9 = vector.broadcast %8 : vector<1x16xf32> to vector<16x16xf32>
    %10 = arith.addf %7, %9 : vector<16x16xf32>
    %cst_7 = arith.constant 0.000000e+00 : f32
    %11 = vector.broadcast %cst_7 : f32 to vector<16x16xf32>
    %12 = arith.maximumf %10, %11 : vector<16x16xf32>
    %13 = vector.shape_cast %12 : vector<16x16xf32> to vector<4x4x16xf32>
    %cst_8 = arith.constant 0.000000e+00 : f32
    %14 = vector.broadcast %cst_8 : f32 to vector<6x6x16xf32>
    %c0_9 = arith.constant 0 : index
    %c0_10 = arith.constant 0 : index
    %c0_11 = arith.constant 0 : index
    %15 = vector.load %arg9[%c0_9, %c0_10, %c0_11] : memref<6x6x16xf32, #tpu.memory_space<vmem>>, vector<6x6x16xf32>
    tpu.vector_store %arg9[%c0_9, %c0_10, %c0_11], %14 {strides = array<i32>} : memref<6x6x16xf32, #tpu.memory_space<vmem>>, vector<6x6x16xf32>,
    %c1 = arith.constant 1 : index
    %c1_12 = arith.constant 1 : index
    %c0_13 = arith.constant 0 : index
    %16 = vector.load %arg9[%c1, %c1_12, %c0_13] : memref<6x6x16xf32, #tpu.memory_space<vmem>>, vector<4x4x16xf32>
    tpu.vector_store %arg9[%c1, %c1_12, %c0_13], %13 {strides = array<i32>} : memref<6x6x16xf32, #tpu.memory_space<vmem>>, vector<4x4x16xf32>,
    %c0_14 = arith.constant 0 : index
    %c0_15 = arith.constant 0 : index
    %c0_16 = arith.constant 0 : index
    %17 = vector.load %arg9[%c0_14, %c0_15, %c0_16] : memref<6x6x16xf32, #tpu.memory_space<vmem>>, vector<6x6x16xf32>
    %c0_17 = arith.constant 0 : index
    %c0_18 = arith.constant 0 : index
    %c0_19 = arith.constant 0 : index
    %18 = vector.load %arg4[%c0_17, %c0_18, %c0_19] : memref<3x3x16xf32, #tpu.memory_space<vmem>>, vector<3x3x16xf32>
    %19 = vector.extract_strided_slice %17 {offsets = [0, 0, 0], sizes = [4, 4, 16], strides = [1, 1, 1]} : vector<6x6x16xf32> to vector<4x4x16xf32>
    %20 = vector.extract_strided_slice %18 {offsets = [0, 0, 0], sizes = [1, 1, 16], strides = [1, 1, 1]} : vector<3x3x16xf32> to vector<1x1x16xf32>
    %21 = vector.shape_cast %20 : vector<1x1x16xf32> to vector<16xf32>
    %22 = vector.shape_cast %21 : vector<16xf32> to vector<1x1x16xf32>
    %23 = vector.broadcast %22 : vector<1x1x16xf32> to vector<4x4x16xf32>
    %24 = arith.mulf %19, %23 : vector<4x4x16xf32>
    %25 = vector.extract_strided_slice %17 {offsets = [0, 1, 0], sizes = [4, 4, 16], strides = [1, 1, 1]} : vector<6x6x16xf32> to vector<4x4x16xf32>
    %26 = vector.extract_strided_slice %18 {offsets = [0, 1, 0], sizes = [1, 1, 16], strides = [1, 1, 1]} : vector<3x3x16xf32> to vector<1x1x16xf32>
    %27 = vector.shape_cast %26 : vector<1x1x16xf32> to vector<16xf32>
    %28 = vector.shape_cast %27 : vector<16xf32> to vector<1x1x16xf32>
    %29 = vector.broadcast %28 : vector<1x1x16xf32> to vector<4x4x16xf32>
    %30 = arith.mulf %25, %29 : vector<4x4x16xf32>
    %31 = vector.extract_strided_slice %17 {offsets = [0, 2, 0], sizes = [4, 4, 16], strides = [1, 1, 1]} : vector<6x6x16xf32> to vector<4x4x16xf32>
    %32 = vector.extract_strided_slice %18 {offsets = [0, 2, 0], sizes = [1, 1, 16], strides = [1, 1, 1]} : vector<3x3x16xf32> to vector<1x1x16xf32>
    %33 = vector.shape_cast %32 : vector<1x1x16xf32> to vector<16xf32>
    %34 = vector.shape_cast %33 : vector<16xf32> to vector<1x1x16xf32>
    %35 = vector.broadcast %34 : vector<1x1x16xf32> to vector<4x4x16xf32>
    %36 = arith.mulf %31, %35 : vector<4x4x16xf32>
    %37 = vector.extract_strided_slice %17 {offsets = [1, 0, 0], sizes = [4, 4, 16], strides = [1, 1, 1]} : vector<6x6x16xf32> to vector<4x4x16xf32>
    %38 = vector.extract_strided_slice %18 {offsets = [1, 0, 0], sizes = [1, 1, 16], strides = [1, 1, 1]} : vector<3x3x16xf32> to vector<1x1x16xf32>
    %39 = vector.shape_cast %38 : vector<1x1x16xf32> to vector<16xf32>
    %40 = vector.shape_cast %39 : vector<16xf32> to vector<1x1x16xf32>
    %41 = vector.broadcast %40 : vector<1x1x16xf32> to vector<4x4x16xf32>
    %42 = arith.mulf %37, %41 : vector<4x4x16xf32>
    %43 = vector.extract_strided_slice %17 {offsets = [1, 1, 0], sizes = [4, 4, 16], strides = [1, 1, 1]} : vector<6x6x16xf32> to vector<4x4x16xf32>
    %44 = vector.extract_strided_slice %18 {offsets = [1, 1, 0], sizes = [1, 1, 16], strides = [1, 1, 1]} : vector<3x3x16xf32> to vector<1x1x16xf32>
    %45 = vector.shape_cast %44 : vector<1x1x16xf32> to vector<16xf32>
    %46 = vector.shape_cast %45 : vector<16xf32> to vector<1x1x16xf32>
    %47 = vector.broadcast %46 : vector<1x1x16xf32> to vector<4x4x16xf32>
    %48 = arith.mulf %43, %47 : vector<4x4x16xf32>
    %49 = vector.extract_strided_slice %17 {offsets = [1, 2, 0], sizes = [4, 4, 16], strides = [1, 1, 1]} : vector<6x6x16xf32> to vector<4x4x16xf32>
    %50 = vector.extract_strided_slice %18 {offsets = [1, 2, 0], sizes = [1, 1, 16], strides = [1, 1, 1]} : vector<3x3x16xf32> to vector<1x1x16xf32>
    %51 = vector.shape_cast %50 : vector<1x1x16xf32> to vector<16xf32>
    %52 = vector.shape_cast %51 : vector<16xf32> to vector<1x1x16xf32>
    %53 = vector.broadcast %52 : vector<1x1x16xf32> to vector<4x4x16xf32>
    %54 = arith.mulf %49, %53 : vector<4x4x16xf32>
    %55 = vector.extract_strided_slice %17 {offsets = [2, 0, 0], sizes = [4, 4, 16], strides = [1, 1, 1]} : vector<6x6x16xf32> to vector<4x4x16xf32>
    %56 = vector.extract_strided_slice %18 {offsets = [2, 0, 0], sizes = [1, 1, 16], strides = [1, 1, 1]} : vector<3x3x16xf32> to vector<1x1x16xf32>
    %57 = vector.shape_cast %56 : vector<1x1x16xf32> to vector<16xf32>
    %58 = vector.shape_cast %57 : vector<16xf32> to vector<1x1x16xf32>
    %59 = vector.broadcast %58 : vector<1x1x16xf32> to vector<4x4x16xf32>
    %60 = arith.mulf %55, %59 : vector<4x4x16xf32>
    %61 = vector.extract_strided_slice %17 {offsets = [2, 1, 0], sizes = [4, 4, 16], strides = [1, 1, 1]} : vector<6x6x16xf32> to vector<4x4x16xf32>
    %62 = vector.extract_strided_slice %18 {offsets = [2, 1, 0], sizes = [1, 1, 16], strides = [1, 1, 1]} : vector<3x3x16xf32> to vector<1x1x16xf32>
    %63 = vector.shape_cast %62 : vector<1x1x16xf32> to vector<16xf32>
    %64 = vector.shape_cast %63 : vector<16xf32> to vector<1x1x16xf32>
    %65 = vector.broadcast %64 : vector<1x1x16xf32> to vector<4x4x16xf32>
    %66 = arith.mulf %61, %65 : vector<4x4x16xf32>
    %67 = vector.extract_strided_slice %17 {offsets = [2, 2, 0], sizes = [4, 4, 16], strides = [1, 1, 1]} : vector<6x6x16xf32> to vector<4x4x16xf32>
    %68 = vector.extract_strided_slice %18 {offsets = [2, 2, 0], sizes = [1, 1, 16], strides = [1, 1, 1]} : vector<3x3x16xf32> to vector<1x1x16xf32>
    %69 = vector.shape_cast %68 : vector<1x1x16xf32> to vector<16xf32>
    %70 = vector.shape_cast %69 : vector<16xf32> to vector<1x1x16xf32>
    %71 = vector.broadcast %70 : vector<1x1x16xf32> to vector<4x4x16xf32>
    %72 = arith.mulf %67, %71 : vector<4x4x16xf32>
    %73 = arith.addf %24, %30 : vector<4x4x16xf32>
    %74 = arith.addf %36, %42 : vector<4x4x16xf32>
    %75 = arith.addf %48, %54 : vector<4x4x16xf32>
    %76 = arith.addf %60, %66 : vector<4x4x16xf32>
    %77 = arith.addf %73, %74 : vector<4x4x16xf32>
    %78 = arith.addf %75, %76 : vector<4x4x16xf32>
    %79 = arith.addf %77, %78 : vector<4x4x16xf32>
    %80 = arith.addf %79, %72 : vector<4x4x16xf32>
    %c0_20 = arith.constant 0 : index
    %c0_21 = arith.constant 0 : index
    %c0_22 = arith.constant 0 : index
    %81 = vector.load %arg5[%c0_20, %c0_21, %c0_22] : memref<1x1x16xf32, #tpu.memory_space<vmem>>, vector<1x1x16xf32>
    %82 = vector.broadcast %81 : vector<1x1x16xf32> to vector<4x4x16xf32>
    %83 = arith.addf %80, %82 : vector<4x4x16xf32>
    %84 = vector.shape_cast %83 : vector<4x4x16xf32> to vector<16x16xf32>
    %85 = arith.truncf %84 : vector<16x16xf32> to vector<16x16xbf16>
    %c0_23 = arith.constant 0 : index
    %c0_24 = arith.constant 0 : index
    %86 = vector.load %arg6[%c0_23, %c0_24] : memref<16x16xbf16, #tpu.memory_space<vmem>>, vector<16x16xbf16>
    %cst_25 = arith.constant dense<0.000000e+00> : vector<16x16xf32>
    %87 = tpu.matmul %85, %86, %cst_25 {dimension_numbers = #tpu.dot_dimension_numbers<[1], [0], [0], [1], [0, 0, 1, 1], [], []>} : vector<16x16xbf16>, vector<16x16xbf16>, vector<16x16xf32> -> vector<16x16xf32>
    %c0_26 = arith.constant 0 : index
    %c0_27 = arith.constant 0 : index
    %88 = vector.load %arg7[%c0_26, %c0_27] : memref<1x16xf32, #tpu.memory_space<vmem>>, vector<1x16xf32>
    %89 = vector.broadcast %88 : vector<1x16xf32> to vector<16x16xf32>
    %90 = arith.addf %87, %89 : vector<16x16xf32>
    %cst_28 = arith.constant 0.000000e+00 : f32
    %91 = vector.broadcast %cst_28 : f32 to vector<16x16xf32>
    %92 = arith.maximumf %90, %91 : vector<16x16xf32>
    %93 = vector.shape_cast %92 : vector<16x16xf32> to vector<4x4x16xf32>
    %94 = tpu.concatenate %2, %93 in 2 : vector<4x4x16xf32>, vector<4x4x16xf32> -> vector<4x4x32xf32>
    %c0_29 = arith.constant 0 : index
    %c0_30 = arith.constant 0 : index
    %c0_31 = arith.constant 0 : index
    %c0_32 = arith.constant 0 : index
    %95 = vector.load %arg8[%c0_29, %c0_30, %c0_31, %c0_32] : memref<1x4x4x32xf32, #tpu.memory_space<vmem>>, vector<1x4x4x32xf32>
    %96 = vector.shape_cast %95 : vector<1x4x4x32xf32> to vector<4x4x32xf32>
    %97 = vector.shape_cast %94 : vector<4x4x32xf32> to vector<1x4x4x32xf32>
    tpu.vector_store %arg8[%c0_29, %c0_30, %c0_31, %c0_32], %97 {strides = array<i32>} : memref<1x4x4x32xf32, #tpu.memory_space<vmem>>, vector<1x4x4x32xf32>,
    return
  }
  func.func @transform_0(%arg0: i32) -> (i32, i32, i32, i32) {
    %c0_i32 = arith.constant 0 : i32
    %c0_i32_0 = arith.constant 0 : i32
    %c0_i32_1 = arith.constant 0 : i32
    %c0_i32_2 = arith.constant 0 : i32
    return %arg0, %c0_i32, %c0_i32_0, %c0_i32_1 : i32, i32, i32, i32
  }
  func.func @transform_1(%arg0: i32) -> (i32, i32) {
    %c0_i32 = arith.constant 0 : i32
    %c0_i32_0 = arith.constant 0 : i32
    %c0_i32_1 = arith.constant 0 : i32
    return %c0_i32, %c0_i32_0 : i32, i32
  }
  func.func @transform_2(%arg0: i32) -> (i32, i32) {
    %c0_i32 = arith.constant 0 : i32
    %c0_i32_0 = arith.constant 0 : i32
    %c0_i32_1 = arith.constant 0 : i32
    return %c0_i32, %c0_i32_0 : i32, i32
  }
  func.func @transform_3(%arg0: i32) -> (i32, i32, i32) {
    %c0_i32 = arith.constant 0 : i32
    %c0_i32_0 = arith.constant 0 : i32
    %c0_i32_1 = arith.constant 0 : i32
    %c0_i32_2 = arith.constant 0 : i32
    return %c0_i32, %c0_i32_0, %c0_i32_1 : i32, i32, i32
  }
  func.func @transform_4(%arg0: i32) -> (i32, i32, i32) {
    %c0_i32 = arith.constant 0 : i32
    %c0_i32_0 = arith.constant 0 : i32
    %c0_i32_1 = arith.constant 0 : i32
    %c0_i32_2 = arith.constant 0 : i32
    return %c0_i32, %c0_i32_0, %c0_i32_1 : i32, i32, i32
  }
  func.func @transform_5(%arg0: i32) -> (i32, i32) {
    %c0_i32 = arith.constant 0 : i32
    %c0_i32_0 = arith.constant 0 : i32
    %c0_i32_1 = arith.constant 0 : i32
    return %c0_i32, %c0_i32_0 : i32, i32
  }
  func.func @transform_6(%arg0: i32) -> (i32, i32) {
    %c0_i32 = arith.constant 0 : i32
    %c0_i32_0 = arith.constant 0 : i32
    %c0_i32_1 = arith.constant 0 : i32
    return %c0_i32, %c0_i32_0 : i32, i32
  }
  func.func @transform_7(%arg0: i32) -> (i32, i32, i32, i32) {
    %c0_i32 = arith.constant 0 : i32
    %c0_i32_0 = arith.constant 0 : i32
    %c0_i32_1 = arith.constant 0 : i32
    %c0_i32_2 = arith.constant 0 : i32
    return %arg0, %c0_i32, %c0_i32_0, %c0_i32_1 : i32, i32, i32, i32
  }
}

module attributes {stable_mosaic.version = 11 : i64} {
  func.func @_matmul_bias_act_kernel(%arg0: i32, %arg1: memref<16x32xf32, #tpu.memory_space<vmem>>, %arg2: memref<32x32xbf16, #tpu.memory_space<vmem>>, %arg3: memref<1x32xf32, #tpu.memory_space<vmem>>, %arg4: memref<16x32xf32, #tpu.memory_space<vmem>>) attributes {dimension_semantics = [#tpu.dimension_semantics<parallel>], iteration_bounds = array<i64: 2>, scalar_prefetch = 0 : i64, scratch_operands = 0 : i64, tpu.core_type = #tpu.core_type<tc>, window_params = [{transform_indices = @transform_0, window_bounds = array<i64: 16, 32>}, {pipeline_mode = #tpu.pipeline_mode<synchronous>, transform_indices = @transform_1, window_bounds = array<i64: 32, 32>}, {pipeline_mode = #tpu.pipeline_mode<synchronous>, transform_indices = @transform_2, window_bounds = array<i64: 1, 32>}, {transform_indices = @transform_3, window_bounds = array<i64: 16, 32>}]} {
    %c0 = arith.constant 0 : index
    %c0_0 = arith.constant 0 : index
    %0 = vector.load %arg1[%c0, %c0_0] : memref<16x32xf32, #tpu.memory_space<vmem>>, vector<16x32xf32>
    %1 = arith.truncf %0 : vector<16x32xf32> to vector<16x32xbf16>
    %c0_1 = arith.constant 0 : index
    %c0_2 = arith.constant 0 : index
    %2 = vector.load %arg2[%c0_1, %c0_2] : memref<32x32xbf16, #tpu.memory_space<vmem>>, vector<32x32xbf16>
    %cst = arith.constant dense<0.000000e+00> : vector<16x32xf32>
    %3 = tpu.matmul %1, %2, %cst {dimension_numbers = #tpu.dot_dimension_numbers<[1], [0], [0], [1], [0, 0, 1, 1], [], []>} : vector<16x32xbf16>, vector<32x32xbf16>, vector<16x32xf32> -> vector<16x32xf32>
    %c0_3 = arith.constant 0 : index
    %c0_4 = arith.constant 0 : index
    %4 = vector.load %arg3[%c0_3, %c0_4] : memref<1x32xf32, #tpu.memory_space<vmem>>, vector<1x32xf32>
    %5 = vector.broadcast %4 : vector<1x32xf32> to vector<16x32xf32>
    %6 = arith.addf %3, %5 : vector<16x32xf32>
    %cst_5 = arith.constant 0.000000e+00 : f32
    %7 = vector.broadcast %cst_5 : f32 to vector<16x32xf32>
    %8 = arith.maximumf %6, %7 : vector<16x32xf32>
    %c0_6 = arith.constant 0 : index
    %c0_7 = arith.constant 0 : index
    %9 = vector.load %arg4[%c0_6, %c0_7] : memref<16x32xf32, #tpu.memory_space<vmem>>, vector<16x32xf32>
    tpu.vector_store %arg4[%c0_6, %c0_7], %8 {strides = array<i32>} : memref<16x32xf32, #tpu.memory_space<vmem>>, vector<16x32xf32>,
    return
  }
  func.func @transform_0(%arg0: i32) -> (i32, i32) {
    %c0_i32 = arith.constant 0 : i32
    %c0_i32_0 = arith.constant 0 : i32
    return %arg0, %c0_i32 : i32, i32
  }
  func.func @transform_1(%arg0: i32) -> (i32, i32) {
    %c0_i32 = arith.constant 0 : i32
    %c0_i32_0 = arith.constant 0 : i32
    %c0_i32_1 = arith.constant 0 : i32
    return %c0_i32, %c0_i32_0 : i32, i32
  }
  func.func @transform_2(%arg0: i32) -> (i32, i32) {
    %c0_i32 = arith.constant 0 : i32
    %c0_i32_0 = arith.constant 0 : i32
    %c0_i32_1 = arith.constant 0 : i32
    return %c0_i32, %c0_i32_0 : i32, i32
  }
  func.func @transform_3(%arg0: i32) -> (i32, i32) {
    %c0_i32 = arith.constant 0 : i32
    %c0_i32_0 = arith.constant 0 : i32
    return %arg0, %c0_i32 : i32, i32
  }
}

module attributes {stable_mosaic.version = 11 : i64} {
  func.func @_dws2_pw_kernel(%arg0: i32, %arg1: memref<6x4x3x32xf32, #tpu.memory_space<vmem>>, %arg2: memref<3x3x32xf32, #tpu.memory_space<vmem>>, %arg3: memref<1x1x32xf32, #tpu.memory_space<vmem>>, %arg4: memref<32x32xbf16, #tpu.memory_space<vmem>>, %arg5: memref<1x32xf32, #tpu.memory_space<vmem>>, %arg6: memref<4x2x32xf32, #tpu.memory_space<vmem>>) attributes {dimension_semantics = [#tpu.dimension_semantics<parallel>], iteration_bounds = array<i64: 1>, scalar_prefetch = 0 : i64, scratch_operands = 0 : i64, tpu.core_type = #tpu.core_type<tc>, window_params = [{transform_indices = @transform_0, window_bounds = array<i64: 6, 4, 3, 32>}, {pipeline_mode = #tpu.pipeline_mode<synchronous>, transform_indices = @transform_1, window_bounds = array<i64: 3, 3, 32>}, {pipeline_mode = #tpu.pipeline_mode<synchronous>, transform_indices = @transform_2, window_bounds = array<i64: 1, 1, 32>}, {pipeline_mode = #tpu.pipeline_mode<synchronous>, transform_indices = @transform_3, window_bounds = array<i64: 32, 32>}, {pipeline_mode = #tpu.pipeline_mode<synchronous>, transform_indices = @transform_4, window_bounds = array<i64: 1, 32>}, {transform_indices = @transform_5, window_bounds = array<i64: 4, 2, 32>}]} {
    %c0 = arith.constant 0 : index
    %c0_0 = arith.constant 0 : index
    %c0_1 = arith.constant 0 : index
    %0 = vector.load %arg2[%c0, %c0_0, %c0_1] : memref<3x3x32xf32, #tpu.memory_space<vmem>>, vector<3x3x32xf32>
    %c0_2 = arith.constant 0 : index
    %c0_3 = arith.constant 0 : index
    %c0_4 = arith.constant 0 : index
    %c0_5 = arith.constant 0 : index
    %1 = vector.load %arg1[%c0_2, %c0_3, %c0_4, %c0_5] : memref<6x4x3x32xf32, #tpu.memory_space<vmem>>, vector<1x4x3x32xf32>
    %2 = vector.shape_cast %1 : vector<1x4x3x32xf32> to vector<4x3x32xf32>
    %c1 = arith.constant 1 : index
    %c0_6 = arith.constant 0 : index
    %c0_7 = arith.constant 0 : index
    %c0_8 = arith.constant 0 : index
    %3 = vector.load %arg1[%c1, %c0_6, %c0_7, %c0_8] : memref<6x4x3x32xf32, #tpu.memory_space<vmem>>, vector<1x4x3x32xf32>
    %4 = vector.shape_cast %3 : vector<1x4x3x32xf32> to vector<4x3x32xf32>
    %5 = vector.extract_strided_slice %2 {offsets = [0, 0, 0], sizes = [4, 2, 32], strides = [1, 1, 1]} : vector<4x3x32xf32> to vector<4x2x32xf32>
    %6 = vector.extract_strided_slice %4 {offsets = [0, 0, 0], sizes = [4, 2, 32], strides = [1, 1, 1]} : vector<4x3x32xf32> to vector<4x2x32xf32>
    %7 = vector.extract_strided_slice %2 {offsets = [0, 1, 0], sizes = [4, 2, 32], strides = [1, 1, 1]} : vector<4x3x32xf32> to vector<4x2x32xf32>
    %8 = vector.extract_strided_slice %0 {offsets = [0, 0, 0], sizes = [1, 1, 32], strides = [1, 1, 1]} : vector<3x3x32xf32> to vector<1x1x32xf32>
    %9 = vector.shape_cast %8 : vector<1x1x32xf32> to vector<32xf32>
    %10 = vector.shape_cast %9 : vector<32xf32> to vector<1x1x32xf32>
    %11 = vector.broadcast %10 : vector<1x1x32xf32> to vector<4x2x32xf32>
    %12 = arith.mulf %5, %11 : vector<4x2x32xf32>
    %13 = vector.extract_strided_slice %0 {offsets = [0, 1, 0], sizes = [1, 1, 32], strides = [1, 1, 1]} : vector<3x3x32xf32> to vector<1x1x32xf32>
    %14 = vector.shape_cast %13 : vector<1x1x32xf32> to vector<32xf32>
    %15 = vector.shape_cast %14 : vector<32xf32> to vector<1x1x32xf32>
    %16 = vector.broadcast %15 : vector<1x1x32xf32> to vector<4x2x32xf32>
    %17 = arith.mulf %6, %16 : vector<4x2x32xf32>
    %18 = vector.extract_strided_slice %0 {offsets = [0, 2, 0], sizes = [1, 1, 32], strides = [1, 1, 1]} : vector<3x3x32xf32> to vector<1x1x32xf32>
    %19 = vector.shape_cast %18 : vector<1x1x32xf32> to vector<32xf32>
    %20 = vector.shape_cast %19 : vector<32xf32> to vector<1x1x32xf32>
    %21 = vector.broadcast %20 : vector<1x1x32xf32> to vector<4x2x32xf32>
    %22 = arith.mulf %7, %21 : vector<4x2x32xf32>
    %c2 = arith.constant 2 : index
    %c0_9 = arith.constant 0 : index
    %c0_10 = arith.constant 0 : index
    %c0_11 = arith.constant 0 : index
    %23 = vector.load %arg1[%c2, %c0_9, %c0_10, %c0_11] : memref<6x4x3x32xf32, #tpu.memory_space<vmem>>, vector<1x4x3x32xf32>
    %24 = vector.shape_cast %23 : vector<1x4x3x32xf32> to vector<4x3x32xf32>
    %c3 = arith.constant 3 : index
    %c0_12 = arith.constant 0 : index
    %c0_13 = arith.constant 0 : index
    %c0_14 = arith.constant 0 : index
    %25 = vector.load %arg1[%c3, %c0_12, %c0_13, %c0_14] : memref<6x4x3x32xf32, #tpu.memory_space<vmem>>, vector<1x4x3x32xf32>
    %26 = vector.shape_cast %25 : vector<1x4x3x32xf32> to vector<4x3x32xf32>
    %27 = vector.extract_strided_slice %24 {offsets = [0, 0, 0], sizes = [4, 2, 32], strides = [1, 1, 1]} : vector<4x3x32xf32> to vector<4x2x32xf32>
    %28 = vector.extract_strided_slice %26 {offsets = [0, 0, 0], sizes = [4, 2, 32], strides = [1, 1, 1]} : vector<4x3x32xf32> to vector<4x2x32xf32>
    %29 = vector.extract_strided_slice %24 {offsets = [0, 1, 0], sizes = [4, 2, 32], strides = [1, 1, 1]} : vector<4x3x32xf32> to vector<4x2x32xf32>
    %30 = vector.extract_strided_slice %0 {offsets = [1, 0, 0], sizes = [1, 1, 32], strides = [1, 1, 1]} : vector<3x3x32xf32> to vector<1x1x32xf32>
    %31 = vector.shape_cast %30 : vector<1x1x32xf32> to vector<32xf32>
    %32 = vector.shape_cast %31 : vector<32xf32> to vector<1x1x32xf32>
    %33 = vector.broadcast %32 : vector<1x1x32xf32> to vector<4x2x32xf32>
    %34 = arith.mulf %27, %33 : vector<4x2x32xf32>
    %35 = vector.extract_strided_slice %0 {offsets = [1, 1, 0], sizes = [1, 1, 32], strides = [1, 1, 1]} : vector<3x3x32xf32> to vector<1x1x32xf32>
    %36 = vector.shape_cast %35 : vector<1x1x32xf32> to vector<32xf32>
    %37 = vector.shape_cast %36 : vector<32xf32> to vector<1x1x32xf32>
    %38 = vector.broadcast %37 : vector<1x1x32xf32> to vector<4x2x32xf32>
    %39 = arith.mulf %28, %38 : vector<4x2x32xf32>
    %40 = vector.extract_strided_slice %0 {offsets = [1, 2, 0], sizes = [1, 1, 32], strides = [1, 1, 1]} : vector<3x3x32xf32> to vector<1x1x32xf32>
    %41 = vector.shape_cast %40 : vector<1x1x32xf32> to vector<32xf32>
    %42 = vector.shape_cast %41 : vector<32xf32> to vector<1x1x32xf32>
    %43 = vector.broadcast %42 : vector<1x1x32xf32> to vector<4x2x32xf32>
    %44 = arith.mulf %29, %43 : vector<4x2x32xf32>
    %c4 = arith.constant 4 : index
    %c0_15 = arith.constant 0 : index
    %c0_16 = arith.constant 0 : index
    %c0_17 = arith.constant 0 : index
    %45 = vector.load %arg1[%c4, %c0_15, %c0_16, %c0_17] : memref<6x4x3x32xf32, #tpu.memory_space<vmem>>, vector<1x4x3x32xf32>
    %46 = vector.shape_cast %45 : vector<1x4x3x32xf32> to vector<4x3x32xf32>
    %c5 = arith.constant 5 : index
    %c0_18 = arith.constant 0 : index
    %c0_19 = arith.constant 0 : index
    %c0_20 = arith.constant 0 : index
    %47 = vector.load %arg1[%c5, %c0_18, %c0_19, %c0_20] : memref<6x4x3x32xf32, #tpu.memory_space<vmem>>, vector<1x4x3x32xf32>
    %48 = vector.shape_cast %47 : vector<1x4x3x32xf32> to vector<4x3x32xf32>
    %49 = vector.extract_strided_slice %46 {offsets = [0, 0, 0], sizes = [4, 2, 32], strides = [1, 1, 1]} : vector<4x3x32xf32> to vector<4x2x32xf32>
    %50 = vector.extract_strided_slice %48 {offsets = [0, 0, 0], sizes = [4, 2, 32], strides = [1, 1, 1]} : vector<4x3x32xf32> to vector<4x2x32xf32>
    %51 = vector.extract_strided_slice %46 {offsets = [0, 1, 0], sizes = [4, 2, 32], strides = [1, 1, 1]} : vector<4x3x32xf32> to vector<4x2x32xf32>
    %52 = vector.extract_strided_slice %0 {offsets = [2, 0, 0], sizes = [1, 1, 32], strides = [1, 1, 1]} : vector<3x3x32xf32> to vector<1x1x32xf32>
    %53 = vector.shape_cast %52 : vector<1x1x32xf32> to vector<32xf32>
    %54 = vector.shape_cast %53 : vector<32xf32> to vector<1x1x32xf32>
    %55 = vector.broadcast %54 : vector<1x1x32xf32> to vector<4x2x32xf32>
    %56 = arith.mulf %49, %55 : vector<4x2x32xf32>
    %57 = vector.extract_strided_slice %0 {offsets = [2, 1, 0], sizes = [1, 1, 32], strides = [1, 1, 1]} : vector<3x3x32xf32> to vector<1x1x32xf32>
    %58 = vector.shape_cast %57 : vector<1x1x32xf32> to vector<32xf32>
    %59 = vector.shape_cast %58 : vector<32xf32> to vector<1x1x32xf32>
    %60 = vector.broadcast %59 : vector<1x1x32xf32> to vector<4x2x32xf32>
    %61 = arith.mulf %50, %60 : vector<4x2x32xf32>
    %62 = vector.extract_strided_slice %0 {offsets = [2, 2, 0], sizes = [1, 1, 32], strides = [1, 1, 1]} : vector<3x3x32xf32> to vector<1x1x32xf32>
    %63 = vector.shape_cast %62 : vector<1x1x32xf32> to vector<32xf32>
    %64 = vector.shape_cast %63 : vector<32xf32> to vector<1x1x32xf32>
    %65 = vector.broadcast %64 : vector<1x1x32xf32> to vector<4x2x32xf32>
    %66 = arith.mulf %51, %65 : vector<4x2x32xf32>
    %67 = arith.addf %12, %17 : vector<4x2x32xf32>
    %68 = arith.addf %22, %34 : vector<4x2x32xf32>
    %69 = arith.addf %39, %44 : vector<4x2x32xf32>
    %70 = arith.addf %56, %61 : vector<4x2x32xf32>
    %71 = arith.addf %67, %68 : vector<4x2x32xf32>
    %72 = arith.addf %69, %70 : vector<4x2x32xf32>
    %73 = arith.addf %71, %72 : vector<4x2x32xf32>
    %74 = arith.addf %73, %66 : vector<4x2x32xf32>
    %c0_21 = arith.constant 0 : index
    %c0_22 = arith.constant 0 : index
    %c0_23 = arith.constant 0 : index
    %75 = vector.load %arg3[%c0_21, %c0_22, %c0_23] : memref<1x1x32xf32, #tpu.memory_space<vmem>>, vector<1x1x32xf32>
    %76 = vector.broadcast %75 : vector<1x1x32xf32> to vector<4x2x32xf32>
    %77 = arith.addf %74, %76 : vector<4x2x32xf32>
    %78 = vector.shape_cast %77 : vector<4x2x32xf32> to vector<8x32xf32>
    %79 = arith.truncf %78 : vector<8x32xf32> to vector<8x32xbf16>
    %c0_24 = arith.constant 0 : index
    %c0_25 = arith.constant 0 : index
    %80 = vector.load %arg4[%c0_24, %c0_25] : memref<32x32xbf16, #tpu.memory_space<vmem>>, vector<32x32xbf16>
    %cst = arith.constant dense<0.000000e+00> : vector<8x32xf32>
    %81 = tpu.matmul %79, %80, %cst {dimension_numbers = #tpu.dot_dimension_numbers<[1], [0], [0], [1], [0, 0, 1, 1], [], []>} : vector<8x32xbf16>, vector<32x32xbf16>, vector<8x32xf32> -> vector<8x32xf32>
    %c0_26 = arith.constant 0 : index
    %c0_27 = arith.constant 0 : index
    %82 = vector.load %arg5[%c0_26, %c0_27] : memref<1x32xf32, #tpu.memory_space<vmem>>, vector<1x32xf32>
    %83 = vector.broadcast %82 : vector<1x32xf32> to vector<8x32xf32>
    %84 = arith.addf %81, %83 : vector<8x32xf32>
    %cst_28 = arith.constant 0.000000e+00 : f32
    %85 = vector.broadcast %cst_28 : f32 to vector<8x32xf32>
    %86 = arith.maximumf %84, %85 : vector<8x32xf32>
    %87 = vector.shape_cast %86 : vector<8x32xf32> to vector<4x2x32xf32>
    %c0_29 = arith.constant 0 : index
    %c0_30 = arith.constant 0 : index
    %c0_31 = arith.constant 0 : index
    %88 = vector.load %arg6[%c0_29, %c0_30, %c0_31] : memref<4x2x32xf32, #tpu.memory_space<vmem>>, vector<4x2x32xf32>
    tpu.vector_store %arg6[%c0_29, %c0_30, %c0_31], %87 {strides = array<i32>} : memref<4x2x32xf32, #tpu.memory_space<vmem>>, vector<4x2x32xf32>,
    return
  }
  func.func @transform_0(%arg0: i32) -> (i32, i32, i32, i32) {
    %c0_i32 = arith.constant 0 : i32
    %c0_i32_0 = arith.constant 0 : i32
    %c0_i32_1 = arith.constant 0 : i32
    %c0_i32_2 = arith.constant 0 : i32
    return %c0_i32, %arg0, %c0_i32_0, %c0_i32_1 : i32, i32, i32, i32
  }
  func.func @transform_1(%arg0: i32) -> (i32, i32, i32) {
    %c0_i32 = arith.constant 0 : i32
    %c0_i32_0 = arith.constant 0 : i32
    %c0_i32_1 = arith.constant 0 : i32
    %c0_i32_2 = arith.constant 0 : i32
    return %c0_i32, %c0_i32_0, %c0_i32_1 : i32, i32, i32
  }
  func.func @transform_2(%arg0: i32) -> (i32, i32, i32) {
    %c0_i32 = arith.constant 0 : i32
    %c0_i32_0 = arith.constant 0 : i32
    %c0_i32_1 = arith.constant 0 : i32
    %c0_i32_2 = arith.constant 0 : i32
    return %c0_i32, %c0_i32_0, %c0_i32_1 : i32, i32, i32
  }
  func.func @transform_3(%arg0: i32) -> (i32, i32) {
    %c0_i32 = arith.constant 0 : i32
    %c0_i32_0 = arith.constant 0 : i32
    %c0_i32_1 = arith.constant 0 : i32
    return %c0_i32, %c0_i32_0 : i32, i32
  }
  func.func @transform_4(%arg0: i32) -> (i32, i32) {
    %c0_i32 = arith.constant 0 : i32
    %c0_i32_0 = arith.constant 0 : i32
    %c0_i32_1 = arith.constant 0 : i32
    return %c0_i32, %c0_i32_0 : i32, i32
  }
  func.func @transform_5(%arg0: i32) -> (i32, i32, i32) {
    %c0_i32 = arith.constant 0 : i32
    %c0_i32_0 = arith.constant 0 : i32
    %c0_i32_1 = arith.constant 0 : i32
    return %arg0, %c0_i32, %c0_i32_0 : i32, i32, i32
  }
}

module attributes {stable_mosaic.version = 11 : i64} {
  func.func @_shuffle_unit_s1_kernel(%arg0: i32, %arg1: memref<1x2x2x64xf32, #tpu.memory_space<vmem>>, %arg2: memref<32x32xbf16, #tpu.memory_space<vmem>>, %arg3: memref<1x32xf32, #tpu.memory_space<vmem>>, %arg4: memref<3x3x32xf32, #tpu.memory_space<vmem>>, %arg5: memref<1x1x32xf32, #tpu.memory_space<vmem>>, %arg6: memref<32x32xbf16, #tpu.memory_space<vmem>>, %arg7: memref<1x32xf32, #tpu.memory_space<vmem>>, %arg8: memref<1x2x2x64xf32, #tpu.memory_space<vmem>>, %arg9: memref<4x4x32xf32, #tpu.memory_space<vmem>>) attributes {dimension_semantics = [#tpu.dimension_semantics<parallel>], iteration_bounds = array<i64: 2>, scalar_prefetch = 0 : i64, scratch_operands = 1 : i64, tpu.core_type = #tpu.core_type<tc>, window_params = [{transform_indices = @transform_0, window_bounds = array<i64: 1, 2, 2, 64>}, {pipeline_mode = #tpu.pipeline_mode<synchronous>, transform_indices = @transform_1, window_bounds = array<i64: 32, 32>}, {pipeline_mode = #tpu.pipeline_mode<synchronous>, transform_indices = @transform_2, window_bounds = array<i64: 1, 32>}, {pipeline_mode = #tpu.pipeline_mode<synchronous>, transform_indices = @transform_3, window_bounds = array<i64: 3, 3, 32>}, {pipeline_mode = #tpu.pipeline_mode<synchronous>, transform_indices = @transform_4, window_bounds = array<i64: 1, 1, 32>}, {pipeline_mode = #tpu.pipeline_mode<synchronous>, transform_indices = @transform_5, window_bounds = array<i64: 32, 32>}, {pipeline_mode = #tpu.pipeline_mode<synchronous>, transform_indices = @transform_6, window_bounds = array<i64: 1, 32>}, {transform_indices = @transform_7, window_bounds = array<i64: 1, 2, 2, 64>}]} {
    %c0 = arith.constant 0 : index
    %c0_0 = arith.constant 0 : index
    %c0_1 = arith.constant 0 : index
    %c0_2 = arith.constant 0 : index
    %0 = vector.load %arg1[%c0, %c0_0, %c0_1, %c0_2] : memref<1x2x2x64xf32, #tpu.memory_space<vmem>>, vector<1x2x2x64xf32>
    %1 = vector.shape_cast %0 : vector<1x2x2x64xf32> to vector<2x2x64xf32>
    %2 = vector.extract_strided_slice %1 {offsets = [0, 0, 0], sizes = [2, 2, 32], strides = [1, 1, 1]} : vector<2x2x64xf32> to vector<2x2x32xf32>
    %3 = vector.extract_strided_slice %1 {offsets = [0, 0, 32], sizes = [2, 2, 32], strides = [1, 1, 1]} : vector<2x2x64xf32> to vector<2x2x32xf32>
    %4 = vector.shape_cast %3 : vector<2x2x32xf32> to vector<4x32xf32>
    %5 = arith.truncf %4 : vector<4x32xf32> to vector<4x32xbf16>
    %c0_3 = arith.constant 0 : index
    %c0_4 = arith.constant 0 : index
    %6 = vector.load %arg2[%c0_3, %c0_4] : memref<32x32xbf16, #tpu.memory_space<vmem>>, vector<32x32xbf16>
    %cst = arith.constant dense<0.000000e+00> : vector<4x32xf32>
    %7 = tpu.matmul %5, %6, %cst {dimension_numbers = #tpu.dot_dimension_numbers<[1], [0], [0], [1], [0, 0, 1, 1], [], []>} : vector<4x32xbf16>, vector<32x32xbf16>, vector<4x32xf32> -> vector<4x32xf32>
    %c0_5 = arith.constant 0 : index
    %c0_6 = arith.constant 0 : index
    %8 = vector.load %arg3[%c0_5, %c0_6] : memref<1x32xf32, #tpu.memory_space<vmem>>, vector<1x32xf32>
    %9 = vector.broadcast %8 : vector<1x32xf32> to vector<4x32xf32>
    %10 = arith.addf %7, %9 : vector<4x32xf32>
    %cst_7 = arith.constant 0.000000e+00 : f32
    %11 = vector.broadcast %cst_7 : f32 to vector<4x32xf32>
    %12 = arith.maximumf %10, %11 : vector<4x32xf32>
    %13 = vector.shape_cast %12 : vector<4x32xf32> to vector<2x2x32xf32>
    %cst_8 = arith.constant 0.000000e+00 : f32
    %14 = vector.broadcast %cst_8 : f32 to vector<4x4x32xf32>
    %c0_9 = arith.constant 0 : index
    %c0_10 = arith.constant 0 : index
    %c0_11 = arith.constant 0 : index
    %15 = vector.load %arg9[%c0_9, %c0_10, %c0_11] : memref<4x4x32xf32, #tpu.memory_space<vmem>>, vector<4x4x32xf32>
    tpu.vector_store %arg9[%c0_9, %c0_10, %c0_11], %14 {strides = array<i32>} : memref<4x4x32xf32, #tpu.memory_space<vmem>>, vector<4x4x32xf32>,
    %c1 = arith.constant 1 : index
    %c1_12 = arith.constant 1 : index
    %c0_13 = arith.constant 0 : index
    %16 = vector.load %arg9[%c1, %c1_12, %c0_13] : memref<4x4x32xf32, #tpu.memory_space<vmem>>, vector<2x2x32xf32>
    tpu.vector_store %arg9[%c1, %c1_12, %c0_13], %13 {strides = array<i32>} : memref<4x4x32xf32, #tpu.memory_space<vmem>>, vector<2x2x32xf32>,
    %c0_14 = arith.constant 0 : index
    %c0_15 = arith.constant 0 : index
    %c0_16 = arith.constant 0 : index
    %17 = vector.load %arg9[%c0_14, %c0_15, %c0_16] : memref<4x4x32xf32, #tpu.memory_space<vmem>>, vector<4x4x32xf32>
    %c0_17 = arith.constant 0 : index
    %c0_18 = arith.constant 0 : index
    %c0_19 = arith.constant 0 : index
    %18 = vector.load %arg4[%c0_17, %c0_18, %c0_19] : memref<3x3x32xf32, #tpu.memory_space<vmem>>, vector<3x3x32xf32>
    %19 = vector.extract_strided_slice %17 {offsets = [0, 0, 0], sizes = [2, 2, 32], strides = [1, 1, 1]} : vector<4x4x32xf32> to vector<2x2x32xf32>
    %20 = vector.extract_strided_slice %18 {offsets = [0, 0, 0], sizes = [1, 1, 32], strides = [1, 1, 1]} : vector<3x3x32xf32> to vector<1x1x32xf32>
    %21 = vector.shape_cast %20 : vector<1x1x32xf32> to vector<32xf32>
    %22 = vector.shape_cast %21 : vector<32xf32> to vector<1x1x32xf32>
    %23 = vector.broadcast %22 : vector<1x1x32xf32> to vector<2x2x32xf32>
    %24 = arith.mulf %19, %23 : vector<2x2x32xf32>
    %25 = vector.extract_strided_slice %17 {offsets = [0, 1, 0], sizes = [2, 2, 32], strides = [1, 1, 1]} : vector<4x4x32xf32> to vector<2x2x32xf32>
    %26 = vector.extract_strided_slice %18 {offsets = [0, 1, 0], sizes = [1, 1, 32], strides = [1, 1, 1]} : vector<3x3x32xf32> to vector<1x1x32xf32>
    %27 = vector.shape_cast %26 : vector<1x1x32xf32> to vector<32xf32>
    %28 = vector.shape_cast %27 : vector<32xf32> to vector<1x1x32xf32>
    %29 = vector.broadcast %28 : vector<1x1x32xf32> to vector<2x2x32xf32>
    %30 = arith.mulf %25, %29 : vector<2x2x32xf32>
    %31 = vector.extract_strided_slice %17 {offsets = [0, 2, 0], sizes = [2, 2, 32], strides = [1, 1, 1]} : vector<4x4x32xf32> to vector<2x2x32xf32>
    %32 = vector.extract_strided_slice %18 {offsets = [0, 2, 0], sizes = [1, 1, 32], strides = [1, 1, 1]} : vector<3x3x32xf32> to vector<1x1x32xf32>
    %33 = vector.shape_cast %32 : vector<1x1x32xf32> to vector<32xf32>
    %34 = vector.shape_cast %33 : vector<32xf32> to vector<1x1x32xf32>
    %35 = vector.broadcast %34 : vector<1x1x32xf32> to vector<2x2x32xf32>
    %36 = arith.mulf %31, %35 : vector<2x2x32xf32>
    %37 = vector.extract_strided_slice %17 {offsets = [1, 0, 0], sizes = [2, 2, 32], strides = [1, 1, 1]} : vector<4x4x32xf32> to vector<2x2x32xf32>
    %38 = vector.extract_strided_slice %18 {offsets = [1, 0, 0], sizes = [1, 1, 32], strides = [1, 1, 1]} : vector<3x3x32xf32> to vector<1x1x32xf32>
    %39 = vector.shape_cast %38 : vector<1x1x32xf32> to vector<32xf32>
    %40 = vector.shape_cast %39 : vector<32xf32> to vector<1x1x32xf32>
    %41 = vector.broadcast %40 : vector<1x1x32xf32> to vector<2x2x32xf32>
    %42 = arith.mulf %37, %41 : vector<2x2x32xf32>
    %43 = vector.extract_strided_slice %17 {offsets = [1, 1, 0], sizes = [2, 2, 32], strides = [1, 1, 1]} : vector<4x4x32xf32> to vector<2x2x32xf32>
    %44 = vector.extract_strided_slice %18 {offsets = [1, 1, 0], sizes = [1, 1, 32], strides = [1, 1, 1]} : vector<3x3x32xf32> to vector<1x1x32xf32>
    %45 = vector.shape_cast %44 : vector<1x1x32xf32> to vector<32xf32>
    %46 = vector.shape_cast %45 : vector<32xf32> to vector<1x1x32xf32>
    %47 = vector.broadcast %46 : vector<1x1x32xf32> to vector<2x2x32xf32>
    %48 = arith.mulf %43, %47 : vector<2x2x32xf32>
    %49 = vector.extract_strided_slice %17 {offsets = [1, 2, 0], sizes = [2, 2, 32], strides = [1, 1, 1]} : vector<4x4x32xf32> to vector<2x2x32xf32>
    %50 = vector.extract_strided_slice %18 {offsets = [1, 2, 0], sizes = [1, 1, 32], strides = [1, 1, 1]} : vector<3x3x32xf32> to vector<1x1x32xf32>
    %51 = vector.shape_cast %50 : vector<1x1x32xf32> to vector<32xf32>
    %52 = vector.shape_cast %51 : vector<32xf32> to vector<1x1x32xf32>
    %53 = vector.broadcast %52 : vector<1x1x32xf32> to vector<2x2x32xf32>
    %54 = arith.mulf %49, %53 : vector<2x2x32xf32>
    %55 = vector.extract_strided_slice %17 {offsets = [2, 0, 0], sizes = [2, 2, 32], strides = [1, 1, 1]} : vector<4x4x32xf32> to vector<2x2x32xf32>
    %56 = vector.extract_strided_slice %18 {offsets = [2, 0, 0], sizes = [1, 1, 32], strides = [1, 1, 1]} : vector<3x3x32xf32> to vector<1x1x32xf32>
    %57 = vector.shape_cast %56 : vector<1x1x32xf32> to vector<32xf32>
    %58 = vector.shape_cast %57 : vector<32xf32> to vector<1x1x32xf32>
    %59 = vector.broadcast %58 : vector<1x1x32xf32> to vector<2x2x32xf32>
    %60 = arith.mulf %55, %59 : vector<2x2x32xf32>
    %61 = vector.extract_strided_slice %17 {offsets = [2, 1, 0], sizes = [2, 2, 32], strides = [1, 1, 1]} : vector<4x4x32xf32> to vector<2x2x32xf32>
    %62 = vector.extract_strided_slice %18 {offsets = [2, 1, 0], sizes = [1, 1, 32], strides = [1, 1, 1]} : vector<3x3x32xf32> to vector<1x1x32xf32>
    %63 = vector.shape_cast %62 : vector<1x1x32xf32> to vector<32xf32>
    %64 = vector.shape_cast %63 : vector<32xf32> to vector<1x1x32xf32>
    %65 = vector.broadcast %64 : vector<1x1x32xf32> to vector<2x2x32xf32>
    %66 = arith.mulf %61, %65 : vector<2x2x32xf32>
    %67 = vector.extract_strided_slice %17 {offsets = [2, 2, 0], sizes = [2, 2, 32], strides = [1, 1, 1]} : vector<4x4x32xf32> to vector<2x2x32xf32>
    %68 = vector.extract_strided_slice %18 {offsets = [2, 2, 0], sizes = [1, 1, 32], strides = [1, 1, 1]} : vector<3x3x32xf32> to vector<1x1x32xf32>
    %69 = vector.shape_cast %68 : vector<1x1x32xf32> to vector<32xf32>
    %70 = vector.shape_cast %69 : vector<32xf32> to vector<1x1x32xf32>
    %71 = vector.broadcast %70 : vector<1x1x32xf32> to vector<2x2x32xf32>
    %72 = arith.mulf %67, %71 : vector<2x2x32xf32>
    %73 = arith.addf %24, %30 : vector<2x2x32xf32>
    %74 = arith.addf %36, %42 : vector<2x2x32xf32>
    %75 = arith.addf %48, %54 : vector<2x2x32xf32>
    %76 = arith.addf %60, %66 : vector<2x2x32xf32>
    %77 = arith.addf %73, %74 : vector<2x2x32xf32>
    %78 = arith.addf %75, %76 : vector<2x2x32xf32>
    %79 = arith.addf %77, %78 : vector<2x2x32xf32>
    %80 = arith.addf %79, %72 : vector<2x2x32xf32>
    %c0_20 = arith.constant 0 : index
    %c0_21 = arith.constant 0 : index
    %c0_22 = arith.constant 0 : index
    %81 = vector.load %arg5[%c0_20, %c0_21, %c0_22] : memref<1x1x32xf32, #tpu.memory_space<vmem>>, vector<1x1x32xf32>
    %82 = vector.broadcast %81 : vector<1x1x32xf32> to vector<2x2x32xf32>
    %83 = arith.addf %80, %82 : vector<2x2x32xf32>
    %84 = vector.shape_cast %83 : vector<2x2x32xf32> to vector<4x32xf32>
    %85 = arith.truncf %84 : vector<4x32xf32> to vector<4x32xbf16>
    %c0_23 = arith.constant 0 : index
    %c0_24 = arith.constant 0 : index
    %86 = vector.load %arg6[%c0_23, %c0_24] : memref<32x32xbf16, #tpu.memory_space<vmem>>, vector<32x32xbf16>
    %cst_25 = arith.constant dense<0.000000e+00> : vector<4x32xf32>
    %87 = tpu.matmul %85, %86, %cst_25 {dimension_numbers = #tpu.dot_dimension_numbers<[1], [0], [0], [1], [0, 0, 1, 1], [], []>} : vector<4x32xbf16>, vector<32x32xbf16>, vector<4x32xf32> -> vector<4x32xf32>
    %c0_26 = arith.constant 0 : index
    %c0_27 = arith.constant 0 : index
    %88 = vector.load %arg7[%c0_26, %c0_27] : memref<1x32xf32, #tpu.memory_space<vmem>>, vector<1x32xf32>
    %89 = vector.broadcast %88 : vector<1x32xf32> to vector<4x32xf32>
    %90 = arith.addf %87, %89 : vector<4x32xf32>
    %cst_28 = arith.constant 0.000000e+00 : f32
    %91 = vector.broadcast %cst_28 : f32 to vector<4x32xf32>
    %92 = arith.maximumf %90, %91 : vector<4x32xf32>
    %93 = vector.shape_cast %92 : vector<4x32xf32> to vector<2x2x32xf32>
    %94 = tpu.concatenate %2, %93 in 2 : vector<2x2x32xf32>, vector<2x2x32xf32> -> vector<2x2x64xf32>
    %c0_29 = arith.constant 0 : index
    %c0_30 = arith.constant 0 : index
    %c0_31 = arith.constant 0 : index
    %c0_32 = arith.constant 0 : index
    %95 = vector.load %arg8[%c0_29, %c0_30, %c0_31, %c0_32] : memref<1x2x2x64xf32, #tpu.memory_space<vmem>>, vector<1x2x2x64xf32>
    %96 = vector.shape_cast %95 : vector<1x2x2x64xf32> to vector<2x2x64xf32>
    %97 = vector.shape_cast %94 : vector<2x2x64xf32> to vector<1x2x2x64xf32>
    tpu.vector_store %arg8[%c0_29, %c0_30, %c0_31, %c0_32], %97 {strides = array<i32>} : memref<1x2x2x64xf32, #tpu.memory_space<vmem>>, vector<1x2x2x64xf32>,
    return
  }
  func.func @transform_0(%arg0: i32) -> (i32, i32, i32, i32) {
    %c0_i32 = arith.constant 0 : i32
    %c0_i32_0 = arith.constant 0 : i32
    %c0_i32_1 = arith.constant 0 : i32
    %c0_i32_2 = arith.constant 0 : i32
    return %arg0, %c0_i32, %c0_i32_0, %c0_i32_1 : i32, i32, i32, i32
  }
  func.func @transform_1(%arg0: i32) -> (i32, i32) {
    %c0_i32 = arith.constant 0 : i32
    %c0_i32_0 = arith.constant 0 : i32
    %c0_i32_1 = arith.constant 0 : i32
    return %c0_i32, %c0_i32_0 : i32, i32
  }
  func.func @transform_2(%arg0: i32) -> (i32, i32) {
    %c0_i32 = arith.constant 0 : i32
    %c0_i32_0 = arith.constant 0 : i32
    %c0_i32_1 = arith.constant 0 : i32
    return %c0_i32, %c0_i32_0 : i32, i32
  }
  func.func @transform_3(%arg0: i32) -> (i32, i32, i32) {
    %c0_i32 = arith.constant 0 : i32
    %c0_i32_0 = arith.constant 0 : i32
    %c0_i32_1 = arith.constant 0 : i32
    %c0_i32_2 = arith.constant 0 : i32
    return %c0_i32, %c0_i32_0, %c0_i32_1 : i32, i32, i32
  }
  func.func @transform_4(%arg0: i32) -> (i32, i32, i32) {
    %c0_i32 = arith.constant 0 : i32
    %c0_i32_0 = arith.constant 0 : i32
    %c0_i32_1 = arith.constant 0 : i32
    %c0_i32_2 = arith.constant 0 : i32
    return %c0_i32, %c0_i32_0, %c0_i32_1 : i32, i32, i32
  }
  func.func @transform_5(%arg0: i32) -> (i32, i32) {
    %c0_i32 = arith.constant 0 : i32
    %c0_i32_0 = arith.constant 0 : i32
    %c0_i32_1 = arith.constant 0 : i32
    return %c0_i32, %c0_i32_0 : i32, i32
  }
  func.func @transform_6(%arg0: i32) -> (i32, i32) {
    %c0_i32 = arith.constant 0 : i32
    %c0_i32_0 = arith.constant 0 : i32
    %c0_i32_1 = arith.constant 0 : i32
    return %c0_i32, %c0_i32_0 : i32, i32
  }
  func.func @transform_7(%arg0: i32) -> (i32, i32, i32, i32) {
    %c0_i32 = arith.constant 0 : i32
    %c0_i32_0 = arith.constant 0 : i32
    %c0_i32_1 = arith.constant 0 : i32
    %c0_i32_2 = arith.constant 0 : i32
    return %arg0, %c0_i32, %c0_i32_0, %c0_i32_1 : i32, i32, i32, i32
  }
}

module attributes {stable_mosaic.version = 11 : i64} {
  func.func @_matmul_bias_act_kernel(%arg0: i32, %arg1: memref<8x64xf32, #tpu.memory_space<vmem>>, %arg2: memref<64x64xbf16, #tpu.memory_space<vmem>>, %arg3: memref<1x64xf32, #tpu.memory_space<vmem>>, %arg4: memref<8x64xf32, #tpu.memory_space<vmem>>) attributes {dimension_semantics = [#tpu.dimension_semantics<parallel>], iteration_bounds = array<i64: 1>, scalar_prefetch = 0 : i64, scratch_operands = 0 : i64, tpu.core_type = #tpu.core_type<tc>, window_params = [{transform_indices = @transform_0, window_bounds = array<i64: 8, 64>}, {pipeline_mode = #tpu.pipeline_mode<synchronous>, transform_indices = @transform_1, window_bounds = array<i64: 64, 64>}, {pipeline_mode = #tpu.pipeline_mode<synchronous>, transform_indices = @transform_2, window_bounds = array<i64: 1, 64>}, {transform_indices = @transform_3, window_bounds = array<i64: 8, 64>}]} {
    %c0 = arith.constant 0 : index
    %c0_0 = arith.constant 0 : index
    %0 = vector.load %arg1[%c0, %c0_0] : memref<8x64xf32, #tpu.memory_space<vmem>>, vector<8x64xf32>
    %1 = arith.truncf %0 : vector<8x64xf32> to vector<8x64xbf16>
    %c0_1 = arith.constant 0 : index
    %c0_2 = arith.constant 0 : index
    %2 = vector.load %arg2[%c0_1, %c0_2] : memref<64x64xbf16, #tpu.memory_space<vmem>>, vector<64x64xbf16>
    %cst = arith.constant dense<0.000000e+00> : vector<8x64xf32>
    %3 = tpu.matmul %1, %2, %cst {dimension_numbers = #tpu.dot_dimension_numbers<[1], [0], [0], [1], [0, 0, 1, 1], [], []>} : vector<8x64xbf16>, vector<64x64xbf16>, vector<8x64xf32> -> vector<8x64xf32>
    %c0_3 = arith.constant 0 : index
    %c0_4 = arith.constant 0 : index
    %4 = vector.load %arg3[%c0_3, %c0_4] : memref<1x64xf32, #tpu.memory_space<vmem>>, vector<1x64xf32>
    %5 = vector.broadcast %4 : vector<1x64xf32> to vector<8x64xf32>
    %6 = arith.addf %3, %5 : vector<8x64xf32>
    %cst_5 = arith.constant 0.000000e+00 : f32
    %7 = vector.broadcast %cst_5 : f32 to vector<8x64xf32>
    %8 = arith.maximumf %6, %7 : vector<8x64xf32>
    %c0_6 = arith.constant 0 : index
    %c0_7 = arith.constant 0 : index
    %9 = vector.load %arg4[%c0_6, %c0_7] : memref<8x64xf32, #tpu.memory_space<vmem>>, vector<8x64xf32>
    tpu.vector_store %arg4[%c0_6, %c0_7], %8 {strides = array<i32>} : memref<8x64xf32, #tpu.memory_space<vmem>>, vector<8x64xf32>,
    return
  }
  func.func @transform_0(%arg0: i32) -> (i32, i32) {
    %c0_i32 = arith.constant 0 : i32
    %c0_i32_0 = arith.constant 0 : i32
    return %arg0, %c0_i32 : i32, i32
  }
  func.func @transform_1(%arg0: i32) -> (i32, i32) {
    %c0_i32 = arith.constant 0 : i32
    %c0_i32_0 = arith.constant 0 : i32
    %c0_i32_1 = arith.constant 0 : i32
    return %c0_i32, %c0_i32_0 : i32, i32
  }
  func.func @transform_2(%arg0: i32) -> (i32, i32) {
    %c0_i32 = arith.constant 0 : i32
    %c0_i32_0 = arith.constant 0 : i32
    %c0_i32_1 = arith.constant 0 : i32
    return %c0_i32, %c0_i32_0 : i32, i32
  }
  func.func @transform_3(%arg0: i32) -> (i32, i32) {
    %c0_i32 = arith.constant 0 : i32
    %c0_i32_0 = arith.constant 0 : i32
    return %arg0, %c0_i32 : i32, i32
  }
}

module attributes {stable_mosaic.version = 11 : i64} {
  func.func @_dws2_pw_kernel(%arg0: i32, %arg1: memref<6x2x2x64xf32, #tpu.memory_space<vmem>>, %arg2: memref<3x3x64xf32, #tpu.memory_space<vmem>>, %arg3: memref<1x1x64xf32, #tpu.memory_space<vmem>>, %arg4: memref<64x64xbf16, #tpu.memory_space<vmem>>, %arg5: memref<1x64xf32, #tpu.memory_space<vmem>>, %arg6: memref<2x1x64xf32, #tpu.memory_space<vmem>>) attributes {dimension_semantics = [#tpu.dimension_semantics<parallel>], iteration_bounds = array<i64: 1>, scalar_prefetch = 0 : i64, scratch_operands = 0 : i64, tpu.core_type = #tpu.core_type<tc>, window_params = [{transform_indices = @transform_0, window_bounds = array<i64: 6, 2, 2, 64>}, {pipeline_mode = #tpu.pipeline_mode<synchronous>, transform_indices = @transform_1, window_bounds = array<i64: 3, 3, 64>}, {pipeline_mode = #tpu.pipeline_mode<synchronous>, transform_indices = @transform_2, window_bounds = array<i64: 1, 1, 64>}, {pipeline_mode = #tpu.pipeline_mode<synchronous>, transform_indices = @transform_3, window_bounds = array<i64: 64, 64>}, {pipeline_mode = #tpu.pipeline_mode<synchronous>, transform_indices = @transform_4, window_bounds = array<i64: 1, 64>}, {transform_indices = @transform_5, window_bounds = array<i64: 2, 1, 64>}]} {
    %c0 = arith.constant 0 : index
    %c0_0 = arith.constant 0 : index
    %c0_1 = arith.constant 0 : index
    %0 = vector.load %arg2[%c0, %c0_0, %c0_1] : memref<3x3x64xf32, #tpu.memory_space<vmem>>, vector<3x3x64xf32>
    %c0_2 = arith.constant 0 : index
    %c0_3 = arith.constant 0 : index
    %c0_4 = arith.constant 0 : index
    %c0_5 = arith.constant 0 : index
    %1 = vector.load %arg1[%c0_2, %c0_3, %c0_4, %c0_5] : memref<6x2x2x64xf32, #tpu.memory_space<vmem>>, vector<1x2x2x64xf32>
    %2 = vector.shape_cast %1 : vector<1x2x2x64xf32> to vector<2x2x64xf32>
    %c1 = arith.constant 1 : index
    %c0_6 = arith.constant 0 : index
    %c0_7 = arith.constant 0 : index
    %c0_8 = arith.constant 0 : index
    %3 = vector.load %arg1[%c1, %c0_6, %c0_7, %c0_8] : memref<6x2x2x64xf32, #tpu.memory_space<vmem>>, vector<1x2x2x64xf32>
    %4 = vector.shape_cast %3 : vector<1x2x2x64xf32> to vector<2x2x64xf32>
    %5 = vector.extract_strided_slice %2 {offsets = [0, 0, 0], sizes = [2, 1, 64], strides = [1, 1, 1]} : vector<2x2x64xf32> to vector<2x1x64xf32>
    %6 = vector.extract_strided_slice %4 {offsets = [0, 0, 0], sizes = [2, 1, 64], strides = [1, 1, 1]} : vector<2x2x64xf32> to vector<2x1x64xf32>
    %7 = vector.extract_strided_slice %2 {offsets = [0, 1, 0], sizes = [2, 1, 64], strides = [1, 1, 1]} : vector<2x2x64xf32> to vector<2x1x64xf32>
    %8 = vector.extract_strided_slice %0 {offsets = [0, 0, 0], sizes = [1, 1, 64], strides = [1, 1, 1]} : vector<3x3x64xf32> to vector<1x1x64xf32>
    %9 = vector.shape_cast %8 : vector<1x1x64xf32> to vector<64xf32>
    %10 = vector.shape_cast %9 : vector<64xf32> to vector<1x1x64xf32>
    %11 = vector.broadcast %10 : vector<1x1x64xf32> to vector<2x1x64xf32>
    %12 = arith.mulf %5, %11 : vector<2x1x64xf32>
    %13 = vector.extract_strided_slice %0 {offsets = [0, 1, 0], sizes = [1, 1, 64], strides = [1, 1, 1]} : vector<3x3x64xf32> to vector<1x1x64xf32>
    %14 = vector.shape_cast %13 : vector<1x1x64xf32> to vector<64xf32>
    %15 = vector.shape_cast %14 : vector<64xf32> to vector<1x1x64xf32>
    %16 = vector.broadcast %15 : vector<1x1x64xf32> to vector<2x1x64xf32>
    %17 = arith.mulf %6, %16 : vector<2x1x64xf32>
    %18 = vector.extract_strided_slice %0 {offsets = [0, 2, 0], sizes = [1, 1, 64], strides = [1, 1, 1]} : vector<3x3x64xf32> to vector<1x1x64xf32>
    %19 = vector.shape_cast %18 : vector<1x1x64xf32> to vector<64xf32>
    %20 = vector.shape_cast %19 : vector<64xf32> to vector<1x1x64xf32>
    %21 = vector.broadcast %20 : vector<1x1x64xf32> to vector<2x1x64xf32>
    %22 = arith.mulf %7, %21 : vector<2x1x64xf32>
    %c2 = arith.constant 2 : index
    %c0_9 = arith.constant 0 : index
    %c0_10 = arith.constant 0 : index
    %c0_11 = arith.constant 0 : index
    %23 = vector.load %arg1[%c2, %c0_9, %c0_10, %c0_11] : memref<6x2x2x64xf32, #tpu.memory_space<vmem>>, vector<1x2x2x64xf32>
    %24 = vector.shape_cast %23 : vector<1x2x2x64xf32> to vector<2x2x64xf32>
    %c3 = arith.constant 3 : index
    %c0_12 = arith.constant 0 : index
    %c0_13 = arith.constant 0 : index
    %c0_14 = arith.constant 0 : index
    %25 = vector.load %arg1[%c3, %c0_12, %c0_13, %c0_14] : memref<6x2x2x64xf32, #tpu.memory_space<vmem>>, vector<1x2x2x64xf32>
    %26 = vector.shape_cast %25 : vector<1x2x2x64xf32> to vector<2x2x64xf32>
    %27 = vector.extract_strided_slice %24 {offsets = [0, 0, 0], sizes = [2, 1, 64], strides = [1, 1, 1]} : vector<2x2x64xf32> to vector<2x1x64xf32>
    %28 = vector.extract_strided_slice %26 {offsets = [0, 0, 0], sizes = [2, 1, 64], strides = [1, 1, 1]} : vector<2x2x64xf32> to vector<2x1x64xf32>
    %29 = vector.extract_strided_slice %24 {offsets = [0, 1, 0], sizes = [2, 1, 64], strides = [1, 1, 1]} : vector<2x2x64xf32> to vector<2x1x64xf32>
    %30 = vector.extract_strided_slice %0 {offsets = [1, 0, 0], sizes = [1, 1, 64], strides = [1, 1, 1]} : vector<3x3x64xf32> to vector<1x1x64xf32>
    %31 = vector.shape_cast %30 : vector<1x1x64xf32> to vector<64xf32>
    %32 = vector.shape_cast %31 : vector<64xf32> to vector<1x1x64xf32>
    %33 = vector.broadcast %32 : vector<1x1x64xf32> to vector<2x1x64xf32>
    %34 = arith.mulf %27, %33 : vector<2x1x64xf32>
    %35 = vector.extract_strided_slice %0 {offsets = [1, 1, 0], sizes = [1, 1, 64], strides = [1, 1, 1]} : vector<3x3x64xf32> to vector<1x1x64xf32>
    %36 = vector.shape_cast %35 : vector<1x1x64xf32> to vector<64xf32>
    %37 = vector.shape_cast %36 : vector<64xf32> to vector<1x1x64xf32>
    %38 = vector.broadcast %37 : vector<1x1x64xf32> to vector<2x1x64xf32>
    %39 = arith.mulf %28, %38 : vector<2x1x64xf32>
    %40 = vector.extract_strided_slice %0 {offsets = [1, 2, 0], sizes = [1, 1, 64], strides = [1, 1, 1]} : vector<3x3x64xf32> to vector<1x1x64xf32>
    %41 = vector.shape_cast %40 : vector<1x1x64xf32> to vector<64xf32>
    %42 = vector.shape_cast %41 : vector<64xf32> to vector<1x1x64xf32>
    %43 = vector.broadcast %42 : vector<1x1x64xf32> to vector<2x1x64xf32>
    %44 = arith.mulf %29, %43 : vector<2x1x64xf32>
    %c4 = arith.constant 4 : index
    %c0_15 = arith.constant 0 : index
    %c0_16 = arith.constant 0 : index
    %c0_17 = arith.constant 0 : index
    %45 = vector.load %arg1[%c4, %c0_15, %c0_16, %c0_17] : memref<6x2x2x64xf32, #tpu.memory_space<vmem>>, vector<1x2x2x64xf32>
    %46 = vector.shape_cast %45 : vector<1x2x2x64xf32> to vector<2x2x64xf32>
    %c5 = arith.constant 5 : index
    %c0_18 = arith.constant 0 : index
    %c0_19 = arith.constant 0 : index
    %c0_20 = arith.constant 0 : index
    %47 = vector.load %arg1[%c5, %c0_18, %c0_19, %c0_20] : memref<6x2x2x64xf32, #tpu.memory_space<vmem>>, vector<1x2x2x64xf32>
    %48 = vector.shape_cast %47 : vector<1x2x2x64xf32> to vector<2x2x64xf32>
    %49 = vector.extract_strided_slice %46 {offsets = [0, 0, 0], sizes = [2, 1, 64], strides = [1, 1, 1]} : vector<2x2x64xf32> to vector<2x1x64xf32>
    %50 = vector.extract_strided_slice %48 {offsets = [0, 0, 0], sizes = [2, 1, 64], strides = [1, 1, 1]} : vector<2x2x64xf32> to vector<2x1x64xf32>
    %51 = vector.extract_strided_slice %46 {offsets = [0, 1, 0], sizes = [2, 1, 64], strides = [1, 1, 1]} : vector<2x2x64xf32> to vector<2x1x64xf32>
    %52 = vector.extract_strided_slice %0 {offsets = [2, 0, 0], sizes = [1, 1, 64], strides = [1, 1, 1]} : vector<3x3x64xf32> to vector<1x1x64xf32>
    %53 = vector.shape_cast %52 : vector<1x1x64xf32> to vector<64xf32>
    %54 = vector.shape_cast %53 : vector<64xf32> to vector<1x1x64xf32>
    %55 = vector.broadcast %54 : vector<1x1x64xf32> to vector<2x1x64xf32>
    %56 = arith.mulf %49, %55 : vector<2x1x64xf32>
    %57 = vector.extract_strided_slice %0 {offsets = [2, 1, 0], sizes = [1, 1, 64], strides = [1, 1, 1]} : vector<3x3x64xf32> to vector<1x1x64xf32>
    %58 = vector.shape_cast %57 : vector<1x1x64xf32> to vector<64xf32>
    %59 = vector.shape_cast %58 : vector<64xf32> to vector<1x1x64xf32>
    %60 = vector.broadcast %59 : vector<1x1x64xf32> to vector<2x1x64xf32>
    %61 = arith.mulf %50, %60 : vector<2x1x64xf32>
    %62 = vector.extract_strided_slice %0 {offsets = [2, 2, 0], sizes = [1, 1, 64], strides = [1, 1, 1]} : vector<3x3x64xf32> to vector<1x1x64xf32>
    %63 = vector.shape_cast %62 : vector<1x1x64xf32> to vector<64xf32>
    %64 = vector.shape_cast %63 : vector<64xf32> to vector<1x1x64xf32>
    %65 = vector.broadcast %64 : vector<1x1x64xf32> to vector<2x1x64xf32>
    %66 = arith.mulf %51, %65 : vector<2x1x64xf32>
    %67 = arith.addf %12, %17 : vector<2x1x64xf32>
    %68 = arith.addf %22, %34 : vector<2x1x64xf32>
    %69 = arith.addf %39, %44 : vector<2x1x64xf32>
    %70 = arith.addf %56, %61 : vector<2x1x64xf32>
    %71 = arith.addf %67, %68 : vector<2x1x64xf32>
    %72 = arith.addf %69, %70 : vector<2x1x64xf32>
    %73 = arith.addf %71, %72 : vector<2x1x64xf32>
    %74 = arith.addf %73, %66 : vector<2x1x64xf32>
    %c0_21 = arith.constant 0 : index
    %c0_22 = arith.constant 0 : index
    %c0_23 = arith.constant 0 : index
    %75 = vector.load %arg3[%c0_21, %c0_22, %c0_23] : memref<1x1x64xf32, #tpu.memory_space<vmem>>, vector<1x1x64xf32>
    %76 = vector.broadcast %75 : vector<1x1x64xf32> to vector<2x1x64xf32>
    %77 = arith.addf %74, %76 : vector<2x1x64xf32>
    %78 = vector.shape_cast %77 : vector<2x1x64xf32> to vector<2x64xf32>
    %79 = arith.truncf %78 : vector<2x64xf32> to vector<2x64xbf16>
    %c0_24 = arith.constant 0 : index
    %c0_25 = arith.constant 0 : index
    %80 = vector.load %arg4[%c0_24, %c0_25] : memref<64x64xbf16, #tpu.memory_space<vmem>>, vector<64x64xbf16>
    %cst = arith.constant dense<0.000000e+00> : vector<2x64xf32>
    %81 = tpu.matmul %79, %80, %cst {dimension_numbers = #tpu.dot_dimension_numbers<[1], [0], [0], [1], [0, 0, 1, 1], [], []>} : vector<2x64xbf16>, vector<64x64xbf16>, vector<2x64xf32> -> vector<2x64xf32>
    %c0_26 = arith.constant 0 : index
    %c0_27 = arith.constant 0 : index
    %82 = vector.load %arg5[%c0_26, %c0_27] : memref<1x64xf32, #tpu.memory_space<vmem>>, vector<1x64xf32>
    %83 = vector.broadcast %82 : vector<1x64xf32> to vector<2x64xf32>
    %84 = arith.addf %81, %83 : vector<2x64xf32>
    %cst_28 = arith.constant 0.000000e+00 : f32
    %85 = vector.broadcast %cst_28 : f32 to vector<2x64xf32>
    %86 = arith.maximumf %84, %85 : vector<2x64xf32>
    %87 = vector.shape_cast %86 : vector<2x64xf32> to vector<2x1x64xf32>
    %c0_29 = arith.constant 0 : index
    %c0_30 = arith.constant 0 : index
    %c0_31 = arith.constant 0 : index
    %88 = vector.load %arg6[%c0_29, %c0_30, %c0_31] : memref<2x1x64xf32, #tpu.memory_space<vmem>>, vector<2x1x64xf32>
    tpu.vector_store %arg6[%c0_29, %c0_30, %c0_31], %87 {strides = array<i32>} : memref<2x1x64xf32, #tpu.memory_space<vmem>>, vector<2x1x64xf32>,
    return
  }
  func.func @transform_0(%arg0: i32) -> (i32, i32, i32, i32) {
    %c0_i32 = arith.constant 0 : i32
    %c0_i32_0 = arith.constant 0 : i32
    %c0_i32_1 = arith.constant 0 : i32
    %c0_i32_2 = arith.constant 0 : i32
    return %c0_i32, %arg0, %c0_i32_0, %c0_i32_1 : i32, i32, i32, i32
  }
  func.func @transform_1(%arg0: i32) -> (i32, i32, i32) {
    %c0_i32 = arith.constant 0 : i32
    %c0_i32_0 = arith.constant 0 : i32
    %c0_i32_1 = arith.constant 0 : i32
    %c0_i32_2 = arith.constant 0 : i32
    return %c0_i32, %c0_i32_0, %c0_i32_1 : i32, i32, i32
  }
  func.func @transform_2(%arg0: i32) -> (i32, i32, i32) {
    %c0_i32 = arith.constant 0 : i32
    %c0_i32_0 = arith.constant 0 : i32
    %c0_i32_1 = arith.constant 0 : i32
    %c0_i32_2 = arith.constant 0 : i32
    return %c0_i32, %c0_i32_0, %c0_i32_1 : i32, i32, i32
  }
  func.func @transform_3(%arg0: i32) -> (i32, i32) {
    %c0_i32 = arith.constant 0 : i32
    %c0_i32_0 = arith.constant 0 : i32
    %c0_i32_1 = arith.constant 0 : i32
    return %c0_i32, %c0_i32_0 : i32, i32
  }
  func.func @transform_4(%arg0: i32) -> (i32, i32) {
    %c0_i32 = arith.constant 0 : i32
    %c0_i32_0 = arith.constant 0 : i32
    %c0_i32_1 = arith.constant 0 : i32
    return %c0_i32, %c0_i32_0 : i32, i32
  }
  func.func @transform_5(%arg0: i32) -> (i32, i32, i32) {
    %c0_i32 = arith.constant 0 : i32
    %c0_i32_0 = arith.constant 0 : i32
    %c0_i32_1 = arith.constant 0 : i32
    return %arg0, %c0_i32, %c0_i32_0 : i32, i32, i32
  }
}

module attributes {stable_mosaic.version = 11 : i64} {
  func.func @_shuffle_unit_s1_kernel(%arg0: i32, %arg1: memref<1x1x1x128xf32, #tpu.memory_space<vmem>>, %arg2: memref<64x64xbf16, #tpu.memory_space<vmem>>, %arg3: memref<1x64xf32, #tpu.memory_space<vmem>>, %arg4: memref<3x3x64xf32, #tpu.memory_space<vmem>>, %arg5: memref<1x1x64xf32, #tpu.memory_space<vmem>>, %arg6: memref<64x64xbf16, #tpu.memory_space<vmem>>, %arg7: memref<1x64xf32, #tpu.memory_space<vmem>>, %arg8: memref<1x1x1x128xf32, #tpu.memory_space<vmem>>, %arg9: memref<3x3x64xf32, #tpu.memory_space<vmem>>) attributes {dimension_semantics = [#tpu.dimension_semantics<parallel>], iteration_bounds = array<i64: 2>, scalar_prefetch = 0 : i64, scratch_operands = 1 : i64, tpu.core_type = #tpu.core_type<tc>, window_params = [{transform_indices = @transform_0, window_bounds = array<i64: 1, 1, 1, 128>}, {pipeline_mode = #tpu.pipeline_mode<synchronous>, transform_indices = @transform_1, window_bounds = array<i64: 64, 64>}, {pipeline_mode = #tpu.pipeline_mode<synchronous>, transform_indices = @transform_2, window_bounds = array<i64: 1, 64>}, {pipeline_mode = #tpu.pipeline_mode<synchronous>, transform_indices = @transform_3, window_bounds = array<i64: 3, 3, 64>}, {pipeline_mode = #tpu.pipeline_mode<synchronous>, transform_indices = @transform_4, window_bounds = array<i64: 1, 1, 64>}, {pipeline_mode = #tpu.pipeline_mode<synchronous>, transform_indices = @transform_5, window_bounds = array<i64: 64, 64>}, {pipeline_mode = #tpu.pipeline_mode<synchronous>, transform_indices = @transform_6, window_bounds = array<i64: 1, 64>}, {transform_indices = @transform_7, window_bounds = array<i64: 1, 1, 1, 128>}]} {
    %c0 = arith.constant 0 : index
    %c0_0 = arith.constant 0 : index
    %c0_1 = arith.constant 0 : index
    %c0_2 = arith.constant 0 : index
    %0 = vector.load %arg1[%c0, %c0_0, %c0_1, %c0_2] : memref<1x1x1x128xf32, #tpu.memory_space<vmem>>, vector<1x1x1x128xf32>
    %1 = vector.shape_cast %0 : vector<1x1x1x128xf32> to vector<1x1x128xf32>
    %2 = vector.extract_strided_slice %1 {offsets = [0, 0, 0], sizes = [1, 1, 64], strides = [1, 1, 1]} : vector<1x1x128xf32> to vector<1x1x64xf32>
    %3 = vector.extract_strided_slice %1 {offsets = [0, 0, 64], sizes = [1, 1, 64], strides = [1, 1, 1]} : vector<1x1x128xf32> to vector<1x1x64xf32>
    %4 = vector.shape_cast %3 : vector<1x1x64xf32> to vector<1x64xf32>
    %5 = arith.truncf %4 : vector<1x64xf32> to vector<1x64xbf16>
    %c0_3 = arith.constant 0 : index
    %c0_4 = arith.constant 0 : index
    %6 = vector.load %arg2[%c0_3, %c0_4] : memref<64x64xbf16, #tpu.memory_space<vmem>>, vector<64x64xbf16>
    %cst = arith.constant dense<0.000000e+00> : vector<1x64xf32>
    %7 = tpu.matmul %5, %6, %cst {dimension_numbers = #tpu.dot_dimension_numbers<[1], [0], [0], [1], [0, 0, 1, 1], [], []>} : vector<1x64xbf16>, vector<64x64xbf16>, vector<1x64xf32> -> vector<1x64xf32>
    %c0_5 = arith.constant 0 : index
    %c0_6 = arith.constant 0 : index
    %8 = vector.load %arg3[%c0_5, %c0_6] : memref<1x64xf32, #tpu.memory_space<vmem>>, vector<1x64xf32>
    %9 = arith.addf %7, %8 : vector<1x64xf32>
    %cst_7 = arith.constant 0.000000e+00 : f32
    %10 = vector.broadcast %cst_7 : f32 to vector<1x64xf32>
    %11 = arith.maximumf %9, %10 : vector<1x64xf32>
    %12 = vector.shape_cast %11 : vector<1x64xf32> to vector<1x1x64xf32>
    %cst_8 = arith.constant 0.000000e+00 : f32
    %13 = vector.broadcast %cst_8 : f32 to vector<3x3x64xf32>
    %c0_9 = arith.constant 0 : index
    %c0_10 = arith.constant 0 : index
    %c0_11 = arith.constant 0 : index
    %14 = vector.load %arg9[%c0_9, %c0_10, %c0_11] : memref<3x3x64xf32, #tpu.memory_space<vmem>>, vector<3x3x64xf32>
    tpu.vector_store %arg9[%c0_9, %c0_10, %c0_11], %13 {strides = array<i32>} : memref<3x3x64xf32, #tpu.memory_space<vmem>>, vector<3x3x64xf32>,
    %c1 = arith.constant 1 : index
    %c1_12 = arith.constant 1 : index
    %c0_13 = arith.constant 0 : index
    %15 = vector.load %arg9[%c1, %c1_12, %c0_13] : memref<3x3x64xf32, #tpu.memory_space<vmem>>, vector<1x1x64xf32>
    tpu.vector_store %arg9[%c1, %c1_12, %c0_13], %12 {strides = array<i32>} : memref<3x3x64xf32, #tpu.memory_space<vmem>>, vector<1x1x64xf32>,
    %c0_14 = arith.constant 0 : index
    %c0_15 = arith.constant 0 : index
    %c0_16 = arith.constant 0 : index
    %16 = vector.load %arg9[%c0_14, %c0_15, %c0_16] : memref<3x3x64xf32, #tpu.memory_space<vmem>>, vector<3x3x64xf32>
    %c0_17 = arith.constant 0 : index
    %c0_18 = arith.constant 0 : index
    %c0_19 = arith.constant 0 : index
    %17 = vector.load %arg4[%c0_17, %c0_18, %c0_19] : memref<3x3x64xf32, #tpu.memory_space<vmem>>, vector<3x3x64xf32>
    %18 = vector.extract_strided_slice %16 {offsets = [0, 0, 0], sizes = [1, 1, 64], strides = [1, 1, 1]} : vector<3x3x64xf32> to vector<1x1x64xf32>
    %19 = vector.extract_strided_slice %17 {offsets = [0, 0, 0], sizes = [1, 1, 64], strides = [1, 1, 1]} : vector<3x3x64xf32> to vector<1x1x64xf32>
    %20 = vector.shape_cast %19 : vector<1x1x64xf32> to vector<64xf32>
    %21 = vector.shape_cast %20 : vector<64xf32> to vector<1x1x64xf32>
    %22 = arith.mulf %18, %21 : vector<1x1x64xf32>
    %23 = vector.extract_strided_slice %16 {offsets = [0, 1, 0], sizes = [1, 1, 64], strides = [1, 1, 1]} : vector<3x3x64xf32> to vector<1x1x64xf32>
    %24 = vector.extract_strided_slice %17 {offsets = [0, 1, 0], sizes = [1, 1, 64], strides = [1, 1, 1]} : vector<3x3x64xf32> to vector<1x1x64xf32>
    %25 = vector.shape_cast %24 : vector<1x1x64xf32> to vector<64xf32>
    %26 = vector.shape_cast %25 : vector<64xf32> to vector<1x1x64xf32>
    %27 = arith.mulf %23, %26 : vector<1x1x64xf32>
    %28 = vector.extract_strided_slice %16 {offsets = [0, 2, 0], sizes = [1, 1, 64], strides = [1, 1, 1]} : vector<3x3x64xf32> to vector<1x1x64xf32>
    %29 = vector.extract_strided_slice %17 {offsets = [0, 2, 0], sizes = [1, 1, 64], strides = [1, 1, 1]} : vector<3x3x64xf32> to vector<1x1x64xf32>
    %30 = vector.shape_cast %29 : vector<1x1x64xf32> to vector<64xf32>
    %31 = vector.shape_cast %30 : vector<64xf32> to vector<1x1x64xf32>
    %32 = arith.mulf %28, %31 : vector<1x1x64xf32>
    %33 = vector.extract_strided_slice %16 {offsets = [1, 0, 0], sizes = [1, 1, 64], strides = [1, 1, 1]} : vector<3x3x64xf32> to vector<1x1x64xf32>
    %34 = vector.extract_strided_slice %17 {offsets = [1, 0, 0], sizes = [1, 1, 64], strides = [1, 1, 1]} : vector<3x3x64xf32> to vector<1x1x64xf32>
    %35 = vector.shape_cast %34 : vector<1x1x64xf32> to vector<64xf32>
    %36 = vector.shape_cast %35 : vector<64xf32> to vector<1x1x64xf32>
    %37 = arith.mulf %33, %36 : vector<1x1x64xf32>
    %38 = vector.extract_strided_slice %16 {offsets = [1, 1, 0], sizes = [1, 1, 64], strides = [1, 1, 1]} : vector<3x3x64xf32> to vector<1x1x64xf32>
    %39 = vector.extract_strided_slice %17 {offsets = [1, 1, 0], sizes = [1, 1, 64], strides = [1, 1, 1]} : vector<3x3x64xf32> to vector<1x1x64xf32>
    %40 = vector.shape_cast %39 : vector<1x1x64xf32> to vector<64xf32>
    %41 = vector.shape_cast %40 : vector<64xf32> to vector<1x1x64xf32>
    %42 = arith.mulf %38, %41 : vector<1x1x64xf32>
    %43 = vector.extract_strided_slice %16 {offsets = [1, 2, 0], sizes = [1, 1, 64], strides = [1, 1, 1]} : vector<3x3x64xf32> to vector<1x1x64xf32>
    %44 = vector.extract_strided_slice %17 {offsets = [1, 2, 0], sizes = [1, 1, 64], strides = [1, 1, 1]} : vector<3x3x64xf32> to vector<1x1x64xf32>
    %45 = vector.shape_cast %44 : vector<1x1x64xf32> to vector<64xf32>
    %46 = vector.shape_cast %45 : vector<64xf32> to vector<1x1x64xf32>
    %47 = arith.mulf %43, %46 : vector<1x1x64xf32>
    %48 = vector.extract_strided_slice %16 {offsets = [2, 0, 0], sizes = [1, 1, 64], strides = [1, 1, 1]} : vector<3x3x64xf32> to vector<1x1x64xf32>
    %49 = vector.extract_strided_slice %17 {offsets = [2, 0, 0], sizes = [1, 1, 64], strides = [1, 1, 1]} : vector<3x3x64xf32> to vector<1x1x64xf32>
    %50 = vector.shape_cast %49 : vector<1x1x64xf32> to vector<64xf32>
    %51 = vector.shape_cast %50 : vector<64xf32> to vector<1x1x64xf32>
    %52 = arith.mulf %48, %51 : vector<1x1x64xf32>
    %53 = vector.extract_strided_slice %16 {offsets = [2, 1, 0], sizes = [1, 1, 64], strides = [1, 1, 1]} : vector<3x3x64xf32> to vector<1x1x64xf32>
    %54 = vector.extract_strided_slice %17 {offsets = [2, 1, 0], sizes = [1, 1, 64], strides = [1, 1, 1]} : vector<3x3x64xf32> to vector<1x1x64xf32>
    %55 = vector.shape_cast %54 : vector<1x1x64xf32> to vector<64xf32>
    %56 = vector.shape_cast %55 : vector<64xf32> to vector<1x1x64xf32>
    %57 = arith.mulf %53, %56 : vector<1x1x64xf32>
    %58 = vector.extract_strided_slice %16 {offsets = [2, 2, 0], sizes = [1, 1, 64], strides = [1, 1, 1]} : vector<3x3x64xf32> to vector<1x1x64xf32>
    %59 = vector.extract_strided_slice %17 {offsets = [2, 2, 0], sizes = [1, 1, 64], strides = [1, 1, 1]} : vector<3x3x64xf32> to vector<1x1x64xf32>
    %60 = vector.shape_cast %59 : vector<1x1x64xf32> to vector<64xf32>
    %61 = vector.shape_cast %60 : vector<64xf32> to vector<1x1x64xf32>
    %62 = arith.mulf %58, %61 : vector<1x1x64xf32>
    %63 = arith.addf %22, %27 : vector<1x1x64xf32>
    %64 = arith.addf %32, %37 : vector<1x1x64xf32>
    %65 = arith.addf %42, %47 : vector<1x1x64xf32>
    %66 = arith.addf %52, %57 : vector<1x1x64xf32>
    %67 = arith.addf %63, %64 : vector<1x1x64xf32>
    %68 = arith.addf %65, %66 : vector<1x1x64xf32>
    %69 = arith.addf %67, %68 : vector<1x1x64xf32>
    %70 = arith.addf %69, %62 : vector<1x1x64xf32>
    %c0_20 = arith.constant 0 : index
    %c0_21 = arith.constant 0 : index
    %c0_22 = arith.constant 0 : index
    %71 = vector.load %arg5[%c0_20, %c0_21, %c0_22] : memref<1x1x64xf32, #tpu.memory_space<vmem>>, vector<1x1x64xf32>
    %72 = arith.addf %70, %71 : vector<1x1x64xf32>
    %73 = vector.shape_cast %72 : vector<1x1x64xf32> to vector<1x64xf32>
    %74 = arith.truncf %73 : vector<1x64xf32> to vector<1x64xbf16>
    %c0_23 = arith.constant 0 : index
    %c0_24 = arith.constant 0 : index
    %75 = vector.load %arg6[%c0_23, %c0_24] : memref<64x64xbf16, #tpu.memory_space<vmem>>, vector<64x64xbf16>
    %cst_25 = arith.constant dense<0.000000e+00> : vector<1x64xf32>
    %76 = tpu.matmul %74, %75, %cst_25 {dimension_numbers = #tpu.dot_dimension_numbers<[1], [0], [0], [1], [0, 0, 1, 1], [], []>} : vector<1x64xbf16>, vector<64x64xbf16>, vector<1x64xf32> -> vector<1x64xf32>
    %c0_26 = arith.constant 0 : index
    %c0_27 = arith.constant 0 : index
    %77 = vector.load %arg7[%c0_26, %c0_27] : memref<1x64xf32, #tpu.memory_space<vmem>>, vector<1x64xf32>
    %78 = arith.addf %76, %77 : vector<1x64xf32>
    %cst_28 = arith.constant 0.000000e+00 : f32
    %79 = vector.broadcast %cst_28 : f32 to vector<1x64xf32>
    %80 = arith.maximumf %78, %79 : vector<1x64xf32>
    %81 = vector.shape_cast %80 : vector<1x64xf32> to vector<1x1x64xf32>
    %82 = tpu.concatenate %2, %81 in 2 : vector<1x1x64xf32>, vector<1x1x64xf32> -> vector<1x1x128xf32>
    %c0_29 = arith.constant 0 : index
    %c0_30 = arith.constant 0 : index
    %c0_31 = arith.constant 0 : index
    %c0_32 = arith.constant 0 : index
    %83 = vector.load %arg8[%c0_29, %c0_30, %c0_31, %c0_32] : memref<1x1x1x128xf32, #tpu.memory_space<vmem>>, vector<1x1x1x128xf32>
    %84 = vector.shape_cast %83 : vector<1x1x1x128xf32> to vector<1x1x128xf32>
    %85 = vector.shape_cast %82 : vector<1x1x128xf32> to vector<1x1x1x128xf32>
    tpu.vector_store %arg8[%c0_29, %c0_30, %c0_31, %c0_32], %85 {strides = array<i32>} : memref<1x1x1x128xf32, #tpu.memory_space<vmem>>, vector<1x1x1x128xf32>,
    return
  }
  func.func @transform_0(%arg0: i32) -> (i32, i32, i32, i32) {
    %c0_i32 = arith.constant 0 : i32
    %c0_i32_0 = arith.constant 0 : i32
    %c0_i32_1 = arith.constant 0 : i32
    %c0_i32_2 = arith.constant 0 : i32
    return %arg0, %c0_i32, %c0_i32_0, %c0_i32_1 : i32, i32, i32, i32
  }
  func.func @transform_1(%arg0: i32) -> (i32, i32) {
    %c0_i32 = arith.constant 0 : i32
    %c0_i32_0 = arith.constant 0 : i32
    %c0_i32_1 = arith.constant 0 : i32
    return %c0_i32, %c0_i32_0 : i32, i32
  }
  func.func @transform_2(%arg0: i32) -> (i32, i32) {
    %c0_i32 = arith.constant 0 : i32
    %c0_i32_0 = arith.constant 0 : i32
    %c0_i32_1 = arith.constant 0 : i32
    return %c0_i32, %c0_i32_0 : i32, i32
  }
  func.func @transform_3(%arg0: i32) -> (i32, i32, i32) {
    %c0_i32 = arith.constant 0 : i32
    %c0_i32_0 = arith.constant 0 : i32
    %c0_i32_1 = arith.constant 0 : i32
    %c0_i32_2 = arith.constant 0 : i32
    return %c0_i32, %c0_i32_0, %c0_i32_1 : i32, i32, i32
  }
  func.func @transform_4(%arg0: i32) -> (i32, i32, i32) {
    %c0_i32 = arith.constant 0 : i32
    %c0_i32_0 = arith.constant 0 : i32
    %c0_i32_1 = arith.constant 0 : i32
    %c0_i32_2 = arith.constant 0 : i32
    return %c0_i32, %c0_i32_0, %c0_i32_1 : i32, i32, i32
  }
  func.func @transform_5(%arg0: i32) -> (i32, i32) {
    %c0_i32 = arith.constant 0 : i32
    %c0_i32_0 = arith.constant 0 : i32
    %c0_i32_1 = arith.constant 0 : i32
    return %c0_i32, %c0_i32_0 : i32, i32
  }
  func.func @transform_6(%arg0: i32) -> (i32, i32) {
    %c0_i32 = arith.constant 0 : i32
    %c0_i32_0 = arith.constant 0 : i32
    %c0_i32_1 = arith.constant 0 : i32
    return %c0_i32, %c0_i32_0 : i32, i32
  }
  func.func @transform_7(%arg0: i32) -> (i32, i32, i32, i32) {
    %c0_i32 = arith.constant 0 : i32
    %c0_i32_0 = arith.constant 0 : i32
    %c0_i32_1 = arith.constant 0 : i32
    %c0_i32_2 = arith.constant 0 : i32
    return %arg0, %c0_i32, %c0_i32_0, %c0_i32_1 : i32, i32, i32, i32
  }
}

</mosaic_0001>

<bundles_post_ra>
// kernel: _lambda_.25
= control target key start
LH: loop header
LB: loop body
LE: loop exit
PB: predicated region body
PF: predicated region fallthrough
CT: control target
= control target key end

     0   :  { %s1046_s6 = smov 0   ;;  %s1048_s7 = smov 0   ;;  %s1417_s0 = inlined_call_operand.vmem [shape: f32[6,16,9,24], index: 0, kind: input, shape index: {}]   ;;  %s1418_s1 = inlined_call_operand.vmem [shape: f32[16,8,24], index: 1, kind: output, shape index: {}]  }
   0x1   :  { %s1050_s8 = smov 0  }
   0x2 LB: > { %s916_s9 = sadd.s32 4294967295, %s1034_s8   ;;  %s1063_s10 = sadd.s32 1, %s1034_s8   ;;  %s1034_s8 = sphi %s1050_s8, %s1421_s8   ;;  %s1030_s7 = sphi %s1048_s7, %s1420_s7   ;;  %s1026_s6 = sphi %s1046_s6, %s1419_s6  }
   0x3   : > { %s15_s11 = ssub.s32 %s1034_s8, %s1063_s10  ;;  %s18_s12 = sadd.s32 1, %s1030_s7 }
   0x4   : > { %p16_p0 = scmp.eq.s32.totalorder %s15_s11, 0  ;;  %p25_p1 = scmp.ne.s32.totalorder %s1030_s7, %s1026_s6 }
   0x5   : > { %p26_p2 = scmp.eq.s32.totalorder %s1034_s8, 0  ;;  %p919_p4 = scmp.ge.s32.totalorder %s1034_s8, 2 }
   0x6   : > { %s1072_s13 = scalar_select %p16_p0, %s1030_s7, %s18_s12  }
   0x7   : > { %p27_p3 = por %p26_p2, %p25_p1  ;;  %77 = sbr.rel (%p919_p4) target bundleno = 67 (0x43), region = 16 }
   0xe   : > { %80 = sbr.rel (!%p27_p3) target bundleno = 67 (0x43), region = 20  ;;  %s82_s14 = sand.u32 (%p27_p3), 1, %s1030_s7  }
   0xf   : > { %s985_s15 = sshll.u32 (%p27_p3), %s1034_s8, 7  ;;  %s986_s16 = smul.u32 (%p27_p3), 768, %s82_s14 }
  0x10   : > { %s1080_s19 = scalar_lea.vmem (%p27_p3), %s1417_s0, %s985_s15 }
  0x11   : > { %v306_v0 = vld [vmem:[%s1080_s19] sm:$0xff] (%p27_p3)  ;;  %v308_v1 = vld [vmem:[%s1080_s19 + $0x8] sm:$0xff] (%p27_p3)  ;;  %v310_v2 = vld [vmem:[%s1080_s19 + $0x10] sm:$0xff] (%p27_p3)  ;;  %s1088_s20 = scalar_lea.vmem (%p27_p3), [#allocation2], %s986_s16 }
  0x12   : > { %v312_v3 = vld [vmem:[%s1080_s19 + $0x18] sm:$0xff] (%p27_p3)  ;;  %v314_v4 = vld [vmem:[%s1080_s19 + $0x20] sm:$0xff] (%p27_p3)  ;;  %v316_v5 = vld [vmem:[%s1080_s19 + $0x28] sm:$0xff] (%p27_p3)  ;;  %307 = vst [vmem:[%s1088_s20] sm:$0xff] (%p27_p3), %v306_v0 }
  0x13   : > { %309 = vst [vmem:[%s1088_s20 + $0x8] sm:$0xff] (%p27_p3), %v308_v1  ;;  %311 = vst [vmem:[%s1088_s20 + $0x10] sm:$0xff] (%p27_p3), %v310_v2  ;;  %v318_v6 = vld [vmem:[%s1080_s19 + $0x30] sm:$0xff] (%p27_p3)  ;;  %v320_v7 = vld [vmem:[%s1080_s19 + $0x38] sm:$0xff] (%p27_p3) }
  0x14   : > { %313 = vst [vmem:[%s1088_s20 + $0x18] sm:$0xff] (%p27_p3), %v312_v3  ;;  %315 = vst [vmem:[%s1088_s20 + $0x20] sm:$0xff] (%p27_p3), %v314_v4  ;;  %v322_v8 = vld [vmem:[%s1080_s19 + $0x40] sm:$0xff] (%p27_p3)  ;;  %v324_v9 = vld [vmem:[%s1080_s19 + $0x48] sm:$0xff] (%p27_p3) }
  0x15   : > { %317 = vst [vmem:[%s1088_s20 + $0x28] sm:$0xff] %v316_v5  ;;  %319 = vst [vmem:[%s1088_s20 + $0x30] sm:$0xff] %v318_v6  ;;  %v326_v10 = vld [vmem:[%s1080_s19 + $0x50] sm:$0xff]  ;;  %v328_v11 = vld [vmem:[%s1080_s19 + $0x58] sm:$0xff] }
  0x16   : > { %321 = vst [vmem:[%s1088_s20 + $0x38] sm:$0xff] %v320_v7  ;;  %323 = vst [vmem:[%s1088_s20 + $0x40] sm:$0xff] %v322_v8  ;;  %v330_v12 = vld [vmem:[%s1080_s19 + $0x60] sm:$0xff]  ;;  %v332_v13 = vld [vmem:[%s1080_s19 + $0x68] sm:$0xff] }
  0x17   : > { %325 = vst [vmem:[%s1088_s20 + $0x48] sm:$0xff] %v324_v9  ;;  %327 = vst [vmem:[%s1088_s20 + $0x50] sm:$0xff] %v326_v10  ;;  %v334_v14 = vld [vmem:[%s1080_s19 + $0x70] sm:$0xff]  ;;  %v336_v15 = vld [vmem:[%s1080_s19 + $0x78] sm:$0xff] }
  0x18   : > { %329 = vst [vmem:[%s1088_s20 + $0x58] sm:$0xff] %v328_v11  ;;  %331 = vst [vmem:[%s1088_s20 + $0x60] sm:$0xff] %v330_v12  ;;  %v338_v16 = vld [vmem:[%s1080_s19 + $0x100] sm:$0xff]  ;;  %v340_v17 = vld [vmem:[%s1080_s19 + $0x108] sm:$0xff] }
  0x19   : > { %333 = vst [vmem:[%s1088_s20 + $0x68] sm:$0xff] %v332_v13  ;;  %335 = vst [vmem:[%s1088_s20 + $0x70] sm:$0xff] %v334_v14  ;;  %v342_v18 = vld [vmem:[%s1080_s19 + $0x110] sm:$0xff]  ;;  %v344_v19 = vld [vmem:[%s1080_s19 + $0x118] sm:$0xff] }
  0x1a   : > { %337 = vst [vmem:[%s1088_s20 + $0x78] sm:$0xff] %v336_v15  ;;  %339 = vst [vmem:[%s1088_s20 + $0x80] sm:$0xff] %v338_v16  ;;  %v346_v20 = vld [vmem:[%s1080_s19 + $0x120] sm:$0xff]  ;;  %v348_v21 = vld [vmem:[%s1080_s19 + $0x128] sm:$0xff] }
  0x1b   : > { %341 = vst [vmem:[%s1088_s20 + $0x88] sm:$0xff] %v340_v17  ;;  %343 = vst [vmem:[%s1088_s20 + $0x90] sm:$0xff] %v342_v18  ;;  %v350_v22 = vld [vmem:[%s1080_s19 + $0x130] sm:$0xff]  ;;  %v352_v23 = vld [vmem:[%s1080_s19 + $0x138] sm:$0xff] }
  0x1c   : > { %345 = vst [vmem:[%s1088_s20 + $0x98] sm:$0xff] %v344_v19  ;;  %347 = vst [vmem:[%s1088_s20 + $0xa0] sm:$0xff] %v346_v20  ;;  %v354_v24 = vld [vmem:[%s1080_s19 + $0x140] sm:$0xff]  ;;  %v356_v25 = vld [vmem:[%s1080_s19 + $0x148] sm:$0xff] }
  0x1d   : > { %349 = vst [vmem:[%s1088_s20 + $0xa8] sm:$0xff] %v348_v21  ;;  %351 = vst [vmem:[%s1088_s20 + $0xb0] sm:$0xff] %v350_v22  ;;  %v358_v26 = vld [vmem:[%s1080_s19 + $0x150] sm:$0xff]  ;;  %v360_v27 = vld [vmem:[%s1080_s19 + $0x158] sm:$0xff] }
  0x1e   : > { %353 = vst [vmem:[%s1088_s20 + $0xb8] sm:$0xff] %v352_v23  ;;  %355 = vst [vmem:[%s1088_s20 + $0xc0] sm:$0xff] %v354_v24  ;;  %v362_v28 = vld [vmem:[%s1080_s19 + $0x160] sm:$0xff]  ;;  %v364_v29 = vld [vmem:[%s1080_s19 + $0x168] sm:$0xff] }
  0x1f   : > { %357 = vst [vmem:[%s1088_s20 + $0xc8] sm:$0xff] %v356_v25  ;;  %359 = vst [vmem:[%s1088_s20 + $0xd0] sm:$0xff] %v358_v26  ;;  %v366_v30 = vld [vmem:[%s1080_s19 + $0x170] sm:$0xff]  ;;  %v368_v31 = vld [vmem:[%s1080_s19 + $0x178] sm:$0xff] }
  0x20   : > { %361 = vst [vmem:[%s1088_s20 + $0xd8] sm:$0xff] %v360_v27  ;;  %363 = vst [vmem:[%s1088_s20 + $0xe0] sm:$0xff] %v362_v28  ;;  %v370_v32 = vld [vmem:[%s1080_s19 + $0x200] sm:$0xff]  ;;  %v372_v33 = vld [vmem:[%s1080_s19 + $0x208] sm:$0xff] }
  0x21   : > { %365 = vst [vmem:[%s1088_s20 + $0xe8] sm:$0xff] %v364_v29  ;;  %367 = vst [vmem:[%s1088_s20 + $0xf0] sm:$0xff] %v366_v30  ;;  %v374_v34 = vld [vmem:[%s1080_s19 + $0x210] sm:$0xff]  ;;  %v376_v35 = vld [vmem:[%s1080_s19 + $0x218] sm:$0xff] }
  0x22   : > { %369 = vst [vmem:[%s1088_s20 + $0xf8] sm:$0xff] %v368_v31  ;;  %371 = vst [vmem:[%s1088_s20 + $0x100] sm:$0xff] %v370_v32  ;;  %v378_v36 = vld [vmem:[%s1080_s19 + $0x220] sm:$0xff]  ;;  %v380_v37 = vld [vmem:[%s1080_s19 + $0x228] sm:$0xff] }
  0x23   : > { %373 = vst [vmem:[%s1088_s20 + $0x108] sm:$0xff] %v372_v33  ;;  %375 = vst [vmem:[%s1088_s20 + $0x110] sm:$0xff] %v374_v34  ;;  %v382_v38 = vld [vmem:[%s1080_s19 + $0x230] sm:$0xff]  ;;  %v384_v39 = vld [vmem:[%s1080_s19 + $0x238] sm:$0xff] }
  0x24   : > { %377 = vst [vmem:[%s1088_s20 + $0x118] sm:$0xff] %v376_v35  ;;  %379 = vst [vmem:[%s1088_s20 + $0x120] sm:$0xff] %v378_v36  ;;  %v386_v40 = vld [vmem:[%s1080_s19 + $0x240] sm:$0xff]  ;;  %v388_v41 = vld [vmem:[%s1080_s19 + $0x248] sm:$0xff] }
  0x25   : > { %381 = vst [vmem:[%s1088_s20 + $0x128] sm:$0xff] %v380_v37  ;;  %383 = vst [vmem:[%s1088_s20 + $0x130] sm:$0xff] %v382_v38  ;;  %v390_v42 = vld [vmem:[%s1080_s19 + $0x250] sm:$0xff]  ;;  %v392_v43 = vld [vmem:[%s1080_s19 + $0x258] sm:$0xff] }
  0x26   : > { %385 = vst [vmem:[%s1088_s20 + $0x138] sm:$0xff] %v384_v39  ;;  %387 = vst [vmem:[%s1088_s20 + $0x140] sm:$0xff] %v386_v40  ;;  %v394_v44 = vld [vmem:[%s1080_s19 + $0x260] sm:$0xff]  ;;  %v396_v45 = vld [vmem:[%s1080_s19 + $0x268] sm:$0xff] }
  0x27   : > { %389 = vst [vmem:[%s1088_s20 + $0x148] sm:$0xff] %v388_v41  ;;  %391 = vst [vmem:[%s1088_s20 + $0x150] sm:$0xff] %v390_v42  ;;  %v398_v46 = vld [vmem:[%s1080_s19 + $0x270] sm:$0xff]  ;;  %v400_v47 = vld [vmem:[%s1080_s19 + $0x278] sm:$0xff] }
  0x28   : > { %393 = vst [vmem:[%s1088_s20 + $0x158] sm:$0xff] %v392_v43  ;;  %395 = vst [vmem:[%s1088_s20 + $0x160] sm:$0xff] %v394_v44  ;;  %v402_v48 = vld [vmem:[%s1080_s19 + $0x300] sm:$0xff]  ;;  %v404_v49 = vld [vmem:[%s1080_s19 + $0x308] sm:$0xff] }
  0x29   : > { %397 = vst [vmem:[%s1088_s20 + $0x168] sm:$0xff] %v396_v45  ;;  %399 = vst [vmem:[%s1088_s20 + $0x170] sm:$0xff] %v398_v46  ;;  %v406_v50 = vld [vmem:[%s1080_s19 + $0x310] sm:$0xff]  ;;  %v408_v51 = vld [vmem:[%s1080_s19 + $0x318] sm:$0xff] }
  0x2a   : > { %401 = vst [vmem:[%s1088_s20 + $0x178] sm:$0xff] %v400_v47  ;;  %403 = vst [vmem:[%s1088_s20 + $0x180] sm:$0xff] %v402_v48  ;;  %v410_v52 = vld [vmem:[%s1080_s19 + $0x320] sm:$0xff]  ;;  %v412_v53 = vld [vmem:[%s1080_s19 + $0x328] sm:$0xff] }
  0x2b   : > { %405 = vst [vmem:[%s1088_s20 + $0x188] sm:$0xff] %v404_v49  ;;  %407 = vst [vmem:[%s1088_s20 + $0x190] sm:$0xff] %v406_v50  ;;  %v414_v54 = vld [vmem:[%s1080_s19 + $0x330] sm:$0xff]  ;;  %v416_v55 = vld [vmem:[%s1080_s19 + $0x338] sm:$0xff] }
  0x2c   : > { %409 = vst [vmem:[%s1088_s20 + $0x198] sm:$0xff] %v408_v51  ;;  %411 = vst [vmem:[%s1088_s20 + $0x1a0] sm:$0xff] %v410_v52  ;;  %v418_v56 = vld [vmem:[%s1080_s19 + $0x340] sm:$0xff]  ;;  %v420_v57 = vld [vmem:[%s1080_s19 + $0x348] sm:$0xff] }
  0x2d   : > { %413 = vst [vmem:[%s1088_s20 + $0x1a8] sm:$0xff] %v412_v53  ;;  %415 = vst [vmem:[%s1088_s20 + $0x1b0] sm:$0xff] %v414_v54  ;;  %v422_v58 = vld [vmem:[%s1080_s19 + $0x350] sm:$0xff]  ;;  %v424_v59 = vld [vmem:[%s1080_s19 + $0x358] sm:$0xff] }
  0x2e   : > { %417 = vst [vmem:[%s1088_s20 + $0x1b8] sm:$0xff] %v416_v55  ;;  %419 = vst [vmem:[%s1088_s20 + $0x1c0] sm:$0xff] %v418_v56  ;;  %v426_v60 = vld [vmem:[%s1080_s19 + $0x360] sm:$0xff]  ;;  %v428_v61 = vld [vmem:[%s1080_s19 + $0x368] sm:$0xff] }
  0x2f   : > { %421 = vst [vmem:[%s1088_s20 + $0x1c8] sm:$0xff] %v420_v57  ;;  %423 = vst [vmem:[%s1088_s20 + $0x1d0] sm:$0xff] %v422_v58  ;;  %v430_v62 = vld [vmem:[%s1080_s19 + $0x370] sm:$0xff]  ;;  %v432_v63 = vld [vmem:[%s1080_s19 + $0x378] sm:$0xff] }
  0x30   : > { %425 = vst [vmem:[%s1088_s20 + $0x1d8] sm:$0xff] %v424_v59  ;;  %427 = vst [vmem:[%s1088_s20 + $0x1e0] sm:$0xff] %v426_v60  ;;  %v434_v0 = vld [vmem:[%s1080_s19 + $0x400] sm:$0xff]  ;;  %v436_v1 = vld [vmem:[%s1080_s19 + $0x408] sm:$0xff] }
  0x31   : > { %429 = vst [vmem:[%s1088_s20 + $0x1e8] sm:$0xff] %v428_v61  ;;  %431 = vst [vmem:[%s1088_s20 + $0x1f0] sm:$0xff] %v430_v62  ;;  %v438_v2 = vld [vmem:[%s1080_s19 + $0x410] sm:$0xff]  ;;  %v440_v3 = vld [vmem:[%s1080_s19 + $0x418] sm:$0xff] }
  0x32   : > { %433 = vst [vmem:[%s1088_s20 + $0x1f8] sm:$0xff] %v432_v63  ;;  %435 = vst [vmem:[%s1088_s20 + $0x200] sm:$0xff] %v434_v0  ;;  %v442_v4 = vld [vmem:[%s1080_s19 + $0x420] sm:$0xff]  ;;  %v444_v5 = vld [vmem:[%s1080_s19 + $0x428] sm:$0xff] }
  0x33   : > { %437 = vst [vmem:[%s1088_s20 + $0x208] sm:$0xff] %v436_v1  ;;  %439 = vst [vmem:[%s1088_s20 + $0x210] sm:$0xff] %v438_v2  ;;  %v446_v6 = vld [vmem:[%s1080_s19 + $0x430] sm:$0xff]  ;;  %v448_v7 = vld [vmem:[%s1080_s19 + $0x438] sm:$0xff] }
  0x34   : > { %441 = vst [vmem:[%s1088_s20 + $0x218] sm:$0xff] %v440_v3  ;;  %443 = vst [vmem:[%s1088_s20 + $0x220] sm:$0xff] %v442_v4  ;;  %v450_v8 = vld [vmem:[%s1080_s19 + $0x440] sm:$0xff]  ;;  %v452_v9 = vld [vmem:[%s1080_s19 + $0x448] sm:$0xff] }
  0x35   : > { %445 = vst [vmem:[%s1088_s20 + $0x228] sm:$0xff] %v444_v5  ;;  %447 = vst [vmem:[%s1088_s20 + $0x230] sm:$0xff] %v446_v6  ;;  %v454_v10 = vld [vmem:[%s1080_s19 + $0x450] sm:$0xff]  ;;  %v456_v11 = vld [vmem:[%s1080_s19 + $0x458] sm:$0xff] }
  0x36   : > { %449 = vst [vmem:[%s1088_s20 + $0x238] sm:$0xff] %v448_v7  ;;  %451 = vst [vmem:[%s1088_s20 + $0x240] sm:$0xff] %v450_v8  ;;  %v458_v12 = vld [vmem:[%s1080_s19 + $0x460] sm:$0xff]  ;;  %v460_v13 = vld [vmem:[%s1080_s19 + $0x468] sm:$0xff] }
  0x37   : > { %453 = vst [vmem:[%s1088_s20 + $0x248] sm:$0xff] %v452_v9  ;;  %455 = vst [vmem:[%s1088_s20 + $0x250] sm:$0xff] %v454_v10  ;;  %v462_v14 = vld [vmem:[%s1080_s19 + $0x470] sm:$0xff]  ;;  %v464_v15 = vld [vmem:[%s1080_s19 + $0x478] sm:$0xff] }
  0x38   : > { %457 = vst [vmem:[%s1088_s20 + $0x258] sm:$0xff] %v456_v11  ;;  %459 = vst [vmem:[%s1088_s20 + $0x260] sm:$0xff] %v458_v12  ;;  %v466_v16 = vld [vmem:[%s1080_s19 + $0x500] sm:$0xff]  ;;  %v468_v17 = vld [vmem:[%s1080_s19 + $0x508] sm:$0xff] }
  0x39   : > { %461 = vst [vmem:[%s1088_s20 + $0x268] sm:$0xff] %v460_v13  ;;  %463 = vst [vmem:[%s1088_s20 + $0x270] sm:$0xff] %v462_v14  ;;  %v470_v18 = vld [vmem:[%s1080_s19 + $0x510] sm:$0xff]  ;;  %v472_v19 = vld [vmem:[%s1080_s19 + $0x518] sm:$0xff] }
  0x3a   : > { %465 = vst [vmem:[%s1088_s20 + $0x278] sm:$0xff] %v464_v15  ;;  %467 = vst [vmem:[%s1088_s20 + $0x280] sm:$0xff] %v466_v16  ;;  %v474_v20 = vld [vmem:[%s1080_s19 + $0x520] sm:$0xff]  ;;  %v476_v21 = vld [vmem:[%s1080_s19 + $0x528] sm:$0xff] }
  0x3b   : > { %469 = vst [vmem:[%s1088_s20 + $0x288] sm:$0xff] %v468_v17  ;;  %471 = vst [vmem:[%s1088_s20 + $0x290] sm:$0xff] %v470_v18  ;;  %v478_v22 = vld [vmem:[%s1080_s19 + $0x530] sm:$0xff]  ;;  %v480_v23 = vld [vmem:[%s1080_s19 + $0x538] sm:$0xff] }
  0x3c   : > { %473 = vst [vmem:[%s1088_s20 + $0x298] sm:$0xff] %v472_v19  ;;  %475 = vst [vmem:[%s1088_s20 + $0x2a0] sm:$0xff] %v474_v20  ;;  %v482_v24 = vld [vmem:[%s1080_s19 + $0x540] sm:$0xff]  ;;  %v484_v25 = vld [vmem:[%s1080_s19 + $0x548] sm:$0xff] }
  0x3d   : > { %477 = vst [vmem:[%s1088_s20 + $0x2a8] sm:$0xff] %v476_v21  ;;  %479 = vst [vmem:[%s1088_s20 + $0x2b0] sm:$0xff] %v478_v22  ;;  %v486_v26 = vld [vmem:[%s1080_s19 + $0x550] sm:$0xff]  ;;  %v488_v27 = vld [vmem:[%s1080_s19 + $0x558] sm:$0xff] }
  0x3e   : > { %481 = vst [vmem:[%s1088_s20 + $0x2b8] sm:$0xff] %v480_v23  ;;  %483 = vst [vmem:[%s1088_s20 + $0x2c0] sm:$0xff] %v482_v24  ;;  %v490_v28 = vld [vmem:[%s1080_s19 + $0x560] sm:$0xff]  ;;  %v492_v29 = vld [vmem:[%s1080_s19 + $0x568] sm:$0xff] }
  0x3f   : > { %485 = vst [vmem:[%s1088_s20 + $0x2c8] sm:$0xff] %v484_v25  ;;  %487 = vst [vmem:[%s1088_s20 + $0x2d0] sm:$0xff] %v486_v26  ;;  %v494_v30 = vld [vmem:[%s1080_s19 + $0x570] sm:$0xff]  ;;  %v496_v31 = vld [vmem:[%s1080_s19 + $0x578] sm:$0xff] }
  0x40   : > { %489 = vst [vmem:[%s1088_s20 + $0x2d8] sm:$0xff] %v488_v27  ;;  %491 = vst [vmem:[%s1088_s20 + $0x2e0] sm:$0xff] %v490_v28 }
  0x41   : > { %493 = vst [vmem:[%s1088_s20 + $0x2e8] sm:$0xff] %v492_v29  ;;  %495 = vst [vmem:[%s1088_s20 + $0x2f0] sm:$0xff] %v494_v30 }
  0x42   : > { %497 = vst [vmem:[%s1088_s20 + $0x2f8] sm:$0xff] %v496_v31 }
  0x43 PF: > { %p923_p5 = scmp.ge.s32.totalorder %s1034_s8, 1  ;;  %p502_p6 = scmp.lt.s32.totalorder %s1034_s8, 3 }
  0x45   : > { %p503_p7 = pnand %p923_p5, %p502_p6 }
  0x46   : > { %s509_s21 = sand.u32 (!%p503_p7), 1, %s1026_s6   ;;  %s924_s23 = sshll.u32 (!%p503_p7), %s916_s9, 3  ;;  %vm668_vm0 = vcmask (!%p503_p7), 1046528   ;;  %vm845_vm1 = vcmask (!%p503_p7), 195584  }
  0x47   : > { %506 = sbr.rel (%p503_p7) target bundleno = 124 (0x7c), region = 58  ;;  %p530_p8 = scmp.lt.s32.totalorder (!%p503_p7), %s924_s23, 15 }
  0x48   : > { %s987_s22 = smul.u32 (!%p503_p7), 768, %s509_s21 }
  0x4a   : > { %s1281_s24 = scalar_lea.vmem (!%p503_p7), [#allocation2], %s987_s22 }
  0x4b   : > { %v535_v32 = vld [vmem:[%s1281_s24] sm:$0xff] (!%p503_p7)  ;;  %v536_v33 = vld [vmem:[%s1281_s24 + $0x8] sm:$0x1] (!%p503_p7)  ;;  %v537_v46 = vld [vmem:[%s1281_s24 + $0x10] sm:$0xff] (!%p503_p7) }
  0x4c   : > { %v926_v34 = vld [vmem:[%s1281_s24 + $0x80] sm:$0xff] (!%p503_p7)  ;;  %v935_v36 = vld [vmem:[%s1281_s24 + $0x108] sm:$0x1] (!%p503_p7)  ;;  %v538_v47 = vld [vmem:[%s1281_s24 + $0x18] sm:$0x1] (!%p503_p7) }
  0x4d   : > { %v934_v35 = vld [vmem:[%s1281_s24 + $0x100] sm:$0xff] (!%p503_p7)  ;;  %v959_v39 = vld [vmem:[%s1281_s24 + $0x208] sm:$0x1] (!%p503_p7)  ;;  %v612_v42 = vmax.f32 (!%p503_p7), %v535_v32, %v926_v34  ;;  %v670_v44 = vrot.slane (!%p503_p7), %v935_v36, 1  ;;  %v927_v52 = vld [vmem:[%s1281_s24 + $0x90] sm:$0xff] (!%p503_p7) }
  0x4e   : > { %v950_v37 = vld [vmem:[%s1281_s24 + $0x180] sm:$0xff]  ;;  %v628_v41 = vrot.slane %v934_v35, 7  ;;  %v669_v43 = vrot.slane %v934_v35, 1  ;;  %v806_v51 = vrot.slane %v959_v39, 1  ;;  %v936_v53 = vld [vmem:[%s1281_s24 + $0x110] sm:$0xff]  ;;  %s1423_s23 = smov (!%p530_p8, %s924_s23), 15  ;;  %v613_v58 = vmax.f32 %v537_v46, %v927_v52 }
  0x4f   : > { %v958_v38 = vld [vmem:[%s1281_s24 + $0x200] sm:$0xff]  ;;  %v937_v54 = vld [vmem:[%s1281_s24 + $0x118] sm:$0x1]  ;;  %v960_v56 = vld [vmem:[%s1281_s24 + $0x210] sm:$0xff]  ;;  %v629_v59 = vrot.slane %v936_v53, 7  ;;  %v672_v60 = vrot.slane %v936_v53, 1 }
  0x50   : > { %v974_v40 = vld [vmem:[%s1281_s24 + $0x280] sm:$0xff]  ;;  %v805_v45 = vrot.slane %v958_v38, 1  ;;  %v644_v48 = vmax.f32 %v535_v32, %v628_v41  ;;  %v645_v49 = vmax.f32 %v536_v33, %v628_v41  ;;  %v671_v55 = vsel %vm668_vm0, %v669_v43, %v670_v44  ;;  %v961_v57 = vld [vmem:[%s1281_s24 + $0x218] sm:$0x1]  ;;  %v975_v1 = vld [vmem:[%s1281_s24 + $0x290] sm:$0xff]  ;;  %s925_s25 = sshll.u32 %s1423_s23, 3 }
  0x51   : > { %v709_v50 = vmax.f32 %v958_v38, %v974_v40  ;;  %v701_v61 = vmax.f32 %v950_v37, %v671_v55  ;;  %v951_v2 = vld [vmem:[%s1281_s24 + $0x190] sm:$0xff]  ;;  %v646_v3 = vmax.f32 %v537_v46, %v629_v59  ;;  %v647_v4 = vmax.f32 %v538_v47, %v629_v59  ;;  %v928_v7 = vld [vmem:[%s1281_s24 + $0xa0] sm:$0xff]  ;;  %v939_v13 = vld [vmem:[%s1281_s24 + $0x128] sm:$0x1]  ;;  %s1322_s28 = scalar_lea.vmem %s1418_s1, %s925_s25 }
  0x52   : > { %v733_v62 = vrot.slane %v644_v48, 1  ;;  %v734_v63 = vrot.slane %v645_v49, 1  ;;  %v807_v0 = vsel %vm668_vm0, %v805_v45, %v806_v51  ;;  %v673_v5 = vrot.slane %v937_v54, 1  ;;  %v938_v8 = vld [vmem:[%s1281_s24 + $0x120] sm:$0xff]  ;;  %v540_v19 = vld [vmem:[%s1281_s24 + $0x28] sm:$0x1] }
  0x53   : > { %v710_v6 = vmax.f32 %v960_v56, %v975_v1  ;;  %v773_v10 = vmax.f32 %v701_v61, %v709_v50  ;;  %v808_v11 = vrot.slane %v960_v56, 1  ;;  %v809_v12 = vrot.slane %v961_v57, 1  ;;  %v539_v18 = vld [vmem:[%s1281_s24 + $0x20] sm:$0xff]  ;;  %v963_v33 = vld [vmem:[%s1281_s24 + $0x228] sm:$0x1]  ;;  %v929_v36 = vld [vmem:[%s1281_s24 + $0xb0] sm:$0xff] }
  0x54   : > { %v735_v9 = vsel %vm668_vm0, %v733_v62, %v734_v63  ;;  %v674_v15 = vsel %vm668_vm0, %v672_v60, %v673_v5  ;;  %v736_v16 = vrot.slane %v646_v3, 1  ;;  %v737_v17 = vrot.slane %v647_v4, 1  ;;  %v962_v22 = vld [vmem:[%s1281_s24 + $0x220] sm:$0xff]  ;;  %v940_v37 = vld [vmem:[%s1281_s24 + $0x130] sm:$0xff]  ;;  %v542_v48 = vld [vmem:[%s1281_s24 + $0x38] sm:$0x1] }
  0x55   : > { %v765_v14 = vmax.f32 %v612_v42, %v735_v9  ;;  %v702_v20 = vmax.f32 %v951_v2, %v674_v15  ;;  %v810_v21 = vsel %vm668_vm0, %v808_v11, %v809_v12  ;;  %v976_v23 = vld [vmem:[%s1281_s24 + $0x2a0] sm:$0xff]  ;;  %v614_v24 = vmax.f32 %v539_v18, %v928_v7  ;;  %v941_v42 = vld [vmem:[%s1281_s24 + $0x138] sm:$0x1]  ;;  %v541_v47 = vld [vmem:[%s1281_s24 + $0x30] sm:$0xff] }
  0x56   : > { %v630_v25 = vrot.slane %v938_v8, 7  ;;  %v738_v27 = vsel %vm668_vm0, %v736_v16, %v737_v17  ;;  %v952_v28 = vld [vmem:[%s1281_s24 + $0x1a0] sm:$0xff]  ;;  %v675_v29 = vrot.slane %v938_v8, 1  ;;  %v676_v30 = vrot.slane %v939_v13, 1  ;;  %v964_v49 = vld [vmem:[%s1281_s24 + $0x230] sm:$0xff] }
  0x57   : > { %v781_v26 = vmax.f32 %v765_v14, %v773_v10  ;;  %v766_v31 = vmax.f32 %v613_v58, %v738_v27  ;;  %v774_v32 = vmax.f32 %v702_v20, %v710_v6  ;;  %v711_v40 = vmax.f32 %v962_v22, %v976_v23  ;;  %v965_v51 = vld [vmem:[%s1281_s24 + $0x238] sm:$0x1]  ;;  %v977_v52 = vld [vmem:[%s1281_s24 + $0x2b0] sm:$0xff]  ;;  %v930_v1 = vld [vmem:[%s1281_s24 + $0xc0] sm:$0xff] }
  0x58   : > { %v648_v34 = vmax.f32 %v539_v18, %v630_v25  ;;  %v649_v35 = vmax.f32 %v540_v19, %v630_v25  ;;  %v677_v39 = vsel %vm668_vm0, %v675_v29, %v676_v30  ;;  %v811_v41 = vrot.slane %v962_v22, 1  ;;  %v953_v59 = vld [vmem:[%s1281_s24 + $0x1b0] sm:$0xff]  ;;  %v942_v2 = vld [vmem:[%s1281_s24 + $0x140] sm:$0xff]  ;;  %v943_v8 = vld [vmem:[%s1281_s24 + $0x148] sm:$0x1] }
  0x59   : > { %v837_v38 = vmax.f32 %v781_v26, %v807_v0  ;;  %v782_v43 = vmax.f32 %v766_v31, %v774_v32  ;;  %v703_v44 = vmax.f32 %v952_v28, %v677_v39  ;;  %v812_v50 = vrot.slane %v963_v33, 1  ;;  %v543_v7 = vld [vmem:[%s1281_s24 + $0x40] sm:$0xff]  ;;  %v544_v13 = vld [vmem:[%s1281_s24 + $0x48] sm:$0x1]  ;;  %v545_v31 = vld [vmem:[%s1281_s24 + $0x50] sm:$0xff] }
  0x5a   : > { %v739_v45 = vrot.slane %v648_v34, 1  ;;  %v740_v46 = vrot.slane %v649_v35, 1  ;;  %v615_v53 = vmax.f32 %v541_v47, %v929_v36  ;;  %v631_v54 = vrot.slane %v940_v37, 7  ;;  %v966_v14 = vld [vmem:[%s1281_s24 + $0x240] sm:$0xff]  ;;  %v967_v17 = vld [vmem:[%s1281_s24 + $0x248] sm:$0x1] }
  0x5b   : > { %846 = vst.msk [vmem:[%s1322_s28] sm:$0xff] %vm845_vm1, %v837_v38  ;;  %v678_v55 = vrot.slane %v940_v37, 1  ;;  %v838_v56 = vmax.f32 %v782_v43, %v810_v21  ;;  %v775_v58 = vmax.f32 %v703_v44, %v711_v40  ;;  %v679_v60 = vrot.slane %v941_v42, 1  ;;  %v978_v15 = vld [vmem:[%s1281_s24 + $0x2c0] sm:$0xff]  ;;  %v1352_v21 = vld [vmem:[%s1281_s24 + $0xd0] sm:$0xff] }
  0x5c   : > { %v741_v57 = vsel %vm668_vm0, %v739_v45, %v740_v46  ;;  %v813_v62 = vsel %vm668_vm0, %v811_v41, %v812_v50  ;;  %v650_v63 = vmax.f32 %v541_v47, %v631_v54  ;;  %v651_v0 = vmax.f32 %v542_v48, %v631_v54  ;;  %v954_v25 = vld [vmem:[%s1281_s24 + $0x1c0] sm:$0xff]  ;;  %v944_v32 = vld [vmem:[%s1281_s24 + $0x150] sm:$0xff]  ;;  %v945_v33 = vld [vmem:[%s1281_s24 + $0x158] sm:$0x1] }
  0x5d   : > { %v767_v61 = vmax.f32 %v614_v24, %v741_v57  ;;  %847 = vst.msk [vmem:[%s1322_s28 + $0x8] sm:$0xff] %vm845_vm1, %v838_v56  ;;  %v680_v3 = vsel %vm668_vm0, %v678_v55, %v679_v60  ;;  %v712_v4 = vmax.f32 %v964_v49, %v977_v52  ;;  %v814_v5 = vrot.slane %v964_v49, 1  ;;  %v968_v37 = vld [vmem:[%s1281_s24 + $0x250] sm:$0xff]  ;;  %v546_v44 = vld [vmem:[%s1281_s24 + $0x58] sm:$0x1]  ;;  %v946_v56 = vld [vmem:[%s1281_s24 + $0x160] sm:$0xff] }
  0x5e   : > { %v815_v6 = vrot.slane %v965_v51, 1  ;;  %v704_v10 = vmax.f32 %v953_v59, %v680_v3  ;;  %v742_v11 = vrot.slane %v650_v63, 1  ;;  %v743_v12 = vrot.slane %v651_v0, 1  ;;  %v979_v38 = vld [vmem:[%s1281_s24 + $0x2d0] sm:$0xff]  ;;  %v969_v47 = vld [vmem:[%s1281_s24 + $0x258] sm:$0x1] }
  0x5f   : > { %v783_v9 = vmax.f32 %v767_v61, %v775_v58  ;;  %v616_v18 = vmax.f32 %v543_v7, %v930_v1  ;;  %v632_v19 = vrot.slane %v942_v2, 7  ;;  %v681_v20 = vrot.slane %v942_v2, 1  ;;  %v955_v45 = vld [vmem:[%s1281_s24 + $0x1d0] sm:$0xff]  ;;  %v932_v51 = vld [vmem:[%s1281_s24 + $0xe0] sm:$0xff]  ;;  %v548_v2 = vld [vmem:[%s1281_s24 + $0x68] sm:$0x1] }
  0x60   : > { %v816_v16 = vsel %vm668_vm0, %v814_v5, %v815_v6  ;;  %v744_v23 = vsel %vm668_vm0, %v742_v11, %v743_v12  ;;  %v776_v24 = vmax.f32 %v704_v10, %v712_v4  ;;  %v682_v26 = vrot.slane %v943_v8, 1  ;;  %v547_v61 = vld [vmem:[%s1281_s24 + $0x60] sm:$0xff] }
  0x61   : > { %v839_v22 = vmax.f32 %v783_v9, %v813_v62  ;;  %v768_v27 = vmax.f32 %v615_v53, %v744_v23  ;;  %v652_v28 = vmax.f32 %v543_v7, %v632_v19  ;;  %v653_v29 = vmax.f32 %v544_v13, %v632_v19  ;;  %v947_v62 = vld [vmem:[%s1281_s24 + $0x168] sm:$0x1]  ;;  %v970_v7 = vld [vmem:[%s1281_s24 + $0x260] sm:$0xff] }
  0x62   : > { %v713_v30 = vmax.f32 %v966_v14, %v978_v15  ;;  %v683_v34 = vsel %vm668_vm0, %v681_v20, %v682_v26  ;;  %v817_v35 = vrot.slane %v966_v14, 1  ;;  %v818_v36 = vrot.slane %v967_v17, 1  ;;  %v980_v8 = vld [vmem:[%s1281_s24 + $0x2e0] sm:$0xff]  ;;  %v971_v13 = vld [vmem:[%s1281_s24 + $0x268] sm:$0x1]  ;;  %v933_v20 = vld [vmem:[%s1281_s24 + $0xf0] sm:$0xff] }
  0x63   : > { %848 = vst.msk [vmem:[%s1322_s28 + $0x10] sm:$0xff] %vm845_vm1, %v839_v22  ;;  %v617_v39 = vmax.f32 %v545_v31, %v1352_v21  ;;  %v784_v40 = vmax.f32 %v768_v27, %v776_v24  ;;  %v705_v41 = vmax.f32 %v954_v25, %v683_v34  ;;  %v745_v42 = vrot.slane %v652_v28, 1  ;;  %v956_v12 = vld [vmem:[%s1281_s24 + $0x1e0] sm:$0xff]  ;;  %v948_v21 = vld [vmem:[%s1281_s24 + $0x170] sm:$0xff]  ;;  %v949_v26 = vld [vmem:[%s1281_s24 + $0x178] sm:$0x1] }
  0x64   : > { %v746_v43 = vrot.slane %v653_v29, 1  ;;  %v819_v46 = vsel %vm668_vm0, %v817_v35, %v818_v36  ;;  %v633_v48 = vrot.slane %v944_v32, 7  ;;  %v684_v49 = vrot.slane %v944_v32, 1  ;;  %v550_v32 = vld [vmem:[%s1281_s24 + $0x78] sm:$0x1]  ;;  %v972_v34 = vld [vmem:[%s1281_s24 + $0x270] sm:$0xff] }
  0x65   : > { %v685_v50 = vrot.slane %v945_v33, 1  ;;  %v840_v52 = vmax.f32 %v784_v40, %v816_v16  ;;  %v777_v54 = vmax.f32 %v705_v41, %v713_v30  ;;  %v714_v55 = vmax.f32 %v968_v37, %v979_v38  ;;  %v973_v35 = vld [vmem:[%s1281_s24 + $0x278] sm:$0x1]  ;;  %v981_v36 = vld [vmem:[%s1281_s24 + $0x2f0] sm:$0xff] }
  0x66   : > { %v747_v53 = vsel %vm668_vm0, %v745_v42, %v746_v43  ;;  %v654_v58 = vmax.f32 %v545_v31, %v633_v48  ;;  %v655_v59 = vmax.f32 %v546_v44, %v633_v48  ;;  %v820_v0 = vrot.slane %v968_v37, 1  ;;  %v549_v31 = vld [vmem:[%s1281_s24 + $0x70] sm:$0xff] }
  0x67   : > { %v769_v57 = vmax.f32 %v616_v18, %v747_v53  ;;  %v686_v60 = vsel %vm668_vm0, %v684_v49, %v685_v50  ;;  %849 = vst.msk [vmem:[%s1322_s28 + $0x18] sm:$0xff] %vm845_vm1, %v840_v52  ;;  %v821_v1 = vrot.slane %v969_v47, 1  ;;  %v618_v3 = vmax.f32 %v547_v61, %v932_v51  ;;  %v957_v43 = vld [vmem:[%s1281_s24 + $0x1f0] sm:$0xff] }
  0x68   : > { %v706_v63 = vmax.f32 %v955_v45, %v686_v60  ;;  %v748_v5 = vrot.slane %v654_v58, 1  ;;  %v749_v6 = vrot.slane %v655_v59, 1  ;;  %v634_v9 = vrot.slane %v946_v56, 7 }
  0x69   : > { %v785_v4 = vmax.f32 %v769_v57, %v777_v54  ;;  %v822_v11 = vsel %vm668_vm0, %v820_v0, %v821_v1  ;;  %v687_v14 = vrot.slane %v946_v56, 1  ;;  %v688_v15 = vrot.slane %v947_v62, 1 }
  0x6a   : > { %v778_v10 = vmax.f32 %v706_v63, %v714_v55  ;;  %v750_v17 = vsel %vm668_vm0, %v748_v5, %v749_v6  ;;  %v656_v18 = vmax.f32 %v547_v61, %v634_v9  ;;  %v657_v19 = vmax.f32 %v548_v2, %v634_v9 }
  0x6b   : > { %v841_v16 = vmax.f32 %v785_v4, %v819_v46  ;;  %v770_v22 = vmax.f32 %v617_v39, %v750_v17  ;;  %v689_v23 = vsel %vm668_vm0, %v687_v14, %v688_v15  ;;  %v715_v24 = vmax.f32 %v970_v7, %v980_v8 }
  0x6c   : > { %v823_v25 = vrot.slane %v970_v7, 1  ;;  %v707_v27 = vmax.f32 %v956_v12, %v689_v23  ;;  %v751_v28 = vrot.slane %v656_v18, 1  ;;  %v752_v29 = vrot.slane %v657_v19, 1 }
  0x6d   : > { %850 = vst.msk [vmem:[%s1322_s28 + $0x20] sm:$0xff] %vm845_vm1, %v841_v16  ;;  %v824_v30 = vrot.slane %v971_v13, 1  ;;  %v786_v33 = vmax.f32 %v770_v22, %v778_v10  ;;  %v619_v37 = vmax.f32 %v549_v31, %v933_v20  ;;  %v635_v38 = vrot.slane %v948_v21, 7 }
  0x6e   : > { %v690_v39 = vrot.slane %v948_v21, 1  ;;  %v753_v40 = vsel %vm668_vm0, %v751_v28, %v752_v29  ;;  %v779_v41 = vmax.f32 %v707_v27, %v715_v24  ;;  %v691_v44 = vrot.slane %v949_v26, 1 }
  0x6f   : > { %v825_v42 = vsel %vm668_vm0, %v823_v25, %v824_v30  ;;  %v842_v45 = vmax.f32 %v786_v33, %v822_v11  ;;  %v771_v46 = vmax.f32 %v618_v3, %v753_v40  ;;  %v658_v47 = vmax.f32 %v549_v31, %v635_v38 }
  0x70   : > { %v659_v48 = vmax.f32 %v550_v32, %v635_v38  ;;  %v692_v49 = vsel %vm668_vm0, %v690_v39, %v691_v44  ;;  %v716_v50 = vmax.f32 %v972_v34, %v981_v36  ;;  %v826_v51 = vrot.slane %v972_v34, 1 }
  0x71   : > { %v827_v52 = vrot.slane %v973_v35, 1  ;;  %851 = vst.msk [vmem:[%s1322_s28 + $0x28] sm:$0xff] %vm845_vm1, %v842_v45  ;;  %v787_v53 = vmax.f32 %v771_v46, %v779_v41  ;;  %v708_v54 = vmax.f32 %v957_v43, %v692_v49  ;;  %v754_v55 = vrot.slane %v658_v47, 1 }
  0x72   : > { %v755_v56 = vrot.slane %v659_v48, 1 }
  0x73   : > { %v843_v57 = vmax.f32 %v787_v53, %v825_v42  ;;  %v780_v59 = vmax.f32 %v708_v54, %v716_v50  ;;  %v828_v61 = vsel %vm668_vm0, %v826_v51, %v827_v52 }
  0x74   : > { %v756_v58 = vsel %vm668_vm0, %v754_v55, %v755_v56 }
  0x75   : > { %v772_v60 = vmax.f32 %v619_v37, %v756_v58  ;;  %852 = vst.msk [vmem:[%s1322_s28 + $0x30] sm:$0xff] %vm845_vm1, %v843_v57 }
  0x77   : > { %v788_v62 = vmax.f32 %v772_v60, %v780_v59 }
  0x79   : > { %v844_v63 = vmax.f32 %v788_v62, %v828_v61 }
  0x7b   : > { %853 = vst.msk [vmem:[%s1322_s28 + $0x38] sm:$0xff] %vm845_vm1, %v844_v63 }
  0x7c PF: > { %p8_p9 = scmp.ge.s32.totalorder %s1063_s10, 4   ;;  %s1419_s6 = smov %s1030_s7 }
  0x7d   : > { %s1420_s7 = smov %s1072_s13  ;;  %s1421_s8 = smov %s1063_s10 }
  0x7e   :  { %10 = sbr.rel (!%p8_p9) target bundleno = 2 (0x2), region = 102 }

// kernel: _lambda_.27
= control target key start
LH: loop header
LB: loop body
LE: loop exit
PB: predicated region body
PF: predicated region fallthrough
CT: control target
= control target key end

     0   :  { %s441_s12 = smov 0   ;;  %s475_s0 = inlined_call_operand.vmem [shape: f32[128,24], index: 0, kind: input, shape index: {}]   ;;  %s476_s1 = inlined_call_operand.vmem [shape: bf16[24,16], index: 1, kind: input, shape index: {}]   ;;  %s477_s2 = inlined_call_operand.vmem [shape: f32[1,16], index: 2, kind: input, shape index: {}]   ;;  %s478_s3 = inlined_call_operand.vmem [shape: f32[128,16], index: 3, kind: output, shape index: {}]  }
   0x1 LB: > { %s361_s13 = sadd.s32 4294967295, %s419_s12   ;;  %p365_p0 = scmp.ge.s32.totalorder %s419_s12, 1  ;;  %s419_s12 = sphi %s441_s12, %s13_s12  }
   0x2   : > { %p138_p1 = scmp.lt.s32.totalorder %s419_s12, 3 }
   0x4   : > { %p139_p2 = pnand %p365_p0, %p138_p1 }
   0x5   : > { %v411_v0 = vld [vmem:[%s476_s1] sm:$0xff] (!%p139_p2)   ;;  %v412_v1 = vld [vmem:[%s476_s1 + $0x8] ss:$0 sps:$4 sm:$0xff] (!%p139_p2)   ;;  %vm219_vm0 = vcmask (!%p139_p2), 1043456   ;;  %s366_s18 = sshll.u32 (!%p139_p2), %s361_s13, 3  ;;  %vm206_vm1 = vcmask (!%p139_p2), 195584  }
   0x6   : > { %142 = sbr.rel (%p139_p2) target bundleno = 241 (0xf1), region = 32  ;;  %385 = vmatprep.subr.bf16.mxu0 (!%p139_p2), %v411_v0  ;;  %397 = vmatprep.subr.bf16.mxu1 (!%p139_p2), %v411_v0  ;;  %p163_p3 = scmp.lt.s32.totalorder (!%p139_p2), %s366_s18, 15  ;;  %v221_v2 = vsel (!%p139_p2), %vm219_vm0, %v412_v1, 0  ;;  %v370_v15 = vld [vmem:[%s477_s2] ss:$0 sm:$0xff] (!%p139_p2)  ;;  %vm296_vm2 = vcmask (!%p139_p2), 130048  }
   0x7   : > { %386 = vmatpush3.bf16.msra.mxu0 (!%p139_p2), %v411_v0  ;;  %399 = vmatpush3.bf16.msra.mxu1 (!%p139_p2), %v411_v0 }
   0x8   : > { %401 = vmatprep.subr.msk.bf16.mxu0 (!%p139_p2), %vm219_vm0, %v412_v1  ;;  %402 = vmatprep.subr.msk.bf16.mxu1 (!%p139_p2), %vm219_vm0, %v412_v1 }
   0xb   : > { %388 = vmatpush3.bf16.msra.mxu0 (!%p139_p2), %v221_v2  ;;  %400 = vmatpush3.bf16.msra.mxu1 (!%p139_p2), %v221_v2 }
   0xd   : > { %s480_s18 = smov (!%p163_p3, %s366_s18), 15 }
   0xe   : > { %s367_s19 = sshll.u32 %s480_s18, 3 }
   0xf   : > { %s166_s22 = scalar_lea.vmem %s475_s0, %s367_s19  ;;  %s172_s27 = scalar_lea.vmem %s478_s3, %s367_s19 }
  0x10   : > { %v175_v3 = vld [vmem:[%s166_s22] sm:$0xff]  ;;  %v176_v4 = vld [vmem:[%s166_s22 + $0x8] sm:$0xff]  ;;  %v177_v8 = vld [vmem:[%s166_s22 + $0x10] sm:$0xff] }
  0x11   : > { %v179_v5 = vld [vmem:[%s166_s22 + $0x20] sm:$0xff]  ;;  %v183_v6 = vpack.c.bf16 %v176_v4, %v175_v3  ;;  %v180_v7 = vld [vmem:[%s166_s22 + $0x28] sm:$0xff]  ;;  %v178_v9 = vld [vmem:[%s166_s22 + $0x18] sm:$0xff] }
  0x12   : > { %v185_v10 = vpack.c.bf16 %v180_v7, %v179_v5  ;;  %v184_v11 = vpack.c.bf16 %v178_v9, %v177_v8  ;;  %v181_v12 = vld [vmem:[%s166_s22 + $0x30] sm:$0xff]  ;;  %v182_v13 = vld [vmem:[%s166_s22 + $0x38] sm:$0xff] }
  0x13   : > { %389 = vmatprep.mubr.msk.bf16.mxu0 %vm206_vm1, %v183_v6  ;;  %v186_v14 = vpack.c.bf16 %v182_v13, %v181_v12 }
  0x14   : > { %393 = vmatprep.mubr.msk.bf16.mxu1 %vm206_vm1, %v185_v10  ;;  %390 = vmatmul.mubr.msk.bf16.vlgmr.msra.gmra.mrb[0].mxu0 %vm206_vm1, %v184_v11 }
  0x15   : > { %394 = vmatmul.mubr.msk.bf16.vlgmr.msra.gmra.mrb[0].mxu1 %vm206_vm1, %v186_v14 }
  0xe7   : > { %v391_v16 = vpop.f32.mrb[0].mxu0 }
  0xe8   : > { %v266_v17 = vadd.f32 %v391_v16, %v370_v15  ;;  %v395_v18 = vpop.f32.mrb[0].mxu1  ;;  %v257_v19 = vpop.f32.mrb[1].mxu0 }
  0xe9   : > { %v282_v20 = vadd.f32 %v395_v18, %v370_v15  ;;  %v258_v21 = vadd.f32 %v370_v15, %v257_v19  ;;  %v273_v22 = vpop.f32.mrb[1].mxu1  ;;  %v392_v23 = vpop.f32.mrb[2].mxu0 }
  0xea   : > { %v290_v24 = vmax.f32 %v266_v17, 0.0  ;;  %v274_v25 = vadd.f32 %v370_v15, %v273_v22  ;;  %v269_v26 = vadd.f32 %v392_v23, %v370_v15  ;;  %v396_v27 = vpop.f32.mrb[2].mxu1  ;;  %v260_v28 = vpop.f32.mrb[3].mxu0 }
  0xeb   : > { %v294_v29 = vmax.f32 %v282_v20, 0.0  ;;  %v288_v30 = vmax.f32 %v258_v21, 0.0  ;;  %v285_v31 = vadd.f32 %v396_v27, %v370_v15  ;;  %v261_v32 = vadd.f32 %v370_v15, %v260_v28  ;;  %v276_v33 = vpop.f32.mrb[3].mxu1 }
  0xec   : > { %299 = vst.msk [vmem:[%s172_s27 + $0x10] sm:$0xff] %vm296_vm2, %v290_v24  ;;  %v292_v34 = vmax.f32 %v274_v25, 0.0  ;;  %v291_v35 = vmax.f32 %v269_v26, 0.0  ;;  %v277_v36 = vadd.f32 %v370_v15, %v276_v33 }
  0xed   : > { %303 = vst.msk [vmem:[%s172_s27 + $0x30] sm:$0xff] %vm296_vm2, %v294_v29  ;;  %297 = vst.msk [vmem:[%s172_s27] sm:$0xff] %vm296_vm2, %v288_v30  ;;  %v295_v37 = vmax.f32 %v285_v31, 0.0  ;;  %v289_v38 = vmax.f32 %v261_v32, 0.0 }
  0xee   : > { %301 = vst.msk [vmem:[%s172_s27 + $0x20] sm:$0xff] %vm296_vm2, %v292_v34  ;;  %300 = vst.msk [vmem:[%s172_s27 + $0x18] sm:$0xff] %vm296_vm2, %v291_v35  ;;  %v293_v39 = vmax.f32 %v277_v36, 0.0 }
  0xef   : > { %304 = vst.msk [vmem:[%s172_s27 + $0x38] sm:$0xff] %vm296_vm2, %v295_v37  ;;  %298 = vst.msk [vmem:[%s172_s27 + $0x8] sm:$0xff] %vm296_vm2, %v289_v38 }
  0xf0   : > { %302 = vst.msk [vmem:[%s172_s27 + $0x28] sm:$0xff] %vm296_vm2, %v293_v39 }
  0xf1 PF: > { %s13_s12 = sadd.s32 1, %s419_s12  }
  0xf2   : > { %p10_p4 = scmp.ge.s32.totalorder %s13_s12, 4  }
  0xf4   :  { %12 = sbr.rel (!%p10_p4) target bundleno = 1 (0x1), region = 62 }

// kernel: _lambda_.26
= control target key start
LH: loop header
LB: loop body
LE: loop exit
PB: predicated region body
PF: predicated region fallthrough
CT: control target
= control target key end

     0   :  { %vm404_vm0 = vcmask 1043456   ;;  %v41_v0 = vlaneseq  ;;  %vm397_vm1 = vcmask 195584   ;;  %vm473_vm2 = vcmask 125952   ;;  %s889_s3 = inlined_call_operand.vmem [shape: bf16[24,16], index: 3, kind: input, shape index: {}]   ;;  %s890_s1 = inlined_call_operand.vmem [shape: f32[3,3,24], index: 1, kind: input, shape index: {}]   ;;  %s891_s0 = inlined_call_operand.vmem [shape: f32[6,8,5,24], index: 0, kind: input, shape index: {}]   ;;  %s892_s2 = inlined_call_operand.vmem [shape: f32[1,1,24], index: 2, kind: input, shape index: {}]   ;;  %s893_s4 = inlined_call_operand.vmem [shape: f32[1,16], index: 4, kind: input, shape index: {}]   ;;  %s894_s5 = inlined_call_operand.vmem [shape: f32[8,4,16], index: 5, kind: output, shape index: {}]  }
   0x1   :  { %v545_v1 = vld [vmem:[%s889_s3] sm:$0xff]   ;;  %v546_v2 = vld [vmem:[%s889_s3 + $0x8] ss:$0 sps:$4 sm:$0xff]   ;;  %v26_v11 = vld [vmem:[%s891_s0 + $0x10] sm:$0x1f] }
   0x2   :  { %v42_v3 = vshrl.u32 %v41_v0, 7  ;;  %v22_v4 = vld [vmem:[%s890_s1 + $0x4] sm:$0x7]  ;;  %536 = vmatprep.subr.bf16.mxu0 %v545_v1  ;;  %v406_v5 = vsel %vm404_vm0, %v546_v2, 0  ;;  %v21_v6 = vld [vmem:[%s890_s1] sm:$0x7] }
   0x3   :  { %v593_v7 = vld [vmem:[%s890_s1 + $0x8] sm:$0x7]  ;;  %537 = vmatpush3.bf16.msra.mxu0 %v545_v1  ;;  %v24_v9 = vld [vmem:[%s891_s0] sm:$0x1f]  ;;  %v27_v12 = vld [vmem:[%s891_s0 + $0x18] sm:$0x1f] }
   0x4   :  { %v43_v8 = vsub.s32 0, %v42_v3  ;;  %v25_v10 = vld [vmem:[%s891_s0 + $0x8] sm:$0x1f]  ;;  %544 = vmatprep.subr.msk.bf16.mxu0 %vm404_vm0, %v546_v2  ;;  %v486_v13 = vld [vmem:[%s891_s0 + $0x40] sm:$0x1f]  ;;  %v55_v16 = vsub.s32 1, %v42_v3 }
   0x5   :  { %v487_v14 = vld [vmem:[%s891_s0 + $0x48] sm:$0x1f]  ;;  %v67_v17 = vsub.s32 2, %v42_v3  ;;  %v494_v19 = vld [vmem:[%s891_s0 + $0x80] sm:$0x1f] }
   0x6   :  { %v614_v15 = vrot.slane %v21_v6, %v43_v8  ;;  %v616_v18 = vrot.slane %v22_v4, %v43_v8  ;;  %v495_v20 = vld [vmem:[%s891_s0 + $0x88] sm:$0x1f]  ;;  %v496_v21 = vld [vmem:[%s891_s0 + $0x90] sm:$0x1f]  ;;  %v628_v22 = vrot.slane %v593_v7, %v43_v8  ;;  %v489_v24 = vld [vmem:[%s891_s0 + $0x58] sm:$0x1f]  ;;  %v643_v30 = vrot.slane %v21_v6, %v55_v16 }
   0x7   :  { %v488_v23 = vld [vmem:[%s891_s0 + $0x50] sm:$0x1f]  ;;  %v497_v29 = vld [vmem:[%s891_s0 + $0x98] sm:$0x1f]  ;;  %539 = vmatpush3.bf16.msra.mxu0 %v406_v5  ;;  %v645_v31 = vrot.slane %v21_v6, %v67_v17  ;;  %v502_v32 = vld [vmem:[%s891_s0 + $0xc0] sm:$0x1f]  ;;  %v663_v40 = vrot.slane %v22_v4, %v55_v16  ;;  %v665_v41 = vrot.slane %v22_v4, %v67_v17  ;;  %v712_v6 = vrot.slane %v593_v7, %v55_v16 }
   0x8   :  { %v45_v25 = vmul.f32 %v614_v15, %v24_v9  ;;  %v46_v26 = vmul.f32 %v614_v15, %v25_v10  ;;  %v47_v27 = vmul.f32 %v614_v15, %v26_v11  ;;  %v48_v28 = vmul.f32 %v614_v15, %v27_v12  ;;  %v503_v35 = vld [vmem:[%s891_s0 + $0xc8] sm:$0x1f]  ;;  %v504_v36 = vld [vmem:[%s891_s0 + $0xd0] sm:$0x1f]  ;;  %v505_v37 = vld [vmem:[%s891_s0 + $0xd8] sm:$0x1f] }
   0x9   :  { %v99_v33 = vmul.f32 %v494_v19, %v616_v18  ;;  %v100_v34 = vmul.f32 %v495_v20, %v616_v18  ;;  %v101_v38 = vmul.f32 %v496_v21, %v616_v18  ;;  %v102_v39 = vmul.f32 %v497_v29, %v616_v18  ;;  %v510_v46 = vld [vmem:[%s891_s0 + $0x100] sm:$0x1f]  ;;  %v511_v51 = vld [vmem:[%s891_s0 + $0x108] sm:$0x1f]  ;;  %v512_v52 = vld [vmem:[%s891_s0 + $0x110] sm:$0x1f] }
   0xa   :  { %v57_v42 = vmul.f32 %v486_v13, %v643_v30  ;;  %v58_v43 = vmul.f32 %v487_v14, %v643_v30  ;;  %v59_v44 = vmul.f32 %v488_v23, %v643_v30  ;;  %v60_v45 = vmul.f32 %v489_v24, %v643_v30  ;;  %v513_v53 = vld [vmem:[%s891_s0 + $0x118] sm:$0x1f]  ;;  %v518_v62 = vld [vmem:[%s891_s0 + $0x140] sm:$0x1f]  ;;  %v519_v63 = vld [vmem:[%s891_s0 + $0x148] sm:$0x1f] }
   0xb   :  { %v69_v47 = vmul.f32 %v645_v31, %v24_v9  ;;  %v70_v48 = vmul.f32 %v645_v31, %v25_v10  ;;  %v71_v49 = vmul.f32 %v645_v31, %v26_v11  ;;  %v72_v50 = vmul.f32 %v645_v31, %v27_v12  ;;  %v520_v0 = vld [vmem:[%s891_s0 + $0x150] sm:$0x1f]  ;;  %v521_v1 = vld [vmem:[%s891_s0 + $0x158] sm:$0x1f] }
   0xc   :  { %v111_v54 = vmul.f32 %v502_v32, %v663_v40  ;;  %v112_v55 = vmul.f32 %v503_v35, %v663_v40  ;;  %v113_v56 = vmul.f32 %v504_v36, %v663_v40  ;;  %v114_v57 = vmul.f32 %v505_v37, %v663_v40 }
   0xd   :  { %v123_v58 = vmul.f32 %v494_v19, %v665_v41  ;;  %v124_v59 = vmul.f32 %v495_v20, %v665_v41  ;;  %v125_v60 = vmul.f32 %v496_v21, %v665_v41  ;;  %v126_v61 = vmul.f32 %v497_v29, %v665_v41 }
   0xe   :  { %v153_v2 = vmul.f32 %v510_v46, %v628_v22  ;;  %v154_v3 = vmul.f32 %v511_v51, %v628_v22  ;;  %v155_v4 = vmul.f32 %v512_v52, %v628_v22  ;;  %v156_v5 = vmul.f32 %v513_v53, %v628_v22 }
   0xf   :  { %v715_v8 = vrot.slane %v593_v7, %v67_v17  ;;  %v185_v9 = vadd.f32 %v57_v42, %v45_v25  ;;  %v186_v10 = vadd.f32 %v58_v43, %v46_v26  ;;  %v187_v11 = vadd.f32 %v59_v44, %v47_v27 }
  0x10   :  { %v188_v12 = vadd.f32 %v60_v45, %v48_v28  ;;  %v201_v13 = vrot.slane %v99_v33, 7  ;;  %v202_v14 = vrot.slane %v100_v34, 7  ;;  %v165_v19 = vmul.f32 %v518_v62, %v712_v6 }
  0x11   :  { %v166_v20 = vmul.f32 %v519_v63, %v712_v6  ;;  %v167_v21 = vmul.f32 %v520_v0, %v712_v6  ;;  %v168_v23 = vmul.f32 %v521_v1, %v712_v6  ;;  %v177_v16 = vmul.f32 %v510_v46, %v715_v8  ;;  %v29_v63 = vld [vmem:[%s891_s0 + $0x28] sm:$0x1f]  ;;  %v30_v0 = vld [vmem:[%s891_s0 + $0x30] sm:$0x1f] }
  0x12   :  { %v178_v24 = vmul.f32 %v511_v51, %v715_v8  ;;  %v179_v7 = vmul.f32 %v512_v52, %v715_v8  ;;  %v180_v17 = vmul.f32 %v513_v53, %v715_v8  ;;  %v203_v25 = vrot.slane %v101_v38, 7 }
  0x13   :  { %v204_v26 = vrot.slane %v102_v39, 7  ;;  %v217_v27 = vadd.f32 %v201_v13, %v69_v47  ;;  %v218_v28 = vadd.f32 %v202_v14, %v70_v48  ;;  %v233_v29 = vrot.slane %v123_v58, 1  ;;  %v492_v13 = vld [vmem:[%s891_s0 + $0x70] sm:$0x1f]  ;;  %v493_v14 = vld [vmem:[%s891_s0 + $0x78] sm:$0x1f] }
  0x14   :  { %v234_v32 = vrot.slane %v124_v59, 1  ;;  %v235_v33 = vrot.slane %v125_v60, 1  ;;  %v236_v34 = vrot.slane %v126_v61, 1  ;;  %v219_v35 = vadd.f32 %v203_v25, %v71_v49  ;;  %v28_v49 = vld [vmem:[%s891_s0 + $0x20] sm:$0x1f] }
  0x15   :  { %v220_v36 = vadd.f32 %v204_v26, %v72_v50  ;;  %v257_v37 = vadd.f32 %v165_v19, %v153_v2  ;;  %v258_v42 = vadd.f32 %v166_v20, %v154_v3  ;;  %v249_v43 = vadd.f32 %v233_v29, %v111_v54 }
  0x16   :  { %v250_v44 = vadd.f32 %v234_v32, %v112_v55  ;;  %v251_v45 = vadd.f32 %v235_v33, %v113_v56  ;;  %v252_v46 = vadd.f32 %v236_v34, %v114_v57  ;;  %v259_v51 = vadd.f32 %v167_v21, %v155_v4  ;;  %v731_v57 = vld [vmem:[%s892_s2] ss:$0 sm:$0xff]  ;;  %v500_v34 = vld [vmem:[%s891_s0 + $0xb0] sm:$0x1f] }
  0x17   :  { %v260_v52 = vadd.f32 %v168_v23, %v156_v5  ;;  %v273_v62 = vrot.slane %v217_v27, 1  ;;  %v274_v53 = vrot.slane %v218_v28, 1  ;;  %v275_v38 = vrot.slane %v219_v35, 1  ;;  %v490_v5 = vld [vmem:[%s891_s0 + $0x60] sm:$0x1f] }
  0x18   :  { %v276_v39 = vrot.slane %v220_v36, 1  ;;  %v297_v47 = vadd.f32 %v257_v37, %v249_v43  ;;  %v298_v48 = vadd.f32 %v258_v42, %v250_v44  ;;  %v299_v60 = vadd.f32 %v259_v51, %v251_v45  ;;  %v498_v27 = vld [vmem:[%s891_s0 + $0xa0] sm:$0x1f]  ;;  %v499_v28 = vld [vmem:[%s891_s0 + $0xa8] sm:$0x1f] }
  0x19   :  { %v289_v58 = vadd.f32 %v273_v62, %v185_v9  ;;  %v290_v59 = vadd.f32 %v274_v53, %v186_v10  ;;  %v300_v61 = vadd.f32 %v260_v52, %v252_v46  ;;  %v291_v50 = vadd.f32 %v275_v38, %v187_v11  ;;  %v491_v9 = vld [vmem:[%s891_s0 + $0x68] sm:$0x1f]  ;;  %v501_v35 = vld [vmem:[%s891_s0 + $0xb8] sm:$0x1f]  ;;  %v506_v36 = vld [vmem:[%s891_s0 + $0xe0] sm:$0x1f] }
  0x1a   :  { %v292_v54 = vadd.f32 %v276_v39, %v188_v12  ;;  %v321_v55 = vrot.slane %v177_v16, 1  ;;  %v322_v56 = vrot.slane %v178_v24, 1  ;;  %v323_v3 = vrot.slane %v179_v7, 1  ;;  %v31_v12 = vld [vmem:[%s891_s0 + $0x38] sm:$0x1f] }
  0x1b   :  { %v305_v1 = vadd.f32 %v297_v47, %v289_v58  ;;  %v306_v2 = vadd.f32 %v298_v48, %v290_v59  ;;  %v324_v4 = vrot.slane %v180_v17, 1  ;;  %v307_v10 = vadd.f32 %v299_v60, %v291_v50  ;;  %v507_v44 = vld [vmem:[%s891_s0 + $0xe8] sm:$0x1f]  ;;  %v508_v45 = vld [vmem:[%s891_s0 + $0xf0] sm:$0x1f] }
  0x1c   :  { %v308_v11 = vadd.f32 %v300_v61, %v292_v54  ;;  %v755_v19 = vmul.f32 %v614_v15, %v28_v49  ;;  %v758_v20 = vmul.f32 %v614_v15, %v29_v63  ;;  %v51_v16 = vmul.f32 %v614_v15, %v30_v0  ;;  %v509_v46 = vld [vmem:[%s891_s0 + $0xf8] sm:$0x1f]  ;;  %v514_v38 = vld [vmem:[%s891_s0 + $0x120] sm:$0x1f]  ;;  %v515_v59 = vld [vmem:[%s891_s0 + $0x128] sm:$0x1f] }
  0x1d   :  { %v337_v21 = vadd.f32 %v321_v55, %v305_v1  ;;  %v338_v23 = vadd.f32 %v322_v56, %v306_v2  ;;  %v52_v24 = vmul.f32 %v614_v15, %v31_v12  ;;  %v339_v7 = vadd.f32 %v323_v3, %v307_v10  ;;  %v517_v60 = vld [vmem:[%s891_s0 + $0x138] sm:$0x1f]  ;;  %v522_v54 = vld [vmem:[%s891_s0 + $0x160] sm:$0x1f]  ;;  %v523_v55 = vld [vmem:[%s891_s0 + $0x168] sm:$0x1f] }
  0x1e   :  { %v340_v17 = vadd.f32 %v324_v4, %v308_v11  ;;  %v61_v25 = vmul.f32 %v490_v5, %v643_v30  ;;  %v62_v26 = vmul.f32 %v491_v9, %v643_v30  ;;  %v63_v15 = vmul.f32 %v492_v13, %v643_v30  ;;  %v524_v56 = vld [vmem:[%s891_s0 + $0x170] sm:$0x1f] }
  0x1f   :  { %v352_v29 = vadd.f32 %v731_v57, %v337_v21  ;;  %v353_v32 = vadd.f32 %v731_v57, %v338_v23  ;;  %v64_v33 = vmul.f32 %v493_v14, %v643_v30  ;;  %v354_v37 = vadd.f32 %v731_v57, %v339_v7 }
  0x20   :  { %v355_v42 = vadd.f32 %v731_v57, %v340_v17  ;;  %v73_v43 = vmul.f32 %v645_v31, %v28_v49  ;;  %v74_v30 = vmul.f32 %v645_v31, %v29_v63  ;;  %v75_v52 = vmul.f32 %v645_v31, %v30_v0 }
  0x21   :  { %v368_v51 = vcombine.low %v352_v29, %v353_v32  ;;  %v76_v62 = vmul.f32 %v645_v31, %v31_v12  ;;  %v103_v53 = vmul.f32 %v498_v27, %v616_v18  ;;  %v104_v47 = vmul.f32 %v499_v28, %v616_v18  ;;  %v516_v31 = vld [vmem:[%s891_s0 + $0x130] sm:$0x1f] }
  0x22   :  { %v369_v39 = vcombine.low %v354_v37, %v355_v42  ;;  %v105_v48 = vmul.f32 %v500_v34, %v616_v18  ;;  %v106_v58 = vmul.f32 %v501_v35, %v616_v18  ;;  %v115_v61 = vmul.f32 %v506_v36, %v663_v40 }
  0x23   :  { %v116_v49 = vmul.f32 %v507_v44, %v663_v40  ;;  %v117_v50 = vmul.f32 %v508_v45, %v663_v40  ;;  %v118_v18 = vmul.f32 %v509_v46, %v663_v40  ;;  %v127_v0 = vmul.f32 %v498_v27, %v665_v41  ;;  %v525_v40 = vld [vmem:[%s891_s0 + $0x178] sm:$0x1f] }
  0x24   :  { %v376_v63 = vpack.c.bf16 %v369_v39, %v368_v51  ;;  %v128_v1 = vmul.f32 %v499_v28, %v665_v41  ;;  %v129_v2 = vmul.f32 %v500_v34, %v665_v41  ;;  %v130_v3 = vmul.f32 %v501_v35, %v665_v41 }
  0x25   :  { %v157_v4 = vmul.f32 %v514_v38, %v628_v22  ;;  %v158_v5 = vmul.f32 %v515_v59, %v628_v22  ;;  %v159_v9 = vmul.f32 %v516_v31, %v628_v22  ;;  %v160_v10 = vmul.f32 %v517_v60, %v628_v22 }
  0x26   :  { %540 = vmatprep.mubr.msk.bf16.mxu0 %vm397_vm1, %v376_v63  ;;  %v169_v11 = vmul.f32 %v522_v54, %v712_v6  ;;  %v170_v12 = vmul.f32 %v523_v55, %v712_v6  ;;  %v171_v13 = vmul.f32 %v524_v56, %v712_v6  ;;  %v172_v14 = vmul.f32 %v525_v40, %v712_v6 }
  0x27   :  { %v181_v41 = vmul.f32 %v514_v38, %v715_v8  ;;  %v182_v21 = vmul.f32 %v515_v59, %v715_v8  ;;  %v183_v23 = vmul.f32 %v516_v31, %v715_v8  ;;  %v184_v7 = vmul.f32 %v517_v60, %v715_v8 }
  0x28   :  { %v189_v17 = vadd.f32 %v61_v25, %v755_v19  ;;  %v190_v22 = vadd.f32 %v62_v26, %v758_v20  ;;  %v191_v27 = vadd.f32 %v63_v15, %v51_v16  ;;  %v192_v28 = vadd.f32 %v64_v33, %v52_v24 }
  0x29   :  { %v205_v29 = vrot.slane %v103_v53, 7  ;;  %v206_v32 = vrot.slane %v104_v47, 7  ;;  %v207_v34 = vrot.slane %v105_v48, 7  ;;  %v208_v35 = vrot.slane %v106_v58, 7 }
  0x2a   :  { %v237_v36 = vrot.slane %v127_v0, 1  ;;  %v238_v6 = vrot.slane %v128_v1, 1  ;;  %v239_v37 = vrot.slane %v129_v2, 1  ;;  %v240_v46 = vrot.slane %v130_v3, 1 }
  0x2b   :  { %v221_v42 = vadd.f32 %v205_v29, %v73_v43  ;;  %v222_v44 = vadd.f32 %v206_v32, %v74_v30  ;;  %v223_v45 = vadd.f32 %v207_v34, %v75_v52  ;;  %v224_v51 = vadd.f32 %v208_v35, %v76_v62 }
  0x2c   :  { %v253_v38 = vadd.f32 %v237_v36, %v115_v61  ;;  %v254_v8 = vadd.f32 %v238_v6, %v116_v49  ;;  %v255_v39 = vadd.f32 %v239_v37, %v117_v50  ;;  %v256_v19 = vadd.f32 %v240_v46, %v118_v18 }
  0x2d   :  { %v261_v25 = vadd.f32 %v169_v11, %v157_v4  ;;  %v262_v20 = vadd.f32 %v170_v12, %v158_v5  ;;  %v263_v16 = vadd.f32 %v171_v13, %v159_v9  ;;  %v264_v24 = vadd.f32 %v172_v14, %v160_v10  ;;  %v527_v11 = vld [vmem:[%s893_s4] ss:$0 sm:$0xff] }
  0x2e   :  { %v277_v26 = vrot.slane %v221_v42, 1  ;;  %v278_v15 = vrot.slane %v222_v44, 1  ;;  %v279_v33 = vrot.slane %v223_v45, 1  ;;  %v280_v53 = vrot.slane %v224_v51, 1 }
  0x2f   :  { %v301_v47 = vadd.f32 %v261_v25, %v253_v38  ;;  %v302_v48 = vadd.f32 %v262_v20, %v254_v8  ;;  %v303_v58 = vadd.f32 %v263_v16, %v255_v39  ;;  %v304_v59 = vadd.f32 %v264_v24, %v256_v19 }
  0x30   :  { %v293_v43 = vadd.f32 %v277_v26, %v189_v17  ;;  %v294_v30 = vadd.f32 %v278_v15, %v190_v22  ;;  %v295_v52 = vadd.f32 %v279_v33, %v191_v27  ;;  %v296_v62 = vadd.f32 %v280_v53, %v192_v28 }
  0x31   :  { %v325_v31 = vrot.slane %v181_v41, 1  ;;  %v326_v60 = vrot.slane %v182_v21, 1  ;;  %v327_v61 = vrot.slane %v183_v23, 1  ;;  %v328_v54 = vrot.slane %v184_v7, 1 }
  0x32   :  { %v309_v49 = vadd.f32 %v301_v47, %v293_v43  ;;  %v310_v50 = vadd.f32 %v302_v48, %v294_v30  ;;  %v311_v18 = vadd.f32 %v303_v58, %v295_v52  ;;  %v312_v55 = vadd.f32 %v304_v59, %v296_v62 }
  0x34   :  { %v341_v56 = vadd.f32 %v325_v31, %v309_v49  ;;  %v342_v63 = vadd.f32 %v326_v60, %v310_v50  ;;  %v343_v0 = vadd.f32 %v327_v61, %v311_v18  ;;  %v344_v1 = vadd.f32 %v328_v54, %v312_v55 }
  0x36   :  { %v356_v2 = vadd.f32 %v731_v57, %v341_v56  ;;  %v357_v40 = vadd.f32 %v731_v57, %v342_v63  ;;  %v358_v3 = vadd.f32 %v731_v57, %v343_v0  ;;  %v359_v4 = vadd.f32 %v731_v57, %v344_v1 }
  0x38   :  { %v370_v5 = vcombine.low %v356_v2, %v357_v40  ;;  %v371_v9 = vcombine.low %v358_v3, %v359_v4 }
  0x3a   :  { %v377_v10 = vpack.c.bf16 %v371_v9, %v370_v5 }
  0x3c   :  { %541 = vmatmul.mubr.msk.bf16.vlgmr.msra.gmra.mrb[0].mxu0 %vm397_vm1, %v377_v10 }
 0x10f   :  { %v542_v12 = vpop.f32.mrb[0].mxu0 }
 0x110   :  { %v451_v13 = vadd.f32 %v542_v12, %v527_v11  ;;  %v442_v14 = vpop.f32.mrb[1].mxu0 }
 0x111   :  { %v443_v41 = vadd.f32 %v527_v11, %v442_v14  ;;  %v543_v21 = vpop.f32.mrb[2].mxu0 }
 0x112   :  { %v459_v23 = vmax.f32 %v451_v13, 0.0  ;;  %v454_v7 = vadd.f32 %v543_v21, %v527_v11  ;;  %v445_v17 = vpop.f32.mrb[3].mxu0 }
 0x113   :  { %v457_v22 = vmax.f32 %v443_v41, 0.0  ;;  %v446_v57 = vadd.f32 %v527_v11, %v445_v17 }
 0x114   :  { %v467_v27 = vcombine.high %v459_v23, %v459_v23  ;;  %478 = vst.msk [vmem:[%s894_s5 + $0x10] sm:$0xf] %vm473_vm2, %v459_v23  ;;  %v460_v28 = vmax.f32 %v454_v7, 0.0 }
 0x115   :  { %v465_v29 = vcombine.high %v457_v22, %v457_v22  ;;  %474 = vst.msk [vmem:[%s894_s5] sm:$0xf] %vm473_vm2, %v457_v22  ;;  %v458_v32 = vmax.f32 %v446_v57, 0.0 }
 0x116   :  { %479 = vst.msk [vmem:[%s894_s5 + $0x14] sm:$0xf] %vm473_vm2, %v467_v27  ;;  %v468_v34 = vcombine.high %v460_v28, %v460_v28  ;;  %480 = vst.msk [vmem:[%s894_s5 + $0x18] sm:$0xf] %vm473_vm2, %v460_v28 }
 0x117   :  { %475 = vst.msk [vmem:[%s894_s5 + $0x4] sm:$0xf] %vm473_vm2, %v465_v29  ;;  %v466_v35 = vcombine.high %v458_v32, %v458_v32  ;;  %476 = vst.msk [vmem:[%s894_s5 + $0x8] sm:$0xf] %vm473_vm2, %v458_v32 }
 0x118   :  { %481 = vst.msk [vmem:[%s894_s5 + $0x1c] sm:$0xf] %vm473_vm2, %v468_v34 }
 0x119   :  { %477 = vst.msk [vmem:[%s894_s5 + $0xc] sm:$0xf] %vm473_vm2, %v466_v35 }

// kernel: _lambda_.24
= control target key start
LH: loop header
LB: loop body
LE: loop exit
PB: predicated region body
PF: predicated region fallthrough
CT: control target
= control target key end

     0   :  { %s5619_s12 = smov 0   ;;  %s5621_s13 = smov 0   ;;  %s7197_s0 = inlined_call_operand.vmem [shape: f32[6,32,17,3], index: 0, kind: input, shape index: {}]   ;;  %s7198_s1 = inlined_call_operand.vmem [shape: bf16[9,3,24], index: 1, kind: input, shape index: {}]   ;;  %s7199_s2 = inlined_call_operand.vmem [shape: f32[1,24], index: 2, kind: input, shape index: {}]   ;;  %s7200_s3 = inlined_call_operand.vmem [shape: f32[32,16,24], index: 3, kind: output, shape index: {}]  }
   0x1   :  { %s5623_s14 = smov 0  }
   0x2 LB: > { %s4456_s15 = sadd.s32 4294967295, %s5596_s14   ;;  %s5636_s16 = sadd.s32 1, %s5596_s14   ;;  %s5596_s14 = sphi %s5623_s14, %s7228_s14   ;;  %s5592_s13 = sphi %s5621_s13, %s7227_s13   ;;  %s5588_s12 = sphi %s5619_s12, %s7226_s12  }
   0x3   : > { %s17_s17 = ssub.s32 %s5596_s14, %s5636_s16  ;;  %s20_s18 = sadd.s32 1, %s5592_s13 }
   0x4   : > { %p18_p0 = scmp.eq.s32.totalorder %s17_s17, 0  ;;  %p27_p1 = scmp.ne.s32.totalorder %s5592_s13, %s5588_s12 }
   0x5   : > { %p28_p2 = scmp.eq.s32.totalorder %s5596_s14, 0  ;;  %p4459_p4 = scmp.ge.s32.totalorder %s5596_s14, 2 }
   0x6   : > { %s5645_s19 = scalar_select %p18_p0, %s5592_s13, %s20_s18  }
   0x7   : > { %p29_p3 = por %p28_p2, %p27_p1  ;;  %127 = sbr.rel (%p4459_p4) target bundleno = 163 (0xa3), region = 24 }
   0xe   : > { %130 = sbr.rel (!%p29_p3) target bundleno = 163 (0xa3), region = 28  ;;  %s132_s20 = sand.u32 (%p29_p3), 1, %s5592_s13  }
   0xf   : > { %s5533_s21 = smul.u32 (%p29_p3), 384, %s5596_s14 }
  0x10   : > { %s5532_s22 = smul.u32 (%p29_p3), 2304, %s132_s20 }
  0x11   : > { %s5653_s25 = scalar_lea.vmem (%p29_p3), %s7197_s0, %s5533_s21 }
  0x12   : > { %v740_v0 = vld [vmem:[%s5653_s25] sm:$0xff] (%p29_p3)  ;;  %v742_v1 = vld [vmem:[%s5653_s25 + $0x8] sm:$0xff] (%p29_p3)  ;;  %v744_v2 = vld [vmem:[%s5653_s25 + $0x10] sm:$0xff] (%p29_p3)  ;;  %s5658_s26 = scalar_lea.vmem (%p29_p3), [#allocation2], %s5532_s22 }
  0x13   : > { %741 = vst [vmem:[%s5658_s26] sm:$0xff] (%p29_p3), %v740_v0  ;;  %743 = vst [vmem:[%s5658_s26 + $0x8] sm:$0xff] (%p29_p3), %v742_v1  ;;  %v746_v3 = vld [vmem:[%s5653_s25 + $0x18] sm:$0xff] (%p29_p3)  ;;  %v748_v4 = vld [vmem:[%s5653_s25 + $0x20] sm:$0xff] (%p29_p3) }
  0x14   : > { %745 = vst [vmem:[%s5658_s26 + $0x10] sm:$0xff] (%p29_p3), %v744_v2  ;;  %v750_v5 = vld [vmem:[%s5653_s25 + $0x28] sm:$0xff] (%p29_p3)  ;;  %747 = vst [vmem:[%s5658_s26 + $0x18] sm:$0xff] (%p29_p3), %v746_v3  ;;  %v752_v6 = vld [vmem:[%s5653_s25 + $0x30] sm:$0xff] (%p29_p3) }
  0x15   : > { %749 = vst [vmem:[%s5658_s26 + $0x20] sm:$0xff] %v748_v4  ;;  %751 = vst [vmem:[%s5658_s26 + $0x28] sm:$0xff] %v750_v5  ;;  %v754_v7 = vld [vmem:[%s5653_s25 + $0x38] sm:$0xff]  ;;  %v756_v8 = vld [vmem:[%s5653_s25 + $0x40] sm:$0xff] }
  0x16   : > { %753 = vst [vmem:[%s5658_s26 + $0x30] sm:$0xff] %v752_v6  ;;  %755 = vst [vmem:[%s5658_s26 + $0x38] sm:$0xff] %v754_v7  ;;  %v758_v9 = vld [vmem:[%s5653_s25 + $0x48] sm:$0xff]  ;;  %v760_v10 = vld [vmem:[%s5653_s25 + $0x50] sm:$0xff] }
  0x17   : > { %757 = vst [vmem:[%s5658_s26 + $0x40] sm:$0xff] %v756_v8  ;;  %v762_v11 = vld [vmem:[%s5653_s25 + $0x58] sm:$0xff]  ;;  %759 = vst [vmem:[%s5658_s26 + $0x48] sm:$0xff] %v758_v9  ;;  %v764_v12 = vld [vmem:[%s5653_s25 + $0x60] sm:$0xff] }
  0x18   : > { %761 = vst [vmem:[%s5658_s26 + $0x50] sm:$0xff] %v760_v10  ;;  %763 = vst [vmem:[%s5658_s26 + $0x58] sm:$0xff] %v762_v11  ;;  %v766_v13 = vld [vmem:[%s5653_s25 + $0x68] sm:$0xff]  ;;  %v768_v14 = vld [vmem:[%s5653_s25 + $0x70] sm:$0xff] }
  0x19   : > { %765 = vst [vmem:[%s5658_s26 + $0x60] sm:$0xff] %v764_v12  ;;  %767 = vst [vmem:[%s5658_s26 + $0x68] sm:$0xff] %v766_v13  ;;  %v770_v15 = vld [vmem:[%s5653_s25 + $0x78] sm:$0xff]  ;;  %v772_v16 = vld [vmem:[%s5653_s25 + $0x80] sm:$0xff] }
  0x1a   : > { %769 = vst [vmem:[%s5658_s26 + $0x70] sm:$0xff] %v768_v14  ;;  %v774_v17 = vld [vmem:[%s5653_s25 + $0x88] sm:$0xff]  ;;  %771 = vst [vmem:[%s5658_s26 + $0x78] sm:$0xff] %v770_v15  ;;  %v776_v18 = vld [vmem:[%s5653_s25 + $0x90] sm:$0xff] }
  0x1b   : > { %773 = vst [vmem:[%s5658_s26 + $0x80] sm:$0xff] %v772_v16  ;;  %775 = vst [vmem:[%s5658_s26 + $0x88] sm:$0xff] %v774_v17  ;;  %v778_v19 = vld [vmem:[%s5653_s25 + $0x98] sm:$0xff]  ;;  %v780_v20 = vld [vmem:[%s5653_s25 + $0xa0] sm:$0xff] }
  0x1c   : > { %777 = vst [vmem:[%s5658_s26 + $0x90] sm:$0xff] %v776_v18  ;;  %779 = vst [vmem:[%s5658_s26 + $0x98] sm:$0xff] %v778_v19  ;;  %v782_v21 = vld [vmem:[%s5653_s25 + $0xa8] sm:$0xff]  ;;  %v784_v22 = vld [vmem:[%s5653_s25 + $0xb0] sm:$0xff] }
  0x1d   : > { %781 = vst [vmem:[%s5658_s26 + $0xa0] sm:$0xff] %v780_v20  ;;  %v786_v23 = vld [vmem:[%s5653_s25 + $0xb8] sm:$0xff]  ;;  %783 = vst [vmem:[%s5658_s26 + $0xa8] sm:$0xff] %v782_v21  ;;  %v788_v24 = vld [vmem:[%s5653_s25 + $0xc0] sm:$0xff] }
  0x1e   : > { %785 = vst [vmem:[%s5658_s26 + $0xb0] sm:$0xff] %v784_v22  ;;  %787 = vst [vmem:[%s5658_s26 + $0xb8] sm:$0xff] %v786_v23  ;;  %v790_v25 = vld [vmem:[%s5653_s25 + $0xc8] sm:$0xff]  ;;  %v792_v26 = vld [vmem:[%s5653_s25 + $0xd0] sm:$0xff] }
  0x1f   : > { %789 = vst [vmem:[%s5658_s26 + $0xc0] sm:$0xff] %v788_v24  ;;  %791 = vst [vmem:[%s5658_s26 + $0xc8] sm:$0xff] %v790_v25  ;;  %v794_v27 = vld [vmem:[%s5653_s25 + $0xd8] sm:$0xff]  ;;  %v796_v28 = vld [vmem:[%s5653_s25 + $0xe0] sm:$0xff] }
  0x20   : > { %793 = vst [vmem:[%s5658_s26 + $0xd0] sm:$0xff] %v792_v26  ;;  %v798_v29 = vld [vmem:[%s5653_s25 + $0xe8] sm:$0xff]  ;;  %795 = vst [vmem:[%s5658_s26 + $0xd8] sm:$0xff] %v794_v27  ;;  %v800_v30 = vld [vmem:[%s5653_s25 + $0xf0] sm:$0xff] }
  0x21   : > { %797 = vst [vmem:[%s5658_s26 + $0xe0] sm:$0xff] %v796_v28  ;;  %799 = vst [vmem:[%s5658_s26 + $0xe8] sm:$0xff] %v798_v29  ;;  %v802_v31 = vld [vmem:[%s5653_s25 + $0xf8] sm:$0xff]  ;;  %v804_v32 = vld [vmem:[%s5653_s25 + $0x100] sm:$0xff] }
  0x22   : > { %801 = vst [vmem:[%s5658_s26 + $0xf0] sm:$0xff] %v800_v30  ;;  %803 = vst [vmem:[%s5658_s26 + $0xf8] sm:$0xff] %v802_v31  ;;  %v806_v33 = vld [vmem:[%s5653_s25 + $0x108] sm:$0xff]  ;;  %v808_v34 = vld [vmem:[%s5653_s25 + $0x110] sm:$0xff] }
  0x23   : > { %805 = vst [vmem:[%s5658_s26 + $0x100] sm:$0xff] %v804_v32  ;;  %v810_v35 = vld [vmem:[%s5653_s25 + $0x118] sm:$0xff]  ;;  %807 = vst [vmem:[%s5658_s26 + $0x108] sm:$0xff] %v806_v33  ;;  %v812_v36 = vld [vmem:[%s5653_s25 + $0x120] sm:$0xff] }
  0x24   : > { %809 = vst [vmem:[%s5658_s26 + $0x110] sm:$0xff] %v808_v34  ;;  %811 = vst [vmem:[%s5658_s26 + $0x118] sm:$0xff] %v810_v35  ;;  %v814_v37 = vld [vmem:[%s5653_s25 + $0x128] sm:$0xff]  ;;  %v816_v38 = vld [vmem:[%s5653_s25 + $0x130] sm:$0xff] }
  0x25   : > { %813 = vst [vmem:[%s5658_s26 + $0x120] sm:$0xff] %v812_v36  ;;  %815 = vst [vmem:[%s5658_s26 + $0x128] sm:$0xff] %v814_v37  ;;  %v818_v39 = vld [vmem:[%s5653_s25 + $0x138] sm:$0xff]  ;;  %v820_v40 = vld [vmem:[%s5653_s25 + $0x140] sm:$0xff] }
  0x26   : > { %817 = vst [vmem:[%s5658_s26 + $0x130] sm:$0xff] %v816_v38  ;;  %v822_v41 = vld [vmem:[%s5653_s25 + $0x148] sm:$0xff]  ;;  %819 = vst [vmem:[%s5658_s26 + $0x138] sm:$0xff] %v818_v39  ;;  %v824_v42 = vld [vmem:[%s5653_s25 + $0x150] sm:$0xff] }
  0x27   : > { %821 = vst [vmem:[%s5658_s26 + $0x140] sm:$0xff] %v820_v40  ;;  %823 = vst [vmem:[%s5658_s26 + $0x148] sm:$0xff] %v822_v41  ;;  %v826_v43 = vld [vmem:[%s5653_s25 + $0x158] sm:$0xff]  ;;  %v828_v44 = vld [vmem:[%s5653_s25 + $0x160] sm:$0xff] }
  0x28   : > { %825 = vst [vmem:[%s5658_s26 + $0x150] sm:$0xff] %v824_v42  ;;  %827 = vst [vmem:[%s5658_s26 + $0x158] sm:$0xff] %v826_v43  ;;  %v830_v45 = vld [vmem:[%s5653_s25 + $0x168] sm:$0xff]  ;;  %v832_v46 = vld [vmem:[%s5653_s25 + $0x170] sm:$0xff] }
  0x29   : > { %829 = vst [vmem:[%s5658_s26 + $0x160] sm:$0xff] %v828_v44  ;;  %v834_v47 = vld [vmem:[%s5653_s25 + $0x178] sm:$0xff]  ;;  %831 = vst [vmem:[%s5658_s26 + $0x168] sm:$0xff] %v830_v45  ;;  %v836_v48 = vld [vmem:[%s5653_s25 + $0x300] sm:$0xff] }
  0x2a   : > { %833 = vst [vmem:[%s5658_s26 + $0x170] sm:$0xff] %v832_v46  ;;  %835 = vst [vmem:[%s5658_s26 + $0x178] sm:$0xff] %v834_v47  ;;  %v838_v49 = vld [vmem:[%s5653_s25 + $0x308] sm:$0xff]  ;;  %v840_v50 = vld [vmem:[%s5653_s25 + $0x310] sm:$0xff] }
  0x2b   : > { %837 = vst [vmem:[%s5658_s26 + $0x180] sm:$0xff] %v836_v48  ;;  %839 = vst [vmem:[%s5658_s26 + $0x188] sm:$0xff] %v838_v49  ;;  %v842_v51 = vld [vmem:[%s5653_s25 + $0x318] sm:$0xff]  ;;  %v844_v52 = vld [vmem:[%s5653_s25 + $0x320] sm:$0xff] }
  0x2c   : > { %841 = vst [vmem:[%s5658_s26 + $0x190] sm:$0xff] %v840_v50  ;;  %v846_v53 = vld [vmem:[%s5653_s25 + $0x328] sm:$0xff]  ;;  %843 = vst [vmem:[%s5658_s26 + $0x198] sm:$0xff] %v842_v51  ;;  %v848_v54 = vld [vmem:[%s5653_s25 + $0x330] sm:$0xff] }
  0x2d   : > { %845 = vst [vmem:[%s5658_s26 + $0x1a0] sm:$0xff] %v844_v52  ;;  %847 = vst [vmem:[%s5658_s26 + $0x1a8] sm:$0xff] %v846_v53  ;;  %v850_v55 = vld [vmem:[%s5653_s25 + $0x338] sm:$0xff]  ;;  %v852_v56 = vld [vmem:[%s5653_s25 + $0x340] sm:$0xff] }
  0x2e   : > { %849 = vst [vmem:[%s5658_s26 + $0x1b0] sm:$0xff] %v848_v54  ;;  %851 = vst [vmem:[%s5658_s26 + $0x1b8] sm:$0xff] %v850_v55  ;;  %v854_v57 = vld [vmem:[%s5653_s25 + $0x348] sm:$0xff]  ;;  %v856_v58 = vld [vmem:[%s5653_s25 + $0x350] sm:$0xff] }
  0x2f   : > { %853 = vst [vmem:[%s5658_s26 + $0x1c0] sm:$0xff] %v852_v56  ;;  %v858_v59 = vld [vmem:[%s5653_s25 + $0x358] sm:$0xff]  ;;  %855 = vst [vmem:[%s5658_s26 + $0x1c8] sm:$0xff] %v854_v57  ;;  %v860_v60 = vld [vmem:[%s5653_s25 + $0x360] sm:$0xff] }
  0x30   : > { %857 = vst [vmem:[%s5658_s26 + $0x1d0] sm:$0xff] %v856_v58  ;;  %859 = vst [vmem:[%s5658_s26 + $0x1d8] sm:$0xff] %v858_v59  ;;  %v862_v61 = vld [vmem:[%s5653_s25 + $0x368] sm:$0xff]  ;;  %v864_v62 = vld [vmem:[%s5653_s25 + $0x370] sm:$0xff] }
  0x31   : > { %861 = vst [vmem:[%s5658_s26 + $0x1e0] sm:$0xff] %v860_v60  ;;  %863 = vst [vmem:[%s5658_s26 + $0x1e8] sm:$0xff] %v862_v61  ;;  %v866_v63 = vld [vmem:[%s5653_s25 + $0x378] sm:$0xff]  ;;  %v868_v0 = vld [vmem:[%s5653_s25 + $0x380] sm:$0xff] }
  0x32   : > { %865 = vst [vmem:[%s5658_s26 + $0x1f0] sm:$0xff] %v864_v62  ;;  %v870_v1 = vld [vmem:[%s5653_s25 + $0x388] sm:$0xff]  ;;  %867 = vst [vmem:[%s5658_s26 + $0x1f8] sm:$0xff] %v866_v63  ;;  %v872_v2 = vld [vmem:[%s5653_s25 + $0x390] sm:$0xff] }
  0x33   : > { %869 = vst [vmem:[%s5658_s26 + $0x200] sm:$0xff] %v868_v0  ;;  %871 = vst [vmem:[%s5658_s26 + $0x208] sm:$0xff] %v870_v1  ;;  %v874_v3 = vld [vmem:[%s5653_s25 + $0x398] sm:$0xff]  ;;  %v876_v4 = vld [vmem:[%s5653_s25 + $0x3a0] sm:$0xff] }
  0x34   : > { %873 = vst [vmem:[%s5658_s26 + $0x210] sm:$0xff] %v872_v2  ;;  %875 = vst [vmem:[%s5658_s26 + $0x218] sm:$0xff] %v874_v3  ;;  %v878_v5 = vld [vmem:[%s5653_s25 + $0x3a8] sm:$0xff]  ;;  %v880_v6 = vld [vmem:[%s5653_s25 + $0x3b0] sm:$0xff] }
  0x35   : > { %877 = vst [vmem:[%s5658_s26 + $0x220] sm:$0xff] %v876_v4  ;;  %v882_v7 = vld [vmem:[%s5653_s25 + $0x3b8] sm:$0xff]  ;;  %879 = vst [vmem:[%s5658_s26 + $0x228] sm:$0xff] %v878_v5  ;;  %v884_v8 = vld [vmem:[%s5653_s25 + $0x3c0] sm:$0xff] }
  0x36   : > { %881 = vst [vmem:[%s5658_s26 + $0x230] sm:$0xff] %v880_v6  ;;  %883 = vst [vmem:[%s5658_s26 + $0x238] sm:$0xff] %v882_v7  ;;  %v886_v9 = vld [vmem:[%s5653_s25 + $0x3c8] sm:$0xff]  ;;  %v888_v10 = vld [vmem:[%s5653_s25 + $0x3d0] sm:$0xff] }
  0x37   : > { %885 = vst [vmem:[%s5658_s26 + $0x240] sm:$0xff] %v884_v8  ;;  %887 = vst [vmem:[%s5658_s26 + $0x248] sm:$0xff] %v886_v9  ;;  %v890_v11 = vld [vmem:[%s5653_s25 + $0x3d8] sm:$0xff]  ;;  %v892_v12 = vld [vmem:[%s5653_s25 + $0x3e0] sm:$0xff] }
  0x38   : > { %889 = vst [vmem:[%s5658_s26 + $0x250] sm:$0xff] %v888_v10  ;;  %v894_v13 = vld [vmem:[%s5653_s25 + $0x3e8] sm:$0xff]  ;;  %891 = vst [vmem:[%s5658_s26 + $0x258] sm:$0xff] %v890_v11  ;;  %v896_v14 = vld [vmem:[%s5653_s25 + $0x3f0] sm:$0xff] }
  0x39   : > { %893 = vst [vmem:[%s5658_s26 + $0x260] sm:$0xff] %v892_v12  ;;  %895 = vst [vmem:[%s5658_s26 + $0x268] sm:$0xff] %v894_v13  ;;  %v898_v15 = vld [vmem:[%s5653_s25 + $0x3f8] sm:$0xff]  ;;  %v900_v16 = vld [vmem:[%s5653_s25 + $0x400] sm:$0xff] }
  0x3a   : > { %897 = vst [vmem:[%s5658_s26 + $0x270] sm:$0xff] %v896_v14  ;;  %899 = vst [vmem:[%s5658_s26 + $0x278] sm:$0xff] %v898_v15  ;;  %v902_v17 = vld [vmem:[%s5653_s25 + $0x408] sm:$0xff]  ;;  %v904_v18 = vld [vmem:[%s5653_s25 + $0x410] sm:$0xff] }
  0x3b   : > { %901 = vst [vmem:[%s5658_s26 + $0x280] sm:$0xff] %v900_v16  ;;  %v906_v19 = vld [vmem:[%s5653_s25 + $0x418] sm:$0xff]  ;;  %903 = vst [vmem:[%s5658_s26 + $0x288] sm:$0xff] %v902_v17  ;;  %v908_v20 = vld [vmem:[%s5653_s25 + $0x420] sm:$0xff] }
  0x3c   : > { %905 = vst [vmem:[%s5658_s26 + $0x290] sm:$0xff] %v904_v18  ;;  %907 = vst [vmem:[%s5658_s26 + $0x298] sm:$0xff] %v906_v19  ;;  %v910_v21 = vld [vmem:[%s5653_s25 + $0x428] sm:$0xff]  ;;  %v912_v22 = vld [vmem:[%s5653_s25 + $0x430] sm:$0xff] }
  0x3d   : > { %909 = vst [vmem:[%s5658_s26 + $0x2a0] sm:$0xff] %v908_v20  ;;  %911 = vst [vmem:[%s5658_s26 + $0x2a8] sm:$0xff] %v910_v21  ;;  %v914_v23 = vld [vmem:[%s5653_s25 + $0x438] sm:$0xff]  ;;  %v916_v24 = vld [vmem:[%s5653_s25 + $0x440] sm:$0xff] }
  0x3e   : > { %913 = vst [vmem:[%s5658_s26 + $0x2b0] sm:$0xff] %v912_v22  ;;  %v918_v25 = vld [vmem:[%s5653_s25 + $0x448] sm:$0xff]  ;;  %915 = vst [vmem:[%s5658_s26 + $0x2b8] sm:$0xff] %v914_v23  ;;  %v920_v26 = vld [vmem:[%s5653_s25 + $0x450] sm:$0xff] }
  0x3f   : > { %917 = vst [vmem:[%s5658_s26 + $0x2c0] sm:$0xff] %v916_v24  ;;  %919 = vst [vmem:[%s5658_s26 + $0x2c8] sm:$0xff] %v918_v25  ;;  %v922_v27 = vld [vmem:[%s5653_s25 + $0x458] sm:$0xff]  ;;  %v924_v28 = vld [vmem:[%s5653_s25 + $0x460] sm:$0xff] }
  0x40   : > { %921 = vst [vmem:[%s5658_s26 + $0x2d0] sm:$0xff] %v920_v26  ;;  %923 = vst [vmem:[%s5658_s26 + $0x2d8] sm:$0xff] %v922_v27  ;;  %v926_v29 = vld [vmem:[%s5653_s25 + $0x468] sm:$0xff]  ;;  %v928_v30 = vld [vmem:[%s5653_s25 + $0x470] sm:$0xff] }
  0x41   : > { %925 = vst [vmem:[%s5658_s26 + $0x2e0] sm:$0xff] %v924_v28  ;;  %v930_v31 = vld [vmem:[%s5653_s25 + $0x478] sm:$0xff]  ;;  %927 = vst [vmem:[%s5658_s26 + $0x2e8] sm:$0xff] %v926_v29  ;;  %v932_v32 = vld [vmem:[%s5653_s25 + $0x600] sm:$0xff] }
  0x42   : > { %929 = vst [vmem:[%s5658_s26 + $0x2f0] sm:$0xff] %v928_v30  ;;  %931 = vst [vmem:[%s5658_s26 + $0x2f8] sm:$0xff] %v930_v31  ;;  %v934_v33 = vld [vmem:[%s5653_s25 + $0x608] sm:$0xff]  ;;  %v936_v34 = vld [vmem:[%s5653_s25 + $0x610] sm:$0xff] }
  0x43   : > { %933 = vst [vmem:[%s5658_s26 + $0x300] sm:$0xff] %v932_v32  ;;  %935 = vst [vmem:[%s5658_s26 + $0x308] sm:$0xff] %v934_v33  ;;  %v938_v35 = vld [vmem:[%s5653_s25 + $0x618] sm:$0xff]  ;;  %v940_v36 = vld [vmem:[%s5653_s25 + $0x620] sm:$0xff] }
  0x44   : > { %937 = vst [vmem:[%s5658_s26 + $0x310] sm:$0xff] %v936_v34  ;;  %v942_v37 = vld [vmem:[%s5653_s25 + $0x628] sm:$0xff]  ;;  %939 = vst [vmem:[%s5658_s26 + $0x318] sm:$0xff] %v938_v35  ;;  %v944_v38 = vld [vmem:[%s5653_s25 + $0x630] sm:$0xff] }
  0x45   : > { %941 = vst [vmem:[%s5658_s26 + $0x320] sm:$0xff] %v940_v36  ;;  %943 = vst [vmem:[%s5658_s26 + $0x328] sm:$0xff] %v942_v37  ;;  %v946_v39 = vld [vmem:[%s5653_s25 + $0x638] sm:$0xff]  ;;  %v948_v40 = vld [vmem:[%s5653_s25 + $0x640] sm:$0xff] }
  0x46   : > { %945 = vst [vmem:[%s5658_s26 + $0x330] sm:$0xff] %v944_v38  ;;  %947 = vst [vmem:[%s5658_s26 + $0x338] sm:$0xff] %v946_v39  ;;  %v950_v41 = vld [vmem:[%s5653_s25 + $0x648] sm:$0xff]  ;;  %v952_v42 = vld [vmem:[%s5653_s25 + $0x650] sm:$0xff] }
  0x47   : > { %949 = vst [vmem:[%s5658_s26 + $0x340] sm:$0xff] %v948_v40  ;;  %v954_v43 = vld [vmem:[%s5653_s25 + $0x658] sm:$0xff]  ;;  %951 = vst [vmem:[%s5658_s26 + $0x348] sm:$0xff] %v950_v41  ;;  %v956_v44 = vld [vmem:[%s5653_s25 + $0x660] sm:$0xff] }
  0x48   : > { %953 = vst [vmem:[%s5658_s26 + $0x350] sm:$0xff] %v952_v42  ;;  %955 = vst [vmem:[%s5658_s26 + $0x358] sm:$0xff] %v954_v43  ;;  %v958_v45 = vld [vmem:[%s5653_s25 + $0x668] sm:$0xff]  ;;  %v960_v46 = vld [vmem:[%s5653_s25 + $0x670] sm:$0xff] }
  0x49   : > { %957 = vst [vmem:[%s5658_s26 + $0x360] sm:$0xff] %v956_v44  ;;  %959 = vst [vmem:[%s5658_s26 + $0x368] sm:$0xff] %v958_v45  ;;  %v962_v47 = vld [vmem:[%s5653_s25 + $0x678] sm:$0xff]  ;;  %v964_v48 = vld [vmem:[%s5653_s25 + $0x680] sm:$0xff] }
  0x4a   : > { %961 = vst [vmem:[%s5658_s26 + $0x370] sm:$0xff] %v960_v46  ;;  %v966_v49 = vld [vmem:[%s5653_s25 + $0x688] sm:$0xff]  ;;  %963 = vst [vmem:[%s5658_s26 + $0x378] sm:$0xff] %v962_v47  ;;  %v968_v50 = vld [vmem:[%s5653_s25 + $0x690] sm:$0xff] }
  0x4b   : > { %965 = vst [vmem:[%s5658_s26 + $0x380] sm:$0xff] %v964_v48  ;;  %967 = vst [vmem:[%s5658_s26 + $0x388] sm:$0xff] %v966_v49  ;;  %v970_v51 = vld [vmem:[%s5653_s25 + $0x698] sm:$0xff]  ;;  %v972_v52 = vld [vmem:[%s5653_s25 + $0x6a0] sm:$0xff] }
  0x4c   : > { %969 = vst [vmem:[%s5658_s26 + $0x390] sm:$0xff] %v968_v50  ;;  %971 = vst [vmem:[%s5658_s26 + $0x398] sm:$0xff] %v970_v51  ;;  %v974_v53 = vld [vmem:[%s5653_s25 + $0x6a8] sm:$0xff]  ;;  %v976_v54 = vld [vmem:[%s5653_s25 + $0x6b0] sm:$0xff] }
  0x4d   : > { %973 = vst [vmem:[%s5658_s26 + $0x3a0] sm:$0xff] %v972_v52  ;;  %v978_v55 = vld [vmem:[%s5653_s25 + $0x6b8] sm:$0xff]  ;;  %975 = vst [vmem:[%s5658_s26 + $0x3a8] sm:$0xff] %v974_v53  ;;  %v980_v56 = vld [vmem:[%s5653_s25 + $0x6c0] sm:$0xff] }
  0x4e   : > { %977 = vst [vmem:[%s5658_s26 + $0x3b0] sm:$0xff] %v976_v54  ;;  %979 = vst [vmem:[%s5658_s26 + $0x3b8] sm:$0xff] %v978_v55  ;;  %v982_v57 = vld [vmem:[%s5653_s25 + $0x6c8] sm:$0xff]  ;;  %v984_v58 = vld [vmem:[%s5653_s25 + $0x6d0] sm:$0xff] }
  0x4f   : > { %981 = vst [vmem:[%s5658_s26 + $0x3c0] sm:$0xff] %v980_v56  ;;  %983 = vst [vmem:[%s5658_s26 + $0x3c8] sm:$0xff] %v982_v57  ;;  %v986_v59 = vld [vmem:[%s5653_s25 + $0x6d8] sm:$0xff]  ;;  %v988_v60 = vld [vmem:[%s5653_s25 + $0x6e0] sm:$0xff] }
  0x50   : > { %985 = vst [vmem:[%s5658_s26 + $0x3d0] sm:$0xff] %v984_v58  ;;  %v990_v61 = vld [vmem:[%s5653_s25 + $0x6e8] sm:$0xff]  ;;  %987 = vst [vmem:[%s5658_s26 + $0x3d8] sm:$0xff] %v986_v59  ;;  %v992_v62 = vld [vmem:[%s5653_s25 + $0x6f0] sm:$0xff] }
  0x51   : > { %989 = vst [vmem:[%s5658_s26 + $0x3e0] sm:$0xff] %v988_v60  ;;  %991 = vst [vmem:[%s5658_s26 + $0x3e8] sm:$0xff] %v990_v61  ;;  %v994_v63 = vld [vmem:[%s5653_s25 + $0x6f8] sm:$0xff]  ;;  %v996_v0 = vld [vmem:[%s5653_s25 + $0x700] sm:$0xff] }
  0x52   : > { %993 = vst [vmem:[%s5658_s26 + $0x3f0] sm:$0xff] %v992_v62  ;;  %995 = vst [vmem:[%s5658_s26 + $0x3f8] sm:$0xff] %v994_v63  ;;  %v998_v1 = vld [vmem:[%s5653_s25 + $0x708] sm:$0xff]  ;;  %v1000_v2 = vld [vmem:[%s5653_s25 + $0x710] sm:$0xff] }
  0x53   : > { %997 = vst [vmem:[%s5658_s26 + $0x400] sm:$0xff] %v996_v0  ;;  %v1002_v3 = vld [vmem:[%s5653_s25 + $0x718] sm:$0xff]  ;;  %999 = vst [vmem:[%s5658_s26 + $0x408] sm:$0xff] %v998_v1  ;;  %v1004_v4 = vld [vmem:[%s5653_s25 + $0x720] sm:$0xff] }
  0x54   : > { %1001 = vst [vmem:[%s5658_s26 + $0x410] sm:$0xff] %v1000_v2  ;;  %1003 = vst [vmem:[%s5658_s26 + $0x418] sm:$0xff] %v1002_v3  ;;  %v1006_v5 = vld [vmem:[%s5653_s25 + $0x728] sm:$0xff]  ;;  %v1008_v6 = vld [vmem:[%s5653_s25 + $0x730] sm:$0xff] }
  0x55   : > { %1005 = vst [vmem:[%s5658_s26 + $0x420] sm:$0xff] %v1004_v4  ;;  %1007 = vst [vmem:[%s5658_s26 + $0x428] sm:$0xff] %v1006_v5  ;;  %v1010_v7 = vld [vmem:[%s5653_s25 + $0x738] sm:$0xff]  ;;  %v1012_v8 = vld [vmem:[%s5653_s25 + $0x740] sm:$0xff] }
  0x56   : > { %1009 = vst [vmem:[%s5658_s26 + $0x430] sm:$0xff] %v1008_v6  ;;  %v1014_v9 = vld [vmem:[%s5653_s25 + $0x748] sm:$0xff]  ;;  %1011 = vst [vmem:[%s5658_s26 + $0x438] sm:$0xff] %v1010_v7  ;;  %v1016_v10 = vld [vmem:[%s5653_s25 + $0x750] sm:$0xff] }
  0x57   : > { %1013 = vst [vmem:[%s5658_s26 + $0x440] sm:$0xff] %v1012_v8  ;;  %1015 = vst [vmem:[%s5658_s26 + $0x448] sm:$0xff] %v1014_v9  ;;  %v1018_v11 = vld [vmem:[%s5653_s25 + $0x758] sm:$0xff]  ;;  %v1020_v12 = vld [vmem:[%s5653_s25 + $0x760] sm:$0xff] }
  0x58   : > { %1017 = vst [vmem:[%s5658_s26 + $0x450] sm:$0xff] %v1016_v10  ;;  %1019 = vst [vmem:[%s5658_s26 + $0x458] sm:$0xff] %v1018_v11  ;;  %v1022_v13 = vld [vmem:[%s5653_s25 + $0x768] sm:$0xff]  ;;  %v1024_v14 = vld [vmem:[%s5653_s25 + $0x770] sm:$0xff] }
  0x59   : > { %1021 = vst [vmem:[%s5658_s26 + $0x460] sm:$0xff] %v1020_v12  ;;  %v1026_v15 = vld [vmem:[%s5653_s25 + $0x778] sm:$0xff]  ;;  %1023 = vst [vmem:[%s5658_s26 + $0x468] sm:$0xff] %v1022_v13  ;;  %v1028_v16 = vld [vmem:[%s5653_s25 + $0x900] sm:$0xff] }
  0x5a   : > { %1025 = vst [vmem:[%s5658_s26 + $0x470] sm:$0xff] %v1024_v14  ;;  %1027 = vst [vmem:[%s5658_s26 + $0x478] sm:$0xff] %v1026_v15  ;;  %v1030_v17 = vld [vmem:[%s5653_s25 + $0x908] sm:$0xff]  ;;  %v1032_v18 = vld [vmem:[%s5653_s25 + $0x910] sm:$0xff] }
  0x5b   : > { %1029 = vst [vmem:[%s5658_s26 + $0x480] sm:$0xff] %v1028_v16  ;;  %1031 = vst [vmem:[%s5658_s26 + $0x488] sm:$0xff] %v1030_v17  ;;  %v1034_v19 = vld [vmem:[%s5653_s25 + $0x918] sm:$0xff]  ;;  %v1036_v20 = vld [vmem:[%s5653_s25 + $0x920] sm:$0xff] }
  0x5c   : > { %1033 = vst [vmem:[%s5658_s26 + $0x490] sm:$0xff] %v1032_v18  ;;  %v1038_v21 = vld [vmem:[%s5653_s25 + $0x928] sm:$0xff]  ;;  %1035 = vst [vmem:[%s5658_s26 + $0x498] sm:$0xff] %v1034_v19  ;;  %v1040_v22 = vld [vmem:[%s5653_s25 + $0x930] sm:$0xff] }
  0x5d   : > { %1037 = vst [vmem:[%s5658_s26 + $0x4a0] sm:$0xff] %v1036_v20  ;;  %1039 = vst [vmem:[%s5658_s26 + $0x4a8] sm:$0xff] %v1038_v21  ;;  %v1042_v23 = vld [vmem:[%s5653_s25 + $0x938] sm:$0xff]  ;;  %v1044_v24 = vld [vmem:[%s5653_s25 + $0x940] sm:$0xff] }
  0x5e   : > { %1041 = vst [vmem:[%s5658_s26 + $0x4b0] sm:$0xff] %v1040_v22  ;;  %1043 = vst [vmem:[%s5658_s26 + $0x4b8] sm:$0xff] %v1042_v23  ;;  %v1046_v25 = vld [vmem:[%s5653_s25 + $0x948] sm:$0xff]  ;;  %v1048_v26 = vld [vmem:[%s5653_s25 + $0x950] sm:$0xff] }
  0x5f   : > { %1045 = vst [vmem:[%s5658_s26 + $0x4c0] sm:$0xff] %v1044_v24  ;;  %v1050_v27 = vld [vmem:[%s5653_s25 + $0x958] sm:$0xff]  ;;  %1047 = vst [vmem:[%s5658_s26 + $0x4c8] sm:$0xff] %v1046_v25  ;;  %v1052_v28 = vld [vmem:[%s5653_s25 + $0x960] sm:$0xff] }
  0x60   : > { %1049 = vst [vmem:[%s5658_s26 + $0x4d0] sm:$0xff] %v1048_v26  ;;  %1051 = vst [vmem:[%s5658_s26 + $0x4d8] sm:$0xff] %v1050_v27  ;;  %v1054_v29 = vld [vmem:[%s5653_s25 + $0x968] sm:$0xff]  ;;  %v1056_v30 = vld [vmem:[%s5653_s25 + $0x970] sm:$0xff] }
  0x61   : > { %1053 = vst [vmem:[%s5658_s26 + $0x4e0] sm:$0xff] %v1052_v28  ;;  %1055 = vst [vmem:[%s5658_s26 + $0x4e8] sm:$0xff] %v1054_v29  ;;  %v1058_v31 = vld [vmem:[%s5653_s25 + $0x978] sm:$0xff]  ;;  %v1060_v32 = vld [vmem:[%s5653_s25 + $0x980] sm:$0xff] }
  0x62   : > { %1057 = vst [vmem:[%s5658_s26 + $0x4f0] sm:$0xff] %v1056_v30  ;;  %v1062_v33 = vld [vmem:[%s5653_s25 + $0x988] sm:$0xff]  ;;  %1059 = vst [vmem:[%s5658_s26 + $0x4f8] sm:$0xff] %v1058_v31  ;;  %v1064_v34 = vld [vmem:[%s5653_s25 + $0x990] sm:$0xff] }
  0x63   : > { %1061 = vst [vmem:[%s5658_s26 + $0x500] sm:$0xff] %v1060_v32  ;;  %1063 = vst [vmem:[%s5658_s26 + $0x508] sm:$0xff] %v1062_v33  ;;  %v1066_v35 = vld [vmem:[%s5653_s25 + $0x998] sm:$0xff]  ;;  %v1068_v36 = vld [vmem:[%s5653_s25 + $0x9a0] sm:$0xff] }
  0x64   : > { %1065 = vst [vmem:[%s5658_s26 + $0x510] sm:$0xff] %v1064_v34  ;;  %1067 = vst [vmem:[%s5658_s26 + $0x518] sm:$0xff] %v1066_v35  ;;  %v1070_v37 = vld [vmem:[%s5653_s25 + $0x9a8] sm:$0xff]  ;;  %v1072_v38 = vld [vmem:[%s5653_s25 + $0x9b0] sm:$0xff] }
  0x65   : > { %1069 = vst [vmem:[%s5658_s26 + $0x520] sm:$0xff] %v1068_v36  ;;  %v1074_v39 = vld [vmem:[%s5653_s25 + $0x9b8] sm:$0xff]  ;;  %1071 = vst [vmem:[%s5658_s26 + $0x528] sm:$0xff] %v1070_v37  ;;  %v1076_v40 = vld [vmem:[%s5653_s25 + $0x9c0] sm:$0xff] }
  0x66   : > { %1073 = vst [vmem:[%s5658_s26 + $0x530] sm:$0xff] %v1072_v38  ;;  %1075 = vst [vmem:[%s5658_s26 + $0x538] sm:$0xff] %v1074_v39  ;;  %v1078_v41 = vld [vmem:[%s5653_s25 + $0x9c8] sm:$0xff]  ;;  %v1080_v42 = vld [vmem:[%s5653_s25 + $0x9d0] sm:$0xff] }
  0x67   : > { %1077 = vst [vmem:[%s5658_s26 + $0x540] sm:$0xff] %v1076_v40  ;;  %1079 = vst [vmem:[%s5658_s26 + $0x548] sm:$0xff] %v1078_v41  ;;  %v1082_v43 = vld [vmem:[%s5653_s25 + $0x9d8] sm:$0xff]  ;;  %v1084_v44 = vld [vmem:[%s5653_s25 + $0x9e0] sm:$0xff] }
  0x68   : > { %1081 = vst [vmem:[%s5658_s26 + $0x550] sm:$0xff] %v1080_v42  ;;  %v1086_v45 = vld [vmem:[%s5653_s25 + $0x9e8] sm:$0xff]  ;;  %1083 = vst [vmem:[%s5658_s26 + $0x558] sm:$0xff] %v1082_v43  ;;  %v1088_v46 = vld [vmem:[%s5653_s25 + $0x9f0] sm:$0xff] }
  0x69   : > { %1085 = vst [vmem:[%s5658_s26 + $0x560] sm:$0xff] %v1084_v44  ;;  %1087 = vst [vmem:[%s5658_s26 + $0x568] sm:$0xff] %v1086_v45  ;;  %v1090_v47 = vld [vmem:[%s5653_s25 + $0x9f8] sm:$0xff]  ;;  %v1092_v48 = vld [vmem:[%s5653_s25 + $0xa00] sm:$0xff] }
  0x6a   : > { %1089 = vst [vmem:[%s5658_s26 + $0x570] sm:$0xff] %v1088_v46  ;;  %1091 = vst [vmem:[%s5658_s26 + $0x578] sm:$0xff] %v1090_v47  ;;  %v1094_v49 = vld [vmem:[%s5653_s25 + $0xa08] sm:$0xff]  ;;  %v1096_v50 = vld [vmem:[%s5653_s25 + $0xa10] sm:$0xff] }
  0x6b   : > { %1093 = vst [vmem:[%s5658_s26 + $0x580] sm:$0xff] %v1092_v48  ;;  %v1098_v51 = vld [vmem:[%s5653_s25 + $0xa18] sm:$0xff]  ;;  %1095 = vst [vmem:[%s5658_s26 + $0x588] sm:$0xff] %v1094_v49  ;;  %v1100_v52 = vld [vmem:[%s5653_s25 + $0xa20] sm:$0xff] }
  0x6c   : > { %1097 = vst [vmem:[%s5658_s26 + $0x590] sm:$0xff] %v1096_v50  ;;  %1099 = vst [vmem:[%s5658_s26 + $0x598] sm:$0xff] %v1098_v51  ;;  %v1102_v53 = vld [vmem:[%s5653_s25 + $0xa28] sm:$0xff]  ;;  %v1104_v54 = vld [vmem:[%s5653_s25 + $0xa30] sm:$0xff] }
  0x6d   : > { %1101 = vst [vmem:[%s5658_s26 + $0x5a0] sm:$0xff] %v1100_v52  ;;  %1103 = vst [vmem:[%s5658_s26 + $0x5a8] sm:$0xff] %v1102_v53  ;;  %v1106_v55 = vld [vmem:[%s5653_s25 + $0xa38] sm:$0xff]  ;;  %v1108_v56 = vld [vmem:[%s5653_s25 + $0xa40] sm:$0xff] }
  0x6e   : > { %1105 = vst [vmem:[%s5658_s26 + $0x5b0] sm:$0xff] %v1104_v54  ;;  %v1110_v57 = vld [vmem:[%s5653_s25 + $0xa48] sm:$0xff]  ;;  %1107 = vst [vmem:[%s5658_s26 + $0x5b8] sm:$0xff] %v1106_v55  ;;  %v1112_v58 = vld [vmem:[%s5653_s25 + $0xa50] sm:$0xff] }
  0x6f   : > { %1109 = vst [vmem:[%s5658_s26 + $0x5c0] sm:$0xff] %v1108_v56  ;;  %1111 = vst [vmem:[%s5658_s26 + $0x5c8] sm:$0xff] %v1110_v57  ;;  %v1114_v59 = vld [vmem:[%s5653_s25 + $0xa58] sm:$0xff]  ;;  %v1116_v60 = vld [vmem:[%s5653_s25 + $0xa60] sm:$0xff] }
  0x70   : > { %1113 = vst [vmem:[%s5658_s26 + $0x5d0] sm:$0xff] %v1112_v58  ;;  %1115 = vst [vmem:[%s5658_s26 + $0x5d8] sm:$0xff] %v1114_v59  ;;  %v1118_v61 = vld [vmem:[%s5653_s25 + $0xa68] sm:$0xff]  ;;  %v1120_v62 = vld [vmem:[%s5653_s25 + $0xa70] sm:$0xff] }
  0x71   : > { %1117 = vst [vmem:[%s5658_s26 + $0x5e0] sm:$0xff] %v1116_v60  ;;  %v1122_v63 = vld [vmem:[%s5653_s25 + $0xa78] sm:$0xff]  ;;  %1119 = vst [vmem:[%s5658_s26 + $0x5e8] sm:$0xff] %v1118_v61  ;;  %v1124_v0 = vld [vmem:[%s5653_s25 + $0xc00] sm:$0xff] }
  0x72   : > { %1121 = vst [vmem:[%s5658_s26 + $0x5f0] sm:$0xff] %v1120_v62  ;;  %1123 = vst [vmem:[%s5658_s26 + $0x5f8] sm:$0xff] %v1122_v63  ;;  %v1126_v1 = vld [vmem:[%s5653_s25 + $0xc08] sm:$0xff]  ;;  %v1128_v2 = vld [vmem:[%s5653_s25 + $0xc10] sm:$0xff] }
  0x73   : > { %1125 = vst [vmem:[%s5658_s26 + $0x600] sm:$0xff] %v1124_v0  ;;  %1127 = vst [vmem:[%s5658_s26 + $0x608] sm:$0xff] %v1126_v1  ;;  %v1130_v3 = vld [vmem:[%s5653_s25 + $0xc18] sm:$0xff]  ;;  %v1132_v4 = vld [vmem:[%s5653_s25 + $0xc20] sm:$0xff] }
  0x74   : > { %1129 = vst [vmem:[%s5658_s26 + $0x610] sm:$0xff] %v1128_v2  ;;  %v1134_v5 = vld [vmem:[%s5653_s25 + $0xc28] sm:$0xff]  ;;  %1131 = vst [vmem:[%s5658_s26 + $0x618] sm:$0xff] %v1130_v3  ;;  %v1136_v6 = vld [vmem:[%s5653_s25 + $0xc30] sm:$0xff] }
  0x75   : > { %1133 = vst [vmem:[%s5658_s26 + $0x620] sm:$0xff] %v1132_v4  ;;  %1135 = vst [vmem:[%s5658_s26 + $0x628] sm:$0xff] %v1134_v5  ;;  %v1138_v7 = vld [vmem:[%s5653_s25 + $0xc38] sm:$0xff]  ;;  %v1140_v8 = vld [vmem:[%s5653_s25 + $0xc40] sm:$0xff] }
  0x76   : > { %1137 = vst [vmem:[%s5658_s26 + $0x630] sm:$0xff] %v1136_v6  ;;  %1139 = vst [vmem:[%s5658_s26 + $0x638] sm:$0xff] %v1138_v7  ;;  %v1142_v9 = vld [vmem:[%s5653_s25 + $0xc48] sm:$0xff]  ;;  %v1144_v10 = vld [vmem:[%s5653_s25 + $0xc50] sm:$0xff] }
  0x77   : > { %1141 = vst [vmem:[%s5658_s26 + $0x640] sm:$0xff] %v1140_v8  ;;  %v1146_v11 = vld [vmem:[%s5653_s25 + $0xc58] sm:$0xff]  ;;  %1143 = vst [vmem:[%s5658_s26 + $0x648] sm:$0xff] %v1142_v9  ;;  %v1148_v12 = vld [vmem:[%s5653_s25 + $0xc60] sm:$0xff] }
  0x78   : > { %1145 = vst [vmem:[%s5658_s26 + $0x650] sm:$0xff] %v1144_v10  ;;  %1147 = vst [vmem:[%s5658_s26 + $0x658] sm:$0xff] %v1146_v11  ;;  %v1150_v13 = vld [vmem:[%s5653_s25 + $0xc68] sm:$0xff]  ;;  %v1152_v14 = vld [vmem:[%s5653_s25 + $0xc70] sm:$0xff] }
  0x79   : > { %1149 = vst [vmem:[%s5658_s26 + $0x660] sm:$0xff] %v1148_v12  ;;  %1151 = vst [vmem:[%s5658_s26 + $0x668] sm:$0xff] %v1150_v13  ;;  %v1154_v15 = vld [vmem:[%s5653_s25 + $0xc78] sm:$0xff]  ;;  %v1156_v16 = vld [vmem:[%s5653_s25 + $0xc80] sm:$0xff] }
  0x7a   : > { %1153 = vst [vmem:[%s5658_s26 + $0x670] sm:$0xff] %v1152_v14  ;;  %v1158_v17 = vld [vmem:[%s5653_s25 + $0xc88] sm:$0xff]  ;;  %1155 = vst [vmem:[%s5658_s26 + $0x678] sm:$0xff] %v1154_v15  ;;  %v1160_v18 = vld [vmem:[%s5653_s25 + $0xc90] sm:$0xff] }
  0x7b   : > { %1157 = vst [vmem:[%s5658_s26 + $0x680] sm:$0xff] %v1156_v16  ;;  %1159 = vst [vmem:[%s5658_s26 + $0x688] sm:$0xff] %v1158_v17  ;;  %v1162_v19 = vld [vmem:[%s5653_s25 + $0xc98] sm:$0xff]  ;;  %v1164_v20 = vld [vmem:[%s5653_s25 + $0xca0] sm:$0xff] }
  0x7c   : > { %1161 = vst [vmem:[%s5658_s26 + $0x690] sm:$0xff] %v1160_v18  ;;  %1163 = vst [vmem:[%s5658_s26 + $0x698] sm:$0xff] %v1162_v19  ;;  %v1166_v21 = vld [vmem:[%s5653_s25 + $0xca8] sm:$0xff]  ;;  %v1168_v22 = vld [vmem:[%s5653_s25 + $0xcb0] sm:$0xff] }
  0x7d   : > { %1165 = vst [vmem:[%s5658_s26 + $0x6a0] sm:$0xff] %v1164_v20  ;;  %v1170_v23 = vld [vmem:[%s5653_s25 + $0xcb8] sm:$0xff]  ;;  %1167 = vst [vmem:[%s5658_s26 + $0x6a8] sm:$0xff] %v1166_v21  ;;  %v1172_v24 = vld [vmem:[%s5653_s25 + $0xcc0] sm:$0xff] }
  0x7e   : > { %1169 = vst [vmem:[%s5658_s26 + $0x6b0] sm:$0xff] %v1168_v22  ;;  %1171 = vst [vmem:[%s5658_s26 + $0x6b8] sm:$0xff] %v1170_v23  ;;  %v1174_v25 = vld [vmem:[%s5653_s25 + $0xcc8] sm:$0xff]  ;;  %v1176_v26 = vld [vmem:[%s5653_s25 + $0xcd0] sm:$0xff] }
  0x7f   : > { %1173 = vst [vmem:[%s5658_s26 + $0x6c0] sm:$0xff] %v1172_v24  ;;  %1175 = vst [vmem:[%s5658_s26 + $0x6c8] sm:$0xff] %v1174_v25  ;;  %v1178_v27 = vld [vmem:[%s5653_s25 + $0xcd8] sm:$0xff]  ;;  %v1180_v28 = vld [vmem:[%s5653_s25 + $0xce0] sm:$0xff] }
  0x80   : > { %1177 = vst [vmem:[%s5658_s26 + $0x6d0] sm:$0xff] %v1176_v26  ;;  %v1182_v29 = vld [vmem:[%s5653_s25 + $0xce8] sm:$0xff]  ;;  %1179 = vst [vmem:[%s5658_s26 + $0x6d8] sm:$0xff] %v1178_v27  ;;  %v1184_v30 = vld [vmem:[%s5653_s25 + $0xcf0] sm:$0xff] }
  0x81   : > { %1181 = vst [vmem:[%s5658_s26 + $0x6e0] sm:$0xff] %v1180_v28  ;;  %1183 = vst [vmem:[%s5658_s26 + $0x6e8] sm:$0xff] %v1182_v29  ;;  %v1186_v31 = vld [vmem:[%s5653_s25 + $0xcf8] sm:$0xff]  ;;  %v1188_v32 = vld [vmem:[%s5653_s25 + $0xd00] sm:$0xff] }
  0x82   : > { %1185 = vst [vmem:[%s5658_s26 + $0x6f0] sm:$0xff] %v1184_v30  ;;  %1187 = vst [vmem:[%s5658_s26 + $0x6f8] sm:$0xff] %v1186_v31  ;;  %v1190_v33 = vld [vmem:[%s5653_s25 + $0xd08] sm:$0xff]  ;;  %v1192_v34 = vld [vmem:[%s5653_s25 + $0xd10] sm:$0xff] }
  0x83   : > { %1189 = vst [vmem:[%s5658_s26 + $0x700] sm:$0xff] %v1188_v32  ;;  %v1194_v35 = vld [vmem:[%s5653_s25 + $0xd18] sm:$0xff]  ;;  %1191 = vst [vmem:[%s5658_s26 + $0x708] sm:$0xff] %v1190_v33  ;;  %v1196_v36 = vld [vmem:[%s5653_s25 + $0xd20] sm:$0xff] }
  0x84   : > { %1193 = vst [vmem:[%s5658_s26 + $0x710] sm:$0xff] %v1192_v34  ;;  %1195 = vst [vmem:[%s5658_s26 + $0x718] sm:$0xff] %v1194_v35  ;;  %v1198_v37 = vld [vmem:[%s5653_s25 + $0xd28] sm:$0xff]  ;;  %v1200_v38 = vld [vmem:[%s5653_s25 + $0xd30] sm:$0xff] }
  0x85   : > { %1197 = vst [vmem:[%s5658_s26 + $0x720] sm:$0xff] %v1196_v36  ;;  %1199 = vst [vmem:[%s5658_s26 + $0x728] sm:$0xff] %v1198_v37  ;;  %v1202_v39 = vld [vmem:[%s5653_s25 + $0xd38] sm:$0xff]  ;;  %v1204_v40 = vld [vmem:[%s5653_s25 + $0xd40] sm:$0xff] }
  0x86   : > { %1201 = vst [vmem:[%s5658_s26 + $0x730] sm:$0xff] %v1200_v38  ;;  %v1206_v41 = vld [vmem:[%s5653_s25 + $0xd48] sm:$0xff]  ;;  %1203 = vst [vmem:[%s5658_s26 + $0x738] sm:$0xff] %v1202_v39  ;;  %v1208_v42 = vld [vmem:[%s5653_s25 + $0xd50] sm:$0xff] }
  0x87   : > { %1205 = vst [vmem:[%s5658_s26 + $0x740] sm:$0xff] %v1204_v40  ;;  %1207 = vst [vmem:[%s5658_s26 + $0x748] sm:$0xff] %v1206_v41  ;;  %v1210_v43 = vld [vmem:[%s5653_s25 + $0xd58] sm:$0xff]  ;;  %v1212_v44 = vld [vmem:[%s5653_s25 + $0xd60] sm:$0xff] }
  0x88   : > { %1209 = vst [vmem:[%s5658_s26 + $0x750] sm:$0xff] %v1208_v42  ;;  %1211 = vst [vmem:[%s5658_s26 + $0x758] sm:$0xff] %v1210_v43  ;;  %v1214_v45 = vld [vmem:[%s5653_s25 + $0xd68] sm:$0xff]  ;;  %v1216_v46 = vld [vmem:[%s5653_s25 + $0xd70] sm:$0xff] }
  0x89   : > { %1213 = vst [vmem:[%s5658_s26 + $0x760] sm:$0xff] %v1212_v44  ;;  %v1218_v47 = vld [vmem:[%s5653_s25 + $0xd78] sm:$0xff]  ;;  %1215 = vst [vmem:[%s5658_s26 + $0x768] sm:$0xff] %v1214_v45  ;;  %v1220_v48 = vld [vmem:[%s5653_s25 + $0xf00] sm:$0xff] }
  0x8a   : > { %1217 = vst [vmem:[%s5658_s26 + $0x770] sm:$0xff] %v1216_v46  ;;  %1219 = vst [vmem:[%s5658_s26 + $0x778] sm:$0xff] %v1218_v47  ;;  %v1222_v49 = vld [vmem:[%s5653_s25 + $0xf08] sm:$0xff]  ;;  %v1224_v50 = vld [vmem:[%s5653_s25 + $0xf10] sm:$0xff] }
  0x8b   : > { %1221 = vst [vmem:[%s5658_s26 + $0x780] sm:$0xff] %v1220_v48  ;;  %1223 = vst [vmem:[%s5658_s26 + $0x788] sm:$0xff] %v1222_v49  ;;  %v1226_v51 = vld [vmem:[%s5653_s25 + $0xf18] sm:$0xff]  ;;  %v1228_v52 = vld [vmem:[%s5653_s25 + $0xf20] sm:$0xff] }
  0x8c   : > { %1225 = vst [vmem:[%s5658_s26 + $0x790] sm:$0xff] %v1224_v50  ;;  %v1230_v53 = vld [vmem:[%s5653_s25 + $0xf28] sm:$0xff]  ;;  %1227 = vst [vmem:[%s5658_s26 + $0x798] sm:$0xff] %v1226_v51  ;;  %v1232_v54 = vld [vmem:[%s5653_s25 + $0xf30] sm:$0xff] }
  0x8d   : > { %1229 = vst [vmem:[%s5658_s26 + $0x7a0] sm:$0xff] %v1228_v52  ;;  %1231 = vst [vmem:[%s5658_s26 + $0x7a8] sm:$0xff] %v1230_v53  ;;  %v1234_v55 = vld [vmem:[%s5653_s25 + $0xf38] sm:$0xff]  ;;  %v1236_v56 = vld [vmem:[%s5653_s25 + $0xf40] sm:$0xff] }
  0x8e   : > { %1233 = vst [vmem:[%s5658_s26 + $0x7b0] sm:$0xff] %v1232_v54  ;;  %1235 = vst [vmem:[%s5658_s26 + $0x7b8] sm:$0xff] %v1234_v55  ;;  %v1238_v57 = vld [vmem:[%s5653_s25 + $0xf48] sm:$0xff]  ;;  %v1240_v58 = vld [vmem:[%s5653_s25 + $0xf50] sm:$0xff] }
  0x8f   : > { %1237 = vst [vmem:[%s5658_s26 + $0x7c0] sm:$0xff] %v1236_v56  ;;  %v1242_v59 = vld [vmem:[%s5653_s25 + $0xf58] sm:$0xff]  ;;  %1239 = vst [vmem:[%s5658_s26 + $0x7c8] sm:$0xff] %v1238_v57  ;;  %v1244_v60 = vld [vmem:[%s5653_s25 + $0xf60] sm:$0xff] }
  0x90   : > { %1241 = vst [vmem:[%s5658_s26 + $0x7d0] sm:$0xff] %v1240_v58  ;;  %1243 = vst [vmem:[%s5658_s26 + $0x7d8] sm:$0xff] %v1242_v59  ;;  %v1246_v61 = vld [vmem:[%s5653_s25 + $0xf68] sm:$0xff]  ;;  %v1248_v62 = vld [vmem:[%s5653_s25 + $0xf70] sm:$0xff] }
  0x91   : > { %1245 = vst [vmem:[%s5658_s26 + $0x7e0] sm:$0xff] %v1244_v60  ;;  %1247 = vst [vmem:[%s5658_s26 + $0x7e8] sm:$0xff] %v1246_v61  ;;  %v1250_v63 = vld [vmem:[%s5653_s25 + $0xf78] sm:$0xff]  ;;  %v1252_v0 = vld [vmem:[%s5653_s25 + $0xf80] sm:$0xff] }
  0x92   : > { %1249 = vst [vmem:[%s5658_s26 + $0x7f0] sm:$0xff] %v1248_v62  ;;  %v1254_v1 = vld [vmem:[%s5653_s25 + $0xf88] sm:$0xff]  ;;  %1251 = vst [vmem:[%s5658_s26 + $0x7f8] sm:$0xff] %v1250_v63  ;;  %v1256_v2 = vld [vmem:[%s5653_s25 + $0xf90] sm:$0xff] }
  0x93   : > { %1253 = vst [vmem:[%s5658_s26 + $0x800] sm:$0xff] %v1252_v0  ;;  %1255 = vst [vmem:[%s5658_s26 + $0x808] sm:$0xff] %v1254_v1  ;;  %v1258_v3 = vld [vmem:[%s5653_s25 + $0xf98] sm:$0xff]  ;;  %v1260_v4 = vld [vmem:[%s5653_s25 + $0xfa0] sm:$0xff] }
  0x94   : > { %1257 = vst [vmem:[%s5658_s26 + $0x810] sm:$0xff] %v1256_v2  ;;  %1259 = vst [vmem:[%s5658_s26 + $0x818] sm:$0xff] %v1258_v3  ;;  %v1262_v5 = vld [vmem:[%s5653_s25 + $0xfa8] sm:$0xff]  ;;  %v1264_v6 = vld [vmem:[%s5653_s25 + $0xfb0] sm:$0xff] }
  0x95   : > { %1261 = vst [vmem:[%s5658_s26 + $0x820] sm:$0xff] %v1260_v4  ;;  %v1266_v7 = vld [vmem:[%s5653_s25 + $0xfb8] sm:$0xff]  ;;  %1263 = vst [vmem:[%s5658_s26 + $0x828] sm:$0xff] %v1262_v5  ;;  %v1268_v8 = vld [vmem:[%s5653_s25 + $0xfc0] sm:$0xff] }
  0x96   : > { %1265 = vst [vmem:[%s5658_s26 + $0x830] sm:$0xff] %v1264_v6  ;;  %1267 = vst [vmem:[%s5658_s26 + $0x838] sm:$0xff] %v1266_v7  ;;  %v1270_v9 = vld [vmem:[%s5653_s25 + $0xfc8] sm:$0xff]  ;;  %v1272_v10 = vld [vmem:[%s5653_s25 + $0xfd0] sm:$0xff] }
  0x97   : > { %1269 = vst [vmem:[%s5658_s26 + $0x840] sm:$0xff] %v1268_v8  ;;  %1271 = vst [vmem:[%s5658_s26 + $0x848] sm:$0xff] %v1270_v9  ;;  %v1274_v11 = vld [vmem:[%s5653_s25 + $0xfd8] sm:$0xff]  ;;  %v1276_v12 = vld [vmem:[%s5653_s25 + $0xfe0] sm:$0xff] }
  0x98   : > { %1273 = vst [vmem:[%s5658_s26 + $0x850] sm:$0xff] %v1272_v10  ;;  %v1278_v13 = vld [vmem:[%s5653_s25 + $0xfe8] sm:$0xff]  ;;  %1275 = vst [vmem:[%s5658_s26 + $0x858] sm:$0xff] %v1274_v11  ;;  %v1280_v14 = vld [vmem:[%s5653_s25 + $0xff0] sm:$0xff] }
  0x99   : > { %1277 = vst [vmem:[%s5658_s26 + $0x860] sm:$0xff] %v1276_v12  ;;  %1279 = vst [vmem:[%s5658_s26 + $0x868] sm:$0xff] %v1278_v13  ;;  %v1282_v15 = vld [vmem:[%s5653_s25 + $0xff8] sm:$0xff]  ;;  %v1284_v16 = vld [vmem:[%s5653_s25 + $0x1000] sm:$0xff] }
  0x9a   : > { %1281 = vst [vmem:[%s5658_s26 + $0x870] sm:$0xff] %v1280_v14  ;;  %1283 = vst [vmem:[%s5658_s26 + $0x878] sm:$0xff] %v1282_v15  ;;  %v1286_v17 = vld [vmem:[%s5653_s25 + $0x1008] sm:$0xff]  ;;  %v1288_v18 = vld [vmem:[%s5653_s25 + $0x1010] sm:$0xff] }
  0x9b   : > { %1285 = vst [vmem:[%s5658_s26 + $0x880] sm:$0xff] %v1284_v16  ;;  %v1290_v19 = vld [vmem:[%s5653_s25 + $0x1018] sm:$0xff]  ;;  %1287 = vst [vmem:[%s5658_s26 + $0x888] sm:$0xff] %v1286_v17  ;;  %v1292_v20 = vld [vmem:[%s5653_s25 + $0x1020] sm:$0xff] }
  0x9c   : > { %1289 = vst [vmem:[%s5658_s26 + $0x890] sm:$0xff] %v1288_v18  ;;  %1291 = vst [vmem:[%s5658_s26 + $0x898] sm:$0xff] %v1290_v19  ;;  %v1294_v21 = vld [vmem:[%s5653_s25 + $0x1028] sm:$0xff]  ;;  %v1296_v22 = vld [vmem:[%s5653_s25 + $0x1030] sm:$0xff] }
  0x9d   : > { %1293 = vst [vmem:[%s5658_s26 + $0x8a0] sm:$0xff] %v1292_v20  ;;  %1295 = vst [vmem:[%s5658_s26 + $0x8a8] sm:$0xff] %v1294_v21  ;;  %v1298_v23 = vld [vmem:[%s5653_s25 + $0x1038] sm:$0xff]  ;;  %v1300_v24 = vld [vmem:[%s5653_s25 + $0x1040] sm:$0xff] }
  0x9e   : > { %1297 = vst [vmem:[%s5658_s26 + $0x8b0] sm:$0xff] %v1296_v22  ;;  %v1302_v25 = vld [vmem:[%s5653_s25 + $0x1048] sm:$0xff]  ;;  %1299 = vst [vmem:[%s5658_s26 + $0x8b8] sm:$0xff] %v1298_v23  ;;  %v1304_v26 = vld [vmem:[%s5653_s25 + $0x1050] sm:$0xff] }
  0x9f   : > { %1301 = vst [vmem:[%s5658_s26 + $0x8c0] sm:$0xff] %v1300_v24  ;;  %1303 = vst [vmem:[%s5658_s26 + $0x8c8] sm:$0xff] %v1302_v25  ;;  %v1306_v27 = vld [vmem:[%s5653_s25 + $0x1058] sm:$0xff]  ;;  %v1308_v28 = vld [vmem:[%s5653_s25 + $0x1060] sm:$0xff] }
  0xa0   : > { %1305 = vst [vmem:[%s5658_s26 + $0x8d0] sm:$0xff] %v1304_v26  ;;  %1307 = vst [vmem:[%s5658_s26 + $0x8d8] sm:$0xff] %v1306_v27  ;;  %v1310_v29 = vld [vmem:[%s5653_s25 + $0x1068] sm:$0xff]  ;;  %v1312_v30 = vld [vmem:[%s5653_s25 + $0x1070] sm:$0xff] }
  0xa1   : > { %1309 = vst [vmem:[%s5658_s26 + $0x8e0] sm:$0xff] %v1308_v28  ;;  %v1314_v31 = vld [vmem:[%s5653_s25 + $0x1078] sm:$0xff]  ;;  %1311 = vst [vmem:[%s5658_s26 + $0x8e8] sm:$0xff] %v1310_v29 }
  0xa2   : > { %1313 = vst [vmem:[%s5658_s26 + $0x8f0] sm:$0xff] %v1312_v30  ;;  %1315 = vst [vmem:[%s5658_s26 + $0x8f8] sm:$0xff] %v1314_v31 }
  0xa3 PF: > { %p4463_p5 = scmp.ge.s32.totalorder %s5596_s14, 1  ;;  %p1320_p6 = scmp.lt.s32.totalorder %s5596_s14, 3 }
  0xa5   : > { %p1321_p7 = pnand %p4463_p5, %p1320_p6 }
  0xa7   : > { %1324 = sbr.rel (%p1321_p7) target bundleno = 689 (0x2b1), region = 66 }
  0xae   : > { %v4499_v32 = vld [vmem:[%s7198_s1 + $0x2] sm:$0x3]  ;;  %vm1525_vm0 = vcmask 1040384   ;;  %vm1526_vm1 = vcmask 1041408   ;;  %s1327_s29 = sand.u32 1, %s5588_s12   ;;  %v5598_v33 = vmov 65535  }
  0xaf   : > { %v1527_v34 = vsel %vm1525_vm0, 4294967295, %v5598_v33  ;;  %v4730_v35 = vld [vmem:[%s7198_s1 + $0x10] sm:$0x3]  ;;  %s5534_s5 = smul.u32 2304, %s1327_s29  ;;  %v4597_v37 = vld [vmem:[%s7198_s1 + $0x6] sm:$0x3] }
  0xb0   : > { %v6242_v36 = vsel %vm1526_vm1, %v1527_v34, 0  ;;  %v1457_v38 = vld [vmem:[%s7198_s1] sm:$0x3]  ;;  %v4615_v42 = vld [vmem:[%s7198_s1 + $0xa] sm:$0x3]  ;;  %vm1476_vm2 = vcmask 23552  }
  0xb1   : > { %v1530_v39 = vand.u32 %v4499_v32, %v6242_v36  ;;  %v6252_v40 = vand.u32 %v4730_v35, %v6242_v36  ;;  %v2021_v41 = vand.u32 %v4597_v37, %v6242_v36  ;;  %s6258_s12 = scalar_lea.vmem [#allocation2], %s5534_s5  ;;  %v6264_v46 = vand.u32 %v6242_v36, %v1457_v38  ;;  %v4516_v47 = vld [vmem:[%s7198_s1 + $0x4] sm:$0x3]  ;;  %s4464_s26 = sshll.u32 %s4456_s15, 4 }
  0xb2   : > { %v4467_v43 = vld [vmem:[%s6258_s12 + $0x180] sm:$0xff]  ;;  %v4468_v44 = vld [vmem:[%s6258_s12 + $0x188] sm:$0xff]  ;;  %v4469_v45 = vld [vmem:[%s6258_s12 + $0x198] sm:$0xff]  ;;  %vm1741_vm3 = vcmask 1046528   ;;  %v6282_v58 = vand.u32 %v4615_v42, %v6242_v36  ;;  %v6303_v12 = vand.u32 %v4516_v47, %v6242_v36  ;;  %p1353_p8 = scmp.lt.s32.totalorder %s4464_s26, 31  ;;  %vm4359_vm4 = vcmask 195584  }
  0xb3   : > { %4968 = vmatprep.subr.bf16.mxu1 %v1530_v39  ;;  %5104 = vmatprep.subr.bf16.mxu0 %v6252_v40  ;;  %v1458_v48 = vpack.c.bf16 %v4468_v44, %v4467_v43  ;;  %v4470_v49 = vld [vmem:[%s6258_s12 + $0x1a0] sm:$0xff]  ;;  %v4633_v51 = vld [vmem:[%s6258_s12 + $0x608] sm:$0xff]  ;;  %v4634_v53 = vld [vmem:[%s6258_s12 + $0x610] sm:$0x1] }
  0xb4   : > { %v4632_v50 = vld [vmem:[%s6258_s12 + $0x600] sm:$0xff]  ;;  %4969 = vmatpush3.bf16.msra.mxu1 %v1530_v39  ;;  %5105 = vmatpush3.bf16.msra.mxu0 %v6252_v40  ;;  %v1459_v52 = vpack.c.bf16 %v4470_v49, %v4469_v45  ;;  %v2971_v55 = vrot.slane %v4633_v51, 1  ;;  %v6276_v56 = vld [vmem:[%s6258_s12 + $0x618] sm:$0xff]  ;;  %v2973_v59 = vrot.slane %v4634_v53, 1  ;;  %v4637_v60 = vld [vmem:[%s6258_s12 + $0x628] sm:$0x1] }
  0xb5   : > { %v2970_v54 = vrot.slane %v4632_v50, 1  ;;  %7209 = vst [vmem:[#allocation3_spill] sm:$0xff] %v6276_v56  ;;  %v6279_v57 = vld [vmem:[%s6258_s12 + $0x620] sm:$0xff]  ;;  %4970 = vmatprep.mubr.msk.bf16.mxu1 %vm1476_vm2, %v1458_v48  ;;  %5002 = vmatprep.subr.bf16.mxu1 %v2021_v41  ;;  %v2975_v62 = vrot.slane %v6276_v56, 1  ;;  %v4471_v0 = vld [vmem:[%s6258_s12 + $0x1b0] sm:$0xff]  ;;  %v2978_v2 = vrot.slane %v4637_v60, 1 }
  0xb6   : > { %7210 = vst [vmem:[#allocation4_spill] sm:$0xff] %v6279_v57  ;;  %v2976_v63 = vrot.slane %v6279_v57, 1  ;;  %5138 = vmatprep.subr.bf16.mxu0 %v6264_v46  ;;  %v4472_v3 = vld [vmem:[%s6258_s12 + $0x1b8] sm:$0xff]  ;;  %v4473_v4 = vld [vmem:[%s6258_s12 + $0x1c8] sm:$0xff]  ;;  %v4474_v5 = vld [vmem:[%s6258_s12 + $0x1d0] sm:$0xff]  ;;  %v2974_v6 = vsel %vm1741_vm3, %v2971_v55, %v2973_v59  ;;  %s7230_s26 = smov (!%p1353_p8, %s4464_s26), 31 }
  0xb7   : > { %v2972_v1 = vsel %vm1741_vm3, %v2970_v54, %v2971_v55  ;;  %4971 = vmatmul.mubr.msk.bf16.vlgmr.msra.gmra.mrb[0].mxu1 %vm1476_vm2, %v1459_v52  ;;  %v1460_v8 = vpack.c.bf16 %v4472_v3, %v4471_v0  ;;  %v4638_v9 = vld [vmem:[%s6258_s12 + $0x630] sm:$0xff]  ;;  %v4639_v10 = vld [vmem:[%s6258_s12 + $0x638] sm:$0xff]  ;;  %v4640_v11 = vld [vmem:[%s6258_s12 + $0x640] sm:$0x1]  ;;  %v1461_v26 = vpack.c.bf16 %v4474_v5, %v4473_v4  ;;  %s4814_s29 = sshll.u32 %s7230_s26, 4 }
  0xb8   : > { %v2977_v7 = vsel %vm1741_vm3, %v2975_v62, %v2976_v63  ;;  %v3082_v13 = vpack.c.bf16 %v2974_v6, %v2972_v1  ;;  %5003 = vmatpush3.bf16.msra.mxu1 %v2021_v41  ;;  %v2979_v14 = vsel %vm1741_vm3, %v2976_v63, %v2978_v2  ;;  %v2980_v15 = vrot.slane %v4638_v9, 1  ;;  %v4641_v17 = vld [vmem:[%s6258_s12 + $0x648] sm:$0xff]  ;;  %v4642_v18 = vld [vmem:[%s6258_s12 + $0x650] sm:$0xff]  ;;  %v4643_v19 = vld [vmem:[%s6258_s12 + $0x658] sm:$0x1]  ;;  %s7086_s30 = scalar_lea.vmem %s7200_s3, %s4814_s29 }
  0xb9   : > { %v2981_v16 = vrot.slane %v4639_v10, 1  ;;  %v3083_v20 = vpack.c.bf16 %v2979_v14, %v2977_v7  ;;  %4974 = vmatprep.mubr.msk.bf16.mxu1 %vm1476_vm2, %v1460_v8  ;;  %v2983_v21 = vrot.slane %v4640_v11, 1  ;;  %v2985_v22 = vrot.slane %v4641_v17, 1  ;;  %v4475_v24 = vld [vmem:[%s6258_s12 + $0x1e0] sm:$0xff]  ;;  %v4476_v25 = vld [vmem:[%s6258_s12 + $0x1e8] sm:$0xff]  ;;  %5036 = vmatprep.subr.bf16.mxu1 %v6282_v58  ;;  %v4647_v42 = vld [vmem:[%s6258_s12 + $0x678] sm:$0xff] }
  0xba   : > { %v2986_v23 = vrot.slane %v4642_v18, 1  ;;  %5106 = vmatprep.mubr.msk.bf16.mxu0 %vm1476_vm2, %v3082_v13  ;;  %v2988_v28 = vrot.slane %v4643_v19, 1  ;;  %v4644_v29 = vld [vmem:[%s6258_s12 + $0x660] sm:$0xff]  ;;  %v4645_v30 = vld [vmem:[%s6258_s12 + $0x668] sm:$0xff]  ;;  %v1462_v33 = vpack.c.bf16 %v4476_v25, %v4475_v24  ;;  %v4646_v34 = vld [vmem:[%s6258_s12 + $0x670] sm:$0x1] }
  0xbb   : > { %v2982_v27 = vsel %vm1741_vm3, %v2980_v15, %v2981_v16  ;;  %5107 = vmatmul.mubr.msk.bf16.vlgmr.msra.gmra.mrb[0].mxu0 %vm1476_vm2, %v3083_v20  ;;  %v2984_v31 = vsel %vm1741_vm3, %v2981_v16, %v2983_v21  ;;  %v2990_v35 = vrot.slane %v4644_v29, 1  ;;  %v2991_v39 = vrot.slane %v4645_v30, 1  ;;  %v4648_v43 = vld [vmem:[%s6258_s12 + $0x680] sm:$0xff]  ;;  %v4649_v44 = vld [vmem:[%s6258_s12 + $0x688] sm:$0x1]  ;;  %v4650_v47 = vld [vmem:[%s6258_s12 + $0x690] sm:$0xff] }
  0xbc   : > { %v2987_v32 = vsel %vm1741_vm3, %v2985_v22, %v2986_v23  ;;  %5139 = vmatpush3.bf16.msra.mxu0 %v6264_v46  ;;  %v3084_v37 = vpack.c.bf16 %v2984_v31, %v2982_v27  ;;  %v2989_v38 = vsel %vm1741_vm3, %v2986_v23, %v2988_v28  ;;  %v2993_v41 = vrot.slane %v4646_v34, 1  ;;  %v4651_v48 = vld [vmem:[%s6258_s12 + $0x698] sm:$0xff]  ;;  %v4652_v49 = vld [vmem:[%s6258_s12 + $0x6a0] sm:$0x1]  ;;  %v4479_v60 = vld [vmem:[%s6258_s12 + $0x210] sm:$0xff] }
  0xbd   : > { %5172 = vmatprep.subr.bf16.mxu0 %v6303_v12  ;;  %v2992_v45 = vsel %vm1741_vm3, %v2990_v35, %v2991_v39  ;;  %v3085_v50 = vpack.c.bf16 %v2989_v38, %v2987_v32  ;;  %v4477_v51 = vld [vmem:[%s6258_s12 + $0x1f8] sm:$0xff]  ;;  %v4478_v52 = vld [vmem:[%s6258_s12 + $0x200] sm:$0xff]  ;;  %v2995_v54 = vrot.slane %v4647_v42, 1  ;;  %v2996_v55 = vrot.slane %v4648_v43, 1  ;;  %v4653_v8 = vld [vmem:[%s6258_s12 + $0x6a8] sm:$0xff] }
  0xbe   : > { %5110 = vmatprep.mubr.msk.bf16.mxu0 %vm1476_vm2, %v3084_v37  ;;  %v2994_v46 = vsel %vm1741_vm3, %v2991_v39, %v2993_v41  ;;  %v2998_v59 = vrot.slane %v4649_v44, 1  ;;  %v4480_v62 = vld [vmem:[%s6258_s12 + $0x218] sm:$0xff]  ;;  %v3000_v63 = vrot.slane %v4650_v47, 1  ;;  %v3001_v0 = vrot.slane %v4651_v48, 1  ;;  %v4654_v9 = vld [vmem:[%s6258_s12 + $0x6b0] sm:$0xff]  ;;  %v4481_v13 = vld [vmem:[%s6258_s12 + $0x228] sm:$0xff] }
  0xbf   : > { %4975 = vmatmul.mubr.msk.bf16.gmra.mrb[4].mxu1 %vm1476_vm2, %v1461_v26  ;;  %v3086_v53 = vpack.c.bf16 %v2994_v46, %v2992_v45  ;;  %v3003_v1 = vrot.slane %v4652_v49, 1  ;;  %v1463_v2 = vpack.c.bf16 %v4478_v52, %v4477_v51  ;;  %v2997_v3 = vsel %vm1741_vm3, %v2995_v54, %v2996_v55  ;;  %v4655_v10 = vld [vmem:[%s6258_s12 + $0x6b8] sm:$0x1]  ;;  %v4482_v14 = vld [vmem:[%s6258_s12 + $0x230] sm:$0xff]  ;;  %v4483_v19 = vld [vmem:[%s6258_s12 + $0x240] sm:$0xff] }
  0xc0   : > { %4978 = vmatprep.mubr.msk.bf16.mxu1 %vm1476_vm2, %v1462_v33  ;;  %v2999_v4 = vsel %vm1741_vm3, %v2996_v55, %v2998_v59  ;;  %v1464_v5 = vpack.c.bf16 %v4480_v62, %v4479_v60  ;;  %v3002_v6 = vsel %vm1741_vm3, %v3000_v63, %v3001_v0  ;;  %v3005_v16 = vrot.slane %v4653_v8, 1  ;;  %v4484_v20 = vld [vmem:[%s6258_s12 + $0x248] sm:$0xff]  ;;  %v6359_v25 = vld [vmem:[%s6258_s12] sm:$0xff]  ;;  %v4485_v28 = vld [vmem:[%s6258_s12 + $0x258] sm:$0xff] }
  0xc1   : > { %v3004_v7 = vsel %vm1741_vm3, %v3001_v0, %v3003_v1  ;;  %v3087_v11 = vpack.c.bf16 %v2999_v4, %v2997_v3  ;;  %v3006_v17 = vrot.slane %v4654_v9, 1  ;;  %v3008_v18 = vrot.slane %v4655_v10, 1  ;;  %v6362_v26 = vld [vmem:[%s6258_s12 + $0x8] sm:$0xff]  ;;  %v4486_v29 = vld [vmem:[%s6258_s12 + $0x260] sm:$0xff]  ;;  %v4487_v31 = vld [vmem:[%s6258_s12 + $0x270] sm:$0xff] }
  0xc2   : > { %v3088_v15 = vpack.c.bf16 %v3004_v7, %v3002_v6  ;;  %v1465_v21 = vpack.c.bf16 %v4482_v14, %v4481_v13  ;;  %v1466_v24 = vpack.c.bf16 %v4484_v20, %v4483_v19  ;;  %v1441_v30 = vpack.c.bf16 %v6362_v26, %v6359_v25  ;;  %v4488_v32 = vld [vmem:[%s6258_s12 + $0x278] sm:$0xff]  ;;  %v6378_v35 = vld [vmem:[%s6258_s12 + $0x20] sm:$0xff]  ;;  %v6381_v38 = vld [vmem:[%s6258_s12 + $0x30] sm:$0xff] }
  0xc3   : > { %5111 = vmatmul.mubr.msk.bf16.gmra.mrb[4].mxu0 %vm1476_vm2, %v3085_v50  ;;  %v3007_v22 = vsel %vm1741_vm3, %v3005_v16, %v3006_v17  ;;  %v3009_v23 = vsel %vm1741_vm3, %v3006_v17, %v3008_v18  ;;  %v1467_v33 = vpack.c.bf16 %v4486_v29, %v4485_v28  ;;  %v6375_v34 = vld [vmem:[%s6258_s12 + $0x18] sm:$0xff]  ;;  %v1468_v37 = vpack.c.bf16 %v4488_v32, %v4487_v31  ;;  %v4614_v42 = vld [vmem:[%s7198_s1 + $0x8] sm:$0x3]  ;;  %v4490_v44 = vld [vmem:[%s6258_s12 + $0x290] sm:$0xff] }
  0xc4   : > { %5114 = vmatprep.mubr.msk.bf16.mxu0 %vm1476_vm2, %v3086_v53  ;;  %v3089_v27 = vpack.c.bf16 %v3009_v23, %v3007_v22  ;;  %v6384_v39 = vld [vmem:[%s6258_s12 + $0x38] sm:$0xff]  ;;  %v1442_v41 = vpack.c.bf16 %v6378_v35, %v6375_v34  ;;  %v4489_v43 = vld [vmem:[%s6258_s12 + $0x288] sm:$0xff]  ;;  %v4491_v46 = vld [vmem:[%s6258_s12 + $0x2a0] sm:$0xff]  ;;  %v6400_v48 = vand.u32 %v4614_v42, %v6242_v36  ;;  %v1747_v56 = vrot.slane %v6375_v34, 1 }
  0xc5   : > { %v1443_v45 = vpack.c.bf16 %v6384_v39, %v6381_v38  ;;  %v4492_v47 = vld [vmem:[%s6258_s12 + $0x2a8] sm:$0xff]  ;;  %v1469_v49 = vpack.c.bf16 %v4490_v44, %v4489_v43  ;;  %v6409_v51 = vld [vmem:[%s6258_s12 + $0x50] sm:$0xff]  ;;  %v6412_v53 = vld [vmem:[%s6258_s12 + $0x60] sm:$0xff]  ;;  %v1748_v57 = vrot.slane %v6378_v35, 1 }
  0xc6   : > { %v6406_v50 = vld [vmem:[%s6258_s12 + $0x48] sm:$0xff]  ;;  %v1470_v52 = vpack.c.bf16 %v4492_v47, %v4491_v46  ;;  %v4493_v55 = vld [vmem:[%s6258_s12 + $0x2b8] sm:$0xff]  ;;  %v4494_v59 = vld [vmem:[%s6258_s12 + $0x2c0] sm:$0xff] }
  0xc7   : > { %4979 = vmatmul.mubr.msk.bf16.gmra.mrb[8].mxu1 %vm1476_vm2, %v1463_v2  ;;  %v6415_v54 = vld [vmem:[%s6258_s12 + $0x68] sm:$0xff]  ;;  %v4495_v62 = vld [vmem:[%s6258_s12 + $0x2d0] sm:$0xff]  ;;  %v4496_v63 = vld [vmem:[%s6258_s12 + $0x2d8] sm:$0xff]  ;;  %v1471_v0 = vpack.c.bf16 %v4494_v59, %v4493_v55 }
  0xc8   : > { %4982 = vmatprep.mubr.msk.bf16.mxu1 %vm1476_vm2, %v1464_v5  ;;  %v1445_v60 = vpack.c.bf16 %v6415_v54, %v6412_v53  ;;  %v6431_v1 = vld [vmem:[%s6258_s12 + $0x78] sm:$0xff]  ;;  %v6434_v2 = vld [vmem:[%s6258_s12 + $0x80] sm:$0xff]  ;;  %v1472_v3 = vpack.c.bf16 %v4496_v63, %v4495_v62  ;;  %v6437_v4 = vld [vmem:[%s6258_s12 + $0x90] sm:$0xff] }
  0xc9   : > { %v6440_v5 = vld [vmem:[%s6258_s12 + $0x98] sm:$0xff]  ;;  %v1446_v6 = vpack.c.bf16 %v6434_v2, %v6431_v1  ;;  %v4497_v7 = vld [vmem:[%s6258_s12 + $0x2e8] sm:$0xff]  ;;  %v4498_v8 = vld [vmem:[%s6258_s12 + $0x2f0] sm:$0xff] }
  0xca   : > { %v1447_v9 = vpack.c.bf16 %v6440_v5, %v6437_v4  ;;  %v6451_v10 = vld [vmem:[%s6258_s12 + $0x300] sm:$0xff]  ;;  %v1473_v13 = vpack.c.bf16 %v4498_v8, %v4497_v7  ;;  %v6459_v14 = vld [vmem:[%s6258_s12 + $0xa8] sm:$0xff]  ;;  %v6477_v20 = vld [vmem:[%s6258_s12 + $0x318] sm:$0xff] }
  0xcb   : > { %5115 = vmatmul.mubr.msk.bf16.gmra.mrb[8].mxu0 %vm1476_vm2, %v3087_v11  ;;  %v6454_v11 = vld [vmem:[%s6258_s12 + $0x308] sm:$0xff]  ;;  %v6467_v17 = vld [vmem:[%s6258_s12 + $0xc0] sm:$0xff]  ;;  %v6485_v23 = vld [vmem:[%s6258_s12 + $0x330] sm:$0xff] }
  0xcc   : > { %5118 = vmatprep.mubr.msk.bf16.mxu0 %vm1476_vm2, %v3088_v15  ;;  %v6462_v15 = vld [vmem:[%s6258_s12 + $0xb0] sm:$0xff]  ;;  %v1954_v16 = vpack.c.bf16 %v6454_v11, %v6451_v10  ;;  %v6470_v18 = vld [vmem:[%s6258_s12 + $0xc8] sm:$0xff]  ;;  %v6498_v29 = vld [vmem:[%s6258_s12 + $0xd8] sm:$0xff] }
  0xcd   : > { %v1448_v19 = vpack.c.bf16 %v6462_v15, %v6459_v14  ;;  %v1449_v22 = vpack.c.bf16 %v6470_v18, %v6467_v17  ;;  %v6506_v32 = vld [vmem:[%s6258_s12 + $0xf0] sm:$0xff]  ;;  %v6520_v42 = vld [vmem:[%s6258_s12 + $0x348] sm:$0xff]  ;;  %v6560_v62 = vld [vmem:[%s6258_s12 + $0x380] sm:$0xff] }
  0xce   : > { %v6523_v43 = vld [vmem:[%s6258_s12 + $0x350] sm:$0xff]  ;;  %v6531_v46 = vld [vmem:[%s6258_s12 + $0x368] sm:$0xff]  ;;  %v6575_v7 = vld [vmem:[%s6258_s12 + $0x138] sm:$0xff] }
  0xcf   : > { %4983 = vmatmul.mubr.msk.bf16.gmra.mrb[12].mxu1 %vm1476_vm2, %v1465_v21  ;;  %v6480_v21 = vld [vmem:[%s6258_s12 + $0x320] sm:$0xff]  ;;  %v6539_v47 = vld [vmem:[%s6258_s12 + $0x108] sm:$0xff] }
  0xd0   : > { %4986 = vmatprep.mubr.msk.bf16.mxu1 %vm1476_vm2, %v1466_v24  ;;  %v6488_v24 = vld [vmem:[%s6258_s12 + $0x338] sm:$0xff]  ;;  %v1955_v28 = vpack.c.bf16 %v6480_v21, %v6477_v20  ;;  %v6550_v55 = vld [vmem:[%s6258_s12 + $0x128] sm:$0xff]  ;;  %v6578_v8 = vld [vmem:[%s6258_s12 + $0x140] sm:$0xff] }
  0xd1   : > { %v1956_v31 = vpack.c.bf16 %v6488_v24, %v6485_v23  ;;  %v1368_v61 = vld [vmem:[%s6258_s12 + $0x40] sm:$0x1] }
  0xd2   : > { %v1755_v34 = vrot.slane %v1368_v61, 1 }
  0xd3   : > { %5119 = vmatmul.mubr.msk.bf16.gmra.mrb[12].mxu0 %vm1476_vm2, %v3089_v27  ;;  %v4713_v27 = vld [vmem:[%s7198_s1 + $0xe] sm:$0x3] }
  0xd4   : > { %5140 = vmatprep.mubr.msk.bf16.mxu0 %vm1476_vm2, %v1441_v30  ;;  %v6501_v30 = vld [vmem:[%s6258_s12 + $0xe0] sm:$0xff] }
  0xd7   : > { %4987 = vmatmul.mubr.msk.bf16.gmra.mrb[16].mxu1 %vm1476_vm2, %v1467_v33  ;;  %v6509_v33 = vld [vmem:[%s6258_s12 + $0xf8] sm:$0xff] }
  0xd8   : > { %4990 = vmatprep.mubr.msk.bf16.mxu1 %vm1476_vm2, %v1468_v37  ;;  %v6512_v37 = vand.u32 %v4713_v27, %v6242_v36  ;;  %v1451_v44 = vpack.c.bf16 %v6509_v33, %v6506_v32  ;;  %v6594_v27 = vld [vmem:[%s6258_s12 + $0x3a8] sm:$0xff] }
  0xdb   : > { %5141 = vmatmul.mubr.msk.bf16.vlgmr.msra.gmra.mrb[0].mxu0 %vm1476_vm2, %v1442_v41  ;;  %v1450_v41 = vpack.c.bf16 %v6501_v30, %v6498_v29 }
  0xdc   : > { %5173 = vmatpush3.bf16.msra.mxu0 %v6303_v12  ;;  %5144 = vmatprep.mubr.msk.bf16.mxu0 %vm1476_vm2, %v1443_v45  ;;  %v1444_v12 = vpack.c.bf16 %v6409_v51, %v6406_v50  ;;  %v6528_v45 = vld [vmem:[%s6258_s12 + $0x360] sm:$0xff] }
  0xdd   : > { %5206 = vmatprep.subr.bf16.mxu0 %v6400_v48 }
  0xdf   : > { %4991 = vmatmul.mubr.msk.bf16.gmra.mrb[20].mxu1 %vm1476_vm2, %v1469_v49  ;;  %v6542_v49 = vld [vmem:[%s6258_s12 + $0x110] sm:$0xff] }
  0xe0   : > { %4994 = vmatprep.mubr.msk.bf16.mxu1 %vm1476_vm2, %v1470_v52  ;;  %v1958_v52 = vpack.c.bf16 %v6531_v46, %v6528_v45  ;;  %v1452_v59 = vpack.c.bf16 %v6542_v49, %v6539_v47 }
  0xe3   : > { %5145 = vmatmul.mubr.msk.bf16.gmra.mrb[4].mxu0 %vm1476_vm2, %v1444_v12  ;;  %v6547_v12 = vld [vmem:[%s6258_s12 + $0x120] sm:$0xff] }
  0xe4   : > { %5148 = vmatprep.mubr.msk.bf16.mxu0 %vm1476_vm2, %v1445_v60  ;;  %v6557_v60 = vld [vmem:[%s6258_s12 + $0x378] sm:$0xff]  ;;  %v1453_v63 = vpack.c.bf16 %v6550_v55, %v6547_v12 }
  0xe7   : > { %4995 = vmatmul.mubr.msk.bf16.gmra.mrb[24].mxu1 %vm1476_vm2, %v1471_v0  ;;  %v6565_v0 = vld [vmem:[%s6258_s12 + $0x390] sm:$0xff] }
  0xe8   : > { %4998 = vmatprep.mubr.msk.bf16.mxu1 %vm1476_vm2, %v1472_v3  ;;  %v6568_v3 = vld [vmem:[%s6258_s12 + $0x398] sm:$0xff] }
  0xeb   : > { %5149 = vmatmul.mubr.msk.bf16.gmra.mrb[8].mxu0 %vm1476_vm2, %v1446_v6  ;;  %v1959_v6 = vpack.c.bf16 %v6560_v62, %v6557_v60 }
  0xec   : > { %5152 = vmatprep.mubr.msk.bf16.mxu0 %vm1476_vm2, %v1447_v9  ;;  %v1960_v9 = vpack.c.bf16 %v6568_v3, %v6565_v0 }
  0xef   : > { %4999 = vmatmul.mubr.msk.bf16.gmra.mrb[28].mxu1 %vm1476_vm2, %v1473_v13  ;;  %v6583_v13 = vld [vmem:[%s6258_s12 + $0x150] sm:$0xff] }
  0xf0   : > { %5004 = vmatprep.mubr.msk.bf16.mxu1 %vm1476_vm2, %v1954_v16  ;;  %v6586_v16 = vld [vmem:[%s6258_s12 + $0x158] sm:$0xff] }
  0xf3   : > { %5153 = vmatmul.mubr.msk.bf16.gmra.mrb[12].mxu0 %vm1476_vm2, %v1448_v19  ;;  %v1362_v19 = vld [vmem:[%s6258_s12 + $0x10] sm:$0x1] }
  0xf4   : > { %5156 = vmatprep.mubr.msk.bf16.mxu0 %vm1476_vm2, %v1449_v22  ;;  %v1454_v22 = vpack.c.bf16 %v6578_v8, %v6575_v7 }
  0xf7   : > { %5005 = vmatmul.mubr.msk.bf16.vlgmr.msra.gmra.mrb[0].mxu1 %vm1476_vm2, %v1955_v28  ;;  %v6597_v28 = vld [vmem:[%s6258_s12 + $0x3b0] sm:$0xff] }
  0xf8   : > { %5037 = vmatpush3.bf16.msra.mxu1 %v6282_v58  ;;  %5008 = vmatprep.mubr.msk.bf16.mxu1 %vm1476_vm2, %v1956_v31  ;;  %v1957_v58 = vpack.c.bf16 %v6523_v43, %v6520_v42  ;;  %7211 = vst [vmem:[#allocation5_spill] sm:$0xff] %v6597_v28  ;;  %v1455_v31 = vpack.c.bf16 %v6586_v16, %v6583_v13 }
  0xf9   : > { %5070 = vmatprep.subr.bf16.mxu1 %v6512_v37 }
  0xfb   : > { %5157 = vmatmul.mubr.msk.bf16.gmra.mrb[16].mxu0 %vm1476_vm2, %v1450_v41  ;;  %v1742_v41 = vrot.slane %v6359_v25, 1 }
  0xfc   : > { %5160 = vmatprep.mubr.msk.bf16.mxu0 %vm1476_vm2, %v1451_v44  ;;  %v1743_v44 = vrot.slane %v6362_v26, 1 }
  0xfe   : > { %v1744_v26 = vsel %vm1741_vm3, %v1742_v41, %v1743_v44 }
  0xff   : > { %5009 = vmatmul.mubr.msk.bf16.gmra.mrb[4].mxu1 %vm1476_vm2, %v1957_v58  ;;  %v6604_v58 = vld [vmem:[%s6258_s12 + $0x3c0] sm:$0xff] }
 0x100   : > { %5012 = vmatprep.mubr.msk.bf16.mxu1 %vm1476_vm2, %v1958_v52  ;;  %7212 = vst [vmem:[#allocation6_spill] sm:$0xff] %v6604_v58  ;;  %v6607_v52 = vld [vmem:[%s6258_s12 + $0x3c8] sm:$0xff] }
 0x101   : > { %7213 = vst [vmem:[#allocation7_spill] sm:$0xff] %v6607_v52  ;;  %v1962_v25 = vpack.c.bf16 %v6607_v52, %v6604_v58  ;;  %v6632_v52 = vld [vmem:[%s6258_s12 + $0x3d8] sm:$0xff]  ;;  %v6635_v58 = vld [vmem:[%s6258_s12 + $0x3e0] sm:$0xff] }
 0x102   : > { %v1963_v35 = vpack.c.bf16 %v6635_v58, %v6632_v52 }
 0x103   : > { %5161 = vmatmul.mubr.msk.bf16.gmra.mrb[20].mxu0 %vm1476_vm2, %v1452_v59  ;;  %v1745_v59 = vrot.slane %v1362_v19, 1 }
 0x104   : > { %5164 = vmatprep.mubr.msk.bf16.mxu0 %vm1476_vm2, %v1453_v63  ;;  %v1961_v63 = vpack.c.bf16 %v6597_v28, %v6594_v27  ;;  %v6640_v28 = vld [vmem:[%s6258_s12 + $0x3f0] sm:$0xff] }
 0x105   : > { %v1746_v19 = vsel %vm1741_vm3, %v1743_v44, %v1745_v59  ;;  %v1752_v59 = vrot.slane %v6381_v38, 1  ;;  %7215 = vst [vmem:[#allocation9_spill] sm:$0xff] %v6640_v28 }
 0x106   : > { %v1854_v41 = vpack.c.bf16 %v1746_v19, %v1744_v26  ;;  %v1371_v19 = vld [vmem:[%s6258_s12 + $0x58] sm:$0x1] }
 0x107   : > { %5013 = vmatmul.mubr.msk.bf16.gmra.mrb[8].mxu1 %vm1476_vm2, %v1959_v6  ;;  %v6614_v6 = vld [vmem:[%s6258_s12 + $0x168] sm:$0xff] }
 0x108   : > { %5016 = vmatprep.mubr.msk.bf16.mxu1 %vm1476_vm2, %v1960_v9  ;;  %v6617_v9 = vld [vmem:[%s6258_s12 + $0x170] sm:$0xff] }
 0x109   : > { %7214 = vst [vmem:[#allocation8_spill] sm:$0xff] %v6617_v9 }
 0x10b   : > { %5165 = vmatmul.mubr.msk.bf16.gmra.mrb[24].mxu0 %vm1476_vm2, %v1454_v22  ;;  %v1365_v22 = vld [vmem:[%s6258_s12 + $0x28] sm:$0x1] }
 0x10c   : > { %5168 = vmatprep.mubr.msk.bf16.mxu0 %vm1476_vm2, %v1455_v31  ;;  %v1456_v31 = vpack.c.bf16 %v6617_v9, %v6614_v6  ;;  %v1750_v44 = vrot.slane %v1365_v22, 1  ;;  %v6643_v9 = vld [vmem:[%s6258_s12 + $0x3f8] sm:$0xff]  ;;  %v1374_v22 = vld [vmem:[%s6258_s12 + $0x70] sm:$0x1] }
 0x10d   : > { %7216 = vst [vmem:[#allocation10_spill] sm:$0xff] %v6643_v9 }
 0x10e   : > { %v1751_v38 = vsel %vm1741_vm3, %v1748_v57, %v1750_v44  ;;  %v6665_v44 = vld [vmem:[%s6258_s12 + $0x408] sm:$0xff] }
 0x10f   : > { %5017 = vmatmul.mubr.msk.bf16.gmra.mrb[12].mxu1 %vm1476_vm2, %v1961_v63  ;;  %v1753_v63 = vrot.slane %v6384_v39, 1  ;;  %v1964_v39 = vpack.c.bf16 %v6643_v9, %v6640_v28  ;;  %v1762_v9 = vrot.slane %v6412_v53, 1  ;;  %v1763_v28 = vrot.slane %v6415_v54, 1 }
 0x110   : > { %5020 = vmatprep.mubr.msk.bf16.mxu1 %vm1476_vm2, %v1962_v25  ;;  %v1749_v25 = vsel %vm1741_vm3, %v1747_v56, %v1748_v57  ;;  %v1757_v57 = vrot.slane %v6406_v50, 1  ;;  %v1765_v50 = vrot.slane %v1374_v22, 1  ;;  %v1767_v22 = vrot.slane %v6431_v1, 1 }
 0x111   : > { %v1754_v26 = vsel %vm1741_vm3, %v1752_v59, %v1753_v63  ;;  %v1756_v61 = vsel %vm1741_vm3, %v1753_v63, %v1755_v34  ;;  %v1855_v56 = vpack.c.bf16 %v1751_v38, %v1749_v25  ;;  %v6668_v59 = vld [vmem:[%s6258_s12 + $0x410] sm:$0xff]  ;;  %v1760_v34 = vrot.slane %v1371_v19, 1  ;;  %v6676_v25 = vld [vmem:[%s6258_s12 + $0x428] sm:$0xff] }
 0x112   : > { %v1856_v63 = vpack.c.bf16 %v1756_v61, %v1754_v26  ;;  %v1965_v38 = vpack.c.bf16 %v6668_v59, %v6665_v44  ;;  %v1766_v26 = vsel %vm1741_vm3, %v1763_v28, %v1765_v50  ;;  %v1377_v61 = vld [vmem:[%s6258_s12 + $0x88] sm:$0x1]  ;;  %v6711_v50 = vld [vmem:[%s6258_s12 + $0x458] sm:$0xff] }
 0x113   : > { %5169 = vmatmul.mubr.msk.bf16.gmra.mrb[28].mxu0 %vm1476_vm2, %v1456_v31  ;;  %v4712_v31 = vld [vmem:[%s7198_s1 + $0xc] sm:$0x3] }
 0x114   : > { %5174 = vmatprep.mubr.msk.bf16.mxu0 %vm1476_vm2, %v1854_v41  ;;  %v1758_v41 = vrot.slane %v6409_v51, 1  ;;  %v6679_v51 = vand.u32 %v4712_v31, %v6242_v36  ;;  %v1764_v36 = vsel %vm1741_vm3, %v1762_v9, %v1763_v28  ;;  %v1768_v31 = vrot.slane %v6434_v2, 1  ;;  %v6703_v9 = vld [vmem:[%s6258_s12 + $0x440] sm:$0xff]  ;;  %v4519_v2 = vld [vmem:[%s6258_s12 + $0x310] sm:$0x1] }
 0x115   : > { %v1858_v28 = vpack.c.bf16 %v1766_v26, %v1764_v36 }
 0x116   : > { %v1759_v53 = vsel %vm1741_vm3, %v1757_v57, %v1758_v41  ;;  %v1761_v54 = vsel %vm1741_vm3, %v1758_v41, %v1760_v34  ;;  %v1770_v57 = vrot.slane %v1377_v61, 1  ;;  %v1772_v41 = vrot.slane %v6437_v4, 1  ;;  %v6708_v34 = vld [vmem:[%s6258_s12 + $0x450] sm:$0xff]  ;;  %v1383_v61 = vld [vmem:[%s6258_s12 + $0xb8] sm:$0x1] }
 0x117   : > { %5021 = vmatmul.mubr.msk.bf16.gmra.mrb[16].mxu1 %vm1476_vm2, %v1963_v35  ;;  %v6673_v35 = vld [vmem:[%s6258_s12 + $0x420] sm:$0xff]  ;;  %v1857_v19 = vpack.c.bf16 %v1761_v54, %v1759_v53  ;;  %v2250_v53 = vrot.slane %v6451_v10, 1  ;;  %v1769_v4 = vsel %vm1741_vm3, %v1767_v22, %v1768_v31  ;;  %v1968_v54 = vpack.c.bf16 %v6711_v50, %v6708_v34 }
 0x118   : > { %5024 = vmatprep.mubr.msk.bf16.mxu1 %vm1476_vm2, %v1964_v39  ;;  %v1966_v39 = vpack.c.bf16 %v6676_v25, %v6673_v35  ;;  %v2253_v10 = vrot.slane %v4519_v2, 1 }
 0x11b   : > { %5175 = vmatmul.mubr.msk.bf16.vlgmr.msra.gmra.mrb[0].mxu0 %vm1476_vm2, %v1855_v56  ;;  %v6700_v56 = vld [vmem:[%s6258_s12 + $0x438] sm:$0xff] }
 0x11c   : > { %5207 = vmatpush3.bf16.msra.mxu0 %v6400_v48  ;;  %5178 = vmatprep.mubr.msk.bf16.mxu0 %vm1476_vm2, %v1856_v63  ;;  %v1380_v48 = vld [vmem:[%s6258_s12 + $0xa0] sm:$0x1]  ;;  %v1773_v63 = vrot.slane %v6440_v5, 1  ;;  %v1771_v5 = vsel %vm1741_vm3, %v1768_v31, %v1770_v57  ;;  %v1778_v31 = vrot.slane %v6462_v15, 1  ;;  %v6737_v57 = vld [vmem:[%s6258_s12 + $0x470] sm:$0xff] }
 0x11d   : > { %5240 = vmatprep.subr.bf16.mxu0 %v6679_v51  ;;  %v1775_v1 = vrot.slane %v1380_v48, 1  ;;  %v1386_v48 = vld [vmem:[%s6258_s12 + $0xd0] sm:$0x1]  ;;  %v1859_v22 = vpack.c.bf16 %v1771_v5, %v1769_v4  ;;  %v4525_v15 = vld [vmem:[%s6258_s12 + $0x340] sm:$0x1]  ;;  %v2256_v5 = vrot.slane %v6480_v21, 1 }
 0x11e   : > { %v1774_v36 = vsel %vm1741_vm3, %v1772_v41, %v1773_v63  ;;  %v1785_v4 = vrot.slane %v1386_v48, 1  ;;  %v1392_v48 = vld [vmem:[%s6258_s12 + $0x100] sm:$0x1] }
 0x11f   : > { %5025 = vmatmul.mubr.msk.bf16.gmra.mrb[20].mxu1 %vm1476_vm2, %v1965_v38  ;;  %v1967_v38 = vpack.c.bf16 %v6703_v9, %v6700_v56  ;;  %v1776_v26 = vsel %vm1741_vm3, %v1773_v63, %v1775_v1  ;;  %v1780_v63 = vrot.slane %v1383_v61, 1  ;;  %v1783_v1 = vrot.slane %v6470_v18, 1 }
 0x120   : > { %5028 = vmatprep.mubr.msk.bf16.mxu1 %vm1476_vm2, %v1966_v39  ;;  %v2251_v39 = vrot.slane %v6454_v11, 1  ;;  %v6734_v11 = vld [vmem:[%s6258_s12 + $0x468] sm:$0xff]  ;;  %v1860_v41 = vpack.c.bf16 %v1776_v26, %v1774_v36  ;;  %v2261_v61 = vrot.slane %v6488_v24, 1 }
 0x121   : > { %v1969_v18 = vpack.c.bf16 %v6737_v57, %v6734_v11  ;;  %v1786_v21 = vsel %vm1741_vm3, %v1783_v1, %v1785_v4  ;;  %v2265_v4 = vrot.slane %v6520_v42, 1 }
 0x122   : > { %v2252_v2 = vsel %vm1741_vm3, %v2250_v53, %v2251_v39 }
 0x123   : > { %5179 = vmatmul.mubr.msk.bf16.gmra.mrb[4].mxu0 %vm1476_vm2, %v1857_v19  ;;  %v1777_v19 = vrot.slane %v6459_v14, 1  ;;  %v2254_v14 = vsel %vm1741_vm3, %v2251_v39, %v2253_v10  ;;  %v1781_v39 = vsel %vm1741_vm3, %v1778_v31, %v1780_v63  ;;  %v2263_v10 = vrot.slane %v4525_v15, 1 }
 0x124   : > { %5182 = vmatprep.mubr.msk.bf16.mxu0 %vm1476_vm2, %v1858_v28  ;;  %v1782_v28 = vrot.slane %v6467_v17, 1  ;;  %v2255_v17 = vrot.slane %v6477_v20, 1  ;;  %v2362_v36 = vpack.c.bf16 %v2254_v14, %v2252_v2  ;;  %v1793_v2 = vrot.slane %v6509_v33, 1 }
 0x125   : > { %v1779_v53 = vsel %vm1741_vm3, %v1777_v19, %v1778_v31  ;;  %v1792_v19 = vrot.slane %v6506_v32, 1  ;;  %v1795_v32 = vrot.slane %v1392_v48, 1  ;;  %v2266_v15 = vrot.slane %v6523_v43, 1  ;;  %v1395_v43 = vld [vmem:[%s6258_s12 + $0x118] sm:$0x1] }
 0x126   : > { %v1784_v20 = vsel %vm1741_vm3, %v1782_v28, %v1783_v1  ;;  %v1861_v31 = vpack.c.bf16 %v1781_v39, %v1779_v53  ;;  %v2257_v24 = vsel %vm1741_vm3, %v2255_v17, %v2256_v5  ;;  %v2270_v17 = vrot.slane %v6528_v45, 1  ;;  %v1398_v45 = vld [vmem:[%s6258_s12 + $0x130] sm:$0x1] }
 0x127   : > { %5029 = vmatmul.mubr.msk.bf16.gmra.mrb[24].mxu1 %vm1476_vm2, %v1967_v38  ;;  %v4522_v38 = vld [vmem:[%s6258_s12 + $0x328] sm:$0x1]  ;;  %v1862_v63 = vpack.c.bf16 %v1786_v21, %v1784_v20  ;;  %v2271_v39 = vrot.slane %v6531_v46, 1  ;;  %v1796_v42 = vsel %vm1741_vm3, %v1793_v2, %v1795_v32  ;;  %v1798_v20 = vrot.slane %v6542_v49, 1  ;;  %v1404_v32 = vld [vmem:[%s6258_s12 + $0x160] sm:$0x1] }
 0x128   : > { %5032 = vmatprep.mubr.msk.bf16.mxu1 %vm1476_vm2, %v1968_v54  ;;  %v2260_v54 = vrot.slane %v6485_v23, 1  ;;  %v2258_v26 = vrot.slane %v4522_v38, 1  ;;  %v1389_v23 = vld [vmem:[%s6258_s12 + $0xe8] sm:$0x1]  ;;  %v4531_v38 = vld [vmem:[%s6258_s12 + $0x370] sm:$0x1]  ;;  %v2267_v46 = vsel %vm1741_vm3, %v2265_v4, %v2266_v15 }
 0x129   : > { %v1790_v1 = vrot.slane %v1389_v23, 1  ;;  %v1802_v21 = vrot.slane %v6547_v12, 1  ;;  %v2272_v49 = vsel %vm1741_vm3, %v2270_v17, %v2271_v39  ;;  %v4534_v12 = vld [vmem:[%s6258_s12 + $0x388] sm:$0x1]  ;;  %v1808_v4 = vrot.slane %v6578_v8, 1 }
 0x12a   : > { %v2259_v28 = vsel %vm1741_vm3, %v2256_v5, %v2258_v26  ;;  %v2262_v14 = vsel %vm1741_vm3, %v2260_v54, %v2261_v61  ;;  %v2273_v26 = vrot.slane %v4531_v38, 1  ;;  %v1807_v38 = vrot.slane %v6575_v7, 1  ;;  %v4540_v8 = vld [vmem:[%s6258_s12 + $0x3b8] sm:$0x1] }
 0x12b   : > { %5183 = vmatmul.mubr.msk.bf16.gmra.mrb[8].mxu0 %vm1476_vm2, %v1859_v22  ;;  %v1787_v22 = vrot.slane %v6498_v29, 1  ;;  %v2264_v29 = vsel %vm1741_vm3, %v2261_v61, %v2263_v10  ;;  %v2363_v5 = vpack.c.bf16 %v2259_v28, %v2257_v24  ;;  %v1797_v61 = vrot.slane %v6539_v47, 1 }
 0x12c   : > { %5186 = vmatprep.mubr.msk.bf16.mxu0 %vm1476_vm2, %v1860_v41  ;;  %v1788_v41 = vrot.slane %v6501_v30, 1  ;;  %v4528_v30 = vld [vmem:[%s6258_s12 + $0x358] sm:$0x1]  ;;  %v1803_v47 = vrot.slane %v6550_v55, 1  ;;  %v2276_v24 = vrot.slane %v6560_v62, 1  ;;  %v2280_v28 = vrot.slane %v6565_v0, 1 }
 0x12d   : > { %v2268_v53 = vrot.slane %v4528_v30, 1  ;;  %v1401_v62 = vld [vmem:[%s6258_s12 + $0x148] sm:$0x1] }
 0x12e   : > { %v1789_v33 = vsel %vm1741_vm3, %v1787_v22, %v1788_v41  ;;  %v1791_v54 = vsel %vm1741_vm3, %v1788_v41, %v1790_v1  ;;  %v1800_v22 = vrot.slane %v1395_v43, 1  ;;  %v2274_v41 = vsel %vm1741_vm3, %v2271_v39, %v2273_v26  ;;  %v4543_v39 = vld [vmem:[%s6258_s12 + $0x3d0] sm:$0x1]  ;;  %v7218_v26 = vld [vmem:[#allocation6_spill] sm:$0xff] }
 0x12f   : > { %5033 = vmatmul.mubr.msk.bf16.gmra.mrb[28].mxu1 %vm1476_vm2, %v1969_v18  ;;  %v2364_v18 = vpack.c.bf16 %v2264_v29, %v2262_v14  ;;  %v1863_v23 = vpack.c.bf16 %v1791_v54, %v1789_v33  ;;  %v2269_v10 = vsel %vm1741_vm3, %v2266_v15, %v2268_v53  ;;  %v2278_v14 = vrot.slane %v4534_v12, 1 }
 0x130   : > { %5038 = vmatprep.mubr.msk.bf16.mxu1 %vm1476_vm2, %v2362_v36  ;;  %v1794_v36 = vsel %vm1741_vm3, %v1792_v19, %v1793_v2  ;;  %v1805_v19 = vrot.slane %v1398_v45, 1  ;;  %v2365_v55 = vpack.c.bf16 %v2269_v10, %v2267_v46  ;;  %v1801_v1 = vsel %vm1741_vm3, %v1798_v20, %v1800_v22  ;;  %v7219_v46 = vld [vmem:[#allocation7_spill] sm:$0xff]  ;;  %v1407_v22 = vld [vmem:[%s6258_s12 + $0x178] sm:$0x1] }
 0x131   : > { %v1864_v48 = vpack.c.bf16 %v1796_v42, %v1794_v36  ;;  %v2366_v2 = vpack.c.bf16 %v2274_v41, %v2272_v49  ;;  %v2281_v29 = vrot.slane %v6568_v3, 1  ;;  %v1804_v30 = vsel %vm1741_vm3, %v1802_v21, %v1803_v47  ;;  %v7217_v42 = vld [vmem:[#allocation5_spill] sm:$0xff]  ;;  %v7220_v41 = vld [vmem:[#allocation8_spill] sm:$0xff] }
 0x132   : > { %v1812_v15 = vrot.slane %v6583_v13, 1  ;;  %v1810_v54 = vrot.slane %v1401_v62, 1  ;;  %v1815_v13 = vrot.slane %v1404_v32, 1  ;;  %v2285_v36 = vrot.slane %v6594_v27, 1  ;;  %v7221_v32 = vld [vmem:[#allocation9_spill] sm:$0xff] }
 0x133   : > { %5187 = vmatmul.mubr.msk.bf16.gmra.mrb[12].mxu0 %vm1476_vm2, %v1861_v31  ;;  %v2275_v31 = vrot.slane %v6557_v60, 1  ;;  %v1806_v60 = vsel %vm1741_vm3, %v1803_v47, %v1805_v19  ;;  %v2282_v53 = vsel %vm1741_vm3, %v2280_v28, %v2281_v29  ;;  %v2286_v43 = vrot.slane %v7217_v42, 1  ;;  %v4567_v42 = vld [vmem:[%s6258_s12 + $0x498] sm:$0xff] }
 0x134   : > { %5190 = vmatprep.mubr.msk.bf16.mxu0 %vm1476_vm2, %v1862_v63  ;;  %v1799_v63 = vsel %vm1741_vm3, %v1797_v61, %v1798_v20  ;;  %v1866_v33 = vpack.c.bf16 %v1806_v60, %v1804_v30  ;;  %v2290_v45 = vrot.slane %v7218_v26, 1  ;;  %v1811_v20 = vsel %vm1741_vm3, %v1808_v4, %v1810_v54 }
 0x135   : > { %v1865_v17 = vpack.c.bf16 %v1801_v1, %v1799_v63  ;;  %v2277_v3 = vsel %vm1741_vm3, %v2275_v31, %v2276_v24  ;;  %v2291_v10 = vrot.slane %v7219_v46, 1  ;;  %v2293_v47 = vrot.slane %v4543_v39, 1  ;;  %v4549_v1 = vld [vmem:[%s6258_s12 + $0x400] sm:$0x1] }
 0x136   : > { %v1817_v49 = vrot.slane %v6614_v6, 1  ;;  %v1818_v12 = vrot.slane %v7220_v41, 1  ;;  %v1820_v28 = vrot.slane %v1407_v22, 1  ;;  %v4546_v6 = vld [vmem:[%s6258_s12 + $0x3e8] sm:$0x1]  ;;  %v2305_v39 = vrot.slane %v6665_v44, 1 }
 0x137   : > { %5039 = vmatmul.mubr.msk.bf16.vlgmr.msra.gmra.mrb[0].mxu1 %vm1476_vm2, %v2363_v5  ;;  %v2279_v5 = vsel %vm1741_vm3, %v2276_v24, %v2278_v14  ;;  %v2294_v63 = vsel %vm1741_vm3, %v2291_v10, %v2293_v47  ;;  %v2296_v14 = vrot.slane %v6635_v58, 1  ;;  %v2303_v58 = vrot.slane %v4549_v1, 1  ;;  %v4571_v41 = vld [vmem:[%s6258_s12 + $0x4c8] sm:$0xff]  ;;  %v4564_v1 = vld [vmem:[%s6258_s12 + $0x478] sm:$0x1] }
 0x138   : > { %5071 = vmatpush3.bf16.msra.mxu1 %v6512_v37  ;;  %5042 = vmatprep.mubr.msk.bf16.mxu1 %vm1476_vm2, %v2364_v18  ;;  %v4537_v37 = vld [vmem:[%s6258_s12 + $0x3a0] sm:$0x1]  ;;  %v1813_v18 = vrot.slane %v6586_v16, 1  ;;  %v2367_v61 = vpack.c.bf16 %v2279_v5, %v2277_v3  ;;  %v1809_v16 = vsel %vm1741_vm3, %v1807_v38, %v1808_v4  ;;  %v1819_v30 = vsel %vm1741_vm3, %v1817_v49, %v1818_v12  ;;  %v7222_v4 = vld [vmem:[#allocation10_spill] sm:$0xff] }
 0x139   : > { %5274 = vmatprep.subr.bf16.mxu1 %v6252_v40  ;;  %v2283_v0 = vrot.slane %v4537_v37, 1  ;;  %v1867_v19 = vpack.c.bf16 %v1811_v20, %v1809_v16  ;;  %v2287_v37 = vsel %vm1741_vm3, %v2285_v36, %v2286_v43  ;;  %v1821_v60 = vsel %vm1741_vm3, %v1818_v12, %v1820_v28  ;;  %v4569_v20 = vld [vmem:[%s6258_s12 + $0x4b0] sm:$0xff]  ;;  %v4573_v28 = vld [vmem:[%s6258_s12 + $0x4e0] sm:$0xff] }
 0x13a   : > { %v1814_v27 = vsel %vm1741_vm3, %v1812_v15, %v1813_v18  ;;  %v2300_v38 = vrot.slane %v7221_v32, 1  ;;  %v2301_v15 = vrot.slane %v7222_v4, 1  ;;  %v1869_v3 = vpack.c.bf16 %v1821_v60, %v1819_v30  ;;  %v4572_v12 = vld [vmem:[%s6258_s12 + $0x4d0] sm:$0xff]  ;;  %v4575_v30 = vld [vmem:[%s6258_s12 + $0x4f8] sm:$0xff]  ;;  %v4576_v60 = vld [vmem:[%s6258_s12 + $0x500] sm:$0xff] }
 0x13b   : > { %5191 = vmatmul.mubr.msk.bf16.gmra.mrb[16].mxu0 %vm1476_vm2, %v1863_v23  ;;  %v2284_v7 = vsel %vm1741_vm3, %v2281_v29, %v2283_v0  ;;  %v2288_v23 = vrot.slane %v4540_v8, 1  ;;  %v2298_v0 = vrot.slane %v4546_v6, 1  ;;  %v4555_v8 = vld [vmem:[%s6258_s12 + $0x430] sm:$0x1]  ;;  %v2306_v36 = vrot.slane %v6668_v59, 1 }
 0x13c   : > { %5194 = vmatprep.mubr.msk.bf16.mxu0 %vm1476_vm2, %v1864_v48  ;;  %v2368_v21 = vpack.c.bf16 %v2284_v7, %v2282_v53  ;;  %v1816_v48 = vsel %vm1741_vm3, %v1813_v18, %v1815_v13  ;;  %v2302_v18 = vsel %vm1741_vm3, %v2300_v38, %v2301_v15  ;;  %v2304_v53 = vsel %vm1741_vm3, %v2301_v15, %v2303_v58  ;;  %v4552_v7 = vld [vmem:[%s6258_s12 + $0x418] sm:$0x1]  ;;  %v4577_v32 = vld [vmem:[%s6258_s12 + $0x510] sm:$0xff] }
 0x13d   : > { %v2289_v31 = vsel %vm1741_vm3, %v2286_v43, %v2288_v23  ;;  %v1868_v24 = vpack.c.bf16 %v1816_v48, %v1814_v27  ;;  %v4568_v43 = vld [vmem:[%s6258_s12 + $0x4a0] sm:$0xff]  ;;  %v2372_v26 = vpack.c.bf16 %v2304_v53, %v2302_v18  ;;  %v2311_v16 = vrot.slane %v6676_v25, 1  ;;  %v4558_v25 = vld [vmem:[%s6258_s12 + $0x448] sm:$0x1]  ;;  %v4578_v38 = vld [vmem:[%s6258_s12 + $0x518] sm:$0xff] }
 0x13e   : > { %v2369_v29 = vpack.c.bf16 %v2289_v31, %v2287_v37  ;;  %v2313_v23 = vrot.slane %v4555_v8, 1  ;;  %v2185_v44 = vpack.c.bf16 %v4568_v43, %v4567_v42  ;;  %v2307_v59 = vsel %vm1741_vm3, %v2305_v39, %v2306_v36  ;;  %v4561_v48 = vld [vmem:[%s6258_s12 + $0x460] sm:$0x1]  ;;  %v4582_v18 = vld [vmem:[%s6258_s12 + $0x548] sm:$0xff]  ;;  %v4684_v39 = vld [vmem:[%s6258_s12 + $0x7b0] sm:$0xff] }
 0x13f   : > { %5043 = vmatmul.mubr.msk.bf16.gmra.mrb[4].mxu1 %vm1476_vm2, %v2365_v55  ;;  %v2292_v55 = vsel %vm1741_vm3, %v2290_v45, %v2291_v10  ;;  %v2308_v45 = vrot.slane %v4552_v7, 1  ;;  %v2315_v47 = vrot.slane %v6700_v56, 1  ;;  %v2316_v49 = vrot.slane %v6703_v9, 1  ;;  %v4682_v7 = vld [vmem:[%s6258_s12 + $0x798] sm:$0xff]  ;;  %v4683_v8 = vld [vmem:[%s6258_s12 + $0x7a0] sm:$0xff] }
 0x140   : > { %5046 = vmatprep.mubr.msk.bf16.mxu1 %vm1476_vm2, %v2366_v2  ;;  %v2295_v2 = vrot.slane %v6632_v52, 1  ;;  %v2370_v62 = vpack.c.bf16 %v2294_v63, %v2292_v55  ;;  %v4565_v52 = vld [vmem:[%s6258_s12 + $0x480] sm:$0xff]  ;;  %v2318_v37 = vrot.slane %v4558_v25, 1  ;;  %v2320_v31 = vrot.slane %v6708_v34, 1  ;;  %v4574_v55 = vld [vmem:[%s6258_s12 + $0x4e8] sm:$0xff]  ;;  %v4583_v43 = vld [vmem:[%s6258_s12 + $0x558] sm:$0xff] }
 0x141   : > { %v2309_v46 = vsel %vm1741_vm3, %v2306_v36, %v2308_v45  ;;  %v2323_v63 = vrot.slane %v4561_v48, 1  ;;  %v2187_v56 = vpack.c.bf16 %v4572_v12, %v4571_v41  ;;  %v2188_v6 = vpack.c.bf16 %v4574_v55, %v4573_v28  ;;  %v4685_v36 = vld [vmem:[%s6258_s12 + $0x7b8] sm:$0xff]  ;;  %v4589_v25 = vld [vmem:[%s6258_s12 + $0x5a0] sm:$0xff]  ;;  %v4590_v48 = vld [vmem:[%s6258_s12 + $0x5a8] sm:$0xff] }
 0x142   : > { %v2297_v5 = vsel %vm1741_vm3, %v2295_v2, %v2296_v14  ;;  %v2373_v22 = vpack.c.bf16 %v2309_v46, %v2307_v59  ;;  %v2319_v9 = vsel %vm1741_vm3, %v2316_v49, %v2318_v37  ;;  %v2189_v4 = vpack.c.bf16 %v4576_v60, %v4575_v30  ;;  %v4688_v59 = vld [vmem:[%s6258_s12 + $0x7e0] sm:$0xff]  ;;  %v4689_v46 = vld [vmem:[%s6258_s12 + $0x7e8] sm:$0xff]  ;;  %v4692_v12 = vld [vmem:[%s6258_s12 + $0x810] sm:$0xff] }
 0x143   : > { %5195 = vmatmul.mubr.msk.bf16.gmra.mrb[20].mxu0 %vm1476_vm2, %v1865_v17  ;;  %v4566_v17 = vld [vmem:[%s6258_s12 + $0x488] sm:$0xff]  ;;  %v2190_v15 = vpack.c.bf16 %v4578_v38, %v4577_v32  ;;  %v2693_v42 = vpack.c.bf16 %v4683_v8, %v4682_v7  ;;  %v2694_v45 = vpack.c.bf16 %v4685_v36, %v4684_v39  ;;  %v2196_v41 = vpack.c.bf16 %v4590_v48, %v4589_v25  ;;  %v4593_v55 = vld [vmem:[%s6258_s12 + $0x5d0] sm:$0xff]  ;;  %v4698_v60 = vld [vmem:[%s6258_s12 + $0x858] sm:$0xff] }
 0x144   : > { %5198 = vmatprep.mubr.msk.bf16.mxu0 %vm1476_vm2, %v1866_v33  ;;  %v2299_v33 = vsel %vm1741_vm3, %v2296_v14, %v2298_v0  ;;  %v2184_v54 = vpack.c.bf16 %v4566_v17, %v4565_v52  ;;  %v2325_v14 = vrot.slane %v6734_v11, 1  ;;  %v2328_v0 = vrot.slane %v4564_v1, 1  ;;  %v4680_v52 = vld [vmem:[%s6258_s12 + $0x780] sm:$0xff]  ;;  %v4681_v17 = vld [vmem:[%s6258_s12 + $0x788] sm:$0xff]  ;;  %v5565_v36 = vld [vmem:[%s6258_s12 + $0x650] sm:$0xff] }
 0x145   : > { %v2371_v13 = vpack.c.bf16 %v2299_v33, %v2297_v5  ;;  %v4580_v5 = vld [vmem:[%s6258_s12 + $0x530] sm:$0xff]  ;;  %v2692_v33 = vpack.c.bf16 %v4681_v17, %v4680_v52  ;;  %v5561_v32 = vld [vmem:[%s6258_s12 + $0x608] sm:$0xff]  ;;  %v5568_v25 = vld [vmem:[%s6258_s12 + $0x678] sm:$0xff] }
 0x146   : > { %v4702_v52 = vld [vmem:[%s6258_s12 + $0x888] sm:$0xff]  ;;  %v4703_v17 = vld [vmem:[%s6258_s12 + $0x890] sm:$0xff]  ;;  %v5569_v48 = vld [vmem:[%s6258_s12 + $0x680] sm:$0xff] }
 0x147   : > { %5047 = vmatmul.mubr.msk.bf16.gmra.mrb[8].mxu1 %vm1476_vm2, %v2367_v61  ;;  %v2310_v61 = vrot.slane %v6673_v35, 1  ;;  %v2314_v35 = vsel %vm1741_vm3, %v2311_v16, %v2313_v23  ;;  %v4687_v23 = vld [vmem:[%s6258_s12 + $0x7d0] sm:$0xff]  ;;  %v2703_v8 = vpack.c.bf16 %v4703_v17, %v4702_v52  ;;  %v5564_v39 = vld [vmem:[%s6258_s12 + $0x648] sm:$0xff]  ;;  %v4667_v52 = vld [vmem:[%s6258_s12 + $0x718] sm:$0x1] }
 0x148   : > { %5050 = vmatprep.mubr.msk.bf16.mxu1 %vm1476_vm2, %v2368_v21  ;;  %v4570_v21 = vld [vmem:[%s6258_s12 + $0x4b8] sm:$0xff]  ;;  %v4668_v17 = vld [vmem:[%s6258_s12 + $0x720] sm:$0xff] }
 0x149   : > { %v2186_v10 = vpack.c.bf16 %v4570_v21, %v4569_v20  ;;  %v2312_v27 = vsel %vm1741_vm3, %v2310_v61, %v2311_v16  ;;  %v4585_v61 = vld [vmem:[%s6258_s12 + $0x570] sm:$0xff]  ;;  %v4586_v16 = vld [vmem:[%s6258_s12 + $0x578] sm:$0xff]  ;;  %v4686_v21 = vld [vmem:[%s6258_s12 + $0x7c8] sm:$0xff] }
 0x14b   : > { %5199 = vmatmul.mubr.msk.bf16.gmra.mrb[24].mxu0 %vm1476_vm2, %v1867_v19  ;;  %v2374_v19 = vpack.c.bf16 %v2314_v35, %v2312_v27  ;;  %v4587_v27 = vld [vmem:[%s6258_s12 + $0x588] sm:$0xff]  ;;  %v4588_v35 = vld [vmem:[%s6258_s12 + $0x590] sm:$0xff] }
 0x14c   : > { %5202 = vmatprep.mubr.msk.bf16.mxu0 %vm1476_vm2, %v1868_v24  ;;  %v2321_v24 = vrot.slane %v6711_v50, 1 }
 0x14e   : > { %v2322_v34 = vsel %vm1741_vm3, %v2320_v31, %v2321_v24  ;;  %v2324_v50 = vsel %vm1741_vm3, %v2321_v24, %v2323_v63  ;;  %v4591_v31 = vld [vmem:[%s6258_s12 + $0x5b8] sm:$0xff]  ;;  %v4592_v24 = vld [vmem:[%s6258_s12 + $0x5c0] sm:$0xff] }
 0x14f   : > { %5051 = vmatmul.mubr.msk.bf16.gmra.mrb[12].mxu1 %vm1476_vm2, %v2369_v29  ;;  %v2326_v29 = vrot.slane %v6737_v57, 1  ;;  %v4594_v63 = vld [vmem:[%s6258_s12 + $0x5d8] sm:$0xff] }
 0x150   : > { %5054 = vmatprep.mubr.msk.bf16.mxu1 %vm1476_vm2, %v2370_v62  ;;  %v2376_v62 = vpack.c.bf16 %v2324_v50, %v2322_v34  ;;  %v4696_v34 = vld [vmem:[%s6258_s12 + $0x840] sm:$0xff]  ;;  %v4697_v50 = vld [vmem:[%s6258_s12 + $0x848] sm:$0xff] }
 0x151   : > { %v2327_v11 = vsel %vm1741_vm3, %v2325_v14, %v2326_v29  ;;  %v2329_v57 = vsel %vm1741_vm3, %v2326_v29, %v2328_v0  ;;  %v4596_v14 = vld [vmem:[%s6258_s12 + $0x5f0] sm:$0xff]  ;;  %v2700_v29 = vpack.c.bf16 %v4697_v50, %v4696_v34  ;;  %v5560_v0 = vld [vmem:[%s6258_s12 + $0x600] sm:$0xff] }
 0x152   : > { %v2377_v58 = vpack.c.bf16 %v2329_v57, %v2327_v11  ;;  %v2674_v38 = vpack.c.bf16 %v5561_v32, %v5560_v0  ;;  %v4701_v11 = vld [vmem:[%s6258_s12 + $0x878] sm:$0xff] }
 0x153   : > { %5203 = vmatmul.mubr.msk.bf16.gmra.mrb[28].mxu0 %vm1476_vm2, %v1869_v3  ;;  %v4579_v3 = vld [vmem:[%s6258_s12 + $0x528] sm:$0xff] }
 0x154   : > { %5208 = vmatprep.mubr.msk.bf16.mxu0 %vm1476_vm2, %v2184_v54  ;;  %v4581_v54 = vld [vmem:[%s6258_s12 + $0x540] sm:$0xff]  ;;  %v2191_v53 = vpack.c.bf16 %v4580_v5, %v4579_v3  ;;  %v5563_v3 = vld [vmem:[%s6258_s12 + $0x638] sm:$0xff] }
 0x157   : > { %5055 = vmatmul.mubr.msk.bf16.gmra.mrb[16].mxu1 %vm1476_vm2, %v2371_v13  ;;  %v2192_v13 = vpack.c.bf16 %v4582_v18, %v4581_v54  ;;  %v4705_v54 = vld [vmem:[%s6258_s12 + $0x8a8] sm:$0xff] }
 0x158   : > { %5058 = vmatprep.mubr.msk.bf16.mxu1 %vm1476_vm2, %v2372_v26  ;;  %v4584_v26 = vld [vmem:[%s6258_s12 + $0x560] sm:$0xff]  ;;  %v7223_v18 = vld [vmem:[#allocation4_spill] sm:$0xff] }
 0x159   : > { %v2193_v20 = vpack.c.bf16 %v4584_v26, %v4583_v43  ;;  %v4706_v43 = vld [vmem:[%s6258_s12 + $0x8b8] sm:$0xff]  ;;  %v4707_v26 = vld [vmem:[%s6258_s12 + $0x8c0] sm:$0xff] }
 0x15b   : > { %5209 = vmatmul.mubr.msk.bf16.vlgmr.msra.gmra.mrb[0].mxu0 %vm1476_vm2, %v2185_v44  ;;  %v2194_v44 = vpack.c.bf16 %v4586_v16, %v4585_v61  ;;  %v5567_v61 = vld [vmem:[%s6258_s12 + $0x668] sm:$0xff] }
 0x15c   : > { %5241 = vmatpush3.bf16.msra.mxu0 %v6679_v51  ;;  %5212 = vmatprep.mubr.msk.bf16.mxu0 %vm1476_vm2, %v2186_v10  ;;  %v2317_v51 = vsel %vm1741_vm3, %v2315_v47, %v2316_v49  ;;  %v2695_v10 = vpack.c.bf16 %v4687_v23, %v4686_v21  ;;  %v4690_v47 = vld [vmem:[%s6258_s12 + $0x7f8] sm:$0xff]  ;;  %v4691_v49 = vld [vmem:[%s6258_s12 + $0x800] sm:$0xff] }
 0x15d   : > { %v2375_v2 = vpack.c.bf16 %v2319_v9, %v2317_v51  ;;  %v2697_v37 = vpack.c.bf16 %v4691_v49, %v4690_v47  ;;  %v4694_v51 = vld [vmem:[%s6258_s12 + $0x828] sm:$0xff]  ;;  %v4695_v9 = vld [vmem:[%s6258_s12 + $0x830] sm:$0xff]  ;;  %v4709_v21 = vld [vmem:[%s6258_s12 + $0x8d8] sm:$0xff] }
 0x15e   : > { %v2699_v1 = vpack.c.bf16 %v4695_v9, %v4694_v51  ;;  %v4656_v23 = vld [vmem:[%s6258_s12 + $0x6c0] sm:$0xff]  ;;  %v4710_v47 = vld [vmem:[%s6258_s12 + $0x8e8] sm:$0xff]  ;;  %v4711_v49 = vld [vmem:[%s6258_s12 + $0x8f0] sm:$0xff] }
 0x15f   : > { %5059 = vmatmul.mubr.msk.bf16.gmra.mrb[20].mxu1 %vm1476_vm2, %v2373_v22  ;;  %v2195_v22 = vpack.c.bf16 %v4588_v35, %v4587_v27  ;;  %v3010_v27 = vrot.slane %v4656_v23, 1  ;;  %v4664_v51 = vld [vmem:[%s6258_s12 + $0x700] sm:$0x1]  ;;  %v2707_v9 = vpack.c.bf16 %v4711_v49, %v4710_v47 }
 0x160   : > { %5062 = vmatprep.mubr.msk.bf16.mxu1 %vm1476_vm2, %v2374_v19  ;;  %v4693_v19 = vld [vmem:[%s6258_s12 + $0x818] sm:$0xff] }
 0x161   : > { %v2698_v28 = vpack.c.bf16 %v4693_v19, %v4692_v12  ;;  %v5571_v12 = vld [vmem:[%s6258_s12 + $0x698] sm:$0xff] }
 0x163   : > { %5213 = vmatmul.mubr.msk.bf16.gmra.mrb[4].mxu0 %vm1476_vm2, %v2187_v56  ;;  %v2197_v56 = vpack.c.bf16 %v4592_v24, %v4591_v31  ;;  %v4659_v24 = vld [vmem:[%s6258_s12 + $0x6d8] sm:$0xff] }
 0x164   : > { %5216 = vmatprep.mubr.msk.bf16.mxu0 %vm1476_vm2, %v2188_v6  ;;  %v2198_v6 = vpack.c.bf16 %v4594_v63, %v4593_v55  ;;  %v4661_v55 = vld [vmem:[%s6258_s12 + $0x6e8] sm:$0x1]  ;;  %v4662_v63 = vld [vmem:[%s6258_s12 + $0x6f0] sm:$0xff]  ;;  %v3015_v34 = vrot.slane %v4659_v24, 1 }
 0x167   : > { %5063 = vmatmul.mubr.msk.bf16.gmra.mrb[24].mxu1 %vm1476_vm2, %v2375_v2  ;;  %v4595_v2 = vld [vmem:[%s6258_s12 + $0x5e8] sm:$0xff] }
 0x168   : > { %5066 = vmatprep.mubr.msk.bf16.mxu1 %vm1476_vm2, %v2376_v62  ;;  %v2199_v30 = vpack.c.bf16 %v4596_v14, %v4595_v2  ;;  %v4699_v62 = vld [vmem:[%s6258_s12 + $0x860] sm:$0xff]  ;;  %v3020_v2 = vrot.slane %v4662_v63, 1 }
 0x169   : > { %v2701_v57 = vpack.c.bf16 %v4699_v62, %v4698_v60  ;;  %v5573_v60 = vld [vmem:[%s6258_s12 + $0x6b0] sm:$0xff] }
 0x16b   : > { %5217 = vmatmul.mubr.msk.bf16.gmra.mrb[8].mxu0 %vm1476_vm2, %v2189_v4  ;;  %v4700_v4 = vld [vmem:[%s6258_s12 + $0x870] sm:$0xff] }
 0x16c   : > { %5220 = vmatprep.mubr.msk.bf16.mxu0 %vm1476_vm2, %v2190_v15  ;;  %v2702_v15 = vpack.c.bf16 %v4701_v11, %v4700_v4 }
 0x16f   : > { %5067 = vmatmul.mubr.msk.bf16.gmra.mrb[28].mxu1 %vm1476_vm2, %v2377_v58  ;;  %v5562_v58 = vld [vmem:[%s6258_s12 + $0x630] sm:$0xff] }
 0x170   : > { %5072 = vmatprep.mubr.msk.bf16.mxu1 %vm1476_vm2, %v2692_v33  ;;  %v2676_v5 = vpack.c.bf16 %v5563_v3, %v5562_v58  ;;  %v4704_v33 = vld [vmem:[%s6258_s12 + $0x8a0] sm:$0xff]  ;;  %v4669_v58 = vld [vmem:[%s6258_s12 + $0x728] sm:$0xff]  ;;  %v4670_v3 = vld [vmem:[%s6258_s12 + $0x730] sm:$0x1] }
 0x173   : > { %5221 = vmatmul.mubr.msk.bf16.gmra.mrb[12].mxu0 %vm1476_vm2, %v2191_v53  ;;  %v7224_v53 = vld [vmem:[#allocation3_spill] sm:$0xff] }
 0x174   : > { %5224 = vmatprep.mubr.msk.bf16.mxu0 %vm1476_vm2, %v2192_v13  ;;  %v7225_v7 = vpack.c.bf16 %v7223_v18, %v7224_v53  ;;  %v2704_v13 = vpack.c.bf16 %v4705_v54, %v4704_v33  ;;  %v3028_v53 = vrot.slane %v4667_v52, 1 }
 0x177   : > { %5073 = vmatmul.mubr.msk.bf16.vlgmr.msra.gmra.mrb[0].mxu1 %vm1476_vm2, %v2693_v42  ;;  %v2677_v42 = vpack.c.bf16 %v5565_v36, %v5564_v39 }
 0x178   : > { %5275 = vmatpush3.bf16.msra.mxu1 %v6252_v40  ;;  %5076 = vmatprep.mubr.msk.bf16.mxu1 %vm1476_vm2, %v2694_v45  ;;  %v2696_v40 = vpack.c.bf16 %v4689_v46, %v4688_v59  ;;  %v5566_v45 = vld [vmem:[%s6258_s12 + $0x660] sm:$0xff]  ;;  %v4658_v59 = vld [vmem:[%s6258_s12 + $0x6d0] sm:$0x1]  ;;  %v2705_v46 = vpack.c.bf16 %v4707_v26, %v4706_v43 }
 0x179   : > { %v2678_v16 = vpack.c.bf16 %v5567_v61, %v5566_v45  ;;  %v4671_v61 = vld [vmem:[%s6258_s12 + $0x738] sm:$0xff] }
 0x17b   : > { %5225 = vmatmul.mubr.msk.bf16.gmra.mrb[16].mxu0 %vm1476_vm2, %v2193_v20  ;;  %v4708_v20 = vld [vmem:[%s6258_s12 + $0x8d0] sm:$0xff] }
 0x17c   : > { %5228 = vmatprep.mubr.msk.bf16.mxu0 %vm1476_vm2, %v2194_v44  ;;  %v4657_v44 = vld [vmem:[%s6258_s12 + $0x6c8] sm:$0xff] }
 0x17d   : > { %v3011_v35 = vrot.slane %v4657_v44, 1 }
 0x17f   : > { %5077 = vmatmul.mubr.msk.bf16.gmra.mrb[4].mxu1 %vm1476_vm2, %v2695_v10  ;;  %v2706_v10 = vpack.c.bf16 %v4709_v21, %v4708_v20  ;;  %v4673_v20 = vld [vmem:[%s6258_s12 + $0x748] sm:$0x1]  ;;  %v4674_v21 = vld [vmem:[%s6258_s12 + $0x750] sm:$0xff] }
 0x180   : > { %5080 = vmatprep.mubr.msk.bf16.mxu1 %vm1476_vm2, %v2696_v40  ;;  %v3013_v40 = vrot.slane %v4658_v59, 1 }
 0x182   : > { %v3014_v31 = vsel %vm1741_vm3, %v3011_v35, %v3013_v40  ;;  %v3040_v40 = vrot.slane %v4674_v21, 1 }
 0x183   : > { %5229 = vmatmul.mubr.msk.bf16.gmra.mrb[20].mxu0 %vm1476_vm2, %v2195_v22  ;;  %v2679_v22 = vpack.c.bf16 %v5569_v48, %v5568_v25 }
 0x184   : > { %5232 = vmatprep.mubr.msk.bf16.mxu0 %vm1476_vm2, %v2196_v41  ;;  %v5570_v41 = vld [vmem:[%s6258_s12 + $0x690] sm:$0xff] }
 0x185   : > { %v2680_v19 = vpack.c.bf16 %v5571_v12, %v5570_v41  ;;  %v2686_v41 = vpack.c.bf16 %v4669_v58, %v4668_v17 }
 0x187   : > { %5081 = vmatmul.mubr.msk.bf16.gmra.mrb[8].mxu1 %vm1476_vm2, %v2697_v37  ;;  %v3012_v37 = vsel %vm1741_vm3, %v3010_v27, %v3011_v35  ;;  %v3038_v35 = vrot.slane %v4673_v20, 1 }
 0x188   : > { %5084 = vmatprep.mubr.msk.bf16.mxu1 %vm1476_vm2, %v2698_v28  ;;  %v4660_v28 = vld [vmem:[%s6258_s12 + $0x6e0] sm:$0xff] }
 0x189   : > { %v3016_v50 = vrot.slane %v4660_v28, 1  ;;  %v2683_v39 = vpack.c.bf16 %v4660_v28, %v4659_v24  ;;  %v4679_v24 = vld [vmem:[%s6258_s12 + $0x778] sm:$0x1] }
 0x18b   : > { %5233 = vmatmul.mubr.msk.bf16.gmra.mrb[24].mxu0 %vm1476_vm2, %v2197_v56  ;;  %v4663_v56 = vld [vmem:[%s6258_s12 + $0x6f8] sm:$0xff]  ;;  %v3017_v0 = vsel %vm1741_vm3, %v3015_v34, %v3016_v50 }
 0x18c   : > { %5236 = vmatprep.mubr.msk.bf16.mxu0 %vm1476_vm2, %v2198_v6  ;;  %v3090_v6 = vpack.c.bf16 %v3014_v31, %v3012_v37  ;;  %v3021_v14 = vrot.slane %v4663_v56, 1  ;;  %v2684_v43 = vpack.c.bf16 %v4663_v56, %v4662_v63  ;;  %v4677_v37 = vld [vmem:[%s6258_s12 + $0x768] sm:$0xff]  ;;  %v4678_v31 = vld [vmem:[%s6258_s12 + $0x770] sm:$0xff] }
 0x18d   : > { %v3045_v63 = vrot.slane %v4677_v37, 1  ;;  %v3046_v56 = vrot.slane %v4678_v31, 1 }
 0x18e   : > { %v3022_v4 = vsel %vm1741_vm3, %v3020_v2, %v3021_v14  ;;  %v2689_v2 = vpack.c.bf16 %v4678_v31, %v4677_v37 }
 0x18f   : > { %5085 = vmatmul.mubr.msk.bf16.gmra.mrb[12].mxu1 %vm1476_vm2, %v2699_v1  ;;  %v3018_v1 = vrot.slane %v4661_v55, 1 }
 0x190   : > { %5088 = vmatprep.mubr.msk.bf16.mxu1 %vm1476_vm2, %v2700_v29  ;;  %v3023_v29 = vrot.slane %v4664_v51, 1  ;;  %v3048_v51 = vrot.slane %v4679_v24, 1 }
 0x191   : > { %v3019_v32 = vsel %vm1741_vm3, %v3016_v50, %v3018_v1 }
 0x192   : > { %v3024_v11 = vsel %vm1741_vm3, %v3021_v14, %v3023_v29  ;;  %v3049_v34 = vsel %vm1741_vm3, %v3046_v56, %v3048_v51 }
 0x193   : > { %5237 = vmatmul.mubr.msk.bf16.gmra.mrb[28].mxu0 %vm1476_vm2, %v2199_v30  ;;  %v5572_v30 = vld [vmem:[%s6258_s12 + $0x6a8] sm:$0xff]  ;;  %v3092_v33 = vpack.c.bf16 %v3024_v11, %v3022_v4 }
 0x194   : > { %5242 = vmatprep.mubr.msk.bf16.mxu0 %vm1476_vm2, %v2674_v38  ;;  %v2681_v62 = vpack.c.bf16 %v5573_v60, %v5572_v30  ;;  %v2682_v38 = vpack.c.bf16 %v4657_v44, %v4656_v23  ;;  %v4675_v23 = vld [vmem:[%s6258_s12 + $0x758] sm:$0xff]  ;;  %v4676_v44 = vld [vmem:[%s6258_s12 + $0x760] sm:$0x1] }
 0x195   : > { %v3041_v25 = vrot.slane %v4675_v23, 1  ;;  %v3043_v48 = vrot.slane %v4676_v44, 1  ;;  %v2688_v50 = vpack.c.bf16 %v4675_v23, %v4674_v21 }
 0x197   : > { %5089 = vmatmul.mubr.msk.bf16.gmra.mrb[16].mxu1 %vm1476_vm2, %v2701_v57  ;;  %v4665_v57 = vld [vmem:[%s6258_s12 + $0x708] sm:$0xff]  ;;  %v3042_v12 = vsel %vm1741_vm3, %v3040_v40, %v3041_v25 }
 0x198   : > { %5092 = vmatprep.mubr.msk.bf16.mxu1 %vm1476_vm2, %v2702_v15  ;;  %v4666_v15 = vld [vmem:[%s6258_s12 + $0x710] sm:$0xff]  ;;  %v3025_v54 = vrot.slane %v4665_v57, 1 }
 0x199   : > { %v3026_v18 = vrot.slane %v4666_v15, 1 }
 0x19b   : > { %5243 = vmatmul.mubr.msk.bf16.vlgmr.msra.gmra.mrb[0].mxu0 %vm1476_vm2, %v7225_v7  ;;  %v3030_v7 = vrot.slane %v4668_v17, 1  ;;  %v3027_v36 = vsel %vm1741_vm3, %v3025_v54, %v3026_v18 }
 0x19c   : > { %5246 = vmatprep.mubr.msk.bf16.mxu0 %vm1476_vm2, %v2676_v5  ;;  %v3091_v5 = vpack.c.bf16 %v3019_v32, %v3017_v0 }
 0x19f   : > { %5093 = vmatmul.mubr.msk.bf16.gmra.mrb[20].mxu1 %vm1476_vm2, %v2703_v8  ;;  %v3031_v8 = vrot.slane %v4669_v58, 1 }
 0x1a0   : > { %5096 = vmatprep.mubr.msk.bf16.mxu1 %vm1476_vm2, %v2704_v13  ;;  %v3033_v13 = vrot.slane %v4670_v3, 1 }
 0x1a1   : > { %v3032_v26 = vsel %vm1741_vm3, %v3030_v7, %v3031_v8 }
 0x1a2   : > { %v3034_v45 = vsel %vm1741_vm3, %v3031_v8, %v3033_v13 }
 0x1a3   : > { %5247 = vmatmul.mubr.msk.bf16.gmra.mrb[4].mxu0 %vm1476_vm2, %v2677_v42  ;;  %v3029_v42 = vsel %vm1741_vm3, %v3026_v18, %v3028_v53 }
 0x1a4   : > { %5250 = vmatprep.mubr.msk.bf16.mxu0 %vm1476_vm2, %v2678_v16  ;;  %v4672_v16 = vld [vmem:[%s6258_s12 + $0x740] sm:$0xff]  ;;  %v3093_v59 = vpack.c.bf16 %v3029_v42, %v3027_v36 }
 0x1a5   : > { %v3036_v27 = vrot.slane %v4672_v16, 1 }
 0x1a7   : > { %5097 = vmatmul.mubr.msk.bf16.gmra.mrb[24].mxu1 %vm1476_vm2, %v2705_v46  ;;  %v3094_v46 = vpack.c.bf16 %v3034_v45, %v3032_v26  ;;  %v3039_v49 = vsel %vm1741_vm3, %v3036_v27, %v3038_v35 }
 0x1a8   : > { %5100 = vmatprep.mubr.msk.bf16.mxu1 %vm1476_vm2, %v2706_v10  ;;  %v3035_v10 = vrot.slane %v4671_v61, 1 }
 0x1aa   : > { %v3037_v47 = vsel %vm1741_vm3, %v3035_v10, %v3036_v27 }
 0x1ab   : > { %5251 = vmatmul.mubr.msk.bf16.gmra.mrb[8].mxu0 %vm1476_vm2, %v2679_v22  ;;  %v2685_v22 = vpack.c.bf16 %v4666_v15, %v4665_v57  ;;  %v3095_v28 = vpack.c.bf16 %v3039_v49, %v3037_v47 }
 0x1ac   : > { %5254 = vmatprep.mubr.msk.bf16.mxu0 %vm1476_vm2, %v2680_v19  ;;  %v3044_v19 = vsel %vm1741_vm3, %v3041_v25, %v3043_v48 }
 0x1ad   : > { %v3096_v55 = vpack.c.bf16 %v3044_v19, %v3042_v12 }
 0x1af   : > { %5101 = vmatmul.mubr.msk.bf16.gmra.mrb[28].mxu1 %vm1476_vm2, %v2707_v9  ;;  %v2687_v9 = vpack.c.bf16 %v4672_v16, %v4671_v61 }
 0x1b0   : > { %5122 = vmatprep.mubr.msk.bf16.mxu1 %vm1476_vm2, %v3090_v6  ;;  %v3047_v6 = vsel %vm1741_vm3, %v3045_v63, %v3046_v56 }
 0x1b1   : > { %v3097_v1 = vpack.c.bf16 %v3049_v34, %v3047_v6 }
 0x1b3   : > { %5255 = vmatmul.mubr.msk.bf16.gmra.mrb[12].mxu0 %vm1476_vm2, %v2681_v62 }
 0x1b4   : > { %5258 = vmatprep.mubr.msk.bf16.mxu0 %vm1476_vm2, %v2682_v38 }
 0x1b7   : > { %5123 = vmatmul.mubr.msk.bf16.vlgmr.msra.gmra.mrb[16].mxu1 %vm1476_vm2, %v3091_v5 }
 0x1b8   : > { %5126 = vmatprep.mubr.msk.bf16.mxu1 %vm1476_vm2, %v3092_v33  ;;  %v7080_v33 = vld [vmem:[%s7199_s2] ss:$0 sm:$0xff] }
 0x1bb   : > { %5259 = vmatmul.mubr.msk.bf16.gmra.mrb[16].mxu0 %vm1476_vm2, %v2683_v39 }
 0x1bc   : > { %5262 = vmatprep.mubr.msk.bf16.mxu0 %vm1476_vm2, %v2684_v43 }
 0x1bf   : > { %5127 = vmatmul.mubr.msk.bf16.gmra.mrb[20].mxu1 %vm1476_vm2, %v3093_v59 }
 0x1c0   : > { %5130 = vmatprep.mubr.msk.bf16.mxu1 %vm1476_vm2, %v3094_v46 }
 0x1c3   : > { %5263 = vmatmul.mubr.msk.bf16.gmra.mrb[20].mxu0 %vm1476_vm2, %v2685_v22 }
 0x1c4   : > { %5266 = vmatprep.mubr.msk.bf16.mxu0 %vm1476_vm2, %v2686_v41 }
 0x1c7   : > { %5131 = vmatmul.mubr.msk.bf16.gmra.mrb[24].mxu1 %vm1476_vm2, %v3095_v28 }
 0x1c8   : > { %5134 = vmatprep.mubr.msk.bf16.mxu1 %vm1476_vm2, %v3096_v55 }
 0x1cb   : > { %5267 = vmatmul.mubr.msk.bf16.gmra.mrb[24].mxu0 %vm1476_vm2, %v2687_v9 }
 0x1cc   : > { %5270 = vmatprep.mubr.msk.bf16.mxu0 %vm1476_vm2, %v2688_v50 }
 0x1cf   : > { %5135 = vmatmul.mubr.msk.bf16.gmra.mrb[28].mxu1 %vm1476_vm2, %v3097_v1 }
 0x1d3   : > { %5271 = vmatmul.mubr.msk.bf16.gmra.mrb[28].mxu0 %vm1476_vm2, %v2689_v2 }
 0x24a   : > { %v5074_v14 = vpop.f32.mrb[0].mxu1 }
 0x24b   : > { %v2795_v29 = vpop.f32.mrb[1].mxu1 }
 0x24c   : > { %v5075_v30 = vpop.f32.mrb[2].mxu1 }
 0x24d   : > { %v2798_v60 = vpop.f32.mrb[3].mxu1 }
 0x252   : > { %v5078_v62 = vpop.f32.mrb[4].mxu1 }
 0x253   : > { %v2811_v0 = vpop.f32.mrb[5].mxu1 }
 0x254   : > { %v5079_v32 = vpop.f32.mrb[6].mxu1 }
 0x255   : > { %v2814_v38 = vpop.f32.mrb[7].mxu1 }
 0x25a   : > { %v5082_v4 = vpop.f32.mrb[8].mxu1 }
 0x25b   : > { %v2827_v11 = vpop.f32.mrb[9].mxu1 }
 0x25c   : > { %v5083_v57 = vpop.f32.mrb[10].mxu1 }
 0x25d   : > { %v2830_v15 = vpop.f32.mrb[11].mxu1 }
 0x262   : > { %v7067_v52 = vpop.f32.mrb[12].mxu1 }
 0x263   : > { %v7069_v17 = vpop.f32.mrb[13].mxu1 }
 0x264   : > { %v7071_v58 = vpop.f32.mrb[14].mxu1 }
 0x265   : > { %v7075_v3 = vpop.f32.mrb[15].mxu1 }
 0x26e   : > { %v5244_v5 = vpop.f32.mrb[0].mxu0 }
 0x26f   : > { %v4042_v54 = vadd.f32 %v5244_v5, %v5074_v14  ;;  %v4033_v18 = vpop.f32.mrb[1].mxu0 }
 0x270   : > { %v4034_v53 = vadd.f32 %v4033_v18, %v2795_v29  ;;  %v5245_v7 = vpop.f32.mrb[2].mxu0 }
 0x271   : > { %v4297_v8 = vadd.f32 %v7080_v33, %v4042_v54  ;;  %v4045_v13 = vadd.f32 %v5245_v7, %v5075_v30  ;;  %v4036_v39 = vpop.f32.mrb[3].mxu0 }
 0x272   : > { %v4295_v36 = vadd.f32 %v7080_v33, %v4034_v53  ;;  %v4037_v42 = vadd.f32 %v4036_v39, %v2798_v60 }
 0x273   : > { %v4329_v43 = vmax.f32 %v4297_v8, 0.0  ;;  %v4298_v26 = vadd.f32 %v7080_v33, %v4045_v13 }
 0x274   : > { %v4327_v45 = vmax.f32 %v4295_v36, 0.0  ;;  %v4296_v61 = vadd.f32 %v7080_v33, %v4037_v42 }
 0x275   : > { %4362 = vst.msk [vmem:[%s7086_s30 + $0x10] sm:$0xff] %vm4359_vm4, %v4329_v43  ;;  %v4330_v16 = vmax.f32 %v4298_v26, 0.0 }
 0x276   : > { %4360 = vst.msk [vmem:[%s7086_s30] sm:$0xff] %vm4359_vm4, %v4327_v45  ;;  %v4328_v20 = vmax.f32 %v4296_v61, 0.0  ;;  %v5248_v21 = vpop.f32.mrb[4].mxu0 }
 0x277   : > { %4363 = vst.msk [vmem:[%s7086_s30 + $0x18] sm:$0xff] %vm4359_vm4, %v4330_v16  ;;  %v4058_v23 = vadd.f32 %v5248_v21, %v5078_v62  ;;  %v4049_v44 = vpop.f32.mrb[5].mxu0 }
 0x278   : > { %4361 = vst.msk [vmem:[%s7086_s30 + $0x8] sm:$0xff] %vm4359_vm4, %v4328_v20  ;;  %v4050_v59 = vadd.f32 %v4049_v44, %v2811_v0  ;;  %v5249_v46 = vpop.f32.mrb[6].mxu0 }
 0x279   : > { %v4301_v10 = vadd.f32 %v7080_v33, %v4058_v23  ;;  %v4061_v27 = vadd.f32 %v5249_v46, %v5079_v32  ;;  %v4052_v35 = vpop.f32.mrb[7].mxu0 }
 0x27a   : > { %v4299_v40 = vadd.f32 %v7080_v33, %v4050_v59  ;;  %v4053_v25 = vadd.f32 %v4052_v35, %v2814_v38 }
 0x27b   : > { %v4333_v48 = vmax.f32 %v4301_v10, 0.0  ;;  %v4302_v22 = vadd.f32 %v7080_v33, %v4061_v27 }
 0x27c   : > { %v4331_v47 = vmax.f32 %v4299_v40, 0.0  ;;  %v4300_v49 = vadd.f32 %v7080_v33, %v4053_v25 }
 0x27d   : > { %4366 = vst.msk [vmem:[%s7086_s30 + $0x30] sm:$0xff] %vm4359_vm4, %v4333_v48  ;;  %v4334_v41 = vmax.f32 %v4302_v22, 0.0 }
 0x27e   : > { %4364 = vst.msk [vmem:[%s7086_s30 + $0x20] sm:$0xff] %vm4359_vm4, %v4331_v47  ;;  %v4332_v12 = vmax.f32 %v4300_v49, 0.0  ;;  %v5252_v19 = vpop.f32.mrb[8].mxu0 }
 0x27f   : > { %4367 = vst.msk [vmem:[%s7086_s30 + $0x38] sm:$0xff] %vm4359_vm4, %v4334_v41  ;;  %v4074_v37 = vadd.f32 %v5252_v19, %v5082_v4  ;;  %v4065_v31 = vpop.f32.mrb[9].mxu0 }
 0x280   : > { %4365 = vst.msk [vmem:[%s7086_s30 + $0x28] sm:$0xff] %vm4359_vm4, %v4332_v12  ;;  %v4066_v24 = vadd.f32 %v4065_v31, %v2827_v11  ;;  %v5253_v28 = vpop.f32.mrb[10].mxu0 }
 0x281   : > { %v4305_v55 = vadd.f32 %v7080_v33, %v4074_v37  ;;  %v4077_v63 = vadd.f32 %v5253_v28, %v5083_v57  ;;  %v4068_v56 = vpop.f32.mrb[11].mxu0 }
 0x282   : > { %v4303_v51 = vadd.f32 %v7080_v33, %v4066_v24  ;;  %v4069_v9 = vadd.f32 %v4068_v56, %v2830_v15 }
 0x283   : > { %v4337_v6 = vmax.f32 %v4305_v55, 0.0  ;;  %v4306_v34 = vadd.f32 %v7080_v33, %v4077_v63 }
 0x284   : > { %v4335_v50 = vmax.f32 %v4303_v51, 0.0  ;;  %v4304_v1 = vadd.f32 %v7080_v33, %v4069_v9 }
 0x285   : > { %4370 = vst.msk [vmem:[%s7086_s30 + $0x50] sm:$0xff] %vm4359_vm4, %v4337_v6  ;;  %v4338_v2 = vmax.f32 %v4306_v34, 0.0 }
 0x286   : > { %4368 = vst.msk [vmem:[%s7086_s30 + $0x40] sm:$0xff] %vm4359_vm4, %v4335_v50  ;;  %v4336_v14 = vmax.f32 %v4304_v1, 0.0  ;;  %v5256_v29 = vpop.f32.mrb[12].mxu0 }
 0x287   : > { %4371 = vst.msk [vmem:[%s7086_s30 + $0x58] sm:$0xff] %vm4359_vm4, %v4338_v2  ;;  %v4090_v30 = vadd.f32 %v5256_v29, %v7067_v52  ;;  %v4081_v60 = vpop.f32.mrb[13].mxu0 }
 0x288   : > { %4369 = vst.msk [vmem:[%s7086_s30 + $0x48] sm:$0xff] %vm4359_vm4, %v4336_v14  ;;  %v4082_v62 = vadd.f32 %v4081_v60, %v7069_v17  ;;  %v5257_v0 = vpop.f32.mrb[14].mxu0 }
 0x289   : > { %v4309_v32 = vadd.f32 %v7080_v33, %v4090_v30  ;;  %v4093_v38 = vadd.f32 %v5257_v0, %v7071_v58  ;;  %v4084_v4 = vpop.f32.mrb[15].mxu0 }
 0x28a   : > { %v4307_v11 = vadd.f32 %v7080_v33, %v4082_v62  ;;  %v4085_v57 = vadd.f32 %v4084_v4, %v7075_v3  ;;  %v5124_v15 = vpop.f32.mrb[16].mxu1 }
 0x28b   : > { %v4341_v52 = vmax.f32 %v4309_v32, 0.0  ;;  %v4310_v5 = vadd.f32 %v7080_v33, %v4093_v38  ;;  %v3249_v54 = vpop.f32.mrb[17].mxu1 }
 0x28c   : > { %v4339_v18 = vmax.f32 %v4307_v11, 0.0  ;;  %v4308_v17 = vadd.f32 %v7080_v33, %v4085_v57  ;;  %v5125_v53 = vpop.f32.mrb[18].mxu1 }
 0x28d   : > { %4374 = vst.msk [vmem:[%s7086_s30 + $0x70] sm:$0xff] %vm4359_vm4, %v4341_v52  ;;  %v4342_v7 = vmax.f32 %v4310_v5, 0.0  ;;  %v3252_v58 = vpop.f32.mrb[19].mxu1 }
 0x28e   : > { %4372 = vst.msk [vmem:[%s7086_s30 + $0x60] sm:$0xff] %vm4359_vm4, %v4339_v18  ;;  %v4340_v8 = vmax.f32 %v4308_v17, 0.0  ;;  %v5260_v13 = vpop.f32.mrb[16].mxu0 }
 0x28f   : > { %4375 = vst.msk [vmem:[%s7086_s30 + $0x78] sm:$0xff] %vm4359_vm4, %v4342_v7  ;;  %v5292_v3 = vadd.f32 %v5260_v13, %v5124_v15  ;;  %v4097_v39 = vpop.f32.mrb[17].mxu0 }
 0x290   : > { %4373 = vst.msk [vmem:[%s7086_s30 + $0x68] sm:$0xff] %vm4359_vm4, %v4340_v8  ;;  %v5293_v36 = vadd.f32 %v4097_v39, %v3249_v54  ;;  %v5261_v42 = vpop.f32.mrb[18].mxu0 }
 0x291   : > { %v4313_v43 = vadd.f32 %v5292_v3, %v7080_v33  ;;  %v5294_v26 = vadd.f32 %v5261_v42, %v5125_v53  ;;  %v4100_v45 = vpop.f32.mrb[19].mxu0 }
 0x292   : > { %v4311_v61 = vadd.f32 %v5293_v36, %v7080_v33  ;;  %v5295_v16 = vadd.f32 %v4100_v45, %v3252_v58  ;;  %v5128_v20 = vpop.f32.mrb[20].mxu1 }
 0x293   : > { %v4345_v21 = vmax.f32 %v4313_v43, 0.0  ;;  %v4314_v23 = vadd.f32 %v5294_v26, %v7080_v33  ;;  %v3265_v44 = vpop.f32.mrb[21].mxu1 }
 0x294   : > { %v4343_v59 = vmax.f32 %v4311_v61, 0.0  ;;  %v4312_v46 = vadd.f32 %v5295_v16, %v7080_v33  ;;  %v5129_v10 = vpop.f32.mrb[22].mxu1 }
 0x295   : > { %4378 = vst.msk [vmem:[%s7086_s30 + $0x90] sm:$0xff] %vm4359_vm4, %v4345_v21  ;;  %v4346_v27 = vmax.f32 %v4314_v23, 0.0  ;;  %v3268_v35 = vpop.f32.mrb[23].mxu1 }
 0x296   : > { %4376 = vst.msk [vmem:[%s7086_s30 + $0x80] sm:$0xff] %vm4359_vm4, %v4343_v59  ;;  %v4344_v40 = vmax.f32 %v4312_v46, 0.0  ;;  %v5264_v25 = vpop.f32.mrb[20].mxu0 }
 0x297   : > { %4379 = vst.msk [vmem:[%s7086_s30 + $0x98] sm:$0xff] %vm4359_vm4, %v4346_v27  ;;  %v5296_v48 = vadd.f32 %v5264_v25, %v5128_v20  ;;  %v4113_v22 = vpop.f32.mrb[21].mxu0 }
 0x298   : > { %4377 = vst.msk [vmem:[%s7086_s30 + $0x88] sm:$0xff] %vm4359_vm4, %v4344_v40  ;;  %v5297_v47 = vadd.f32 %v4113_v22, %v3265_v44  ;;  %v5265_v49 = vpop.f32.mrb[22].mxu0 }
 0x299   : > { %v4317_v41 = vadd.f32 %v5296_v48, %v7080_v33  ;;  %v5298_v12 = vadd.f32 %v5265_v49, %v5129_v10  ;;  %v4116_v19 = vpop.f32.mrb[23].mxu0 }
 0x29a   : > { %v4315_v37 = vadd.f32 %v5297_v47, %v7080_v33  ;;  %v5299_v31 = vadd.f32 %v4116_v19, %v3268_v35  ;;  %v5132_v24 = vpop.f32.mrb[24].mxu1 }
 0x29b   : > { %v4349_v28 = vmax.f32 %v4317_v41, 0.0  ;;  %v4318_v55 = vadd.f32 %v5298_v12, %v7080_v33  ;;  %v3281_v63 = vpop.f32.mrb[25].mxu1 }
 0x29c   : > { %v4347_v56 = vmax.f32 %v4315_v37, 0.0  ;;  %v4316_v51 = vadd.f32 %v5299_v31, %v7080_v33  ;;  %v5133_v9 = vpop.f32.mrb[26].mxu1 }
 0x29d   : > { %4382 = vst.msk [vmem:[%s7086_s30 + $0xb0] sm:$0xff] %vm4359_vm4, %v4349_v28  ;;  %v4350_v6 = vmax.f32 %v4318_v55, 0.0  ;;  %v3284_v34 = vpop.f32.mrb[27].mxu1 }
 0x29e   : > { %4380 = vst.msk [vmem:[%s7086_s30 + $0xa0] sm:$0xff] %vm4359_vm4, %v4347_v56  ;;  %v4348_v50 = vmax.f32 %v4316_v51, 0.0  ;;  %v5268_v1 = vpop.f32.mrb[24].mxu0 }
 0x29f   : > { %4383 = vst.msk [vmem:[%s7086_s30 + $0xb8] sm:$0xff] %vm4359_vm4, %v4350_v6  ;;  %v5300_v2 = vadd.f32 %v5268_v1, %v5132_v24  ;;  %v4129_v14 = vpop.f32.mrb[25].mxu0 }
 0x2a0   : > { %4381 = vst.msk [vmem:[%s7086_s30 + $0xa8] sm:$0xff] %vm4359_vm4, %v4348_v50  ;;  %v5301_v29 = vadd.f32 %v4129_v14, %v3281_v63  ;;  %v5269_v30 = vpop.f32.mrb[26].mxu0 }
 0x2a1   : > { %v4321_v60 = vadd.f32 %v5300_v2, %v7080_v33  ;;  %v5302_v62 = vadd.f32 %v5269_v30, %v5133_v9  ;;  %v4132_v0 = vpop.f32.mrb[27].mxu0 }
 0x2a2   : > { %v4319_v32 = vadd.f32 %v5301_v29, %v7080_v33  ;;  %v5303_v38 = vadd.f32 %v4132_v0, %v3284_v34  ;;  %v5136_v4 = vpop.f32.mrb[28].mxu1 }
 0x2a3   : > { %v4353_v11 = vmax.f32 %v4321_v60, 0.0  ;;  %v4322_v57 = vadd.f32 %v5302_v62, %v7080_v33  ;;  %v3297_v15 = vpop.f32.mrb[29].mxu1 }
 0x2a4   : > { %v4351_v52 = vmax.f32 %v4319_v32, 0.0  ;;  %v4320_v5 = vadd.f32 %v5303_v38, %v7080_v33  ;;  %v5137_v54 = vpop.f32.mrb[30].mxu1 }
 0x2a5   : > { %4386 = vst.msk [vmem:[%s7086_s30 + $0xd0] sm:$0xff] %vm4359_vm4, %v4353_v11  ;;  %v4354_v18 = vmax.f32 %v4322_v57, 0.0  ;;  %v3300_v17 = vpop.f32.mrb[31].mxu1 }
 0x2a6   : > { %4384 = vst.msk [vmem:[%s7086_s30 + $0xc0] sm:$0xff] %vm4359_vm4, %v4351_v52  ;;  %v4352_v53 = vmax.f32 %v4320_v5, 0.0  ;;  %v5272_v7 = vpop.f32.mrb[28].mxu0 }
 0x2a7   : > { %4387 = vst.msk [vmem:[%s7086_s30 + $0xd8] sm:$0xff] %vm4359_vm4, %v4354_v18  ;;  %v5304_v58 = vadd.f32 %v5272_v7, %v5136_v4  ;;  %v4145_v8 = vpop.f32.mrb[29].mxu0 }
 0x2a8   : > { %4385 = vst.msk [vmem:[%s7086_s30 + $0xc8] sm:$0xff] %vm4359_vm4, %v4352_v53  ;;  %v5305_v13 = vadd.f32 %v4145_v8, %v3297_v15  ;;  %v5273_v3 = vpop.f32.mrb[30].mxu0 }
 0x2a9   : > { %v4325_v39 = vadd.f32 %v5304_v58, %v7080_v33  ;;  %v5306_v36 = vadd.f32 %v5273_v3, %v5137_v54  ;;  %v4148_v42 = vpop.f32.mrb[31].mxu0 }
 0x2aa   : > { %v4323_v43 = vadd.f32 %v5305_v13, %v7080_v33  ;;  %v5307_v26 = vadd.f32 %v4148_v42, %v3300_v17 }
 0x2ab   : > { %v4357_v45 = vmax.f32 %v4325_v39, 0.0  ;;  %v4326_v61 = vadd.f32 %v5306_v36, %v7080_v33 }
 0x2ac   : > { %v4355_v16 = vmax.f32 %v4323_v43, 0.0  ;;  %v4324_v20 = vadd.f32 %v5307_v26, %v7080_v33 }
 0x2ad   : > { %4390 = vst.msk [vmem:[%s7086_s30 + $0xf0] sm:$0xff] %vm4359_vm4, %v4357_v45  ;;  %v4358_v21 = vmax.f32 %v4326_v61, 0.0 }
 0x2ae   : > { %4388 = vst.msk [vmem:[%s7086_s30 + $0xe0] sm:$0xff] %vm4359_vm4, %v4355_v16  ;;  %v4356_v23 = vmax.f32 %v4324_v20, 0.0 }
 0x2af   : > { %4391 = vst.msk [vmem:[%s7086_s30 + $0xf8] sm:$0xff] %vm4359_vm4, %v4358_v21 }
 0x2b0   : > { %4389 = vst.msk [vmem:[%s7086_s30 + $0xe8] sm:$0xff] %vm4359_vm4, %v4356_v23 }
 0x2b1 PF: > { %p10_p9 = scmp.ge.s32.totalorder %s5636_s16, 4   ;;  %s7226_s12 = smov %s5592_s13 }
 0x2b2   : > { %s7227_s13 = smov %s5645_s19  ;;  %s7228_s14 = smov %s5636_s16 }
 0x2b3   :  { %12 = sbr.rel (!%p10_p9) target bundleno = 2 (0x2), region = 118 }

// kernel: _lambda_.28
= control target key start
LH: loop header
LB: loop body
LE: loop exit
PB: predicated region body
PF: predicated region fallthrough
CT: control target
= control target key end

     0   :  { %v41_v1 = vlaneseq  ;;  %vm393_vm0 = vcmask 130048   ;;  %vm465_vm1 = vcmask 125952   ;;  %s878_s3 = inlined_call_operand.vmem [shape: bf16[16,16], index: 3, kind: input, shape index: {}]   ;;  %s879_s1 = inlined_call_operand.vmem [shape: f32[3,3,16], index: 1, kind: input, shape index: {}]   ;;  %s880_s0 = inlined_call_operand.vmem [shape: f32[6,8,5,16], index: 0, kind: input, shape index: {}]   ;;  %s881_s2 = inlined_call_operand.vmem [shape: f32[1,1,16], index: 2, kind: input, shape index: {}]   ;;  %s882_s4 = inlined_call_operand.vmem [shape: f32[1,16], index: 4, kind: input, shape index: {}]   ;;  %s883_s5 = inlined_call_operand.vmem [shape: f32[8,4,16], index: 5, kind: output, shape index: {}]  }
   0x1   :  { %v532_v0 = vld [vmem:[%s878_s3] sm:$0xff]   ;;  %v575_v5 = vld [vmem:[%s879_s1 + $0x8] sm:$0x7]  ;;  %v26_v11 = vld [vmem:[%s880_s0 + $0x10] sm:$0x1f] }
   0x2   :  { %526 = vmatprep.subr.bf16.mxu0 %v532_v0  ;;  %v42_v2 = vshrl.u32 %v41_v1, 7  ;;  %v21_v3 = vld [vmem:[%s879_s1] sm:$0x7]  ;;  %v22_v4 = vld [vmem:[%s879_s1 + $0x4] sm:$0x7] }
   0x3   :  { %527 = vmatpush3.bf16.msra.mxu0 %v532_v0  ;;  %v24_v9 = vld [vmem:[%s880_s0] sm:$0x1f]  ;;  %v25_v10 = vld [vmem:[%s880_s0 + $0x8] sm:$0x1f]  ;;  %v480_v14 = vld [vmem:[%s880_s0 + $0x50] sm:$0x1f] }
   0x4   :  { %v43_v6 = vsub.s32 0, %v42_v2  ;;  %v55_v7 = vsub.s32 1, %v42_v2  ;;  %v577_v8 = vsub.s32 2, %v42_v2  ;;  %v478_v12 = vld [vmem:[%s880_s0 + $0x40] sm:$0x1f] }
   0x5   :  { %v479_v13 = vld [vmem:[%s880_s0 + $0x48] sm:$0x1f]  ;;  %v481_v15 = vld [vmem:[%s880_s0 + $0x58] sm:$0x1f]  ;;  %v486_v21 = vld [vmem:[%s880_s0 + $0x80] sm:$0x1f] }
   0x6   :  { %v600_v16 = vrot.slane %v21_v3, %v43_v6  ;;  %v602_v17 = vrot.slane %v21_v3, %v55_v7  ;;  %v605_v18 = vrot.slane %v21_v3, %v577_v8  ;;  %v607_v19 = vrot.slane %v22_v4, %v43_v6  ;;  %v27_v20 = vld [vmem:[%s880_s0 + $0x18] sm:$0x1f]  ;;  %v487_v22 = vld [vmem:[%s880_s0 + $0x88] sm:$0x1f]  ;;  %v488_v31 = vld [vmem:[%s880_s0 + $0x90] sm:$0x1f] }
   0x7   :  { %v618_v23 = vrot.slane %v22_v4, %v55_v7  ;;  %v621_v24 = vrot.slane %v22_v4, %v577_v8  ;;  %v624_v25 = vrot.slane %v575_v5, %v43_v6  ;;  %v627_v26 = vrot.slane %v575_v5, %v55_v7  ;;  %v489_v32 = vld [vmem:[%s880_s0 + $0x98] sm:$0x1f]  ;;  %v494_v33 = vld [vmem:[%s880_s0 + $0xc0] sm:$0x1f]  ;;  %v495_v38 = vld [vmem:[%s880_s0 + $0xc8] sm:$0x1f] }
   0x8   :  { %v45_v27 = vmul.f32 %v600_v16, %v24_v9  ;;  %v46_v28 = vmul.f32 %v600_v16, %v25_v10  ;;  %v47_v29 = vmul.f32 %v600_v16, %v26_v11  ;;  %v48_v30 = vmul.f32 %v600_v16, %v27_v20  ;;  %v496_v39 = vld [vmem:[%s880_s0 + $0xd0] sm:$0x1f]  ;;  %v497_v40 = vld [vmem:[%s880_s0 + $0xd8] sm:$0x1f]  ;;  %v502_v45 = vld [vmem:[%s880_s0 + $0x100] sm:$0x1f] }
   0x9   :  { %v57_v34 = vmul.f32 %v478_v12, %v602_v17  ;;  %v58_v35 = vmul.f32 %v479_v13, %v602_v17  ;;  %v59_v36 = vmul.f32 %v480_v14, %v602_v17  ;;  %v60_v37 = vmul.f32 %v481_v15, %v602_v17  ;;  %v503_v46 = vld [vmem:[%s880_s0 + $0x108] sm:$0x1f]  ;;  %v504_v51 = vld [vmem:[%s880_s0 + $0x110] sm:$0x1f]  ;;  %v505_v52 = vld [vmem:[%s880_s0 + $0x118] sm:$0x1f] }
   0xa   :  { %v69_v41 = vmul.f32 %v605_v18, %v24_v9  ;;  %v70_v42 = vmul.f32 %v605_v18, %v25_v10  ;;  %v71_v43 = vmul.f32 %v605_v18, %v26_v11  ;;  %v72_v44 = vmul.f32 %v605_v18, %v27_v20  ;;  %v510_v53 = vld [vmem:[%s880_s0 + $0x140] sm:$0x1f]  ;;  %v511_v58 = vld [vmem:[%s880_s0 + $0x148] sm:$0x1f]  ;;  %v512_v59 = vld [vmem:[%s880_s0 + $0x150] sm:$0x1f] }
   0xb   :  { %v99_v47 = vmul.f32 %v486_v21, %v607_v19  ;;  %v100_v48 = vmul.f32 %v487_v22, %v607_v19  ;;  %v101_v49 = vmul.f32 %v488_v31, %v607_v19  ;;  %v102_v50 = vmul.f32 %v489_v32, %v607_v19  ;;  %v513_v60 = vld [vmem:[%s880_s0 + $0x158] sm:$0x1f] }
   0xc   :  { %v111_v54 = vmul.f32 %v494_v33, %v618_v23  ;;  %v112_v55 = vmul.f32 %v495_v38, %v618_v23  ;;  %v113_v56 = vmul.f32 %v496_v39, %v618_v23  ;;  %v114_v57 = vmul.f32 %v497_v40, %v618_v23 }
   0xd   :  { %v123_v61 = vmul.f32 %v486_v21, %v621_v24  ;;  %v124_v62 = vmul.f32 %v487_v22, %v621_v24  ;;  %v125_v63 = vmul.f32 %v488_v31, %v621_v24  ;;  %v126_v0 = vmul.f32 %v489_v32, %v621_v24 }
   0xe   :  { %v153_v1 = vmul.f32 %v502_v45, %v624_v25  ;;  %v154_v2 = vmul.f32 %v503_v46, %v624_v25  ;;  %v155_v3 = vmul.f32 %v504_v51, %v624_v25  ;;  %v156_v4 = vmul.f32 %v505_v52, %v624_v25 }
   0xf   :  { %v165_v6 = vmul.f32 %v510_v53, %v627_v26  ;;  %v166_v7 = vmul.f32 %v511_v58, %v627_v26  ;;  %v167_v9 = vmul.f32 %v512_v59, %v627_v26  ;;  %v168_v10 = vmul.f32 %v513_v60, %v627_v26 }
  0x10   :  { %v705_v11 = vrot.slane %v575_v5, %v577_v8  ;;  %v185_v12 = vadd.f32 %v57_v34, %v45_v27  ;;  %v186_v13 = vadd.f32 %v58_v35, %v46_v28  ;;  %v187_v14 = vadd.f32 %v59_v36, %v47_v29 }
  0x11   :  { %v188_v15 = vadd.f32 %v60_v37, %v48_v30  ;;  %v201_v20 = vrot.slane %v99_v47, 7  ;;  %v202_v21 = vrot.slane %v100_v48, 7  ;;  %v203_v22 = vrot.slane %v101_v49, 7 }
  0x12   :  { %v177_v31 = vmul.f32 %v502_v45, %v705_v11  ;;  %v178_v32 = vmul.f32 %v503_v46, %v705_v11  ;;  %v179_v33 = vmul.f32 %v504_v51, %v705_v11  ;;  %v180_v38 = vmul.f32 %v505_v52, %v705_v11 }
  0x13   :  { %v204_v39 = vrot.slane %v102_v50, 7  ;;  %v217_v40 = vadd.f32 %v201_v20, %v69_v41  ;;  %v218_v53 = vadd.f32 %v202_v21, %v70_v42  ;;  %v219_v5 = vadd.f32 %v203_v22, %v71_v43 }
  0x14   :  { %v233_v8 = vrot.slane %v123_v61, 1  ;;  %v234_v27 = vrot.slane %v124_v62, 1  ;;  %v235_v28 = vrot.slane %v125_v63, 1  ;;  %v236_v29 = vrot.slane %v126_v0, 1  ;;  %v482_v0 = vld [vmem:[%s880_s0 + $0x60] sm:$0x1f] }
  0x15   :  { %v220_v30 = vadd.f32 %v204_v39, %v72_v44  ;;  %v257_v34 = vadd.f32 %v165_v6, %v153_v1  ;;  %v258_v35 = vadd.f32 %v166_v7, %v154_v2  ;;  %v259_v36 = vadd.f32 %v167_v9, %v155_v3  ;;  %v28_v44 = vld [vmem:[%s880_s0 + $0x20] sm:$0x1f]  ;;  %v483_v6 = vld [vmem:[%s880_s0 + $0x68] sm:$0x1f]  ;;  %v484_v7 = vld [vmem:[%s880_s0 + $0x70] sm:$0x1f] }
  0x16   :  { %v249_v37 = vadd.f32 %v233_v8, %v111_v54  ;;  %v250_v45 = vadd.f32 %v234_v27, %v112_v55  ;;  %v251_v47 = vadd.f32 %v235_v28, %v113_v56  ;;  %v252_v46 = vadd.f32 %v236_v29, %v114_v57  ;;  %v29_v54 = vld [vmem:[%s880_s0 + $0x28] sm:$0x1f]  ;;  %v30_v55 = vld [vmem:[%s880_s0 + $0x30] sm:$0x1f] }
  0x17   :  { %v260_v48 = vadd.f32 %v168_v10, %v156_v4  ;;  %v273_v49 = vrot.slane %v217_v40, 1  ;;  %v274_v51 = vrot.slane %v218_v53, 1  ;;  %v275_v52 = vrot.slane %v219_v5, 1  ;;  %v732_v10 = vld [vmem:[%s881_s2] ss:$0 sm:$0xff] }
  0x18   :  { %v276_v50 = vrot.slane %v220_v30, 1  ;;  %v297_v41 = vadd.f32 %v257_v34, %v249_v37  ;;  %v298_v42 = vadd.f32 %v258_v35, %v250_v45  ;;  %v299_v43 = vadd.f32 %v259_v36, %v251_v47  ;;  %v490_v53 = vld [vmem:[%s880_s0 + $0xa0] sm:$0x1f]  ;;  %v491_v5 = vld [vmem:[%s880_s0 + $0xa8] sm:$0x1f] }
  0x19   :  { %v289_v58 = vadd.f32 %v273_v49, %v185_v12  ;;  %v290_v59 = vadd.f32 %v274_v51, %v186_v13  ;;  %v291_v60 = vadd.f32 %v275_v52, %v187_v14  ;;  %v300_v61 = vadd.f32 %v260_v48, %v252_v46  ;;  %v31_v12 = vld [vmem:[%s880_s0 + $0x38] sm:$0x1f]  ;;  %v492_v29 = vld [vmem:[%s880_s0 + $0xb0] sm:$0x1f]  ;;  %v498_v34 = vld [vmem:[%s880_s0 + $0xe0] sm:$0x1f] }
  0x1a   :  { %v292_v56 = vadd.f32 %v276_v50, %v188_v15  ;;  %v321_v57 = vrot.slane %v177_v31, 1  ;;  %v322_v62 = vrot.slane %v178_v32, 1  ;;  %v323_v63 = vrot.slane %v179_v33, 1  ;;  %v485_v13 = vld [vmem:[%s880_s0 + $0x78] sm:$0x1f] }
  0x1b   :  { %v305_v1 = vadd.f32 %v297_v41, %v289_v58  ;;  %v306_v2 = vadd.f32 %v298_v42, %v290_v59  ;;  %v307_v3 = vadd.f32 %v299_v43, %v291_v60  ;;  %v324_v4 = vrot.slane %v180_v38, 1  ;;  %v493_v30 = vld [vmem:[%s880_s0 + $0xb8] sm:$0x1f]  ;;  %v499_v45 = vld [vmem:[%s880_s0 + $0xe8] sm:$0x1f] }
  0x1c   :  { %v308_v9 = vadd.f32 %v300_v61, %v292_v56  ;;  %v741_v14 = vmul.f32 %v600_v16, %v28_v44  ;;  %v744_v15 = vmul.f32 %v600_v16, %v29_v54  ;;  %v747_v20 = vmul.f32 %v600_v16, %v30_v55  ;;  %v500_v47 = vld [vmem:[%s880_s0 + $0xf0] sm:$0x1f]  ;;  %v501_v46 = vld [vmem:[%s880_s0 + $0xf8] sm:$0x1f]  ;;  %v506_v50 = vld [vmem:[%s880_s0 + $0x120] sm:$0x1f] }
  0x1d   :  { %v337_v21 = vadd.f32 %v321_v57, %v305_v1  ;;  %v338_v22 = vadd.f32 %v322_v62, %v306_v2  ;;  %v339_v31 = vadd.f32 %v323_v63, %v307_v3  ;;  %v52_v32 = vmul.f32 %v600_v16, %v31_v12  ;;  %v507_v41 = vld [vmem:[%s880_s0 + $0x128] sm:$0x1f]  ;;  %v509_v60 = vld [vmem:[%s880_s0 + $0x138] sm:$0x1f]  ;;  %v514_v61 = vld [vmem:[%s880_s0 + $0x160] sm:$0x1f] }
  0x1e   :  { %v340_v33 = vadd.f32 %v324_v4, %v308_v9  ;;  %v61_v38 = vmul.f32 %v482_v0, %v602_v17  ;;  %v62_v39 = vmul.f32 %v483_v6, %v602_v17  ;;  %v63_v40 = vmul.f32 %v484_v7, %v602_v17  ;;  %v515_v56 = vld [vmem:[%s880_s0 + $0x168] sm:$0x1f]  ;;  %v516_v57 = vld [vmem:[%s880_s0 + $0x170] sm:$0x1f]  ;;  %v517_v62 = vld [vmem:[%s880_s0 + $0x178] sm:$0x1f] }
  0x1f   :  { %v352_v8 = vadd.f32 %v732_v10, %v337_v21  ;;  %v353_v27 = vadd.f32 %v732_v10, %v338_v22  ;;  %v354_v16 = vadd.f32 %v732_v10, %v339_v31  ;;  %v64_v28 = vmul.f32 %v485_v13, %v602_v17 }
  0x20   :  { %v355_v35 = vadd.f32 %v732_v10, %v340_v33  ;;  %v73_v36 = vmul.f32 %v605_v18, %v28_v44  ;;  %v74_v37 = vmul.f32 %v605_v18, %v29_v54  ;;  %v75_v17 = vmul.f32 %v605_v18, %v30_v55 }
  0x21   :  { %v368_v48 = vcombine.low %v352_v8, %v353_v27  ;;  %v76_v49 = vmul.f32 %v605_v18, %v31_v12  ;;  %v103_v51 = vmul.f32 %v490_v53, %v607_v19  ;;  %v104_v52 = vmul.f32 %v491_v5, %v607_v19  ;;  %v508_v18 = vld [vmem:[%s880_s0 + $0x130] sm:$0x1f] }
  0x22   :  { %v369_v42 = vcombine.low %v354_v16, %v355_v35  ;;  %v105_v43 = vmul.f32 %v492_v29, %v607_v19  ;;  %v106_v58 = vmul.f32 %v493_v30, %v607_v19  ;;  %v115_v59 = vmul.f32 %v498_v34, %v618_v23 }
  0x23   :  { %v116_v44 = vmul.f32 %v499_v45, %v618_v23  ;;  %v117_v54 = vmul.f32 %v500_v47, %v618_v23  ;;  %v118_v19 = vmul.f32 %v501_v46, %v618_v23  ;;  %v127_v55 = vmul.f32 %v490_v53, %v621_v24 }
  0x24   :  { %v376_v63 = vpack.c.bf16 %v369_v42, %v368_v48  ;;  %v128_v0 = vmul.f32 %v491_v5, %v621_v24  ;;  %v129_v1 = vmul.f32 %v492_v29, %v621_v24  ;;  %v130_v23 = vmul.f32 %v493_v30, %v621_v24 }
  0x25   :  { %v157_v2 = vmul.f32 %v506_v50, %v624_v25  ;;  %v158_v3 = vmul.f32 %v507_v41, %v624_v25  ;;  %v159_v4 = vmul.f32 %v508_v18, %v624_v25  ;;  %v160_v6 = vmul.f32 %v509_v60, %v624_v25 }
  0x26   :  { %528 = vmatprep.mubr.msk.bf16.mxu0 %vm393_vm0, %v376_v63  ;;  %v169_v7 = vmul.f32 %v514_v61, %v627_v26  ;;  %v170_v9 = vmul.f32 %v515_v56, %v627_v26  ;;  %v171_v12 = vmul.f32 %v516_v57, %v627_v26  ;;  %v172_v13 = vmul.f32 %v517_v62, %v627_v26 }
  0x27   :  { %v181_v24 = vmul.f32 %v506_v50, %v705_v11  ;;  %v182_v21 = vmul.f32 %v507_v41, %v705_v11  ;;  %v183_v22 = vmul.f32 %v508_v18, %v705_v11  ;;  %v184_v31 = vmul.f32 %v509_v60, %v705_v11 }
  0x28   :  { %v189_v25 = vadd.f32 %v61_v38, %v741_v14  ;;  %v190_v33 = vadd.f32 %v62_v39, %v744_v15  ;;  %v191_v53 = vadd.f32 %v63_v40, %v747_v20  ;;  %v192_v5 = vadd.f32 %v64_v28, %v52_v32 }
  0x29   :  { %v205_v8 = vrot.slane %v103_v51, 7  ;;  %v206_v27 = vrot.slane %v104_v52, 7  ;;  %v207_v16 = vrot.slane %v105_v43, 7  ;;  %v208_v29 = vrot.slane %v106_v58, 7 }
  0x2a   :  { %v237_v26 = vrot.slane %v127_v55, 1  ;;  %v238_v30 = vrot.slane %v128_v0, 1  ;;  %v239_v34 = vrot.slane %v129_v1, 1  ;;  %v240_v35 = vrot.slane %v130_v23, 1 }
  0x2b   :  { %v221_v45 = vadd.f32 %v205_v8, %v73_v36  ;;  %v222_v47 = vadd.f32 %v206_v27, %v74_v37  ;;  %v223_v46 = vadd.f32 %v207_v16, %v75_v17  ;;  %v224_v48 = vadd.f32 %v208_v29, %v76_v49 }
  0x2c   :  { %v253_v11 = vadd.f32 %v237_v26, %v115_v59  ;;  %v254_v50 = vadd.f32 %v238_v30, %v116_v44  ;;  %v255_v14 = vadd.f32 %v239_v34, %v117_v54  ;;  %v256_v38 = vadd.f32 %v240_v35, %v118_v19 }
  0x2d   :  { %v261_v15 = vadd.f32 %v169_v7, %v157_v2  ;;  %v262_v39 = vadd.f32 %v170_v9, %v158_v3  ;;  %v263_v20 = vadd.f32 %v171_v12, %v159_v4  ;;  %v264_v32 = vadd.f32 %v172_v13, %v160_v6  ;;  %v519_v7 = vld [vmem:[%s882_s4] ss:$0 sm:$0xff] }
  0x2e   :  { %v277_v40 = vrot.slane %v221_v45, 1  ;;  %v278_v28 = vrot.slane %v222_v47, 1  ;;  %v279_v51 = vrot.slane %v223_v46, 1  ;;  %v280_v52 = vrot.slane %v224_v48, 1 }
  0x2f   :  { %v301_v41 = vadd.f32 %v261_v15, %v253_v11  ;;  %v302_v42 = vadd.f32 %v262_v39, %v254_v50  ;;  %v303_v43 = vadd.f32 %v263_v20, %v255_v14  ;;  %v304_v58 = vadd.f32 %v264_v32, %v256_v38 }
  0x30   :  { %v293_v36 = vadd.f32 %v277_v40, %v189_v25  ;;  %v294_v37 = vadd.f32 %v278_v28, %v190_v33  ;;  %v295_v17 = vadd.f32 %v279_v51, %v191_v53  ;;  %v296_v49 = vadd.f32 %v280_v52, %v192_v5 }
  0x31   :  { %v325_v59 = vrot.slane %v181_v24, 1  ;;  %v326_v18 = vrot.slane %v182_v21, 1  ;;  %v327_v60 = vrot.slane %v183_v22, 1  ;;  %v328_v61 = vrot.slane %v184_v31, 1 }
  0x32   :  { %v309_v44 = vadd.f32 %v301_v41, %v293_v36  ;;  %v310_v54 = vadd.f32 %v302_v42, %v294_v37  ;;  %v311_v19 = vadd.f32 %v303_v43, %v295_v17  ;;  %v312_v55 = vadd.f32 %v304_v58, %v296_v49 }
  0x34   :  { %v341_v56 = vadd.f32 %v325_v59, %v309_v44  ;;  %v342_v57 = vadd.f32 %v326_v18, %v310_v54  ;;  %v343_v62 = vadd.f32 %v327_v60, %v311_v19  ;;  %v344_v63 = vadd.f32 %v328_v61, %v312_v55 }
  0x36   :  { %v356_v0 = vadd.f32 %v732_v10, %v341_v56  ;;  %v357_v1 = vadd.f32 %v732_v10, %v342_v57  ;;  %v358_v23 = vadd.f32 %v732_v10, %v343_v62  ;;  %v359_v2 = vadd.f32 %v732_v10, %v344_v63 }
  0x38   :  { %v370_v3 = vcombine.low %v356_v0, %v357_v1  ;;  %v371_v4 = vcombine.low %v358_v23, %v359_v2 }
  0x3a   :  { %v377_v6 = vpack.c.bf16 %v371_v4, %v370_v3 }
  0x3c   :  { %529 = vmatmul.mubr.msk.bf16.vlgmr.msra.gmra.mrb[0].mxu0 %vm393_vm0, %v377_v6 }
 0x10f   :  { %v530_v9 = vpop.f32.mrb[0].mxu0 }
 0x110   :  { %v443_v12 = vadd.f32 %v530_v9, %v519_v7  ;;  %v434_v13 = vpop.f32.mrb[1].mxu0 }
 0x111   :  { %v435_v24 = vadd.f32 %v519_v7, %v434_v13  ;;  %v531_v21 = vpop.f32.mrb[2].mxu0 }
 0x112   :  { %v451_v22 = vmax.f32 %v443_v12, 0.0  ;;  %v446_v31 = vadd.f32 %v531_v21, %v519_v7  ;;  %v437_v25 = vpop.f32.mrb[3].mxu0 }
 0x113   :  { %v449_v33 = vmax.f32 %v435_v24, 0.0  ;;  %v438_v10 = vadd.f32 %v519_v7, %v437_v25 }
 0x114   :  { %v459_v53 = vcombine.high %v451_v22, %v451_v22  ;;  %470 = vst.msk [vmem:[%s883_s5 + $0x10] sm:$0xf] %vm465_vm1, %v451_v22  ;;  %v452_v5 = vmax.f32 %v446_v31, 0.0 }
 0x115   :  { %v457_v8 = vcombine.high %v449_v33, %v449_v33  ;;  %466 = vst.msk [vmem:[%s883_s5] sm:$0xf] %vm465_vm1, %v449_v33  ;;  %v450_v27 = vmax.f32 %v438_v10, 0.0 }
 0x116   :  { %471 = vst.msk [vmem:[%s883_s5 + $0x14] sm:$0xf] %vm465_vm1, %v459_v53  ;;  %v460_v16 = vcombine.high %v452_v5, %v452_v5  ;;  %472 = vst.msk [vmem:[%s883_s5 + $0x18] sm:$0xf] %vm465_vm1, %v452_v5 }
 0x117   :  { %467 = vst.msk [vmem:[%s883_s5 + $0x4] sm:$0xf] %vm465_vm1, %v457_v8  ;;  %v458_v29 = vcombine.high %v450_v27, %v450_v27  ;;  %468 = vst.msk [vmem:[%s883_s5 + $0x8] sm:$0xf] %vm465_vm1, %v450_v27 }
 0x118   :  { %473 = vst.msk [vmem:[%s883_s5 + $0x1c] sm:$0xf] %vm465_vm1, %v460_v16 }
 0x119   :  { %469 = vst.msk [vmem:[%s883_s5 + $0xc] sm:$0xf] %vm465_vm1, %v458_v29 }

// kernel: _lambda_.29
= control target key start
LH: loop header
LB: loop body
LE: loop exit
PB: predicated region body
PF: predicated region fallthrough
CT: control target
= control target key end

     0   :  { %s851_s24 = smov 0   ;;  %s968_s0 = inlined_call_operand.vmem [shape: f32[2,4,4,32], index: 0, kind: input, shape index: {}]   ;;  %s969_s1 = inlined_call_operand.vmem [shape: bf16[16,16], index: 1, kind: input, shape index: {}]   ;;  %s970_s2 = inlined_call_operand.vmem [shape: f32[1,16], index: 2, kind: input, shape index: {}, may-alias: {2,6}]   ;;  %s971_s3 = inlined_call_operand.vmem [shape: f32[3,3,16], index: 3, kind: input, shape index: {}]   ;;  %s972_s4 = inlined_call_operand.vmem [shape: f32[1,1,16], index: 4, kind: input, shape index: {}]   ;;  %s973_s5 = inlined_call_operand.vmem [shape: bf16[16,16], index: 5, kind: input, shape index: {}]   ;;  %s974_s6 = inlined_call_operand.vmem [shape: f32[1,16], index: 6, kind: input, shape index: {}, may-alias: {2,6}]   ;;  %s975_s7 = inlined_call_operand.vmem [shape: f32[2,4,4,32], index: 7, kind: output, shape index: {}]  }
   0x1 LB: > { %s747_s25 = sadd.s32 4294967295, %s805_s24   ;;  %p751_p0 = scmp.ge.s32.totalorder %s805_s24, 1  ;;  %s805_s24 = sphi %s851_s24, %s17_s24  }
   0x2   : > { %p237_p1 = scmp.lt.s32.totalorder %s805_s24, 3 }
   0x4   : > { %p238_p2 = pnand %p751_p0, %p237_p1 }
   0x5   : > { %p269_p3 = scmp.lt.s32.totalorder (!%p238_p2), %s747_s25, 1  ;;  %v797_v0 = vld [vmem:[%s969_s1] sm:$0xff] (!%p238_p2)   ;;  %v807_v1 = vmov (!%p238_p2), 0.0   ;;  %vm808_vm0 = vmmov (!%p238_p2), 0   ;;  %s809_s9 = smov (!%p238_p2), 112   ;;  %vm311_vm1 = vcmask (!%p238_p2), 130048   ;;  %v386_v11 = vlaneseq (!%p238_p2) }
   0x6   : > { %241 = sbr.rel (%p238_p2) target bundleno = 732 (0x2dc), region = 48  ;;  %771 = vmatprep.subr.bf16.mxu0 (!%p238_p2), %v807_v1  ;;  %777 = vmatprep.subr.bf16.mxu1 (!%p238_p2), %v807_v1  ;;  %vm364_vm2 = vcmask (!%p238_p2), 128000   ;;  %v798_v10 = vld [vmem:[%s973_s5] sm:$0xff] (!%p238_p2)   ;;  %v385_v13 = vld [vmem:[%s971_s3 + $0x8] sm:$0x7] (!%p238_p2)  ;;  %vm372_vm3 = vcmask (!%p238_p2), 125952  }
   0x7   : > { %772 = vmatpush3.bf16.msra.mxu0 (!%p238_p2), %v797_v0  ;;  %773 = vmatprep.mubr.msk.bf16.mxu0 (!%p238_p2), %vm808_vm0, %v807_v1  ;;  %365 = vst.msk [vmem:[#allocation2] sm:$0x3f] (!%p238_p2), %vm364_vm2, %v807_v1  ;;  %366 = vst.msk [vmem:[#allocation2 + $0x8] sm:$0x3f] (!%p238_p2), %vm364_vm2, %v807_v1  ;;  %v387_v12 = vshrl.u32 (!%p238_p2), %v386_v11, 7  ;;  %s810_s26 = smov (!%p238_p2), 16  }
   0x8   : > { %779 = vmatprep.mubr.msk.bf16.mxu1 (!%p238_p2), %vm808_vm0, %v807_v1  ;;  %367 = vst.msk [vmem:[#allocation2 + $0x10] sm:$0x3f] (!%p238_p2), %vm364_vm2, %v807_v1  ;;  %370 = vst.msk [vmem:[#allocation2 + $0x28] sm:$0x3f] (!%p238_p2), %vm364_vm2, %v807_v1  ;;  %778 = vmatpush3.bf16.msra.mxu1 (!%p238_p2), %v798_v10  ;;  %v756_v15 = vld [vmem:[%s970_s2] ss:$0 sm:$0xff] (!%p238_p2) }
   0x9   : > { %368 = vst.msk [vmem:[#allocation2 + $0x18] sm:$0x3f] (!%p238_p2), %vm364_vm2, %v807_v1  ;;  %369 = vst.msk [vmem:[#allocation2 + $0x20] sm:$0x3f] (!%p238_p2), %vm364_vm2, %v807_v1  ;;  %v396_v14 = vsub.s32 (!%p238_p2), 1, %v387_v12  ;;  %v388_v23 = vsub.s32 (!%p238_p2), 0, %v387_v12 }
   0xa   : > { %v383_v21 = vld [vmem:[%s971_s3] sm:$0x7] (!%p238_p2)  ;;  %v404_v37 = vsub.s32 (!%p238_p2), 2, %v387_v12  ;;  %v384_v39 = vld [vmem:[%s971_s3 + $0x4] sm:$0x7] (!%p238_p2)  ;;  %vm687_vm4 = vcmask (!%p238_p2), 257024  }
   0xb   : > { %v892_v16 = vrot.slane (!%p238_p2), %v385_v13, %v396_v14  ;;  %v397_v29 = vrot.slane (!%p238_p2), %v383_v21, %v396_v14  ;;  %v437_v30 = vrot.slane (!%p238_p2), %v385_v13, %v388_v23  ;;  %v389_v38 = vrot.slane (!%p238_p2), %v383_v21, %v388_v23 }
   0xc   : > { %v905_v40 = vrot.slane (!%p238_p2), %v385_v13, %v404_v37  ;;  %v405_v44 = vrot.slane (!%p238_p2), %v383_v21, %v404_v37  ;;  %v413_v47 = vrot.slane (!%p238_p2), %v384_v39, %v388_v23  ;;  %v421_v48 = vrot.slane (!%p238_p2), %v384_v39, %v396_v14 }
   0xd   : > { %s977_s25 = smov (!%p269_p3, %s747_s25), 1  ;;  %v429_v49 = vrot.slane %v384_v39, %v404_v37 }
   0xe   : > { %s765_s28 = sshll.u32 %s977_s25, 4  ;;  %v377_v28 = vld [vmem:[#allocation2] sm:$0x3f] }
   0xf   : > { %s273_s8 = scalar_lea.vmem %s968_s0, %s765_s28  ;;  %v382_v17 = vld [vmem:[#allocation2 + $0x28] sm:$0x3f]  ;;  %v398_v33 = vmul.f32 %v397_v29, %v377_v28  ;;  %v390_v41 = vmul.f32 %v389_v38, %v377_v28  ;;  %v406_v52 = vmul.f32 %v405_v44, %v377_v28  ;;  %s278_s30 = scalar_lea.vmem %s975_s7, %s765_s28 }
  0x10   : > { %v870_v2 = vld [vmem:[%s273_s8] sm:$0xf]  ;;  %v872_v3 = vld [vmem:[%s273_s8 + $0x4] sm:$0xf]  ;;  %v874_v4 = vld [vmem:[%s273_s8 + $0x8] sm:$0xf]  ;;  %v449_v24 = vmul.f32 %v892_v16, %v382_v17  ;;  %v441_v34 = vmul.f32 %v437_v30, %v382_v17  ;;  %v910_v45 = vmul.f32 %v905_v40, %v382_v17 }
  0x11   : > { %v876_v5 = vld [vmem:[%s273_s8 + $0xc] sm:$0xf]  ;;  %v288_v6 = vcombine.low %v870_v2, %v872_v3  ;;  %v462_v42 = vrot.slane %v398_v33, 1 }
  0x12   : > { %v289_v7 = vcombine.low %v874_v4, %v876_v5  ;;  %v513_v35 = vrot.slane %v449_v24, 1  ;;  %v577_v58 = vrot.slane %v910_v45, 2  ;;  %v760_v45 = vld [vmem:[%s974_s6] ss:$0 sm:$0xff] }
  0x13   : > { %v914_v53 = vadd.f32 %v462_v42, %v390_v41 }
  0x14   : > { %v292_v8 = vpack.c.bf16 %v289_v7, %v288_v6  ;;  %v907_v43 = vadd.f32 %v513_v35, %v441_v34 }
  0x16   : > { %303 = vrot.lane.b32.xlu0 %v292_v8, %s809_s9  ;;  %v545_v54 = vrot.slane %v907_v43, 7 }
  0x88   : > { %v304_v9 = vpop.permute.xlu0 %303 }
  0x89   : > { %774 = vmatmul.mubr.msk.bf16.vlgmr.msra.gmra.mrb[0].mxu0 %vm311_vm1, %v304_v9 }
 0x15c   : > { %v349_v18 = vpop.f32.mrb[0].mxu0 }
 0x15d   : > { %v350_v19 = vadd.f32 %v756_v15, %v349_v18  ;;  %v775_v20 = vpop.f32.mrb[1].mxu0 }
 0x15e   : > { %v352_v22 = vpop.f32.mrb[2].mxu0 }
 0x15f   : > { %v356_v25 = vmax.f32 %v350_v19, 0.0  ;;  %v353_v26 = vadd.f32 %v756_v15, %v352_v22  ;;  %v776_v27 = vpop.f32.mrb[3].mxu0 }
 0x161   : > { %v360_v31 = vcombine.high %v356_v25, %v356_v25  ;;  %373 = vst.msk [vmem:[#allocation2 + $0x9] sm:$0xf] %vm372_vm3, %v356_v25  ;;  %v357_v32 = vmax.f32 %v353_v26, 0.0 }
 0x163   : > { %374 = vst.msk [vmem:[#allocation2 + $0x11] sm:$0xf] %vm372_vm3, %v360_v31  ;;  %v361_v36 = vcombine.high %v357_v32, %v357_v32  ;;  %375 = vst.msk [vmem:[#allocation2 + $0x19] sm:$0xf] %vm372_vm3, %v357_v32 }
 0x165   : > { %376 = vst.msk [vmem:[#allocation2 + $0x21] sm:$0xf] %vm372_vm3, %v361_v36 }
 0x168   : > { %v378_v46 = vld [vmem:[#allocation2 + $0x8] sm:$0x3f] }
 0x169   : > { %v917_v55 = vmul.f32 %v389_v38, %v378_v46  ;;  %v919_v56 = vmul.f32 %v397_v29, %v378_v46  ;;  %v407_v57 = vmul.f32 %v405_v44, %v378_v46  ;;  %v414_v61 = vmul.f32 %v413_v47, %v378_v46 }
 0x16a   : > { %v379_v50 = vld [vmem:[#allocation2 + $0x10] sm:$0x3f]  ;;  %v912_v51 = vld [vmem:[#allocation2 + $0x18] sm:$0x3f]  ;;  %v422_v62 = vmul.f32 %v421_v48, %v378_v46  ;;  %v430_v63 = vmul.f32 %v429_v49, %v378_v46 }
 0x16b   : > { %v922_v60 = vmul.f32 %v389_v38, %v379_v50  ;;  %v393_v0 = vmul.f32 %v389_v38, %v912_v51  ;;  %v400_v1 = vmul.f32 %v397_v29, %v379_v50  ;;  %v401_v6 = vmul.f32 %v397_v29, %v912_v51 }
 0x16c   : > { %v381_v59 = vld [vmem:[#allocation2 + $0x20] sm:$0x3f]  ;;  %v408_v7 = vmul.f32 %v405_v44, %v379_v50  ;;  %v409_v8 = vmul.f32 %v405_v44, %v912_v51  ;;  %v415_v9 = vmul.f32 %v413_v47, %v379_v50  ;;  %v416_v10 = vmul.f32 %v413_v47, %v912_v51 }
 0x16d   : > { %v417_v11 = vmul.f32 %v413_v47, %v381_v59  ;;  %v423_v12 = vmul.f32 %v421_v48, %v379_v50  ;;  %v424_v13 = vmul.f32 %v421_v48, %v912_v51  ;;  %v425_v14 = vmul.f32 %v421_v48, %v381_v59 }
 0x16e   : > { %v431_v15 = vmul.f32 %v429_v49, %v379_v50  ;;  %v432_v17 = vmul.f32 %v429_v49, %v912_v51  ;;  %v433_v18 = vmul.f32 %v429_v49, %v381_v59  ;;  %v438_v19 = vmul.f32 %v437_v30, %v379_v50 }
 0x16f   : > { %v439_v20 = vmul.f32 %v437_v30, %v912_v51  ;;  %v446_v21 = vmul.f32 %v892_v16, %v379_v50  ;;  %v447_v22 = vmul.f32 %v892_v16, %v912_v51  ;;  %v448_v23 = vmul.f32 %v892_v16, %v381_v59 }
 0x170   : > { %v478_v24 = vrot.slane %v414_v61, 6  ;;  %v465_v25 = vrot.slane %v401_v6, 1  ;;  %v479_v26 = vrot.slane %v415_v9, 6  ;;  %v480_v27 = vrot.slane %v416_v10, 6 }
 0x171   : > { %v481_v28 = vrot.slane %v417_v11, 6  ;;  %v440_v29 = vmul.f32 %v437_v30, %v381_v59  ;;  %v454_v31 = vmul.f32 %v905_v40, %v379_v50  ;;  %v463_v32 = vrot.slane %v919_v56, 1 }
 0x172   : > { %v494_v33 = vrot.slane %v430_v63, 1  ;;  %v464_v34 = vrot.slane %v400_v1, 1  ;;  %v486_v35 = vadd.f32 %v478_v24, %v406_v52  ;;  %v495_v37 = vrot.slane %v431_v15, 1 }
 0x173   : > { %v489_v36 = vadd.f32 %v481_v28, %v409_v8  ;;  %v487_v38 = vadd.f32 %v479_v26, %v407_v57  ;;  %v496_v39 = vrot.slane %v432_v17, 1  ;;  %v497_v41 = vrot.slane %v433_v18, 1 }
 0x174   : > { %v510_v42 = vrot.slane %v446_v21, 1  ;;  %v473_v16 = vadd.f32 %v465_v25, %v393_v0  ;;  %v488_v43 = vadd.f32 %v480_v27, %v408_v7  ;;  %v511_v44 = vrot.slane %v447_v22, 1 }
 0x175   : > { %v512_v46 = vrot.slane %v448_v23, 1  ;;  %v502_v47 = vadd.f32 %v494_v33, %v422_v62  ;;  %v503_v48 = vadd.f32 %v495_v37, %v423_v12  ;;  %v505_v30 = vadd.f32 %v497_v41, %v425_v14 }
 0x176   : > { %v518_v49 = vadd.f32 %v510_v42, %v438_v19  ;;  %v519_v50 = vadd.f32 %v511_v44, %v439_v20  ;;  %v526_v56 = vrot.slane %v486_v35, 2  ;;  %v529_v63 = vrot.slane %v489_v36, 2 }
 0x177   : > { %v520_v61 = vadd.f32 %v512_v46, %v440_v29  ;;  %v504_v1 = vadd.f32 %v496_v39, %v424_v13  ;;  %v527_v52 = vrot.slane %v487_v38, 2  ;;  %v553_v8 = vadd.f32 %v545_v54, %v505_v30 }
 0x178   : > { %v542_v6 = vrot.slane %v518_v49, 7  ;;  %v528_v57 = vrot.slane %v488_v43, 2  ;;  %v537_v9 = vadd.f32 %v529_v63, %v473_v16  ;;  %v543_v10 = vrot.slane %v519_v50, 7 }
 0x179   : > { %v544_v11 = vrot.slane %v520_v61, 7  ;;  %v455_v0 = vmul.f32 %v905_v40, %v912_v51  ;;  %v456_v62 = vmul.f32 %v905_v40, %v381_v59  ;;  %v561_v12 = vrot.slane %v553_v8, 1 }
 0x17a   : > { %v550_v7 = vadd.f32 %v542_v6, %v502_v47  ;;  %v471_v14 = vadd.f32 %v463_v32, %v917_v55  ;;  %v472_v15 = vadd.f32 %v464_v34, %v922_v60  ;;  %v551_v17 = vadd.f32 %v543_v10, %v503_v48  ;;  %v759_v60 = vld [vmem:[%s972_s4] ss:$0 sm:$0xff] }
 0x17b   : > { %v552_v13 = vadd.f32 %v544_v11, %v504_v1  ;;  %v534_v18 = vadd.f32 %v526_v56, %v914_v53  ;;  %v569_v19 = vadd.f32 %v561_v12, %v537_v9  ;;  %v574_v51 = vrot.slane %v454_v31, 2 }
 0x17c   : > { %v558_v54 = vrot.slane %v550_v7, 1  ;;  %v535_v20 = vadd.f32 %v527_v52, %v471_v14  ;;  %v536_v21 = vadd.f32 %v528_v57, %v472_v15  ;;  %v559_v22 = vrot.slane %v551_v17, 1 }
 0x17d   : > { %v560_v23 = vrot.slane %v552_v13, 1  ;;  %v575_v25 = vrot.slane %v455_v0, 2  ;;  %v576_v26 = vrot.slane %v456_v62, 2  ;;  %v585_v55 = vadd.f32 %v577_v58, %v569_v19 }
 0x17e   : > { %v566_v24 = vadd.f32 %v558_v54, %v534_v18  ;;  %v567_v40 = vadd.f32 %v559_v22, %v535_v20 }
 0x17f   : > { %v568_v59 = vadd.f32 %v560_v23, %v536_v21  ;;  %v596_v34 = vadd.f32 %v759_v60, %v585_v55 }
 0x180   : > { %v582_v53 = vadd.f32 %v574_v51, %v566_v24  ;;  %v583_v27 = vadd.f32 %v575_v25, %v567_v40 }
 0x181   : > { %v584_v28 = vadd.f32 %v576_v26, %v568_v59 }
 0x182   : > { %v593_v29 = vadd.f32 %v759_v60, %v582_v53  ;;  %v594_v32 = vadd.f32 %v759_v60, %v583_v27 }
 0x183   : > { %v595_v33 = vadd.f32 %v759_v60, %v584_v28 }
 0x184   : > { %v601_v35 = vcombine.low %v593_v29, %v594_v32 }
 0x185   : > { %v602_v31 = vcombine.low %v595_v33, %v596_v34 }
 0x187   : > { %v605_v36 = vpack.c.bf16 %v602_v31, %v601_v35 }
 0x189   : > { %780 = vmatmul.mubr.msk.bf16.vlgmr.msra.gmra.mrb[0].mxu1 %vm311_vm1, %v605_v36 }
 0x25c   : > { %v658_v58 = vpop.f32.mrb[0].mxu1 }
 0x25d   : > { %v659_v37 = vadd.f32 %v760_v45, %v658_v58  ;;  %v781_v38 = vpop.f32.mrb[1].mxu1 }
 0x25e   : > { %v661_v39 = vpop.f32.mrb[2].mxu1 }
 0x25f   : > { %v665_v41 = vmax.f32 %v659_v37, 0.0  ;;  %v662_v42 = vadd.f32 %v760_v45, %v661_v39  ;;  %v782_v16 = vpop.f32.mrb[3].mxu1 }
 0x261   : > { %v666_v43 = vmax.f32 %v662_v42, 0.0  ;;  %671 = vrot.lane.b32.xlu0 %v665_v41, %s810_s26  ;;  %v669_v44 = vcombine.high %v665_v41, %v665_v41 }
 0x263   : > { %v670_v46 = vcombine.high %v666_v43, %v666_v43  ;;  %673 = vrot.lane.b32.xlu1 %v669_v44, %s810_s26 }
 0x265   : > { %677 = vrot.lane.b32.xlu0 %v670_v46, %s810_s26 }
 0x267   : > { %675 = vrot.lane.b32.xlu1 %v666_v43, %s810_s26 }
 0x2d3   : > { %v672_v47 = vpop.permute.xlu0 %671 }
 0x2d4   : > { %v683_v48 = vsel %vm311_vm1, %v870_v2, %v672_v47 }
 0x2d5   : > { %688 = vst.msk [vmem:[%s278_s30] sm:$0xf] %vm687_vm4, %v683_v48  ;;  %v674_v30 = vpop.permute.xlu1 %673 }
 0x2d6   : > { %v684_v49 = vsel %vm311_vm1, %v872_v3, %v674_v30 }
 0x2d7   : > { %689 = vst.msk [vmem:[%s278_s30 + $0x4] sm:$0xf] %vm687_vm4, %v684_v49  ;;  %v678_v50 = vpop.permute.xlu0 %677 }
 0x2d8   : > { %v686_v61 = vsel %vm311_vm1, %v876_v5, %v678_v50 }
 0x2d9   : > { %691 = vst.msk [vmem:[%s278_s30 + $0xc] sm:$0xf] %vm687_vm4, %v686_v61  ;;  %v676_v56 = vpop.permute.xlu1 %675 }
 0x2da   : > { %v685_v63 = vsel %vm311_vm1, %v874_v4, %v676_v56 }
 0x2db   : > { %690 = vst.msk [vmem:[%s278_s30 + $0x8] sm:$0xf] %vm687_vm4, %v685_v63 }
 0x2dc PF: > { %s17_s24 = sadd.s32 1, %s805_s24  }
 0x2dd   : > { %p14_p4 = scmp.ge.s32.totalorder %s17_s24, 4  }
 0x2df   :  { %16 = sbr.rel (!%p14_p4) target bundleno = 1 (0x1), region = 79 }

// kernel: _lambda_.33
= control target key start
LH: loop header
LB: loop body
LE: loop exit
PB: predicated region body
PF: predicated region fallthrough
CT: control target
= control target key end

     0   :  { %s374_s12 = smov 0   ;;  %s400_s0 = inlined_call_operand.vmem [shape: f32[32,32], index: 0, kind: input, shape index: {}]   ;;  %s401_s1 = inlined_call_operand.vmem [shape: bf16[32,32], index: 1, kind: input, shape index: {}]   ;;  %s402_s2 = inlined_call_operand.vmem [shape: f32[1,32], index: 2, kind: input, shape index: {}]   ;;  %s403_s3 = inlined_call_operand.vmem [shape: f32[32,32], index: 3, kind: output, shape index: {}]  }
   0x1 LB: > { %s306_s13 = sadd.s32 4294967295, %s350_s12   ;;  %p310_p0 = scmp.ge.s32.totalorder %s350_s12, 1  ;;  %s350_s12 = sphi %s374_s12, %s13_s12  }
   0x2   : > { %p138_p1 = scmp.lt.s32.totalorder %s350_s12, 3 }
   0x4   : > { %p139_p2 = pnand %p310_p0, %p138_p1 }
   0x5   : > { %v342_v0 = vld [vmem:[%s401_s1] sm:$0xff] (!%p139_p2)   ;;  %v352_v1 = vmov (!%p139_p2), 0.0   ;;  %v343_v2 = vld [vmem:[%s401_s1 + $0x8] sm:$0xff] (!%p139_p2)   ;;  %vm353_vm0 = vmmov (!%p139_p2), 0   ;;  %s311_s18 = sshll.u32 (!%p139_p2), %s306_s13, 1  ;;  %vm201_vm1 = vcmask (!%p139_p2), 261120  }
   0x6   : > { %142 = sbr.rel (%p139_p2) target bundleno = 238 (0xee), region = 32  ;;  %324 = vmatprep.subr.bf16.mxu0 (!%p139_p2), %v352_v1  ;;  %328 = vmatprep.mubr.msk.bf16.mxu0 (!%p139_p2), %vm353_vm0, %v352_v1  ;;  %p163_p3 = scmp.lt.s32.totalorder (!%p139_p2), %s311_s18, 3  ;;  %v315_v6 = vld [vmem:[%s402_s2] ss:$0 sm:$0xff] (!%p139_p2) }
   0x7   : > { %325 = vmatpush3.bf16.msra.mxu0 (!%p139_p2), %v342_v0 }
   0x8   : > { %326 = vmatprep.subr.bf16.mxu0 (!%p139_p2), %v352_v1 }
   0xb   : > { %327 = vmatpush3.bf16.msra.mxu0 (!%p139_p2), %v343_v2 }
   0xd   : > { %s405_s18 = smov (!%p163_p3, %s311_s18), 3 }
   0xe   : > { %s312_s19 = sshll.u32 %s405_s18, 3 }
   0xf   : > { %s166_s22 = scalar_lea.vmem %s400_s0, %s312_s19  ;;  %s172_s27 = scalar_lea.vmem %s403_s3, %s312_s19 }
  0x10   : > { %v175_v3 = vld [vmem:[%s166_s22] sm:$0xff]  ;;  %v176_v4 = vld [vmem:[%s166_s22 + $0x8] sm:$0xff] }
  0x11   : > { %v177_v5 = vpack.c.bf16 %v176_v4, %v175_v3 }
  0x13   : > { %329 = vmatmul.mubr.msk.bf16.vlgmr.msra.gmra.mrb[0].mxu0 %vm201_vm1, %v177_v5 }
  0xe6   : > { %v239_v7 = vpop.f32.mrb[0].mxu0 }
  0xe7   : > { %v240_v8 = vadd.f32 %v315_v6, %v239_v7  ;;  %v330_v9 = vpop.f32.mrb[1].mxu0 }
  0xe8   : > { %v242_v10 = vpop.f32.mrb[2].mxu0 }
  0xe9   : > { %v246_v11 = vmax.f32 %v240_v8, 0.0  ;;  %v243_v12 = vadd.f32 %v315_v6, %v242_v10  ;;  %v331_v13 = vpop.f32.mrb[3].mxu0 }
  0xeb   : > { %248 = vst.msk [vmem:[%s172_s27] sm:$0xff] %vm201_vm1, %v246_v11  ;;  %v247_v14 = vmax.f32 %v243_v12, 0.0 }
  0xed   : > { %249 = vst.msk [vmem:[%s172_s27 + $0x8] sm:$0xff] %vm201_vm1, %v247_v14 }
  0xee PF: > { %s13_s12 = sadd.s32 1, %s350_s12  }
  0xef   : > { %p10_p4 = scmp.ge.s32.totalorder %s13_s12, 4  }
  0xf1   :  { %12 = sbr.rel (!%p10_p4) target bundleno = 1 (0x1), region = 62 }

// kernel: _lambda_.32
= control target key start
LH: loop header
LB: loop body
LE: loop exit
PB: predicated region body
PF: predicated region fallthrough
CT: control target
= control target key end

     0   :  { %v33_v0 = vlaneseq  ;;  %v379_v1 = vmov 0.0   ;;  %vm380_vm0 = vmmov 0   ;;  %v381_v5 = vmov 1983009808   ;;  %s533_s3 = inlined_call_operand.vmem [shape: bf16[32,32], index: 3, kind: input, shape index: {}]   ;;  %s534_s1 = inlined_call_operand.vmem [shape: f32[3,3,32], index: 1, kind: input, shape index: {}]   ;;  %s535_s0 = inlined_call_operand.vmem [shape: f32[6,4,3,32], index: 0, kind: input, shape index: {}]   ;;  %s536_s2 = inlined_call_operand.vmem [shape: f32[1,1,32], index: 2, kind: input, shape index: {}]   ;;  %s537_s4 = inlined_call_operand.vmem [shape: f32[1,32], index: 4, kind: input, shape index: {}]   ;;  %s538_s5 = inlined_call_operand.vmem [shape: f32[4,2,32], index: 5, kind: output, shape index: {}]  }
   0x1   :  { %366 = vmatprep.subr.bf16.mxu0 %v379_v1  ;;  %v377_v2 = vld [vmem:[%s533_s3] sm:$0xff]   ;;  %370 = vmatprep.mubr.msk.bf16.mxu0 %vm380_vm0, %v379_v1  ;;  %v378_v4 = vld [vmem:[%s533_s3 + $0x8] sm:$0xff]   ;;  %v420_v6 = vunpack.c.l.s4 %v381_v5  ;;  %v338_v15 = vld [vmem:[%s535_s0 + $0x10] sm:$0x7]  ;;  %vm262_vm1 = vcmask 261120   ;;  %vm329_vm2 = vcmask 254976  }
   0x2   :  { %v415_v3 = vshrl.u32 %v33_v0, 7  ;;  %367 = vmatpush3.bf16.msra.mxu0 %v377_v2  ;;  %v22_v7 = vld [vmem:[%s534_s1 + $0x4] sm:$0x7]  ;;  %v21_v8 = vld [vmem:[%s534_s1] sm:$0x7] }
   0x3   :  { %368 = vmatprep.subr.bf16.mxu0 %v379_v1  ;;  %v431_v9 = vld [vmem:[%s534_s1 + $0x8] sm:$0x7]  ;;  %v24_v12 = vld [vmem:[%s535_s0] sm:$0x7]  ;;  %v25_v13 = vld [vmem:[%s535_s0 + $0x4] sm:$0x7]  ;;  %v224_v17 = vunpack.c.0.s8 %v420_v6 }
   0x4   :  { %v35_v10 = vsub.s32 0, %v415_v3  ;;  %v43_v11 = vsub.s32 1, %v415_v3  ;;  %v26_v14 = vld [vmem:[%s535_s0 + $0x8] sm:$0x7]  ;;  %v51_v16 = vsub.s32 2, %v415_v3 }
   0x5   :  { %v339_v18 = vld [vmem:[%s535_s0 + $0x14] sm:$0x7]  ;;  %v340_v19 = vld [vmem:[%s535_s0 + $0x18] sm:$0x7]  ;;  %v341_v20 = vld [vmem:[%s535_s0 + $0x1c] sm:$0x7] }
   0x6   :  { %369 = vmatpush3.bf16.msra.mxu0 %v378_v4  ;;  %v36_v21 = vrot.slane %v21_v8, %v35_v10  ;;  %v44_v22 = vrot.slane %v21_v8, %v43_v11  ;;  %v70_v23 = vrot.slane %v22_v7, %v35_v10  ;;  %v78_v24 = vrot.slane %v22_v7, %v43_v11  ;;  %v27_v25 = vld [vmem:[%s535_s0 + $0xc] sm:$0x7]  ;;  %v342_v27 = vld [vmem:[%s535_s0 + $0x20] sm:$0x7]  ;;  %v343_v28 = vld [vmem:[%s535_s0 + $0x24] sm:$0x7] }
   0x7   :  { %v52_v26 = vrot.slane %v21_v8, %v51_v16  ;;  %v86_v29 = vrot.slane %v22_v7, %v51_v16  ;;  %v104_v30 = vrot.slane %v431_v9, %v35_v10  ;;  %v112_v31 = vrot.slane %v431_v9, %v43_v11  ;;  %v344_v36 = vld [vmem:[%s535_s0 + $0x28] sm:$0x7]  ;;  %v345_v37 = vld [vmem:[%s535_s0 + $0x2c] sm:$0x7]  ;;  %v346_v38 = vld [vmem:[%s535_s0 + $0x30] sm:$0x7] }
   0x8   :  { %v37_v32 = vmul.f32 %v36_v21, %v24_v12  ;;  %v38_v33 = vmul.f32 %v36_v21, %v25_v13  ;;  %v39_v34 = vmul.f32 %v36_v21, %v26_v14  ;;  %v40_v35 = vmul.f32 %v36_v21, %v27_v25  ;;  %v347_v43 = vld [vmem:[%s535_s0 + $0x34] sm:$0x7]  ;;  %v348_v44 = vld [vmem:[%s535_s0 + $0x38] sm:$0x7]  ;;  %v349_v45 = vld [vmem:[%s535_s0 + $0x3c] sm:$0x7] }
   0x9   :  { %v45_v39 = vmul.f32 %v338_v15, %v44_v22  ;;  %v46_v40 = vmul.f32 %v339_v18, %v44_v22  ;;  %v47_v41 = vmul.f32 %v340_v19, %v44_v22  ;;  %v48_v42 = vmul.f32 %v341_v20, %v44_v22  ;;  %v350_v50 = vld [vmem:[%s535_s0 + $0x40] sm:$0x7]  ;;  %v351_v51 = vld [vmem:[%s535_s0 + $0x44] sm:$0x7]  ;;  %v352_v56 = vld [vmem:[%s535_s0 + $0x48] sm:$0x7] }
   0xa   :  { %v53_v46 = vmul.f32 %v52_v26, %v24_v12  ;;  %v54_v47 = vmul.f32 %v52_v26, %v25_v13  ;;  %v55_v48 = vmul.f32 %v52_v26, %v26_v14  ;;  %v56_v49 = vmul.f32 %v52_v26, %v27_v25  ;;  %v353_v57 = vld [vmem:[%s535_s0 + $0x4c] sm:$0x7]  ;;  %v354_v58 = vld [vmem:[%s535_s0 + $0x50] sm:$0x7]  ;;  %v355_v63 = vld [vmem:[%s535_s0 + $0x54] sm:$0x7] }
   0xb   :  { %v71_v52 = vmul.f32 %v342_v27, %v70_v23  ;;  %v72_v53 = vmul.f32 %v343_v28, %v70_v23  ;;  %v73_v54 = vmul.f32 %v344_v36, %v70_v23  ;;  %v74_v55 = vmul.f32 %v345_v37, %v70_v23  ;;  %v356_v0 = vld [vmem:[%s535_s0 + $0x58] sm:$0x7]  ;;  %v357_v1 = vld [vmem:[%s535_s0 + $0x5c] sm:$0x7] }
   0xc   :  { %v79_v59 = vmul.f32 %v346_v38, %v78_v24  ;;  %v80_v60 = vmul.f32 %v347_v43, %v78_v24  ;;  %v81_v61 = vmul.f32 %v348_v44, %v78_v24  ;;  %v82_v62 = vmul.f32 %v349_v45, %v78_v24 }
   0xd   :  { %v87_v2 = vmul.f32 %v342_v27, %v86_v29  ;;  %v88_v4 = vmul.f32 %v343_v28, %v86_v29  ;;  %v89_v5 = vmul.f32 %v344_v36, %v86_v29  ;;  %v90_v7 = vmul.f32 %v345_v37, %v86_v29 }
   0xe   :  { %v105_v8 = vmul.f32 %v350_v50, %v104_v30  ;;  %v106_v10 = vmul.f32 %v351_v51, %v104_v30  ;;  %v107_v11 = vmul.f32 %v352_v56, %v104_v30  ;;  %v108_v12 = vmul.f32 %v353_v57, %v104_v30 }
   0xf   :  { %v113_v13 = vmul.f32 %v354_v58, %v112_v31  ;;  %v114_v14 = vmul.f32 %v355_v63, %v112_v31  ;;  %v115_v15 = vmul.f32 %v356_v0, %v112_v31  ;;  %v116_v18 = vmul.f32 %v357_v1, %v112_v31 }
  0x10   :  { %v120_v19 = vrot.slane %v431_v9, %v51_v16  ;;  %v125_v20 = vadd.f32 %v45_v39, %v37_v32  ;;  %v126_v21 = vadd.f32 %v46_v40, %v38_v33  ;;  %v127_v22 = vadd.f32 %v47_v41, %v39_v34 }
  0x11   :  { %v128_v23 = vadd.f32 %v48_v42, %v40_v35  ;;  %v133_v24 = vrot.slane %v71_v52, 7  ;;  %v134_v25 = vrot.slane %v72_v53, 7  ;;  %v135_v26 = vrot.slane %v73_v54, 7 }
  0x12   :  { %v121_v27 = vmul.f32 %v350_v50, %v120_v19  ;;  %v122_v28 = vmul.f32 %v351_v51, %v120_v19  ;;  %v123_v29 = vmul.f32 %v352_v56, %v120_v19  ;;  %v124_v36 = vmul.f32 %v353_v57, %v120_v19 }
  0x13   :  { %v136_v37 = vrot.slane %v74_v55, 7  ;;  %v141_v38 = vadd.f32 %v133_v24, %v53_v46  ;;  %v142_v30 = vadd.f32 %v134_v25, %v54_v47  ;;  %v143_v43 = vadd.f32 %v135_v26, %v55_v48 }
  0x14   :  { %v149_v44 = vrot.slane %v87_v2, 1  ;;  %v150_v45 = vrot.slane %v88_v4, 1  ;;  %v151_v31 = vrot.slane %v89_v5, 1  ;;  %v152_v58 = vrot.slane %v90_v7, 1  ;;  %v358_v2 = vld [vmem:[%s536_s2] ss:$0 sm:$0xff] }
  0x15   :  { %v144_v9 = vadd.f32 %v136_v37, %v56_v49  ;;  %v161_v16 = vadd.f32 %v113_v13, %v105_v8  ;;  %v162_v32 = vadd.f32 %v114_v14, %v106_v10  ;;  %v163_v33 = vadd.f32 %v115_v15, %v107_v11 }
  0x16   :  { %v157_v34 = vadd.f32 %v149_v44, %v79_v59  ;;  %v158_v35 = vadd.f32 %v150_v45, %v80_v60  ;;  %v159_v39 = vadd.f32 %v151_v31, %v81_v61  ;;  %v160_v40 = vadd.f32 %v152_v58, %v82_v62 }
  0x17   :  { %v164_v41 = vadd.f32 %v116_v18, %v108_v12  ;;  %v169_v42 = vrot.slane %v141_v38, 1  ;;  %v170_v50 = vrot.slane %v142_v30, 1  ;;  %v171_v51 = vrot.slane %v143_v43, 1 }
  0x18   :  { %v172_v52 = vrot.slane %v144_v9, 1  ;;  %v181_v46 = vadd.f32 %v161_v16, %v157_v34  ;;  %v182_v47 = vadd.f32 %v162_v32, %v158_v35  ;;  %v183_v48 = vadd.f32 %v163_v33, %v159_v39 }
  0x19   :  { %v177_v53 = vadd.f32 %v169_v42, %v125_v20  ;;  %v178_v54 = vadd.f32 %v170_v50, %v126_v21  ;;  %v179_v55 = vadd.f32 %v171_v51, %v127_v22  ;;  %v184_v56 = vadd.f32 %v164_v41, %v160_v40 }
  0x1a   :  { %v180_v49 = vadd.f32 %v172_v52, %v128_v23  ;;  %v193_v57 = vrot.slane %v121_v27, 1  ;;  %v194_v63 = vrot.slane %v122_v28, 1  ;;  %v195_v0 = vrot.slane %v123_v29, 1  ;;  %v359_v23 = vld [vmem:[%s537_s4] ss:$0 sm:$0xff] }
  0x1b   :  { %v185_v59 = vadd.f32 %v181_v46, %v177_v53  ;;  %v186_v60 = vadd.f32 %v182_v47, %v178_v54  ;;  %v187_v61 = vadd.f32 %v183_v48, %v179_v55  ;;  %v196_v62 = vrot.slane %v124_v36, 1 }
  0x1c   :  { %v188_v1 = vadd.f32 %v184_v56, %v180_v49  ;;  %v227_v13 = vsub.s32 %v224_v17, %v415_v3 }
  0x1d   :  { %v201_v4 = vadd.f32 %v193_v57, %v185_v59  ;;  %v202_v5 = vadd.f32 %v194_v63, %v186_v60  ;;  %v203_v7 = vadd.f32 %v195_v0, %v187_v61 }
  0x1e   :  { %v204_v8 = vadd.f32 %v196_v62, %v188_v1 }
  0x1f   :  { %v212_v10 = vadd.f32 %v358_v2, %v201_v4  ;;  %v213_v11 = vadd.f32 %v358_v2, %v202_v5  ;;  %v214_v12 = vadd.f32 %v358_v2, %v203_v7 }
  0x20   :  { %v215_v14 = vadd.f32 %v358_v2, %v204_v8 }
  0x21   :  { %v220_v15 = vcombine.low %v212_v10, %v213_v11 }
  0x22   :  { %v221_v18 = vcombine.low %v214_v12, %v215_v14 }
  0x23   :  { %v228_v19 = vrot.slane %v220_v15, %v227_v13 }
  0x24   :  { %v235_v20 = vrot.slane %v221_v18, %v227_v13 }
  0x26   :  { %v236_v21 = vcombine.low %v228_v19, %v235_v20 }
  0x28   :  { %v238_v22 = vpack.c.bf16 %v236_v21, %v236_v21 }
  0x2a   :  { %371 = vmatmul.mubr.msk.bf16.vlgmr.msra.gmra.mrb[0].mxu0 %vm262_vm1, %v238_v22 }
  0xfd   :  { %v300_v24 = vpop.f32.mrb[0].mxu0 }
  0xfe   :  { %v301_v25 = vadd.f32 %v359_v23, %v300_v24  ;;  %v372_v26 = vpop.f32.mrb[1].mxu0 }
  0xff   :  { %v303_v27 = vpop.f32.mrb[2].mxu0 }
 0x100   :  { %v306_v28 = vmax.f32 %v301_v25, 0.0  ;;  %v373_v6 = vpop.f32.mrb[3].mxu0 }
 0x102   :  { %v308_v3 = vcombine.high %v306_v28, %v306_v28  ;;  %v315_v17 = vrot.slane %v306_v28, %v227_v13 }
 0x104   :  { %v322_v29 = vrot.slane %v308_v3, %v227_v13  ;;  %v323_v36 = vcombine.high %v315_v17, %v315_v17  ;;  %330 = vst.msk [vmem:[%s538_s5] sm:$0x3] %vm329_vm2, %v315_v17 }
 0x106   :  { %v324_v37 = vcombine.high %v322_v29, %v322_v29  ;;  %331 = vst.msk [vmem:[%s538_s5 + $0x2] sm:$0x3] %vm329_vm2, %v323_v36  ;;  %332 = vst.msk [vmem:[%s538_s5 + $0x4] sm:$0x3] %vm329_vm2, %v322_v29 }
 0x108   :  { %333 = vst.msk [vmem:[%s538_s5 + $0x6] sm:$0x3] %vm329_vm2, %v324_v37 }

// kernel: _lambda_.35
= control target key start
LH: loop header
LB: loop body
LE: loop exit
PB: predicated region body
PF: predicated region fallthrough
CT: control target
= control target key end

     0   :  { %s801_s24 = smov 0   ;;  %s875_s0 = inlined_call_operand.vmem [shape: f32[2,2,2,64], index: 0, kind: input, shape index: {}]   ;;  %s876_s1 = inlined_call_operand.vmem [shape: bf16[32,32], index: 1, kind: input, shape index: {}]   ;;  %s877_s2 = inlined_call_operand.vmem [shape: f32[1,32], index: 2, kind: input, shape index: {}, may-alias: {2,6}]   ;;  %s878_s3 = inlined_call_operand.vmem [shape: f32[3,3,32], index: 3, kind: input, shape index: {}]   ;;  %s879_s4 = inlined_call_operand.vmem [shape: f32[1,1,32], index: 4, kind: input, shape index: {}]   ;;  %s880_s5 = inlined_call_operand.vmem [shape: bf16[32,32], index: 5, kind: input, shape index: {}]   ;;  %s881_s6 = inlined_call_operand.vmem [shape: f32[1,32], index: 6, kind: input, shape index: {}, may-alias: {2,6}]   ;;  %s882_s7 = inlined_call_operand.vmem [shape: f32[2,2,2,64], index: 7, kind: output, shape index: {}]  }
   0x1 LB: > { %s687_s25 = sadd.s32 4294967295, %s754_s24   ;;  %p691_p0 = scmp.ge.s32.totalorder %s754_s24, 1  ;;  %s754_s24 = sphi %s801_s24, %s17_s24  }
   0x2   : > { %p237_p1 = scmp.lt.s32.totalorder %s754_s24, 3 }
   0x4   : > { %p238_p2 = pnand %p691_p0, %p237_p1 }
   0x5   : > { %p269_p3 = scmp.lt.s32.totalorder (!%p238_p2), %s687_s25, 1  ;;  %v288_v0 = vlaneseq (!%p238_p2)  ;;  %v744_v1 = vld [vmem:[%s876_s1] sm:$0xff] (!%p238_p2)   ;;  %v756_v2 = vmov (!%p238_p2), 1983009808   ;;  %v757_v4 = vmov (!%p238_p2), 0.0   ;;  %v745_v6 = vld [vmem:[%s876_s1 + $0x8] sm:$0xff] (!%p238_p2)  }
   0x6   : > { %241 = sbr.rel (%p238_p2) target bundleno = 729 (0x2d9), region = 48  ;;  %v286_v3 = vunpack.c.l.s4 (!%p238_p2), %v756_v2  ;;  %715 = vmatprep.subr.bf16.mxu0 (!%p238_p2), %v757_v4  ;;  %723 = vmatprep.subr.bf16.mxu1 (!%p238_p2), %v757_v4  ;;  %vm758_vm0 = vmmov (!%p238_p2), 0   ;;  %s759_s11 = smov (!%p238_p2), 96   ;;  %vm320_vm1 = vcmask (!%p238_p2), 261120   ;;  %vm376_vm2 = vcmask (!%p238_p2), 257024   ;;  %v746_v15 = vld [vmem:[%s880_s5] sm:$0xff] (!%p238_p2)  }
   0x7   : > { %v289_v5 = vshrl.u32 (!%p238_p2), %v288_v0, 7  ;;  %716 = vmatpush3.bf16.msra.mxu0 (!%p238_p2), %v744_v1  ;;  %719 = vmatprep.mubr.msk.bf16.mxu0 (!%p238_p2), %vm758_vm0, %v757_v4  ;;  %377 = vst.msk [vmem:[#allocation2] sm:$0xf] (!%p238_p2), %vm376_vm2, %v757_v4  ;;  %378 = vst.msk [vmem:[#allocation2 + $0x4] sm:$0xf] (!%p238_p2), %vm376_vm2, %v757_v4  ;;  %v747_v16 = vld [vmem:[%s880_s5 + $0x8] sm:$0xff] (!%p238_p2)  }
   0x8   : > { %v287_v7 = vunpack.c.0.s8 (!%p238_p2), %v286_v3  ;;  %717 = vmatprep.subr.bf16.mxu0 (!%p238_p2), %v757_v4  ;;  %727 = vmatprep.mubr.msk.bf16.mxu1 (!%p238_p2), %vm758_vm0, %v757_v4  ;;  %379 = vst.msk [vmem:[#allocation2 + $0x8] sm:$0xf] (!%p238_p2), %vm376_vm2, %v757_v4  ;;  %380 = vst.msk [vmem:[#allocation2 + $0xc] sm:$0xf] (!%p238_p2), %vm376_vm2, %v757_v4  ;;  %v696_v17 = vld [vmem:[%s877_s2] ss:$0 sm:$0xff] (!%p238_p2) }
   0x9   : > { %724 = vmatpush3.bf16.msra.mxu1 (!%p238_p2), %v746_v15  ;;  %v400_v18 = vsub.s32 (!%p238_p2), 1, %v289_v5  ;;  %v391_v19 = vld [vmem:[%s878_s3 + $0x8] sm:$0x7] (!%p238_p2)  ;;  %vm382_vm3 = vcmask (!%p238_p2), 254976   ;;  %v394_v28 = vsub.s32 (!%p238_p2), 0, %v289_v5  ;;  %v406_v35 = vsub.s32 (!%p238_p2), 2, %v289_v5 }
   0xa   : > { %v823_v8 = vsub.s32 (!%p238_p2), %v287_v7, %v289_v5  ;;  %725 = vmatprep.subr.bf16.mxu1 (!%p238_p2), %v757_v4  ;;  %v389_v33 = vld [vmem:[%s878_s3] sm:$0x7] (!%p238_p2)  ;;  %v390_v34 = vld [vmem:[%s878_s3 + $0x4] sm:$0x7] (!%p238_p2)  ;;  %s760_s8 = smov (!%p238_p2), 32   ;;  %vm629_vm4 = vcmask (!%p238_p2), 517120  }
   0xb   : > { %718 = vmatpush3.bf16.msra.mxu0 (!%p238_p2), %v745_v6  ;;  %v437_v24 = vrot.slane (!%p238_p2), %v391_v19, %v400_v18  ;;  %v431_v30 = vrot.slane (!%p238_p2), %v391_v19, %v394_v28  ;;  %v401_v39 = vrot.slane (!%p238_p2), %v389_v33, %v400_v18  ;;  %v413_v40 = vrot.slane (!%p238_p2), %v390_v34, %v394_v28 }
   0xc   : > { %v425_v41 = vrot.slane (!%p238_p2), %v390_v34, %v406_v35  ;;  %v395_v44 = vrot.slane (!%p238_p2), %v389_v33, %v394_v28  ;;  %v407_v45 = vrot.slane (!%p238_p2), %v389_v33, %v406_v35  ;;  %v419_v52 = vrot.slane (!%p238_p2), %v390_v34, %v400_v18 }
   0xd   : > { %s884_s25 = smov (!%p269_p3, %s687_s25), 1  ;;  %726 = vmatpush3.bf16.msra.mxu1 %v747_v16  ;;  %v443_v56 = vrot.slane %v391_v19, %v406_v35 }
   0xe   : > { %s707_s30 = sshll.u32 %s884_s25, 2  ;;  %v385_v36 = vld [vmem:[#allocation2] sm:$0xf] }
   0xf   : > { %s273_s10 = scalar_lea.vmem %s875_s0, %s707_s30  ;;  %v388_v27 = vld [vmem:[#allocation2 + $0xc] sm:$0xf]  ;;  %v402_v42 = vmul.f32 %v401_v39, %v385_v36  ;;  %v396_v50 = vmul.f32 %v395_v44, %v385_v36  ;;  %v408_v51 = vmul.f32 %v407_v45, %v385_v36 }
  0x10   : > { %v825_v9 = vld [vmem:[%s273_s10] sm:$0x3]  ;;  %v827_v10 = vld [vmem:[%s273_s10 + $0x2] sm:$0x3]  ;;  %v439_v31 = vmul.f32 %v437_v24, %v388_v27  ;;  %v433_v37 = vmul.f32 %v431_v30, %v388_v27 }
  0x11   : > { %v284_v11 = vcombine.low %v825_v9, %v827_v10  ;;  %v448_v57 = vrot.slane %v402_v42, 1 }
  0x12   : > { %v473_v38 = vrot.slane %v439_v31, 1 }
  0x13   : > { %v291_v12 = vrot.slane %v284_v11, %v823_v8  ;;  %v452_v18 = vadd.f32 %v448_v57, %v396_v50 }
  0x14   : > { %v477_v46 = vadd.f32 %v473_v38, %v433_v37 }
  0x15   : > { %v293_v13 = vpack.c.bf16 %v291_v12, %v291_v12 }
  0x16   : > { %v489_v61 = vrot.slane %v477_v46, 7 }
  0x17   : > { %306 = vrot.lane.b32.xlu0 %v293_v13, %s759_s11  ;;  %v445_v13 = vmul.f32 %v443_v56, %v388_v27  ;;  %v700_v27 = vld [vmem:[%s879_s4] ss:$0 sm:$0xff]  ;;  %s278_s11 = scalar_lea.vmem %s882_s7, %s707_s30 }
  0x89   : > { %v307_v14 = vpop.permute.xlu0 %306 }
  0x8a   : > { %720 = vmatmul.mubr.msk.bf16.vlgmr.msra.gmra.mrb[0].mxu0 %vm320_vm1, %v307_v14 }
 0x15d   : > { %v358_v20 = vpop.f32.mrb[0].mxu0 }
 0x15e   : > { %v359_v21 = vadd.f32 %v696_v17, %v358_v20  ;;  %v721_v22 = vpop.f32.mrb[1].mxu0 }
 0x15f   : > { %v361_v23 = vpop.f32.mrb[2].mxu0 }
 0x160   : > { %v364_v25 = vmax.f32 %v359_v21, 0.0  ;;  %v722_v26 = vpop.f32.mrb[3].mxu0 }
 0x161   : > { %v505_v26 = vrot.slane %v445_v13, 2 }
 0x162   : > { %v372_v29 = vrot.slane %v364_v25, %v823_v8 }
 0x164   : > { %v373_v32 = vcombine.high %v372_v29, %v372_v29  ;;  %383 = vst.msk [vmem:[#allocation2 + $0x5] sm:$0x3] %vm382_vm3, %v372_v29 }
 0x166   : > { %384 = vst.msk [vmem:[#allocation2 + $0x9] sm:$0x3] %vm382_vm3, %v373_v32 }
 0x16b   : > { %v386_v43 = vld [vmem:[#allocation2 + $0x4] sm:$0xf] }
 0x16c   : > { %v403_v47 = vmul.f32 %v401_v39, %v386_v43  ;;  %v414_v48 = vmul.f32 %v413_v40, %v386_v43  ;;  %v426_v53 = vmul.f32 %v425_v41, %v386_v43  ;;  %v409_v58 = vmul.f32 %v407_v45, %v386_v43 }
 0x16d   : > { %v387_v49 = vld [vmem:[#allocation2 + $0x8] sm:$0xf]  ;;  %v397_v6 = vmul.f32 %v395_v44, %v386_v43  ;;  %v420_v12 = vmul.f32 %v419_v52, %v386_v43 }
 0x16e   : > { %v415_v54 = vmul.f32 %v413_v40, %v387_v49  ;;  %v427_v55 = vmul.f32 %v425_v41, %v387_v49  ;;  %v438_v59 = vmul.f32 %v437_v24, %v387_v49  ;;  %v456_v60 = vrot.slane %v414_v48, 6  ;;  %v701_v40 = vld [vmem:[%s881_s6] ss:$0 sm:$0xff] }
 0x16f   : > { %v421_v62 = vmul.f32 %v419_v52, %v387_v49  ;;  %v449_v63 = vrot.slane %v403_v47, 1  ;;  %v432_v2 = vmul.f32 %v431_v30, %v387_v49  ;;  %v464_v4 = vrot.slane %v426_v53, 1 }
 0x170   : > { %v457_v0 = vrot.slane %v415_v54, 6  ;;  %v465_v1 = vrot.slane %v427_v55, 1  ;;  %v460_v3 = vadd.f32 %v456_v60, %v408_v51  ;;  %v472_v5 = vrot.slane %v438_v59, 1 }
 0x171   : > { %v453_v15 = vadd.f32 %v449_v63, %v397_v6  ;;  %v468_v19 = vadd.f32 %v464_v4, %v420_v12  ;;  %v444_v24 = vmul.f32 %v443_v56, %v387_v49 }
 0x172   : > { %v461_v7 = vadd.f32 %v457_v0, %v409_v58  ;;  %v469_v11 = vadd.f32 %v465_v1, %v421_v62  ;;  %v476_v14 = vadd.f32 %v472_v5, %v432_v2  ;;  %v480_v20 = vrot.slane %v460_v3, 2 }
 0x173   : > { %v504_v32 = vrot.slane %v444_v24, 2 }
 0x174   : > { %v481_v16 = vrot.slane %v461_v7, 2  ;;  %v493_v17 = vadd.f32 %v489_v61, %v469_v11  ;;  %v488_v21 = vrot.slane %v476_v14, 7  ;;  %v484_v29 = vadd.f32 %v480_v20, %v452_v18 }
 0x176   : > { %v485_v22 = vadd.f32 %v481_v16, %v453_v15  ;;  %v497_v23 = vrot.slane %v493_v17, 1  ;;  %v492_v25 = vadd.f32 %v488_v21, %v468_v19 }
 0x178   : > { %v501_v28 = vadd.f32 %v497_v23, %v485_v22  ;;  %v496_v30 = vrot.slane %v492_v25, 1 }
 0x17a   : > { %v500_v31 = vadd.f32 %v496_v30, %v484_v29  ;;  %v509_v33 = vadd.f32 %v505_v26, %v501_v28 }
 0x17c   : > { %v508_v34 = vadd.f32 %v504_v32, %v500_v31  ;;  %v518_v36 = vadd.f32 %v700_v27, %v509_v33 }
 0x17e   : > { %v517_v35 = vadd.f32 %v700_v27, %v508_v34 }
 0x180   : > { %v521_v37 = vcombine.low %v517_v35, %v518_v36 }
 0x182   : > { %v528_v38 = vrot.slane %v521_v37, %v823_v8 }
 0x184   : > { %v530_v39 = vpack.c.bf16 %v528_v38, %v528_v38 }
 0x186   : > { %728 = vmatmul.mubr.msk.bf16.vlgmr.msra.gmra.mrb[0].mxu1 %vm320_vm1, %v530_v39 }
 0x259   : > { %v591_v41 = vpop.f32.mrb[0].mxu1 }
 0x25a   : > { %v592_v42 = vadd.f32 %v701_v40, %v591_v41  ;;  %v729_v43 = vpop.f32.mrb[1].mxu1 }
 0x25b   : > { %v594_v44 = vpop.f32.mrb[2].mxu1 }
 0x25c   : > { %v597_v45 = vmax.f32 %v592_v42, 0.0  ;;  %v730_v46 = vpop.f32.mrb[3].mxu1 }
 0x25e   : > { %v605_v47 = vrot.slane %v597_v45, %v823_v8 }
 0x260   : > { %v613_v48 = vrot.slane %v605_v47, %v823_v8  ;;  %v606_v49 = vcombine.high %v605_v47, %v605_v47 }
 0x262   : > { %621 = vrot.lane.b32.xlu0 %v613_v48, %s760_s8  ;;  %v620_v50 = vrot.slane %v606_v49, %v823_v8 }
 0x264   : > { %623 = vrot.lane.b32.xlu1 %v620_v50, %s760_s8 }
 0x2d4   : > { %v622_v51 = vpop.permute.xlu0 %621 }
 0x2d5   : > { %v627_v52 = vsel %vm320_vm1, %v825_v9, %v622_v51 }
 0x2d6   : > { %630 = vst.msk [vmem:[%s278_s11] sm:$0x3] %vm629_vm4, %v627_v52  ;;  %v624_v53 = vpop.permute.xlu1 %623 }
 0x2d7   : > { %v628_v54 = vsel %vm320_vm1, %v827_v10, %v624_v53 }
 0x2d8   : > { %631 = vst.msk [vmem:[%s278_s11 + $0x2] sm:$0x3] %vm629_vm4, %v628_v54 }
 0x2d9 PF: > { %s17_s24 = sadd.s32 1, %s754_s24  }
 0x2da   : > { %p14_p4 = scmp.ge.s32.totalorder %s17_s24, 4  }
 0x2dc   :  { %16 = sbr.rel (!%p14_p4) target bundleno = 1 (0x1), region = 79 }

// kernel: _lambda_.43
= control target key start
LH: loop header
LB: loop body
LE: loop exit
PB: predicated region body
PF: predicated region fallthrough
CT: control target
= control target key end

     0   :  { %v135_v0 = vmov 0.0   ;;  %vm136_vm0 = vmmov 0   ;;  %vm56_vm1 = vcmask 523264   ;;  %s178_s1 = inlined_call_operand.vmem [shape: bf16[64,64], index: 1, kind: input, shape index: {}]   ;;  %s179_s0 = inlined_call_operand.vmem [shape: f32[8,64], index: 0, kind: input, shape index: {}]   ;;  %s180_s2 = inlined_call_operand.vmem [shape: f32[1,64], index: 2, kind: input, shape index: {}]   ;;  %s181_s3 = inlined_call_operand.vmem [shape: f32[8,64], index: 3, kind: output, shape index: {}]  }
   0x1   :  { %117 = vmatprep.subr.bf16.mxu0 %v135_v0  ;;  %v131_v1 = vld [vmem:[%s178_s1] sm:$0xff]   ;;  %125 = vmatprep.mubr.msk.bf16.mxu0 %vm136_vm0, %v135_v0  ;;  %v132_v2 = vld [vmem:[%s178_s1 + $0x8] sm:$0xff]   ;;  %v133_v3 = vld [vmem:[%s178_s1 + $0x10] sm:$0xff]  }
   0x2   :  { %118 = vmatpush3.bf16.msra.mxu0 %v131_v1  ;;  %v134_v4 = vld [vmem:[%s178_s1 + $0x18] sm:$0xff]   ;;  %v15_v5 = vld [vmem:[%s179_s0] sm:$0xff] }
   0x3   :  { %119 = vmatprep.subr.bf16.mxu0 %v135_v0  ;;  %v16_v6 = vpack.c.bf16 %v15_v5, %v15_v5  ;;  %v106_v7 = vld [vmem:[%s180_s2] ss:$0 sm:$0xff] }
   0x6   :  { %120 = vmatpush3.bf16.msra.mxu0 %v132_v2 }
   0x7   :  { %121 = vmatprep.subr.bf16.mxu0 %v135_v0 }
   0xa   :  { %122 = vmatpush3.bf16.msra.mxu0 %v133_v3 }
   0xb   :  { %123 = vmatprep.subr.bf16.mxu0 %v135_v0 }
   0xe   :  { %124 = vmatpush3.bf16.msra.mxu0 %v134_v4 }
  0x11   :  { %126 = vmatmul.mubr.msk.bf16.vlgmr.msra.gmra.mrb[0].mxu0 %vm56_vm1, %v16_v6 }
  0xe4   :  { %v94_v8 = vpop.f32.mrb[0].mxu0 }
  0xe5   :  { %v95_v9 = vadd.f32 %v106_v7, %v94_v8  ;;  %v127_v10 = vpop.f32.mrb[1].mxu0 }
  0xe6   :  { %v97_v11 = vpop.f32.mrb[2].mxu0 }
  0xe7   :  { %v100_v12 = vmax.f32 %v95_v9, 0.0  ;;  %v128_v13 = vpop.f32.mrb[3].mxu0 }
  0xe9   :  { %101 = vst.msk [vmem:[%s181_s3] sm:$0xff] %vm56_vm1, %v100_v12 }

// kernel: _lambda_.42
= control target key start
LH: loop header
LB: loop body
LE: loop exit
PB: predicated region body
PF: predicated region fallthrough
CT: control target
= control target key end

     0   :  { %v277_v0 = vmov 0.0   ;;  %vm278_vm0 = vmmov 0   ;;  %vm133_vm1 = vcmask 1041409   ;;  %vm160_vm2 = vcmask 523264   ;;  %s379_s3 = inlined_call_operand.vmem [shape: bf16[64,64], index: 3, kind: input, shape index: {}]   ;;  %s380_s1 = inlined_call_operand.vmem [shape: f32[3,3,64], index: 1, kind: input, shape index: {}]   ;;  %s381_s0 = inlined_call_operand.vmem [shape: f32[6,2,2,64], index: 0, kind: input, shape index: {}]   ;;  %s382_s2 = inlined_call_operand.vmem [shape: f32[1,1,64], index: 2, kind: input, shape index: {}]   ;;  %s383_s4 = inlined_call_operand.vmem [shape: f32[1,64], index: 4, kind: input, shape index: {}]   ;;  %s384_s5 = inlined_call_operand.vmem [shape: f32[2,1,64], index: 5, kind: output, shape index: {}]  }
   0x1   :  { %258 = vmatprep.subr.bf16.mxu0 %v277_v0  ;;  %v273_v1 = vld [vmem:[%s379_s3] sm:$0xff]   ;;  %266 = vmatprep.mubr.msk.bf16.mxu0 %vm278_vm0, %v277_v0  ;;  %v274_v2 = vld [vmem:[%s379_s3 + $0x8] sm:$0xff]   ;;  %v275_v3 = vld [vmem:[%s379_s3 + $0x10] sm:$0xff]   ;;  %vm230_vm3 = vcmask 516096  }
   0x2   :  { %259 = vmatpush3.bf16.msra.mxu0 %v273_v1  ;;  %v21_v4 = vld [vmem:[%s380_s1] sm:$0x7]  ;;  %v22_v5 = vld [vmem:[%s380_s1 + $0x4] sm:$0x7]  ;;  %v23_v6 = vld [vmem:[%s380_s1 + $0x8] sm:$0x7] }
   0x3   :  { %260 = vmatprep.subr.bf16.mxu0 %v277_v0  ;;  %v24_v7 = vld [vmem:[%s381_s0] sm:$0x3]  ;;  %v25_v8 = vld [vmem:[%s381_s0 + $0x2] sm:$0x3]  ;;  %v237_v9 = vld [vmem:[%s381_s0 + $0x4] sm:$0x3] }
   0x4   :  { %v238_v10 = vld [vmem:[%s381_s0 + $0x6] sm:$0x3]  ;;  %v32_v11 = vrot.slane %v21_v4, 1  ;;  %v239_v12 = vld [vmem:[%s381_s0 + $0x8] sm:$0x3]  ;;  %v47_v13 = vrot.slane %v22_v5, 1  ;;  %v29_v14 = vmul.f32 %v24_v7, %v21_v4  ;;  %v30_v15 = vmul.f32 %v25_v8, %v21_v4 }
   0x5   :  { %v240_v16 = vld [vmem:[%s381_s0 + $0xa] sm:$0x3]  ;;  %v241_v17 = vld [vmem:[%s381_s0 + $0xc] sm:$0x3]  ;;  %v242_v18 = vld [vmem:[%s381_s0 + $0xe] sm:$0x3]  ;;  %v44_v19 = vmul.f32 %v239_v12, %v22_v5 }
   0x6   :  { %261 = vmatpush3.bf16.msra.mxu0 %v274_v2  ;;  %v34_v20 = vmul.f32 %v237_v9, %v32_v11  ;;  %v35_v21 = vmul.f32 %v238_v10, %v32_v11  ;;  %v36_v22 = vmul.f32 %v32_v11, %v24_v7  ;;  %v37_v23 = vmul.f32 %v32_v11, %v25_v8  ;;  %v243_v24 = vld [vmem:[%s381_s0 + $0x10] sm:$0x3]  ;;  %v244_v25 = vld [vmem:[%s381_s0 + $0x12] sm:$0x3]  ;;  %v245_v30 = vld [vmem:[%s381_s0 + $0x14] sm:$0x3] }
   0x7   :  { %262 = vmatprep.subr.bf16.mxu0 %v277_v0  ;;  %v45_v26 = vmul.f32 %v240_v16, %v22_v5  ;;  %v49_v27 = vmul.f32 %v241_v17, %v47_v13  ;;  %v50_v28 = vmul.f32 %v242_v18, %v47_v13  ;;  %v51_v29 = vmul.f32 %v239_v12, %v47_v13  ;;  %v246_v31 = vld [vmem:[%s381_s0 + $0x16] sm:$0x3]  ;;  %v276_v32 = vld [vmem:[%s379_s3 + $0x18] sm:$0xff]   ;;  %v108_v63 = vld [vmem:[%s382_s2] sm:$0x1] }
   0x8   :  { %v52_v33 = vmul.f32 %v240_v16, %v47_v13  ;;  %v59_v34 = vmul.f32 %v243_v24, %v23_v6  ;;  %v60_v35 = vmul.f32 %v244_v25, %v23_v6  ;;  %v62_v36 = vrot.slane %v23_v6, 1  ;;  %v247_v16 = vld [vmem:[%s383_s4] ss:$0 sm:$0xff] }
   0x9   :  { %v68_v37 = vadd.f32 %v34_v20, %v29_v14  ;;  %v69_v38 = vadd.f32 %v35_v21, %v30_v15  ;;  %v72_v39 = vrot.slane %v44_v19, 7  ;;  %v73_v40 = vrot.slane %v45_v26, 7 }
   0xa   :  { %263 = vmatpush3.bf16.msra.mxu0 %v275_v3  ;;  %v64_v41 = vmul.f32 %v245_v30, %v62_v36  ;;  %v65_v42 = vmul.f32 %v246_v31, %v62_v36  ;;  %v66_v43 = vmul.f32 %v243_v24, %v62_v36  ;;  %v67_v44 = vmul.f32 %v244_v25, %v62_v36 }
   0xb   :  { %264 = vmatprep.subr.bf16.mxu0 %v277_v0  ;;  %v76_v45 = vadd.f32 %v72_v39, %v36_v22  ;;  %v77_v46 = vadd.f32 %v73_v40, %v37_v23  ;;  %v80_v47 = vrot.slane %v51_v29, 1  ;;  %v81_v48 = vrot.slane %v52_v33, 1 }
   0xc   :  { %v86_v49 = vadd.f32 %v64_v41, %v59_v34  ;;  %v87_v50 = vadd.f32 %v65_v42, %v60_v35  ;;  %v102_v55 = vrot.slane %v66_v43, 1  ;;  %v103_v56 = vrot.slane %v67_v44, 1 }
   0xd   :  { %v84_v51 = vadd.f32 %v80_v47, %v49_v27  ;;  %v85_v52 = vadd.f32 %v81_v48, %v50_v28  ;;  %v90_v53 = vrot.slane %v76_v45, 1  ;;  %v91_v54 = vrot.slane %v77_v46, 1 }
   0xe   :  { %265 = vmatpush3.bf16.msra.mxu0 %v276_v32  ;;  %v279_v11 = vmov 1966171168   ;;  %v209_v13 = vlaneseq }
   0xf   :  { %v94_v57 = vadd.f32 %v90_v53, %v68_v37  ;;  %v95_v58 = vadd.f32 %v91_v54, %v69_v38  ;;  %v96_v59 = vadd.f32 %v86_v49, %v84_v51  ;;  %v97_v60 = vadd.f32 %v87_v50, %v85_v52 }
  0x10   :  { %v207_v12 = vunpack.c.l.s4 %v279_v11  ;;  %v210_v15 = vshrl.u32 %v209_v13, 7 }
  0x11   :  { %v98_v61 = vadd.f32 %v96_v59, %v94_v57  ;;  %v99_v62 = vadd.f32 %v97_v60, %v95_v58 }
  0x12   :  { %v208_v14 = vunpack.c.0.s8 %v207_v12 }
  0x13   :  { %v106_v0 = vadd.f32 %v102_v55, %v98_v61  ;;  %v107_v1 = vadd.f32 %v103_v56, %v99_v62 }
  0x14   :  { %v211_v19 = vsub.s32 %v208_v14, %v210_v15 }
  0x15   :  { %v109_v2 = vadd.f32 %v108_v63, %v106_v0  ;;  %v110_v3 = vadd.f32 %v108_v63, %v107_v1 }
  0x17   :  { %v111_v4 = vpack.c.bf16 %v109_v2, %v109_v2  ;;  %v112_v5 = vpack.c.bf16 %v110_v3, %v110_v3 }
  0x19   :  { %v130_v6 = vunpack.c.l.b16 %v111_v4  ;;  %v131_v7 = vunpack.c.l.b16 %v112_v5 }
  0x1b   :  { %v132_v8 = vrot.slane %v131_v7, 7 }
  0x1d   :  { %v134_v9 = vsel %vm133_vm1, %v132_v8, %v130_v6 }
  0x1e   :  { %v135_v10 = vpack.c.b16 %v134_v9, %v134_v9 }
  0x20   :  { %267 = vmatmul.mubr.msk.bf16.vlgmr.msra.gmra.mrb[0].mxu0 %vm160_vm2, %v135_v10 }
  0xf3   :  { %v198_v17 = vpop.f32.mrb[0].mxu0 }
  0xf4   :  { %v199_v18 = vadd.f32 %v247_v16, %v198_v17  ;;  %v268_v20 = vpop.f32.mrb[1].mxu0 }
  0xf5   :  { %v201_v21 = vpop.f32.mrb[2].mxu0 }
  0xf6   :  { %v204_v22 = vmax.f32 %v199_v18, 0.0  ;;  %v269_v23 = vpop.f32.mrb[3].mxu0 }
  0xf8   :  { %v212_v24 = vrot.slane %v204_v22, %v211_v19 }
  0xfa   :  { %v213_v25 = vcombine.high %v212_v24, %v212_v24  ;;  %v220_v26 = vrot.slane %v212_v24, %v211_v19 }
  0xfc   :  { %v227_v27 = vrot.slane %v213_v25, %v211_v19  ;;  %231 = vst.msk [vmem:[%s384_s5] sm:$0x1] %vm230_vm3, %v220_v26 }
  0xfe   :  { %232 = vst.msk [vmem:[%s384_s5 + $0x1] sm:$0x1] %vm230_vm3, %v227_v27 }

// kernel: _lambda_.45
= control target key start
LH: loop header
LB: loop body
LE: loop exit
PB: predicated region body
PF: predicated region fallthrough
CT: control target
= control target key end

     0   :  { %s650_s24 = smov 0   ;;  %s723_s0 = inlined_call_operand.vmem [shape: f32[2,1,1,128], index: 0, kind: input, shape index: {}]   ;;  %s724_s1 = inlined_call_operand.vmem [shape: bf16[64,64], index: 1, kind: input, shape index: {}]   ;;  %s725_s2 = inlined_call_operand.vmem [shape: f32[1,64], index: 2, kind: input, shape index: {}, may-alias: {2,6}]   ;;  %s726_s3 = inlined_call_operand.vmem [shape: f32[3,3,64], index: 3, kind: input, shape index: {}]   ;;  %s727_s4 = inlined_call_operand.vmem [shape: f32[1,1,64], index: 4, kind: input, shape index: {}]   ;;  %s728_s5 = inlined_call_operand.vmem [shape: bf16[64,64], index: 5, kind: input, shape index: {}]   ;;  %s729_s6 = inlined_call_operand.vmem [shape: f32[1,64], index: 6, kind: input, shape index: {}, may-alias: {2,6}]   ;;  %s730_s7 = inlined_call_operand.vmem [shape: f32[2,1,1,128], index: 7, kind: output, shape index: {}]  }
   0x1 LB: > { %s529_s25 = sadd.s32 4294967295, %s605_s24   ;;  %p533_p0 = scmp.ge.s32.totalorder %s605_s24, 1  ;;  %s605_s24 = sphi %s650_s24, %s17_s24  }
   0x2   : > { %p235_p1 = scmp.lt.s32.totalorder %s605_s24, 3 }
   0x4   : > { %p236_p2 = pnand %p533_p0, %p235_p1 }
   0x5   : > { %p263_p3 = scmp.lt.s32.totalorder (!%p236_p2), %s529_s25, 1  ;;  %v591_v0 = vld [vmem:[%s724_s1] sm:$0xff] (!%p236_p2)   ;;  %v607_v1 = vmov (!%p236_p2), 0.0   ;;  %v592_v2 = vld [vmem:[%s724_s1 + $0x8] sm:$0xff] (!%p236_p2)   ;;  %v593_v3 = vld [vmem:[%s724_s1 + $0x10] sm:$0xff] (!%p236_p2)   ;;  %vm608_vm0 = vmmov (!%p236_p2), 0  }
   0x6   : > { %239 = sbr.rel (%p236_p2) target bundleno = 708 (0x2c4), region = 48  ;;  %556 = vmatprep.subr.bf16.mxu0 (!%p236_p2), %v607_v1  ;;  %568 = vmatprep.subr.bf16.mxu1 (!%p236_p2), %v607_v1  ;;  %s609_s12 = smov (!%p236_p2), 64   ;;  %v594_v6 = vld [vmem:[%s724_s1 + $0x18] sm:$0xff] (!%p236_p2)   ;;  %vm308_vm1 = vcmask (!%p236_p2), 523264   ;;  %vm353_vm2 = vcmask (!%p236_p2), 518144   ;;  %v595_v8 = vld [vmem:[%s728_s5] sm:$0xff] (!%p236_p2)  }
   0x7   : > { %557 = vmatpush3.bf16.msra.mxu0 (!%p236_p2), %v591_v0  ;;  %564 = vmatprep.mubr.msk.bf16.mxu0 (!%p236_p2), %vm608_vm0, %v607_v1  ;;  %354 = vst.msk [vmem:[#allocation2] sm:$0x7] (!%p236_p2), %vm353_vm2, %v607_v1  ;;  %355 = vst.msk [vmem:[#allocation2 + $0x4] sm:$0x7] (!%p236_p2), %vm353_vm2, %v607_v1  ;;  %v596_v9 = vld [vmem:[%s728_s5 + $0x8] sm:$0xff] (!%p236_p2)   ;;  %v597_v10 = vld [vmem:[%s728_s5 + $0x10] sm:$0xff] (!%p236_p2)  }
   0x8   : > { %558 = vmatprep.subr.bf16.mxu0 (!%p236_p2), %v607_v1  ;;  %576 = vmatprep.mubr.msk.bf16.mxu1 (!%p236_p2), %vm608_vm0, %v607_v1  ;;  %356 = vst.msk [vmem:[#allocation2 + $0x8] sm:$0x7] (!%p236_p2), %vm353_vm2, %v607_v1  ;;  %v598_v11 = vld [vmem:[%s728_s5 + $0x18] sm:$0xff] (!%p236_p2)   ;;  %v280_v12 = vld [vmem:[%s725_s2] sm:$0x1] (!%p236_p2)  ;;  %vm358_vm3 = vcmask (!%p236_p2), 516096  }
   0x9   : > { %569 = vmatpush3.bf16.msra.mxu1 (!%p236_p2), %v595_v8  ;;  %v365_v15 = vld [vmem:[%s726_s3 + $0x8] sm:$0x7] (!%p236_p2)  ;;  %v363_v23 = vld [vmem:[%s726_s3] sm:$0x7] (!%p236_p2)  ;;  %v364_v26 = vld [vmem:[%s726_s3 + $0x4] sm:$0x7] (!%p236_p2) }
   0xa   : > { %570 = vmatprep.subr.bf16.mxu1 (!%p236_p2), %v607_v1  ;;  %v399_v43 = vld [vmem:[%s727_s4] sm:$0x1] (!%p236_p2) }
   0xb   : > { %559 = vmatpush3.bf16.msra.mxu0 (!%p236_p2), %v592_v2  ;;  %v410_v47 = vld [vmem:[%s729_s6] sm:$0x1] (!%p236_p2) }
   0xc   : > { %560 = vmatprep.subr.bf16.mxu0 (!%p236_p2), %v607_v1 }
   0xd   : > { %s732_s25 = smov (!%p263_p3, %s529_s25), 1  ;;  %571 = vmatpush3.bf16.msra.mxu1 %v596_v9 }
   0xe   : > { %s265_s9 = scalar_lea.vmem %s723_s0, %s732_s25  ;;  %572 = vmatprep.subr.bf16.mxu1 %v607_v1  ;;  %v360_v22 = vld [vmem:[#allocation2] sm:$0x7]  ;;  %s268_s17 = scalar_lea.vmem %s730_s7, %s732_s25 }
   0xf   : > { %v673_v4 = vld [vmem:[%s265_s9] sm:$0x1]  ;;  %561 = vmatpush3.bf16.msra.mxu0 %v593_v3  ;;  %v362_v14 = vld [vmem:[#allocation2 + $0x8] sm:$0x7]  ;;  %v366_v25 = vmul.f32 %v363_v23, %v360_v22 }
  0x10   : > { %v271_v5 = vpack.c.bf16 %v673_v4, %v673_v4  ;;  %562 = vmatprep.subr.bf16.mxu0 %v607_v1  ;;  %v368_v21 = vmul.f32 %v365_v15, %v362_v14 }
  0x11   : > { %573 = vmatpush3.bf16.msra.mxu1 %v597_v10  ;;  %v370_v30 = vrot.slane %v366_v25, 1 }
  0x12   : > { %282 = vrot.lane.b32.xlu0 %v271_v5, %s609_s12  ;;  %574 = vmatprep.subr.bf16.mxu1 %v607_v1  ;;  %v381_v24 = vrot.slane %v368_v21, 1  ;;  %v396_v41 = vrot.slane %v368_v21, 2 }
  0x13   : > { %563 = vmatpush3.bf16.msra.mxu0 %v594_v6  ;;  %v372_v34 = vadd.f32 %v370_v30, %v366_v25 }
  0x14   : > { %v383_v27 = vadd.f32 %v381_v24, %v368_v21 }
  0x15   : > { %575 = vmatpush3.bf16.msra.mxu1 %v598_v11 }
  0x16   : > { %v389_v33 = vrot.slane %v383_v27, 7 }
  0x84   : > { %v283_v7 = vpop.permute.xlu0 %282 }
  0x85   : > { %565 = vmatmul.mubr.msk.bf16.vlgmr.msra.gmra.mrb[0].mxu0 %vm308_vm1, %v283_v7 }
 0x158   : > { %v346_v13 = vpop.f32.mrb[0].mxu0 }
 0x159   : > { %v347_v16 = vadd.f32 %v346_v13, %v280_v12  ;;  %v566_v17 = vpop.f32.mrb[1].mxu0 }
 0x15a   : > { %v349_v18 = vpop.f32.mrb[2].mxu0 }
 0x15b   : > { %v352_v19 = vmax.f32 %v347_v16, 0.0  ;;  %v567_v20 = vpop.f32.mrb[3].mxu0 }
 0x15d   : > { %359 = vst.msk [vmem:[#allocation2 + $0x5] sm:$0x1] %vm358_vm3, %v352_v19 }
 0x164   : > { %v361_v28 = vld [vmem:[#allocation2 + $0x4] sm:$0x7] }
 0x165   : > { %v367_v29 = vmul.f32 %v364_v26, %v361_v28 }
 0x167   : > { %v374_v31 = vrot.slane %v367_v29, 6  ;;  %v377_v32 = vrot.slane %v367_v29, 1 }
 0x169   : > { %v376_v35 = vadd.f32 %v374_v31, %v366_v25  ;;  %v379_v36 = vadd.f32 %v377_v32, %v367_v29 }
 0x16b   : > { %v385_v37 = vrot.slane %v376_v35, 2  ;;  %v391_v38 = vadd.f32 %v389_v33, %v379_v36 }
 0x16d   : > { %v387_v39 = vadd.f32 %v385_v37, %v372_v34  ;;  %v393_v40 = vrot.slane %v391_v38, 1 }
 0x16f   : > { %v395_v42 = vadd.f32 %v393_v40, %v387_v39 }
 0x171   : > { %v398_v44 = vadd.f32 %v396_v41, %v395_v42 }
 0x173   : > { %v400_v45 = vadd.f32 %v399_v43, %v398_v44 }
 0x175   : > { %v401_v46 = vpack.c.bf16 %v400_v45, %v400_v45 }
 0x177   : > { %577 = vmatmul.mubr.msk.bf16.vlgmr.msra.gmra.mrb[0].mxu1 %vm308_vm1, %v401_v46 }
 0x24a   : > { %v472_v48 = vpop.f32.mrb[0].mxu1 }
 0x24b   : > { %v473_v49 = vadd.f32 %v472_v48, %v410_v47  ;;  %v578_v50 = vpop.f32.mrb[1].mxu1 }
 0x24c   : > { %v475_v51 = vpop.f32.mrb[2].mxu1 }
 0x24d   : > { %v478_v52 = vmax.f32 %v473_v49, 0.0  ;;  %v579_v53 = vpop.f32.mrb[3].mxu1 }
 0x24f   : > { %480 = vrot.lane.b32.xlu0 %v478_v52, %s609_s12 }
 0x2c1   : > { %v481_v54 = vpop.permute.xlu0 %480 }
 0x2c2   : > { %v483_v55 = vsel %vm308_vm1, %v673_v4, %v481_v54 }
 0x2c3   : > { %484 = vst [vmem:[%s268_s17] sm:$0x1] %v483_v55 }
 0x2c4 PF: > { %s17_s24 = sadd.s32 1, %s605_s24  }
 0x2c5   : > { %p14_p4 = scmp.ge.s32.totalorder %s17_s24, 4  }
 0x2c7   :  { %16 = sbr.rel (!%p14_p4) target bundleno = 1 (0x1), region = 79 }

</bundles_post_ra>
